<compile_context>
chip_gen: v5e
topology: v5e:2x2
jax: 0.10.0
libtpu: 0.0.40
codegen_flags: <defaults>
</compile_context>

<pallas_src>
import functools

import jax
import jax.numpy as jnp
from jax import lax
from jax.experimental import pallas as pl
from jax.experimental.pallas import tpu as pltpu

HIDDEN = 100        # logical hidden size (self.hidden_size = 100)
H_PAD = 128         # lane-aligned hidden size used inside the kernel
LANE = 128
SUBLANE = 8


def _round_up(n, m):
    return ((n + m - 1) // m) * m


# ---------------------------------------------------------------------------
# Kernel
# ---------------------------------------------------------------------------
def rnn_kernel(x_ref, wih0_ref, wcomb_ref, b0_ref, b1_ref, whead_ref,
               bhead_ref, out_ref, *, seq_len, batch_pad):
    bp = batch_pad
    hp = H_PAD

    # Hoisted layer-0 input projection for ALL timesteps: (T*Bp, D) @ (D, 4Hp),
    # bf16 operands, f32 accumulate; combined bias (b_ih0 + b_hh0) folded in.
    gx0 = (jnp.dot(x_ref[...], wih0_ref[...],
                   preferred_element_type=jnp.float32) + b0_ref[...])

    wcomb = wcomb_ref[...]                                   # (2Hp, 8Hp) bf16
    b1 = jnp.broadcast_to(b1_ref[...], (bp, 4 * hp))         # hoisted broadcast

    def apply_gates(gates, c):
        # PyTorch gate order i | f | g | o; slices are lane-aligned (Hp = 128).
        i = jax.nn.sigmoid(gates[:, 0 * hp:1 * hp])
        f = jax.nn.sigmoid(gates[:, 1 * hp:2 * hp])
        g = jnp.tanh(gates[:, 2 * hp:3 * hp])
        o = jax.nn.sigmoid(gates[:, 3 * hp:4 * hp])
        c_new = f * c + i * g
        h_new = o * jnp.tanh(c_new)
        return h_new, c_new

    zeros = jnp.zeros((bp, hp), jnp.float32)
    c1, h2, c2 = zeros, zeros, zeros

    # Wave 0: h1(-1) = 0, so layer-0 gates at t=0 are just gx0[0] (no MXU push)
    # and there is no layer-1 work yet.
    h1, c1 = apply_gates(gx0[0:bp, :], c1)

    # Waves 1..T (fully unrolled; seq_len is a small static constant).  At the
    # start of wave t the carried state is [h1(t-1), h2(t-2)].  A single fused
    # MXU push yields both layers' gate pre-activations:
    #   cols 0:4Hp   = h1(t-1) @ Whh0                 (+ gx0[t]) -> layer-0 @ t
    #   cols 4Hp:8Hp = h1(t-1) @ Wih1 + h2(t-2) @ Whh1 (+ b1)    -> layer-1 @ t-1
    # TODO(synk): for long sequences (T >~ 64) switch this Python unroll to
    # lax.fori_loop(..., unroll=4..8) and tile gx0 over time to bound VMEM
    # (matters earlier on v7x's 64 MiB VMEM).
    for t in range(1, seq_len + 1):
        hh = jnp.concatenate([h1, h2], axis=1).astype(jnp.bfloat16)  # (Bp, 2Hp)
        gates_all = jnp.dot(hh, wcomb, preferred_element_type=jnp.float32)
        h2, c2 = apply_gates(gates_all[:, 4 * hp:] + b1, c2)         # step t-1
        if t < seq_len:
            h1, c1 = apply_gates(
                gates_all[:, :4 * hp] + gx0[t * bp:(t + 1) * bp, :], c1)  # step t
    # After wave T, h2 = h2(T-1): last-timestep hidden state of layer 1.

    # Folded head fc_out(fc(.)): single (Bp, Hp) @ (Hp, cp) matmul into a
    # lane-dense output slab.
    out_ref[...] = (jnp.dot(h2.astype(jnp.bfloat16), whead_ref[...],
                            preferred_element_type=jnp.float32) + bhead_ref[...])


# ---------------------------------------------------------------------------
# Wrapper
# ---------------------------------------------------------------------------
@functools.partial(jax.jit, static_argnames=("num_classes",))
def rnn_network_forward(x, padded_params, num_classes):
    """x: (B, T, D) float32, batch-first (nn.LSTM(batch_first=True)).

    Returns logits of shape (B, num_classes)."""
    B, T, D = x.shape
    bp = _round_up(max(B, SUBLANE), SUBLANE)
    cp = padded_params["whead"].shape[1]

    # Time-major, zero-pad batch to a sublane multiple, flatten (T, Bp) -> rows
    # so the layer-0 input projection is one big matmul; bf16 for the MXU.
    x_tm = jnp.transpose(x, (1, 0, 2))
    x_tm = jnp.pad(x_tm, ((0, 0), (0, bp - B), (0, 0)))
    x2d = x_tm.reshape(T * bp, D).astype(jnp.bfloat16)

    args = (x2d, padded_params["wih0"], padded_params["wcomb"],
            padded_params["b0"], padded_params["b1"],
            padded_params["whead"], padded_params["bhead"])

    vmem = pl.BlockSpec(memory_space=pltpu.MemorySpace.VMEM)
    # TODO(synk): on v7x (2 TCs/chip), once batch grows past a few sublane
    # tiles, add a leading grid axis over batch tiles with
    # dimension_semantics=("parallel",) so independent recurrences shard
    # across both TensorCores.
    out = pl.pallas_call(
        functools.partial(rnn_kernel, seq_len=T, batch_pad=bp),
        out_shape=jax.ShapeDtypeStruct((bp, cp), jnp.float32),
        in_specs=[vmem] * len(args),
        out_specs=vmem,
    )(*args)
    return out[:B, :num_classes]


# ---------------------------------------------------------------------------
# Parameters (logical + padded/kernel layout)
# ---------------------------------------------------------------------------
def init_params(key, input_size, num_classes):
    """Logical (unpadded) params, PyTorch-style U(-1/sqrt(H), 1/sqrt(H)).

    Weights are pre-transposed for right-multiplication:
      wih: (D_in, 4H), whh: (H, 4H), gate order i|f|g|o, b = b_ih + b_hh (1, 4H).
    """
    bound = 1.0 / jnp.sqrt(jnp.float32(HIDDEN))
    keys = jax.random.split(key, 12)

    def u(k, shape):
        return jax.random.uniform(k, shape, jnp.float32, -bound, bound)

    return dict(
        wih0=u(keys[0], (input_size, 4 * HIDDEN)),
        whh0=u(keys[1], (HIDDEN, 4 * HIDDEN)),
        b0=u(keys[2], (1, 4 * HIDDEN)) + u(keys[3], (1, 4 * HIDDEN)),
        wih1=u(keys[4], (HIDDEN, 4 * HIDDEN)),
        whh1=u(keys[5], (HIDDEN, 4 * HIDDEN)),
        b1=u(keys[6], (1, 4 * HIDDEN)) + u(keys[7], (1, 4 * HIDDEN)),
        wfc=u(keys[8], (HIDDEN, HIDDEN)),
        bfc=u(keys[9], (1, HIDDEN)),
        wout=u(keys[10], (HIDDEN, num_classes)),
        bout=u(keys[11], (1, num_classes)),
    )


def _pad_gate_blocks(w):
    """(rows, 4*HIDDEN) -> (rows, 4*H_PAD); each i/f/g/o block zero-padded."""
    rows = w.shape[0]
    out = jnp.zeros((rows, 4 * H_PAD), w.dtype)
    for g in range(4):
        out = out.at[:, g * H_PAD:g * H_PAD + HIDDEN].set(
            w[:, g * HIDDEN:(g + 1) * HIDDEN])
    return out


def _pad_rows(w, rows_to):
    return jnp.pad(w, ((0, rows_to - w.shape[0]), (0, 0)))


def pad_params(params):
    """Repack logical params into the lane-aligned, bf16 layout the kernel uses.

    All padding is zero, which keeps the padded hidden lanes of h/c exactly
    zero through the recurrence (sigmoid(0)*0 terms), so no garbage leaks into
    the valid region.  MXU weights are bf16; biases stay f32 (added after the
    f32-accumulated matmul).
    """
    num_classes = params["wout"].shape[1]
    cp = _round_up(num_classes, LANE)

    # Layer-0 input projection weight + combined bias.
    wih0 = _pad_gate_blocks(params["wih0"]).astype(jnp.bfloat16)    # (D, 512)
    b0 = _pad_gate_blocks(params["b0"])                             # (1, 512)

    # Wavefront-fused recurrent weight W_comb = [[Whh0, Wih1], [0, Whh1]].
    whh0 = _pad_rows(_pad_gate_blocks(params["whh0"]), H_PAD)       # (128, 512)
    wih1 = _pad_rows(_pad_gate_blocks(params["wih1"]), H_PAD)       # (128, 512)
    whh1 = _pad_rows(_pad_gate_blocks(params["whh1"]), H_PAD)       # (128, 512)
    top = jnp.concatenate([whh0, wih1], axis=1)                     # (128, 1024)
    bot = jnp.concatenate([jnp.zeros_like(whh1), whh1], axis=1)     # (128, 1024)
    wcomb = jnp.concatenate([top, bot], axis=0).astype(jnp.bfloat16)  # (256, 1024)
    b1 = _pad_gate_blocks(params["b1"])                             # (1, 512)

    # Folded head (no activation between fc and fc_out in the torch module):
    #   W_head = Wfc @ Wout, b_head = bfc @ Wout + bout  (folded in f32).
    whead = params["wfc"] @ params["wout"]                          # (100, C)
    bhead = params["bfc"] @ params["wout"] + params["bout"]         # (1, C)
    whead = jnp.pad(whead, ((0, H_PAD - HIDDEN), (0, cp - num_classes)))
    bhead = jnp.pad(bhead, ((0, 0), (0, cp - num_classes)))

    return dict(wih0=wih0, wcomb=wcomb, b0=b0, b1=b1,
                whead=whead.astype(jnp.bfloat16), bhead=bhead)


# ---------------------------------------------------------------------------
# Pure-JAX f32 reference (unpadded, H = 100) for verification
# ---------------------------------------------------------------------------
def _ref_lstm_cell(x_in, h, c, w_ih, w_hh, b):
    gates = x_in @ w_ih + h @ w_hh + b
    i = jax.nn.sigmoid(gates[:, 0 * HIDDEN:1 * HIDDEN])
    f = jax.nn.sigmoid(gates[:, 1 * HIDDEN:2 * HIDDEN])
    g = jnp.tanh(gates[:, 2 * HIDDEN:3 * HIDDEN])
    o = jax.nn.sigmoid(gates[:, 3 * HIDDEN:4 * HIDDEN])
    c_new = f * c + i * g
    h_new = o * jnp.tanh(c_new)
    return h_new, c_new


def rnn_network_reference(x, params):
    B = x.shape[0]
    zeros = jnp.zeros((B, HIDDEN), jnp.float32)

    def step(carry, x_t):
        h1, c1, h2, c2 = carry
        h1, c1 = _ref_lstm_cell(x_t, h1, c1,
                                params["wih0"], params["whh0"], params["b0"])
        h2, c2 = _ref_lstm_cell(h1, h2, c2,
                                params["wih1"], params["whh1"], params["b1"])
        return (h1, c1, h2, c2), None

    (h1, c1, h2, c2), _ = lax.scan(step, (zeros,) * 4,
                                   jnp.transpose(x, (1, 0, 2)))
    hid = h2 @ params["wfc"] + params["bfc"]
    return hid @ params["wout"] + params["bout"]


if __name__ == "__main__":
    # x is (batch, sequence_length, input_size) as implied by the module.
    B, T, D = 2, 8, 16
    NUM_CLASSES = 5

    key = jax.random.PRNGKey(0)
    kx, kp = jax.random.split(key)
    x = jax.random.normal(kx, (B, T, D), jnp.float32)
    params = init_params(kp, D, NUM_CLASSES)
    padded = pad_params(params)

    out = rnn_network_forward(x, padded, NUM_CLASSES)
    out = jax.block_until_ready(out)

    ref = rnn_network_reference(x, params)
    assert out.shape == (B, NUM_CLASSES)
    # bf16 MXU operands over a T-step recurrence -> loosened tolerance vs. the
    # pure-f32 reference (gate math and accumulation remain f32 in the kernel).
    assert jnp.allclose(out, ref, atol=2e-2, rtol=2e-2)

    print("KERNEL_OK")
</pallas_src>

<mosaic_0001>
module attributes {stable_mosaic.version = 11 : i64} {
  func.func @rnn_kernel(%arg0: memref<64x16xbf16, #tpu.memory_space<vmem>>, %arg1: memref<16x512xbf16, #tpu.memory_space<vmem>>, %arg2: memref<256x1024xbf16, #tpu.memory_space<vmem>>, %arg3: memref<1x512xf32, #tpu.memory_space<vmem>>, %arg4: memref<1x512xf32, #tpu.memory_space<vmem>>, %arg5: memref<128x128xbf16, #tpu.memory_space<vmem>>, %arg6: memref<1x128xf32, #tpu.memory_space<vmem>>, %arg7: memref<8x128xf32, #tpu.memory_space<vmem>>) attributes {dimension_semantics = [], scalar_prefetch = 0 : i64, scratch_operands = 0 : i64, tpu.core_type = #tpu.core_type<tc>} {
    %c0 = arith.constant 0 : index
    %c0_0 = arith.constant 0 : index
    %0 = vector.load %arg0[%c0, %c0_0] : memref<64x16xbf16, #tpu.memory_space<vmem>>, vector<64x16xbf16>
    %c0_1 = arith.constant 0 : index
    %c0_2 = arith.constant 0 : index
    %1 = vector.load %arg1[%c0_1, %c0_2] : memref<16x512xbf16, #tpu.memory_space<vmem>>, vector<16x512xbf16>
    %cst = arith.constant dense<0.000000e+00> : vector<64x512xf32>
    %2 = tpu.matmul %0, %1, %cst {dimension_numbers = #tpu.dot_dimension_numbers<[1], [0], [0], [1], [0, 0, 1, 1], [], []>} : vector<64x16xbf16>, vector<16x512xbf16>, vector<64x512xf32> -> vector<64x512xf32>
    %c0_3 = arith.constant 0 : index
    %c0_4 = arith.constant 0 : index
    %3 = vector.load %arg3[%c0_3, %c0_4] : memref<1x512xf32, #tpu.memory_space<vmem>>, vector<1x512xf32>
    %4 = vector.broadcast %3 : vector<1x512xf32> to vector<64x512xf32>
    %5 = arith.addf %2, %4 : vector<64x512xf32>
    %c0_5 = arith.constant 0 : index
    %c0_6 = arith.constant 0 : index
    %6 = vector.load %arg2[%c0_5, %c0_6] : memref<256x1024xbf16, #tpu.memory_space<vmem>>, vector<256x1024xbf16>
    %c0_7 = arith.constant 0 : index
    %c0_8 = arith.constant 0 : index
    %7 = vector.load %arg4[%c0_7, %c0_8] : memref<1x512xf32, #tpu.memory_space<vmem>>, vector<1x512xf32>
    %8 = vector.shape_cast %7 : vector<1x512xf32> to vector<1x512xf32>
    %9 = vector.broadcast %8 : vector<1x512xf32> to vector<8x512xf32>
    %cst_9 = arith.constant 0.000000e+00 : f32
    %10 = vector.broadcast %cst_9 : f32 to vector<8x128xf32>
    %11 = vector.extract_strided_slice %5 {offsets = [0, 0], sizes = [8, 512], strides = [1, 1]} : vector<64x512xf32> to vector<8x512xf32>
    %12 = vector.extract_strided_slice %11 {offsets = [0, 0], sizes = [8, 128], strides = [1, 1]} : vector<8x512xf32> to vector<8x128xf32>
    %13 = arith.negf %12 : vector<8x128xf32>
    %14 = math.exp %13 : vector<8x128xf32>
    %cst_10 = arith.constant 1.000000e+00 : f32
    %15 = vector.broadcast %cst_10 : f32 to vector<8x128xf32>
    %16 = arith.addf %15, %14 : vector<8x128xf32>
    %17 = arith.divf %15, %16 : vector<8x128xf32>
    %18 = vector.extract_strided_slice %11 {offsets = [0, 128], sizes = [8, 128], strides = [1, 1]} : vector<8x512xf32> to vector<8x128xf32>
    %19 = arith.negf %18 : vector<8x128xf32>
    %20 = math.exp %19 : vector<8x128xf32>
    %cst_11 = arith.constant 1.000000e+00 : f32
    %21 = vector.broadcast %cst_11 : f32 to vector<8x128xf32>
    %22 = arith.addf %21, %20 : vector<8x128xf32>
    %23 = arith.divf %21, %22 : vector<8x128xf32>
    %24 = vector.extract_strided_slice %11 {offsets = [0, 256], sizes = [8, 128], strides = [1, 1]} : vector<8x512xf32> to vector<8x128xf32>
    %25 = math.tanh %24 : vector<8x128xf32>
    %26 = vector.extract_strided_slice %11 {offsets = [0, 384], sizes = [8, 128], strides = [1, 1]} : vector<8x512xf32> to vector<8x128xf32>
    %27 = arith.negf %26 : vector<8x128xf32>
    %28 = math.exp %27 : vector<8x128xf32>
    %cst_12 = arith.constant 1.000000e+00 : f32
    %29 = vector.broadcast %cst_12 : f32 to vector<8x128xf32>
    %30 = arith.addf %29, %28 : vector<8x128xf32>
    %31 = arith.divf %29, %30 : vector<8x128xf32>
    %32 = arith.mulf %23, %10 : vector<8x128xf32>
    %33 = arith.mulf %17, %25 : vector<8x128xf32>
    %34 = arith.addf %32, %33 : vector<8x128xf32>
    %35 = math.tanh %34 : vector<8x128xf32>
    %36 = arith.mulf %31, %35 : vector<8x128xf32>
    %37 = tpu.concatenate %36, %10 in 1 : vector<8x128xf32>, vector<8x128xf32> -> vector<8x256xf32>
    %38 = arith.truncf %37 : vector<8x256xf32> to vector<8x256xbf16>
    %cst_13 = arith.constant dense<0.000000e+00> : vector<8x1024xf32>
    %39 = tpu.matmul %38, %6, %cst_13 {dimension_numbers = #tpu.dot_dimension_numbers<[1], [0], [0], [1], [0, 0, 1, 1], [], []>} : vector<8x256xbf16>, vector<256x1024xbf16>, vector<8x1024xf32> -> vector<8x1024xf32>
    %40 = vector.extract_strided_slice %39 {offsets = [0, 512], sizes = [8, 512], strides = [1, 1]} : vector<8x1024xf32> to vector<8x512xf32>
    %41 = arith.addf %40, %9 : vector<8x512xf32>
    %42 = vector.extract_strided_slice %41 {offsets = [0, 0], sizes = [8, 128], strides = [1, 1]} : vector<8x512xf32> to vector<8x128xf32>
    %43 = arith.negf %42 : vector<8x128xf32>
    %44 = math.exp %43 : vector<8x128xf32>
    %cst_14 = arith.constant 1.000000e+00 : f32
    %45 = vector.broadcast %cst_14 : f32 to vector<8x128xf32>
    %46 = arith.addf %45, %44 : vector<8x128xf32>
    %47 = arith.divf %45, %46 : vector<8x128xf32>
    %48 = vector.extract_strided_slice %41 {offsets = [0, 128], sizes = [8, 128], strides = [1, 1]} : vector<8x512xf32> to vector<8x128xf32>
    %49 = arith.negf %48 : vector<8x128xf32>
    %50 = math.exp %49 : vector<8x128xf32>
    %cst_15 = arith.constant 1.000000e+00 : f32
    %51 = vector.broadcast %cst_15 : f32 to vector<8x128xf32>
    %52 = arith.addf %51, %50 : vector<8x128xf32>
    %53 = arith.divf %51, %52 : vector<8x128xf32>
    %54 = vector.extract_strided_slice %41 {offsets = [0, 256], sizes = [8, 128], strides = [1, 1]} : vector<8x512xf32> to vector<8x128xf32>
    %55 = math.tanh %54 : vector<8x128xf32>
    %56 = vector.extract_strided_slice %41 {offsets = [0, 384], sizes = [8, 128], strides = [1, 1]} : vector<8x512xf32> to vector<8x128xf32>
    %57 = arith.negf %56 : vector<8x128xf32>
    %58 = math.exp %57 : vector<8x128xf32>
    %cst_16 = arith.constant 1.000000e+00 : f32
    %59 = vector.broadcast %cst_16 : f32 to vector<8x128xf32>
    %60 = arith.addf %59, %58 : vector<8x128xf32>
    %61 = arith.divf %59, %60 : vector<8x128xf32>
    %62 = arith.mulf %53, %10 : vector<8x128xf32>
    %63 = arith.mulf %47, %55 : vector<8x128xf32>
    %64 = arith.addf %62, %63 : vector<8x128xf32>
    %65 = math.tanh %64 : vector<8x128xf32>
    %66 = arith.mulf %61, %65 : vector<8x128xf32>
    %67 = vector.extract_strided_slice %39 {offsets = [0, 0], sizes = [8, 512], strides = [1, 1]} : vector<8x1024xf32> to vector<8x512xf32>
    %68 = vector.extract_strided_slice %5 {offsets = [8, 0], sizes = [8, 512], strides = [1, 1]} : vector<64x512xf32> to vector<8x512xf32>
    %69 = arith.addf %67, %68 : vector<8x512xf32>
    %70 = vector.extract_strided_slice %69 {offsets = [0, 0], sizes = [8, 128], strides = [1, 1]} : vector<8x512xf32> to vector<8x128xf32>
    %71 = arith.negf %70 : vector<8x128xf32>
    %72 = math.exp %71 : vector<8x128xf32>
    %cst_17 = arith.constant 1.000000e+00 : f32
    %73 = vector.broadcast %cst_17 : f32 to vector<8x128xf32>
    %74 = arith.addf %73, %72 : vector<8x128xf32>
    %75 = arith.divf %73, %74 : vector<8x128xf32>
    %76 = vector.extract_strided_slice %69 {offsets = [0, 128], sizes = [8, 128], strides = [1, 1]} : vector<8x512xf32> to vector<8x128xf32>
    %77 = arith.negf %76 : vector<8x128xf32>
    %78 = math.exp %77 : vector<8x128xf32>
    %cst_18 = arith.constant 1.000000e+00 : f32
    %79 = vector.broadcast %cst_18 : f32 to vector<8x128xf32>
    %80 = arith.addf %79, %78 : vector<8x128xf32>
    %81 = arith.divf %79, %80 : vector<8x128xf32>
    %82 = vector.extract_strided_slice %69 {offsets = [0, 256], sizes = [8, 128], strides = [1, 1]} : vector<8x512xf32> to vector<8x128xf32>
    %83 = math.tanh %82 : vector<8x128xf32>
    %84 = vector.extract_strided_slice %69 {offsets = [0, 384], sizes = [8, 128], strides = [1, 1]} : vector<8x512xf32> to vector<8x128xf32>
    %85 = arith.negf %84 : vector<8x128xf32>
    %86 = math.exp %85 : vector<8x128xf32>
    %cst_19 = arith.constant 1.000000e+00 : f32
    %87 = vector.broadcast %cst_19 : f32 to vector<8x128xf32>
    %88 = arith.addf %87, %86 : vector<8x128xf32>
    %89 = arith.divf %87, %88 : vector<8x128xf32>
    %90 = arith.mulf %81, %34 : vector<8x128xf32>
    %91 = arith.mulf %75, %83 : vector<8x128xf32>
    %92 = arith.addf %90, %91 : vector<8x128xf32>
    %93 = math.tanh %92 : vector<8x128xf32>
    %94 = arith.mulf %89, %93 : vector<8x128xf32>
    %95 = tpu.concatenate %94, %66 in 1 : vector<8x128xf32>, vector<8x128xf32> -> vector<8x256xf32>
    %96 = arith.truncf %95 : vector<8x256xf32> to vector<8x256xbf16>
    %cst_20 = arith.constant dense<0.000000e+00> : vector<8x1024xf32>
    %97 = tpu.matmul %96, %6, %cst_20 {dimension_numbers = #tpu.dot_dimension_numbers<[1], [0], [0], [1], [0, 0, 1, 1], [], []>} : vector<8x256xbf16>, vector<256x1024xbf16>, vector<8x1024xf32> -> vector<8x1024xf32>
    %98 = vector.extract_strided_slice %97 {offsets = [0, 512], sizes = [8, 512], strides = [1, 1]} : vector<8x1024xf32> to vector<8x512xf32>
    %99 = arith.addf %98, %9 : vector<8x512xf32>
    %100 = vector.extract_strided_slice %99 {offsets = [0, 0], sizes = [8, 128], strides = [1, 1]} : vector<8x512xf32> to vector<8x128xf32>
    %101 = arith.negf %100 : vector<8x128xf32>
    %102 = math.exp %101 : vector<8x128xf32>
    %cst_21 = arith.constant 1.000000e+00 : f32
    %103 = vector.broadcast %cst_21 : f32 to vector<8x128xf32>
    %104 = arith.addf %103, %102 : vector<8x128xf32>
    %105 = arith.divf %103, %104 : vector<8x128xf32>
    %106 = vector.extract_strided_slice %99 {offsets = [0, 128], sizes = [8, 128], strides = [1, 1]} : vector<8x512xf32> to vector<8x128xf32>
    %107 = arith.negf %106 : vector<8x128xf32>
    %108 = math.exp %107 : vector<8x128xf32>
    %cst_22 = arith.constant 1.000000e+00 : f32
    %109 = vector.broadcast %cst_22 : f32 to vector<8x128xf32>
    %110 = arith.addf %109, %108 : vector<8x128xf32>
    %111 = arith.divf %109, %110 : vector<8x128xf32>
    %112 = vector.extract_strided_slice %99 {offsets = [0, 256], sizes = [8, 128], strides = [1, 1]} : vector<8x512xf32> to vector<8x128xf32>
    %113 = math.tanh %112 : vector<8x128xf32>
    %114 = vector.extract_strided_slice %99 {offsets = [0, 384], sizes = [8, 128], strides = [1, 1]} : vector<8x512xf32> to vector<8x128xf32>
    %115 = arith.negf %114 : vector<8x128xf32>
    %116 = math.exp %115 : vector<8x128xf32>
    %cst_23 = arith.constant 1.000000e+00 : f32
    %117 = vector.broadcast %cst_23 : f32 to vector<8x128xf32>
    %118 = arith.addf %117, %116 : vector<8x128xf32>
    %119 = arith.divf %117, %118 : vector<8x128xf32>
    %120 = arith.mulf %111, %64 : vector<8x128xf32>
    %121 = arith.mulf %105, %113 : vector<8x128xf32>
    %122 = arith.addf %120, %121 : vector<8x128xf32>
    %123 = math.tanh %122 : vector<8x128xf32>
    %124 = arith.mulf %119, %123 : vector<8x128xf32>
    %125 = vector.extract_strided_slice %97 {offsets = [0, 0], sizes = [8, 512], strides = [1, 1]} : vector<8x1024xf32> to vector<8x512xf32>
    %126 = vector.extract_strided_slice %5 {offsets = [16, 0], sizes = [8, 512], strides = [1, 1]} : vector<64x512xf32> to vector<8x512xf32>
    %127 = arith.addf %125, %126 : vector<8x512xf32>
    %128 = vector.extract_strided_slice %127 {offsets = [0, 0], sizes = [8, 128], strides = [1, 1]} : vector<8x512xf32> to vector<8x128xf32>
    %129 = arith.negf %128 : vector<8x128xf32>
    %130 = math.exp %129 : vector<8x128xf32>
    %cst_24 = arith.constant 1.000000e+00 : f32
    %131 = vector.broadcast %cst_24 : f32 to vector<8x128xf32>
    %132 = arith.addf %131, %130 : vector<8x128xf32>
    %133 = arith.divf %131, %132 : vector<8x128xf32>
    %134 = vector.extract_strided_slice %127 {offsets = [0, 128], sizes = [8, 128], strides = [1, 1]} : vector<8x512xf32> to vector<8x128xf32>
    %135 = arith.negf %134 : vector<8x128xf32>
    %136 = math.exp %135 : vector<8x128xf32>
    %cst_25 = arith.constant 1.000000e+00 : f32
    %137 = vector.broadcast %cst_25 : f32 to vector<8x128xf32>
    %138 = arith.addf %137, %136 : vector<8x128xf32>
    %139 = arith.divf %137, %138 : vector<8x128xf32>
    %140 = vector.extract_strided_slice %127 {offsets = [0, 256], sizes = [8, 128], strides = [1, 1]} : vector<8x512xf32> to vector<8x128xf32>
    %141 = math.tanh %140 : vector<8x128xf32>
    %142 = vector.extract_strided_slice %127 {offsets = [0, 384], sizes = [8, 128], strides = [1, 1]} : vector<8x512xf32> to vector<8x128xf32>
    %143 = arith.negf %142 : vector<8x128xf32>
    %144 = math.exp %143 : vector<8x128xf32>
    %cst_26 = arith.constant 1.000000e+00 : f32
    %145 = vector.broadcast %cst_26 : f32 to vector<8x128xf32>
    %146 = arith.addf %145, %144 : vector<8x128xf32>
    %147 = arith.divf %145, %146 : vector<8x128xf32>
    %148 = arith.mulf %139, %92 : vector<8x128xf32>
    %149 = arith.mulf %133, %141 : vector<8x128xf32>
    %150 = arith.addf %148, %149 : vector<8x128xf32>
    %151 = math.tanh %150 : vector<8x128xf32>
    %152 = arith.mulf %147, %151 : vector<8x128xf32>
    %153 = tpu.concatenate %152, %124 in 1 : vector<8x128xf32>, vector<8x128xf32> -> vector<8x256xf32>
    %154 = arith.truncf %153 : vector<8x256xf32> to vector<8x256xbf16>
    %cst_27 = arith.constant dense<0.000000e+00> : vector<8x1024xf32>
    %155 = tpu.matmul %154, %6, %cst_27 {dimension_numbers = #tpu.dot_dimension_numbers<[1], [0], [0], [1], [0, 0, 1, 1], [], []>} : vector<8x256xbf16>, vector<256x1024xbf16>, vector<8x1024xf32> -> vector<8x1024xf32>
    %156 = vector.extract_strided_slice %155 {offsets = [0, 512], sizes = [8, 512], strides = [1, 1]} : vector<8x1024xf32> to vector<8x512xf32>
    %157 = arith.addf %156, %9 : vector<8x512xf32>
    %158 = vector.extract_strided_slice %157 {offsets = [0, 0], sizes = [8, 128], strides = [1, 1]} : vector<8x512xf32> to vector<8x128xf32>
    %159 = arith.negf %158 : vector<8x128xf32>
    %160 = math.exp %159 : vector<8x128xf32>
    %cst_28 = arith.constant 1.000000e+00 : f32
    %161 = vector.broadcast %cst_28 : f32 to vector<8x128xf32>
    %162 = arith.addf %161, %160 : vector<8x128xf32>
    %163 = arith.divf %161, %162 : vector<8x128xf32>
    %164 = vector.extract_strided_slice %157 {offsets = [0, 128], sizes = [8, 128], strides = [1, 1]} : vector<8x512xf32> to vector<8x128xf32>
    %165 = arith.negf %164 : vector<8x128xf32>
    %166 = math.exp %165 : vector<8x128xf32>
    %cst_29 = arith.constant 1.000000e+00 : f32
    %167 = vector.broadcast %cst_29 : f32 to vector<8x128xf32>
    %168 = arith.addf %167, %166 : vector<8x128xf32>
    %169 = arith.divf %167, %168 : vector<8x128xf32>
    %170 = vector.extract_strided_slice %157 {offsets = [0, 256], sizes = [8, 128], strides = [1, 1]} : vector<8x512xf32> to vector<8x128xf32>
    %171 = math.tanh %170 : vector<8x128xf32>
    %172 = vector.extract_strided_slice %157 {offsets = [0, 384], sizes = [8, 128], strides = [1, 1]} : vector<8x512xf32> to vector<8x128xf32>
    %173 = arith.negf %172 : vector<8x128xf32>
    %174 = math.exp %173 : vector<8x128xf32>
    %cst_30 = arith.constant 1.000000e+00 : f32
    %175 = vector.broadcast %cst_30 : f32 to vector<8x128xf32>
    %176 = arith.addf %175, %174 : vector<8x128xf32>
    %177 = arith.divf %175, %176 : vector<8x128xf32>
    %178 = arith.mulf %169, %122 : vector<8x128xf32>
    %179 = arith.mulf %163, %171 : vector<8x128xf32>
    %180 = arith.addf %178, %179 : vector<8x128xf32>
    %181 = math.tanh %180 : vector<8x128xf32>
    %182 = arith.mulf %177, %181 : vector<8x128xf32>
    %183 = vector.extract_strided_slice %155 {offsets = [0, 0], sizes = [8, 512], strides = [1, 1]} : vector<8x1024xf32> to vector<8x512xf32>
    %184 = vector.extract_strided_slice %5 {offsets = [24, 0], sizes = [8, 512], strides = [1, 1]} : vector<64x512xf32> to vector<8x512xf32>
    %185 = arith.addf %183, %184 : vector<8x512xf32>
    %186 = vector.extract_strided_slice %185 {offsets = [0, 0], sizes = [8, 128], strides = [1, 1]} : vector<8x512xf32> to vector<8x128xf32>
    %187 = arith.negf %186 : vector<8x128xf32>
    %188 = math.exp %187 : vector<8x128xf32>
    %cst_31 = arith.constant 1.000000e+00 : f32
    %189 = vector.broadcast %cst_31 : f32 to vector<8x128xf32>
    %190 = arith.addf %189, %188 : vector<8x128xf32>
    %191 = arith.divf %189, %190 : vector<8x128xf32>
    %192 = vector.extract_strided_slice %185 {offsets = [0, 128], sizes = [8, 128], strides = [1, 1]} : vector<8x512xf32> to vector<8x128xf32>
    %193 = arith.negf %192 : vector<8x128xf32>
    %194 = math.exp %193 : vector<8x128xf32>
    %cst_32 = arith.constant 1.000000e+00 : f32
    %195 = vector.broadcast %cst_32 : f32 to vector<8x128xf32>
    %196 = arith.addf %195, %194 : vector<8x128xf32>
    %197 = arith.divf %195, %196 : vector<8x128xf32>
    %198 = vector.extract_strided_slice %185 {offsets = [0, 256], sizes = [8, 128], strides = [1, 1]} : vector<8x512xf32> to vector<8x128xf32>
    %199 = math.tanh %198 : vector<8x128xf32>
    %200 = vector.extract_strided_slice %185 {offsets = [0, 384], sizes = [8, 128], strides = [1, 1]} : vector<8x512xf32> to vector<8x128xf32>
    %201 = arith.negf %200 : vector<8x128xf32>
    %202 = math.exp %201 : vector<8x128xf32>
    %cst_33 = arith.constant 1.000000e+00 : f32
    %203 = vector.broadcast %cst_33 : f32 to vector<8x128xf32>
    %204 = arith.addf %203, %202 : vector<8x128xf32>
    %205 = arith.divf %203, %204 : vector<8x128xf32>
    %206 = arith.mulf %197, %150 : vector<8x128xf32>
    %207 = arith.mulf %191, %199 : vector<8x128xf32>
    %208 = arith.addf %206, %207 : vector<8x128xf32>
    %209 = math.tanh %208 : vector<8x128xf32>
    %210 = arith.mulf %205, %209 : vector<8x128xf32>
    %211 = tpu.concatenate %210, %182 in 1 : vector<8x128xf32>, vector<8x128xf32> -> vector<8x256xf32>
    %212 = arith.truncf %211 : vector<8x256xf32> to vector<8x256xbf16>
    %cst_34 = arith.constant dense<0.000000e+00> : vector<8x1024xf32>
    %213 = tpu.matmul %212, %6, %cst_34 {dimension_numbers = #tpu.dot_dimension_numbers<[1], [0], [0], [1], [0, 0, 1, 1], [], []>} : vector<8x256xbf16>, vector<256x1024xbf16>, vector<8x1024xf32> -> vector<8x1024xf32>
    %214 = vector.extract_strided_slice %213 {offsets = [0, 512], sizes = [8, 512], strides = [1, 1]} : vector<8x1024xf32> to vector<8x512xf32>
    %215 = arith.addf %214, %9 : vector<8x512xf32>
    %216 = vector.extract_strided_slice %215 {offsets = [0, 0], sizes = [8, 128], strides = [1, 1]} : vector<8x512xf32> to vector<8x128xf32>
    %217 = arith.negf %216 : vector<8x128xf32>
    %218 = math.exp %217 : vector<8x128xf32>
    %cst_35 = arith.constant 1.000000e+00 : f32
    %219 = vector.broadcast %cst_35 : f32 to vector<8x128xf32>
    %220 = arith.addf %219, %218 : vector<8x128xf32>
    %221 = arith.divf %219, %220 : vector<8x128xf32>
    %222 = vector.extract_strided_slice %215 {offsets = [0, 128], sizes = [8, 128], strides = [1, 1]} : vector<8x512xf32> to vector<8x128xf32>
    %223 = arith.negf %222 : vector<8x128xf32>
    %224 = math.exp %223 : vector<8x128xf32>
    %cst_36 = arith.constant 1.000000e+00 : f32
    %225 = vector.broadcast %cst_36 : f32 to vector<8x128xf32>
    %226 = arith.addf %225, %224 : vector<8x128xf32>
    %227 = arith.divf %225, %226 : vector<8x128xf32>
    %228 = vector.extract_strided_slice %215 {offsets = [0, 256], sizes = [8, 128], strides = [1, 1]} : vector<8x512xf32> to vector<8x128xf32>
    %229 = math.tanh %228 : vector<8x128xf32>
    %230 = vector.extract_strided_slice %215 {offsets = [0, 384], sizes = [8, 128], strides = [1, 1]} : vector<8x512xf32> to vector<8x128xf32>
    %231 = arith.negf %230 : vector<8x128xf32>
    %232 = math.exp %231 : vector<8x128xf32>
    %cst_37 = arith.constant 1.000000e+00 : f32
    %233 = vector.broadcast %cst_37 : f32 to vector<8x128xf32>
    %234 = arith.addf %233, %232 : vector<8x128xf32>
    %235 = arith.divf %233, %234 : vector<8x128xf32>
    %236 = arith.mulf %227, %180 : vector<8x128xf32>
    %237 = arith.mulf %221, %229 : vector<8x128xf32>
    %238 = arith.addf %236, %237 : vector<8x128xf32>
    %239 = math.tanh %238 : vector<8x128xf32>
    %240 = arith.mulf %235, %239 : vector<8x128xf32>
    %241 = vector.extract_strided_slice %213 {offsets = [0, 0], sizes = [8, 512], strides = [1, 1]} : vector<8x1024xf32> to vector<8x512xf32>
    %242 = vector.extract_strided_slice %5 {offsets = [32, 0], sizes = [8, 512], strides = [1, 1]} : vector<64x512xf32> to vector<8x512xf32>
    %243 = arith.addf %241, %242 : vector<8x512xf32>
    %244 = vector.extract_strided_slice %243 {offsets = [0, 0], sizes = [8, 128], strides = [1, 1]} : vector<8x512xf32> to vector<8x128xf32>
    %245 = arith.negf %244 : vector<8x128xf32>
    %246 = math.exp %245 : vector<8x128xf32>
    %cst_38 = arith.constant 1.000000e+00 : f32
    %247 = vector.broadcast %cst_38 : f32 to vector<8x128xf32>
    %248 = arith.addf %247, %246 : vector<8x128xf32>
    %249 = arith.divf %247, %248 : vector<8x128xf32>
    %250 = vector.extract_strided_slice %243 {offsets = [0, 128], sizes = [8, 128], strides = [1, 1]} : vector<8x512xf32> to vector<8x128xf32>
    %251 = arith.negf %250 : vector<8x128xf32>
    %252 = math.exp %251 : vector<8x128xf32>
    %cst_39 = arith.constant 1.000000e+00 : f32
    %253 = vector.broadcast %cst_39 : f32 to vector<8x128xf32>
    %254 = arith.addf %253, %252 : vector<8x128xf32>
    %255 = arith.divf %253, %254 : vector<8x128xf32>
    %256 = vector.extract_strided_slice %243 {offsets = [0, 256], sizes = [8, 128], strides = [1, 1]} : vector<8x512xf32> to vector<8x128xf32>
    %257 = math.tanh %256 : vector<8x128xf32>
    %258 = vector.extract_strided_slice %243 {offsets = [0, 384], sizes = [8, 128], strides = [1, 1]} : vector<8x512xf32> to vector<8x128xf32>
    %259 = arith.negf %258 : vector<8x128xf32>
    %260 = math.exp %259 : vector<8x128xf32>
    %cst_40 = arith.constant 1.000000e+00 : f32
    %261 = vector.broadcast %cst_40 : f32 to vector<8x128xf32>
    %262 = arith.addf %261, %260 : vector<8x128xf32>
    %263 = arith.divf %261, %262 : vector<8x128xf32>
    %264 = arith.mulf %255, %208 : vector<8x128xf32>
    %265 = arith.mulf %249, %257 : vector<8x128xf32>
    %266 = arith.addf %264, %265 : vector<8x128xf32>
    %267 = math.tanh %266 : vector<8x128xf32>
    %268 = arith.mulf %263, %267 : vector<8x128xf32>
    %269 = tpu.concatenate %268, %240 in 1 : vector<8x128xf32>, vector<8x128xf32> -> vector<8x256xf32>
    %270 = arith.truncf %269 : vector<8x256xf32> to vector<8x256xbf16>
    %cst_41 = arith.constant dense<0.000000e+00> : vector<8x1024xf32>
    %271 = tpu.matmul %270, %6, %cst_41 {dimension_numbers = #tpu.dot_dimension_numbers<[1], [0], [0], [1], [0, 0, 1, 1], [], []>} : vector<8x256xbf16>, vector<256x1024xbf16>, vector<8x1024xf32> -> vector<8x1024xf32>
    %272 = vector.extract_strided_slice %271 {offsets = [0, 512], sizes = [8, 512], strides = [1, 1]} : vector<8x1024xf32> to vector<8x512xf32>
    %273 = arith.addf %272, %9 : vector<8x512xf32>
    %274 = vector.extract_strided_slice %273 {offsets = [0, 0], sizes = [8, 128], strides = [1, 1]} : vector<8x512xf32> to vector<8x128xf32>
    %275 = arith.negf %274 : vector<8x128xf32>
    %276 = math.exp %275 : vector<8x128xf32>
    %cst_42 = arith.constant 1.000000e+00 : f32
    %277 = vector.broadcast %cst_42 : f32 to vector<8x128xf32>
    %278 = arith.addf %277, %276 : vector<8x128xf32>
    %279 = arith.divf %277, %278 : vector<8x128xf32>
    %280 = vector.extract_strided_slice %273 {offsets = [0, 128], sizes = [8, 128], strides = [1, 1]} : vector<8x512xf32> to vector<8x128xf32>
    %281 = arith.negf %280 : vector<8x128xf32>
    %282 = math.exp %281 : vector<8x128xf32>
    %cst_43 = arith.constant 1.000000e+00 : f32
    %283 = vector.broadcast %cst_43 : f32 to vector<8x128xf32>
    %284 = arith.addf %283, %282 : vector<8x128xf32>
    %285 = arith.divf %283, %284 : vector<8x128xf32>
    %286 = vector.extract_strided_slice %273 {offsets = [0, 256], sizes = [8, 128], strides = [1, 1]} : vector<8x512xf32> to vector<8x128xf32>
    %287 = math.tanh %286 : vector<8x128xf32>
    %288 = vector.extract_strided_slice %273 {offsets = [0, 384], sizes = [8, 128], strides = [1, 1]} : vector<8x512xf32> to vector<8x128xf32>
    %289 = arith.negf %288 : vector<8x128xf32>
    %290 = math.exp %289 : vector<8x128xf32>
    %cst_44 = arith.constant 1.000000e+00 : f32
    %291 = vector.broadcast %cst_44 : f32 to vector<8x128xf32>
    %292 = arith.addf %291, %290 : vector<8x128xf32>
    %293 = arith.divf %291, %292 : vector<8x128xf32>
    %294 = arith.mulf %285, %238 : vector<8x128xf32>
    %295 = arith.mulf %279, %287 : vector<8x128xf32>
    %296 = arith.addf %294, %295 : vector<8x128xf32>
    %297 = math.tanh %296 : vector<8x128xf32>
    %298 = arith.mulf %293, %297 : vector<8x128xf32>
    %299 = vector.extract_strided_slice %271 {offsets = [0, 0], sizes = [8, 512], strides = [1, 1]} : vector<8x1024xf32> to vector<8x512xf32>
    %300 = vector.extract_strided_slice %5 {offsets = [40, 0], sizes = [8, 512], strides = [1, 1]} : vector<64x512xf32> to vector<8x512xf32>
    %301 = arith.addf %299, %300 : vector<8x512xf32>
    %302 = vector.extract_strided_slice %301 {offsets = [0, 0], sizes = [8, 128], strides = [1, 1]} : vector<8x512xf32> to vector<8x128xf32>
    %303 = arith.negf %302 : vector<8x128xf32>
    %304 = math.exp %303 : vector<8x128xf32>
    %cst_45 = arith.constant 1.000000e+00 : f32
    %305 = vector.broadcast %cst_45 : f32 to vector<8x128xf32>
    %306 = arith.addf %305, %304 : vector<8x128xf32>
    %307 = arith.divf %305, %306 : vector<8x128xf32>
    %308 = vector.extract_strided_slice %301 {offsets = [0, 128], sizes = [8, 128], strides = [1, 1]} : vector<8x512xf32> to vector<8x128xf32>
    %309 = arith.negf %308 : vector<8x128xf32>
    %310 = math.exp %309 : vector<8x128xf32>
    %cst_46 = arith.constant 1.000000e+00 : f32
    %311 = vector.broadcast %cst_46 : f32 to vector<8x128xf32>
    %312 = arith.addf %311, %310 : vector<8x128xf32>
    %313 = arith.divf %311, %312 : vector<8x128xf32>
    %314 = vector.extract_strided_slice %301 {offsets = [0, 256], sizes = [8, 128], strides = [1, 1]} : vector<8x512xf32> to vector<8x128xf32>
    %315 = math.tanh %314 : vector<8x128xf32>
    %316 = vector.extract_strided_slice %301 {offsets = [0, 384], sizes = [8, 128], strides = [1, 1]} : vector<8x512xf32> to vector<8x128xf32>
    %317 = arith.negf %316 : vector<8x128xf32>
    %318 = math.exp %317 : vector<8x128xf32>
    %cst_47 = arith.constant 1.000000e+00 : f32
    %319 = vector.broadcast %cst_47 : f32 to vector<8x128xf32>
    %320 = arith.addf %319, %318 : vector<8x128xf32>
    %321 = arith.divf %319, %320 : vector<8x128xf32>
    %322 = arith.mulf %313, %266 : vector<8x128xf32>
    %323 = arith.mulf %307, %315 : vector<8x128xf32>
    %324 = arith.addf %322, %323 : vector<8x128xf32>
    %325 = math.tanh %324 : vector<8x128xf32>
    %326 = arith.mulf %321, %325 : vector<8x128xf32>
    %327 = tpu.concatenate %326, %298 in 1 : vector<8x128xf32>, vector<8x128xf32> -> vector<8x256xf32>
    %328 = arith.truncf %327 : vector<8x256xf32> to vector<8x256xbf16>
    %cst_48 = arith.constant dense<0.000000e+00> : vector<8x1024xf32>
    %329 = tpu.matmul %328, %6, %cst_48 {dimension_numbers = #tpu.dot_dimension_numbers<[1], [0], [0], [1], [0, 0, 1, 1], [], []>} : vector<8x256xbf16>, vector<256x1024xbf16>, vector<8x1024xf32> -> vector<8x1024xf32>
    %330 = vector.extract_strided_slice %329 {offsets = [0, 512], sizes = [8, 512], strides = [1, 1]} : vector<8x1024xf32> to vector<8x512xf32>
    %331 = arith.addf %330, %9 : vector<8x512xf32>
    %332 = vector.extract_strided_slice %331 {offsets = [0, 0], sizes = [8, 128], strides = [1, 1]} : vector<8x512xf32> to vector<8x128xf32>
    %333 = arith.negf %332 : vector<8x128xf32>
    %334 = math.exp %333 : vector<8x128xf32>
    %cst_49 = arith.constant 1.000000e+00 : f32
    %335 = vector.broadcast %cst_49 : f32 to vector<8x128xf32>
    %336 = arith.addf %335, %334 : vector<8x128xf32>
    %337 = arith.divf %335, %336 : vector<8x128xf32>
    %338 = vector.extract_strided_slice %331 {offsets = [0, 128], sizes = [8, 128], strides = [1, 1]} : vector<8x512xf32> to vector<8x128xf32>
    %339 = arith.negf %338 : vector<8x128xf32>
    %340 = math.exp %339 : vector<8x128xf32>
    %cst_50 = arith.constant 1.000000e+00 : f32
    %341 = vector.broadcast %cst_50 : f32 to vector<8x128xf32>
    %342 = arith.addf %341, %340 : vector<8x128xf32>
    %343 = arith.divf %341, %342 : vector<8x128xf32>
    %344 = vector.extract_strided_slice %331 {offsets = [0, 256], sizes = [8, 128], strides = [1, 1]} : vector<8x512xf32> to vector<8x128xf32>
    %345 = math.tanh %344 : vector<8x128xf32>
    %346 = vector.extract_strided_slice %331 {offsets = [0, 384], sizes = [8, 128], strides = [1, 1]} : vector<8x512xf32> to vector<8x128xf32>
    %347 = arith.negf %346 : vector<8x128xf32>
    %348 = math.exp %347 : vector<8x128xf32>
    %cst_51 = arith.constant 1.000000e+00 : f32
    %349 = vector.broadcast %cst_51 : f32 to vector<8x128xf32>
    %350 = arith.addf %349, %348 : vector<8x128xf32>
    %351 = arith.divf %349, %350 : vector<8x128xf32>
    %352 = arith.mulf %343, %296 : vector<8x128xf32>
    %353 = arith.mulf %337, %345 : vector<8x128xf32>
    %354 = arith.addf %352, %353 : vector<8x128xf32>
    %355 = math.tanh %354 : vector<8x128xf32>
    %356 = arith.mulf %351, %355 : vector<8x128xf32>
    %357 = vector.extract_strided_slice %329 {offsets = [0, 0], sizes = [8, 512], strides = [1, 1]} : vector<8x1024xf32> to vector<8x512xf32>
    %358 = vector.extract_strided_slice %5 {offsets = [48, 0], sizes = [8, 512], strides = [1, 1]} : vector<64x512xf32> to vector<8x512xf32>
    %359 = arith.addf %357, %358 : vector<8x512xf32>
    %360 = vector.extract_strided_slice %359 {offsets = [0, 0], sizes = [8, 128], strides = [1, 1]} : vector<8x512xf32> to vector<8x128xf32>
    %361 = arith.negf %360 : vector<8x128xf32>
    %362 = math.exp %361 : vector<8x128xf32>
    %cst_52 = arith.constant 1.000000e+00 : f32
    %363 = vector.broadcast %cst_52 : f32 to vector<8x128xf32>
    %364 = arith.addf %363, %362 : vector<8x128xf32>
    %365 = arith.divf %363, %364 : vector<8x128xf32>
    %366 = vector.extract_strided_slice %359 {offsets = [0, 128], sizes = [8, 128], strides = [1, 1]} : vector<8x512xf32> to vector<8x128xf32>
    %367 = arith.negf %366 : vector<8x128xf32>
    %368 = math.exp %367 : vector<8x128xf32>
    %cst_53 = arith.constant 1.000000e+00 : f32
    %369 = vector.broadcast %cst_53 : f32 to vector<8x128xf32>
    %370 = arith.addf %369, %368 : vector<8x128xf32>
    %371 = arith.divf %369, %370 : vector<8x128xf32>
    %372 = vector.extract_strided_slice %359 {offsets = [0, 256], sizes = [8, 128], strides = [1, 1]} : vector<8x512xf32> to vector<8x128xf32>
    %373 = math.tanh %372 : vector<8x128xf32>
    %374 = vector.extract_strided_slice %359 {offsets = [0, 384], sizes = [8, 128], strides = [1, 1]} : vector<8x512xf32> to vector<8x128xf32>
    %375 = arith.negf %374 : vector<8x128xf32>
    %376 = math.exp %375 : vector<8x128xf32>
    %cst_54 = arith.constant 1.000000e+00 : f32
    %377 = vector.broadcast %cst_54 : f32 to vector<8x128xf32>
    %378 = arith.addf %377, %376 : vector<8x128xf32>
    %379 = arith.divf %377, %378 : vector<8x128xf32>
    %380 = arith.mulf %371, %324 : vector<8x128xf32>
    %381 = arith.mulf %365, %373 : vector<8x128xf32>
    %382 = arith.addf %380, %381 : vector<8x128xf32>
    %383 = math.tanh %382 : vector<8x128xf32>
    %384 = arith.mulf %379, %383 : vector<8x128xf32>
    %385 = tpu.concatenate %384, %356 in 1 : vector<8x128xf32>, vector<8x128xf32> -> vector<8x256xf32>
    %386 = arith.truncf %385 : vector<8x256xf32> to vector<8x256xbf16>
    %cst_55 = arith.constant dense<0.000000e+00> : vector<8x1024xf32>
    %387 = tpu.matmul %386, %6, %cst_55 {dimension_numbers = #tpu.dot_dimension_numbers<[1], [0], [0], [1], [0, 0, 1, 1], [], []>} : vector<8x256xbf16>, vector<256x1024xbf16>, vector<8x1024xf32> -> vector<8x1024xf32>
    %388 = vector.extract_strided_slice %387 {offsets = [0, 512], sizes = [8, 512], strides = [1, 1]} : vector<8x1024xf32> to vector<8x512xf32>
    %389 = arith.addf %388, %9 : vector<8x512xf32>
    %390 = vector.extract_strided_slice %389 {offsets = [0, 0], sizes = [8, 128], strides = [1, 1]} : vector<8x512xf32> to vector<8x128xf32>
    %391 = arith.negf %390 : vector<8x128xf32>
    %392 = math.exp %391 : vector<8x128xf32>
    %cst_56 = arith.constant 1.000000e+00 : f32
    %393 = vector.broadcast %cst_56 : f32 to vector<8x128xf32>
    %394 = arith.addf %393, %392 : vector<8x128xf32>
    %395 = arith.divf %393, %394 : vector<8x128xf32>
    %396 = vector.extract_strided_slice %389 {offsets = [0, 128], sizes = [8, 128], strides = [1, 1]} : vector<8x512xf32> to vector<8x128xf32>
    %397 = arith.negf %396 : vector<8x128xf32>
    %398 = math.exp %397 : vector<8x128xf32>
    %cst_57 = arith.constant 1.000000e+00 : f32
    %399 = vector.broadcast %cst_57 : f32 to vector<8x128xf32>
    %400 = arith.addf %399, %398 : vector<8x128xf32>
    %401 = arith.divf %399, %400 : vector<8x128xf32>
    %402 = vector.extract_strided_slice %389 {offsets = [0, 256], sizes = [8, 128], strides = [1, 1]} : vector<8x512xf32> to vector<8x128xf32>
    %403 = math.tanh %402 : vector<8x128xf32>
    %404 = vector.extract_strided_slice %389 {offsets = [0, 384], sizes = [8, 128], strides = [1, 1]} : vector<8x512xf32> to vector<8x128xf32>
    %405 = arith.negf %404 : vector<8x128xf32>
    %406 = math.exp %405 : vector<8x128xf32>
    %cst_58 = arith.constant 1.000000e+00 : f32
    %407 = vector.broadcast %cst_58 : f32 to vector<8x128xf32>
    %408 = arith.addf %407, %406 : vector<8x128xf32>
    %409 = arith.divf %407, %408 : vector<8x128xf32>
    %410 = arith.mulf %401, %354 : vector<8x128xf32>
    %411 = arith.mulf %395, %403 : vector<8x128xf32>
    %412 = arith.addf %410, %411 : vector<8x128xf32>
    %413 = math.tanh %412 : vector<8x128xf32>
    %414 = arith.mulf %409, %413 : vector<8x128xf32>
    %415 = vector.extract_strided_slice %387 {offsets = [0, 0], sizes = [8, 512], strides = [1, 1]} : vector<8x1024xf32> to vector<8x512xf32>
    %416 = vector.extract_strided_slice %5 {offsets = [56, 0], sizes = [8, 512], strides = [1, 1]} : vector<64x512xf32> to vector<8x512xf32>
    %417 = arith.addf %415, %416 : vector<8x512xf32>
    %418 = vector.extract_strided_slice %417 {offsets = [0, 0], sizes = [8, 128], strides = [1, 1]} : vector<8x512xf32> to vector<8x128xf32>
    %419 = arith.negf %418 : vector<8x128xf32>
    %420 = math.exp %419 : vector<8x128xf32>
    %cst_59 = arith.constant 1.000000e+00 : f32
    %421 = vector.broadcast %cst_59 : f32 to vector<8x128xf32>
    %422 = arith.addf %421, %420 : vector<8x128xf32>
    %423 = arith.divf %421, %422 : vector<8x128xf32>
    %424 = vector.extract_strided_slice %417 {offsets = [0, 128], sizes = [8, 128], strides = [1, 1]} : vector<8x512xf32> to vector<8x128xf32>
    %425 = arith.negf %424 : vector<8x128xf32>
    %426 = math.exp %425 : vector<8x128xf32>
    %cst_60 = arith.constant 1.000000e+00 : f32
    %427 = vector.broadcast %cst_60 : f32 to vector<8x128xf32>
    %428 = arith.addf %427, %426 : vector<8x128xf32>
    %429 = arith.divf %427, %428 : vector<8x128xf32>
    %430 = vector.extract_strided_slice %417 {offsets = [0, 256], sizes = [8, 128], strides = [1, 1]} : vector<8x512xf32> to vector<8x128xf32>
    %431 = math.tanh %430 : vector<8x128xf32>
    %432 = vector.extract_strided_slice %417 {offsets = [0, 384], sizes = [8, 128], strides = [1, 1]} : vector<8x512xf32> to vector<8x128xf32>
    %433 = arith.negf %432 : vector<8x128xf32>
    %434 = math.exp %433 : vector<8x128xf32>
    %cst_61 = arith.constant 1.000000e+00 : f32
    %435 = vector.broadcast %cst_61 : f32 to vector<8x128xf32>
    %436 = arith.addf %435, %434 : vector<8x128xf32>
    %437 = arith.divf %435, %436 : vector<8x128xf32>
    %438 = arith.mulf %429, %382 : vector<8x128xf32>
    %439 = arith.mulf %423, %431 : vector<8x128xf32>
    %440 = arith.addf %438, %439 : vector<8x128xf32>
    %441 = math.tanh %440 : vector<8x128xf32>
    %442 = arith.mulf %437, %441 : vector<8x128xf32>
    %443 = tpu.concatenate %442, %414 in 1 : vector<8x128xf32>, vector<8x128xf32> -> vector<8x256xf32>
    %444 = arith.truncf %443 : vector<8x256xf32> to vector<8x256xbf16>
    %cst_62 = arith.constant dense<0.000000e+00> : vector<8x1024xf32>
    %445 = tpu.matmul %444, %6, %cst_62 {dimension_numbers = #tpu.dot_dimension_numbers<[1], [0], [0], [1], [0, 0, 1, 1], [], []>} : vector<8x256xbf16>, vector<256x1024xbf16>, vector<8x1024xf32> -> vector<8x1024xf32>
    %446 = vector.extract_strided_slice %445 {offsets = [0, 512], sizes = [8, 512], strides = [1, 1]} : vector<8x1024xf32> to vector<8x512xf32>
    %447 = arith.addf %446, %9 : vector<8x512xf32>
    %448 = vector.extract_strided_slice %447 {offsets = [0, 0], sizes = [8, 128], strides = [1, 1]} : vector<8x512xf32> to vector<8x128xf32>
    %449 = arith.negf %448 : vector<8x128xf32>
    %450 = math.exp %449 : vector<8x128xf32>
    %cst_63 = arith.constant 1.000000e+00 : f32
    %451 = vector.broadcast %cst_63 : f32 to vector<8x128xf32>
    %452 = arith.addf %451, %450 : vector<8x128xf32>
    %453 = arith.divf %451, %452 : vector<8x128xf32>
    %454 = vector.extract_strided_slice %447 {offsets = [0, 128], sizes = [8, 128], strides = [1, 1]} : vector<8x512xf32> to vector<8x128xf32>
    %455 = arith.negf %454 : vector<8x128xf32>
    %456 = math.exp %455 : vector<8x128xf32>
    %cst_64 = arith.constant 1.000000e+00 : f32
    %457 = vector.broadcast %cst_64 : f32 to vector<8x128xf32>
    %458 = arith.addf %457, %456 : vector<8x128xf32>
    %459 = arith.divf %457, %458 : vector<8x128xf32>
    %460 = vector.extract_strided_slice %447 {offsets = [0, 256], sizes = [8, 128], strides = [1, 1]} : vector<8x512xf32> to vector<8x128xf32>
    %461 = math.tanh %460 : vector<8x128xf32>
    %462 = vector.extract_strided_slice %447 {offsets = [0, 384], sizes = [8, 128], strides = [1, 1]} : vector<8x512xf32> to vector<8x128xf32>
    %463 = arith.negf %462 : vector<8x128xf32>
    %464 = math.exp %463 : vector<8x128xf32>
    %cst_65 = arith.constant 1.000000e+00 : f32
    %465 = vector.broadcast %cst_65 : f32 to vector<8x128xf32>
    %466 = arith.addf %465, %464 : vector<8x128xf32>
    %467 = arith.divf %465, %466 : vector<8x128xf32>
    %468 = arith.mulf %459, %412 : vector<8x128xf32>
    %469 = arith.mulf %453, %461 : vector<8x128xf32>
    %470 = arith.addf %468, %469 : vector<8x128xf32>
    %471 = math.tanh %470 : vector<8x128xf32>
    %472 = arith.mulf %467, %471 : vector<8x128xf32>
    %473 = arith.truncf %472 : vector<8x128xf32> to vector<8x128xbf16>
    %c0_66 = arith.constant 0 : index
    %c0_67 = arith.constant 0 : index
    %474 = vector.load %arg5[%c0_66, %c0_67] : memref<128x128xbf16, #tpu.memory_space<vmem>>, vector<128x128xbf16>
    %cst_68 = arith.constant dense<0.000000e+00> : vector<8x128xf32>
    %475 = tpu.matmul %473, %474, %cst_68 {dimension_numbers = #tpu.dot_dimension_numbers<[1], [0], [0], [1], [0, 0, 1, 1], [], []>} : vector<8x128xbf16>, vector<128x128xbf16>, vector<8x128xf32> -> vector<8x128xf32>
    %c0_69 = arith.constant 0 : index
    %c0_70 = arith.constant 0 : index
    %476 = vector.load %arg6[%c0_69, %c0_70] : memref<1x128xf32, #tpu.memory_space<vmem>>, vector<1x128xf32>
    %477 = vector.broadcast %476 : vector<1x128xf32> to vector<8x128xf32>
    %478 = arith.addf %475, %477 : vector<8x128xf32>
    %c0_71 = arith.constant 0 : index
    %c0_72 = arith.constant 0 : index
    %479 = vector.load %arg7[%c0_71, %c0_72] : memref<8x128xf32, #tpu.memory_space<vmem>>, vector<8x128xf32>
    tpu.vector_store %arg7[%c0_71, %c0_72], %478 {strides = array<i32>} : memref<8x128xf32, #tpu.memory_space<vmem>>, vector<8x128xf32>,
    return
  }
}

</mosaic_0001>

<bundles_post_ra>
// kernel: rnn_network_forward.1
= control target key start
LH: loop header
LB: loop body
LE: loop exit
PB: predicated region body
PF: predicated region fallthrough
CT: control target
= control target key end

     0   :  { %12 = vsyncpa [#allocation3], 0  ;;  %s6799_s0 = inlined_call_operand.vmem [shape: bf16[64,16], index: 0, kind: input, shape index: {}]   ;;  %s6800_s1 = inlined_call_operand.hbm [shape: bf16[16,512], index: 1, kind: input, shape index: {}]   ;;  %s6801_s2 = inlined_call_operand.hbm [shape: bf16[256,1024], index: 2, kind: input, shape index: {}]   ;;  %s6802_s3 = inlined_call_operand.vmem [shape: f32[1,512], index: 3, kind: input, shape index: {}]   ;;  %s6803_s4 = inlined_call_operand.vmem [shape: f32[1,512], index: 4, kind: input, shape index: {}]   ;;  %s6804_s5 = inlined_call_operand.vmem [shape: bf16[128,128], index: 5, kind: input, shape index: {}]   ;;  %s6805_s6 = inlined_call_operand.vmem [shape: f32[1,128], index: 6, kind: input, shape index: {}]   ;;  %s6806_s7 = inlined_call_operand.vmem [shape: f32[8,128], index: 7, kind: output, shape index: {}]  }
   0x1   :  { %s20_s26 = sshll.u32 %s6800_s1, 4  ;;  %s21_s26 = int_to_ptr.hbm [resolvable:$true] %s20_s26 }
   0x2   :  { %13 = vsyncpa [#allocation5], 0  ;;  %s4862_s27 = smov [#allocation2]   ;;  %s33_s8 = sshll.u32 %s6801_s2, 4  ;;  %s34_s8 = int_to_ptr.hbm [resolvable:$true] %s33_s8 }
   0x3   :  { %s22_s28 = sshll.u32 %s4862_s27, 4  ;;  %s4863_s9 = smov 256   ;;  %s23_s28 = int_to_ptr.vmem [resolvable:$true] %s22_s28 }
   0x4   :  { %s4864_s10 = smov 16   ;;  %s4865_s11 = smov [#allocation4]  }
   0x5   :  { %28 = dma.hbm_to_vmem [thread:$0]  %s21_s26, 512, %s23_s28, [#allocation3], %s4863_s9, %s4863_s9, %s4864_s10  }
   0x6   :  { %s35_s12 = sshll.u32 %s4865_s11, 4  ;;  %s4866_s13 = smov 512   ;;  %s36_s12 = int_to_ptr.vmem [resolvable:$true] %s35_s12 }
   0x7   :  { %s4867_s14 = smov 32  }
   0x8   :  { %41 = dma.hbm_to_vmem [thread:$0]  %s34_s8, 16384, %s36_s12, [#allocation5], %s4866_s13, %s4866_s13, %s4867_s14  }
   0x9   :  { %4858 = dma.done.wait [#allocation3], 512  }
   0xa   :  { %4859 = vsyncadd [#allocation3], 4294966784 }
   0xb   :  { %4860 = dma.done.wait [#allocation5], 16384  }
   0xc   :  { %4861 = vsyncadd [#allocation5], 4294950912  ;;  %v3779_v0 = vld [vmem:[#allocation2] sm:$0xf]  ;;  %v4407_v1 = vld [vmem:[#allocation2 + $0xc] sm:$0xf0] }
   0xd   :  { %v4918_v2 = vld [vmem:[%s6799_s0 + $0x18] sm:$0xff]  ;;  %v3780_v3 = vor.u32 %v4407_v1, %v3779_v0  ;;  %vm121_vm0 = vcmask 130048   ;;  %v4401_v4 = vld [vmem:[%s6799_s0] sm:$0xff]  ;;  %v4406_v5 = vld [vmem:[#allocation2 + $0xc] sm:$0xf] }
   0xe   :  { %v3789_v6 = vld [vmem:[#allocation2 + $0x18] sm:$0xf0]  ;;  %v4405_v8 = vld [vmem:[#allocation2 + $0x4] sm:$0xf]  ;;  %v3781_v9 = vld [vmem:[#allocation2 + $0x10] sm:$0xf0] }
   0xf   :  { %v3792_v7 = vor.u32 %v4406_v5, %v3789_v6  ;;  %v3787_v10 = vld [vmem:[#allocation2 + $0x8] sm:$0xf]  ;;  %4545 = vmatpush.bf16.msra.mxu1 %v3780_v3  ;;  %141 = vmatpush.bf16.msra.mxu0 %v3780_v3  ;;  %v3784_v11 = vor.u32 %v4405_v8, %v3781_v9  ;;  %v4408_v12 = vld [vmem:[#allocation2 + $0x14] sm:$0xf0]  ;;  %v4529_v13 = vld [vmem:[#allocation4 + $0x3c4] sm:$0xf] }
  0x10   :  { %v4296_v14 = vld [vmem:[#allocation4 + $0x3e0] sm:$0xf0]  ;;  %v3788_v15 = vor.u32 %v4408_v12, %v3787_v10  ;;  %v4038_v20 = vld [vmem:[#allocation4 + $0x1c0] sm:$0xf]  ;;  %v4402_v32 = vld [vmem:[%s6799_s0 + $0x8] sm:$0xff] }
  0x11   :  { %228 = vmatpush.bf16.msra.mxu3 %v3792_v7  ;;  %v4923_v16 = vor.u32 %v4529_v13, %v4296_v14  ;;  %v4521_v17 = vld [vmem:[#allocation4 + $0x384] sm:$0xf]  ;;  %v4469_v21 = vld [vmem:[#allocation4 + $0x1dc] sm:$0xf0] }
  0x12   :  { %3796 = vmatmul.msk.bf16.vlgmr.msra.gmra.mxu1 %vm121_vm0, %v4918_v2  ;;  %3793 = vmatmul.msk.bf16.vlgmr.msra.gmra.mxu0 %vm121_vm0, %v4401_v4  ;;  %v4264_v18 = vld [vmem:[#allocation4 + $0x3a0] sm:$0xf0]  ;;  %v4294_v22 = vld [vmem:[#allocation4 + $0x3c0] sm:$0xf]  ;;  %v4935_v23 = vor.u32 %v4469_v21, %v4038_v20  ;;  %v4403_v20 = vld [vmem:[%s6799_s0 + $0x10] sm:$0xff] }
  0x13   :  { %7059 = vst [vmem:[#allocation8_spill] sm:$0xff] %v4923_v16  ;;  %170 = vmatpush.bf16.msrb.mxu1 %v3784_v11  ;;  %199 = vmatpush.bf16.msra.mxu2 %v3788_v15  ;;  %v4932_v19 = vor.u32 %v4521_v17, %v4264_v18  ;;  %v4533_v24 = vld [vmem:[#allocation4 + $0x3dc] sm:$0xf0]  ;;  %v4465_v25 = vld [vmem:[#allocation4 + $0x1c4] sm:$0xf] }
  0x14   :  { %3805 = vmatmul.msk.bf16.vlgmr.msra.gmra.mxu3 %vm121_vm0, %v4401_v4  ;;  %7061 = vst [vmem:[#allocation10_spill] sm:$0xff] %v4935_v23  ;;  %v4040_v26 = vld [vmem:[#allocation4 + $0x1e0] sm:$0xf0]  ;;  %v4937_v27 = vor.u32 %v4533_v24, %v4294_v22  ;;  %1093 = vmatpush.bf16.msrb.mxu0 %v4935_v23  ;;  %v4006_v33 = vld [vmem:[#allocation4 + $0x180] sm:$0xf] }
  0x15   :  { %1132 = vmatpush.bf16.msrb.mxu3 %v4923_v16  ;;  %7060 = vst [vmem:[#allocation9_spill] sm:$0xff] %v4932_v19  ;;  %v4939_v28 = vor.u32 %v4465_v25, %v4040_v26  ;;  %v4513_v29 = vld [vmem:[#allocation4 + $0x344] sm:$0xf]  ;;  %v4461_v34 = vld [vmem:[#allocation4 + $0x19c] sm:$0xf0] }
  0x16   :  { %3801 = vmatmul.msk.bf16.vlgmr.msra.gmra.mxu2 %vm121_vm0, %v4401_v4  ;;  %7062 = vst [vmem:[#allocation11_spill] sm:$0xff] %v4937_v27  ;;  %v4232_v30 = vld [vmem:[#allocation4 + $0x360] sm:$0xf0]  ;;  %v4262_v35 = vld [vmem:[#allocation4 + $0x380] sm:$0xf]  ;;  %v4951_v36 = vor.u32 %v4461_v34, %v4006_v33 }
  0x17   :  { %7063 = vst [vmem:[#allocation12_spill] sm:$0xff] %v4939_v28  ;;  %v4942_v31 = vor.u32 %v4513_v29, %v4232_v30  ;;  %1106 = vmatpush.bf16.msra.mxu1 %v4937_v27  ;;  %1119 = vmatpush.bf16.msrb.mxu2 %v4939_v28  ;;  %v4525_v37 = vld [vmem:[#allocation4 + $0x39c] sm:$0xf0]  ;;  %v4457_v38 = vld [vmem:[#allocation4 + $0x184] sm:$0xf] }
  0x18   :  { %7065 = vst [vmem:[#allocation14_spill] sm:$0xff] %v4951_v36  ;;  %v4008_v39 = vld [vmem:[#allocation4 + $0x1a0] sm:$0xf0]  ;;  %v4954_v40 = vor.u32 %v4525_v37, %v4262_v35  ;;  %1094 = vmatpush.bf16.msrb.mxu0 %v4951_v36  ;;  %v3974_v45 = vld [vmem:[#allocation4 + $0x140] sm:$0xf] }
  0x19   :  { %1133 = vmatpush.bf16.msrb.mxu3 %v4932_v19  ;;  %7064 = vst [vmem:[#allocation13_spill] sm:$0xff] %v4942_v31  ;;  %v4956_v41 = vor.u32 %v4457_v38, %v4008_v39  ;;  %v4505_v42 = vld [vmem:[#allocation4 + $0x304] sm:$0xf]  ;;  %v4453_v46 = vld [vmem:[#allocation4 + $0x15c] sm:$0xf0] }
  0x1a   :  { %7066 = vst [vmem:[#allocation15_spill] sm:$0xff] %v4954_v40  ;;  %v4200_v43 = vld [vmem:[#allocation4 + $0x320] sm:$0xf0]  ;;  %v4230_v47 = vld [vmem:[#allocation4 + $0x340] sm:$0xf]  ;;  %v4965_v48 = vor.u32 %v4453_v46, %v3974_v45 }
  0x1b   :  { %7067 = vst [vmem:[#allocation16_spill] sm:$0xff] %v4956_v41  ;;  %v4960_v44 = vor.u32 %v4505_v42, %v4200_v43  ;;  %1107 = vmatpush.bf16.msra.mxu1 %v4954_v40  ;;  %1120 = vmatpush.bf16.msrb.mxu2 %v4956_v41  ;;  %v4517_v49 = vld [vmem:[#allocation4 + $0x35c] sm:$0xf0]  ;;  %v4449_v50 = vld [vmem:[#allocation4 + $0x144] sm:$0xf] }
  0x1c   :  { %7069 = vst [vmem:[#allocation18_spill] sm:$0xff] %v4965_v48  ;;  %v3976_v51 = vld [vmem:[#allocation4 + $0x160] sm:$0xf0]  ;;  %v4968_v52 = vor.u32 %v4517_v49, %v4230_v47  ;;  %1095 = vmatpush.bf16.msrb.mxu0 %v4965_v48  ;;  %v3942_v57 = vld [vmem:[#allocation4 + $0x100] sm:$0xf] }
  0x1d   :  { %1134 = vmatpush.bf16.msrb.mxu3 %v4942_v31  ;;  %7068 = vst [vmem:[#allocation17_spill] sm:$0xff] %v4960_v44  ;;  %v4970_v53 = vor.u32 %v4449_v50, %v3976_v51  ;;  %v4497_v54 = vld [vmem:[#allocation4 + $0x2c4] sm:$0xf]  ;;  %v4445_v58 = vld [vmem:[#allocation4 + $0x11c] sm:$0xf0] }
  0x1e   :  { %7070 = vst [vmem:[#allocation19_spill] sm:$0xff] %v4968_v52  ;;  %v4168_v55 = vld [vmem:[#allocation4 + $0x2e0] sm:$0xf0]  ;;  %v4198_v59 = vld [vmem:[#allocation4 + $0x300] sm:$0xf]  ;;  %v4978_v60 = vor.u32 %v4445_v58, %v3942_v57 }
  0x1f   :  { %7071 = vst [vmem:[#allocation20_spill] sm:$0xff] %v4970_v53  ;;  %v4973_v56 = vor.u32 %v4497_v54, %v4168_v55  ;;  %1108 = vmatpush.bf16.msra.mxu1 %v4968_v52  ;;  %1121 = vmatpush.bf16.msrb.mxu2 %v4970_v53  ;;  %v4509_v61 = vld [vmem:[#allocation4 + $0x31c] sm:$0xf0]  ;;  %v4441_v62 = vld [vmem:[#allocation4 + $0x104] sm:$0xf] }
  0x20   :  { %7073 = vst [vmem:[#allocation22_spill] sm:$0xff] %v4978_v60  ;;  %v4980_v63 = vor.u32 %v4509_v61, %v4198_v59  ;;  %v3944_v0 = vld [vmem:[#allocation4 + $0x120] sm:$0xf0]  ;;  %1096 = vmatpush.bf16.msrb.mxu0 %v4978_v60  ;;  %v3910_v6 = vld [vmem:[#allocation4 + $0xc0] sm:$0xf] }
  0x21   :  { %1135 = vmatpush.bf16.msrb.mxu3 %v4960_v44  ;;  %7072 = vst [vmem:[#allocation21_spill] sm:$0xff] %v4973_v56  ;;  %v4489_v1 = vld [vmem:[#allocation4 + $0x284] sm:$0xf]  ;;  %v4437_v7 = vld [vmem:[#allocation4 + $0xdc] sm:$0xf0] }
  0x22   :  { %3797 = vmatmul.msk.bf16.vlgmr.msrb.gmra.mxu1 %vm121_vm0, %v4401_v4  ;;  %3794 = vmatmul.msk.bf16.gmra.mxu0 %vm121_vm0, %v4402_v32  ;;  %7074 = vst [vmem:[#allocation23_spill] sm:$0xff] %v4980_v63  ;;  %v4136_v3 = vld [vmem:[#allocation4 + $0x2a0] sm:$0xf0]  ;;  %v4983_v4 = vor.u32 %v4441_v62, %v3944_v0  ;;  %v4166_v8 = vld [vmem:[#allocation4 + $0x2c0] sm:$0xf]  ;;  %v4990_v9 = vor.u32 %v4437_v7, %v3910_v6 }
  0x23   :  { %v4985_v5 = vor.u32 %v4489_v1, %v4136_v3  ;;  %1109 = vmatpush.bf16.msra.mxu1 %v4980_v63  ;;  %v4501_v10 = vld [vmem:[#allocation4 + $0x2dc] sm:$0xf0]  ;;  %v4433_v11 = vld [vmem:[#allocation4 + $0xc4] sm:$0xf]  ;;  %v4530_v39 = vld [vmem:[#allocation4 + $0x3cc] sm:$0xf] }
  0x24   :  { %3806 = vmatmul.msk.bf16.gmra.mxu3 %vm121_vm0, %v4402_v32  ;;  %7075 = vst [vmem:[#allocation24_spill] sm:$0xff] %v4983_v4  ;;  %1122 = vmatpush.bf16.msrb.mxu2 %v4983_v4  ;;  %v3912_v12 = vld [vmem:[#allocation4 + $0xe0] sm:$0xf0]  ;;  %v4992_v13 = vor.u32 %v4501_v10, %v4166_v8  ;;  %v3878_v21 = vld [vmem:[#allocation4 + $0x80] sm:$0xf] }
  0x25   :  { %1136 = vmatpush.bf16.msrb.mxu3 %v4973_v56  ;;  %7076 = vst [vmem:[#allocation25_spill] sm:$0xff] %v4985_v5  ;;  %v4994_v14 = vor.u32 %v4433_v11, %v3912_v12  ;;  %v4481_v15 = vld [vmem:[#allocation4 + $0x244] sm:$0xf]  ;;  %1097 = vmatpush.bf16.msrb.mxu0 %v4990_v9  ;;  %v4429_v22 = vld [vmem:[#allocation4 + $0x9c] sm:$0xf0] }
  0x26   :  { %3802 = vmatmul.msk.bf16.gmra.mxu2 %vm121_vm0, %v4402_v32  ;;  %7077 = vst [vmem:[#allocation26_spill] sm:$0xff] %v4990_v9  ;;  %v4104_v17 = vld [vmem:[#allocation4 + $0x260] sm:$0xf0]  ;;  %v4134_v24 = vld [vmem:[#allocation4 + $0x280] sm:$0xf]  ;;  %v5005_v25 = vor.u32 %v4429_v22, %v3878_v21 }
  0x27   :  { %7078 = vst [vmem:[#allocation27_spill] sm:$0xff] %v4992_v13  ;;  %v4997_v18 = vor.u32 %v4481_v15, %v4104_v17  ;;  %1110 = vmatpush.bf16.msra.mxu1 %v4992_v13  ;;  %v4493_v26 = vld [vmem:[#allocation4 + $0x29c] sm:$0xf0]  ;;  %v4425_v29 = vld [vmem:[#allocation4 + $0x84] sm:$0xf] }
  0x28   :  { %7079 = vst [vmem:[#allocation28_spill] sm:$0xff] %v4994_v14  ;;  %1123 = vmatpush.bf16.msrb.mxu2 %v4994_v14  ;;  %v3880_v30 = vld [vmem:[#allocation4 + $0xa0] sm:$0xf0]  ;;  %v5016_v37 = vld [vmem:[%s6802_s3] sm:$0xf] }
  0x29   :  { %1137 = vmatpush.bf16.msrb.mxu3 %v4985_v5  ;;  %7080 = vst [vmem:[#allocation29_spill] sm:$0xff] %v4997_v18  ;;  %v5011_v33 = vor.u32 %v4425_v29, %v3880_v30  ;;  %v4473_v34 = vld [vmem:[#allocation4 + $0x204] sm:$0xf]  ;;  %1098 = vmatpush.bf16.msrb.mxu0 %v5005_v25  ;;  %v4304_v42 = vld [vmem:[#allocation4 + $0x3e8] sm:$0xf0]  ;;  %v5036_v61 = vperm.slane %v5016_v37, 0 }
  0x2a   :  { %7081 = vst [vmem:[#allocation30_spill] sm:$0xff] %v5005_v25  ;;  %v4072_v35 = vld [vmem:[#allocation4 + $0x220] sm:$0xf0]  ;;  %v5023_v43 = vor.u32 %v4530_v39, %v4304_v42  ;;  %v3846_v45 = vld [vmem:[#allocation4 + $0x40] sm:$0xf] }
  0x2b   :  { %7083 = vst [vmem:[#allocation32_spill] sm:$0xff] %v5011_v33  ;;  %v5019_v38 = vor.u32 %v4473_v34, %v4072_v35  ;;  %v4421_v46 = vld [vmem:[#allocation4 + $0x5c] sm:$0xf0]  ;;  %v4417_v51 = vld [vmem:[#allocation4 + $0x44] sm:$0xf]  ;;  %v5057_v35 = vperm.slane %v5016_v37, 3 }
  0x2c   :  { %7085 = vst [vmem:[#allocation34_spill] sm:$0xff] %v5023_v43  ;;  %v4102_v47 = vld [vmem:[#allocation4 + $0x240] sm:$0xf]  ;;  %1124 = vmatpush.bf16.msrb.mxu2 %v5011_v33  ;;  %v5028_v49 = vor.u32 %v4421_v46, %v3846_v45  ;;  %v3848_v54 = vld [vmem:[#allocation4 + $0x60] sm:$0xf0] }
  0x2d   :  { %1138 = vmatpush.bf16.msrb.mxu3 %v4997_v18  ;;  %7084 = vst [vmem:[#allocation33_spill] sm:$0xff] %v5019_v38  ;;  %v4485_v50 = vld [vmem:[#allocation4 + $0x25c] sm:$0xf0]  ;;  %v5033_v57 = vor.u32 %v4417_v51, %v3848_v54  ;;  %v4522_v58 = vld [vmem:[#allocation4 + $0x38c] sm:$0xf] }
  0x2e   :  { %7086 = vst [vmem:[#allocation35_spill] sm:$0xff] %v5028_v49  ;;  %v5031_v55 = vor.u32 %v4485_v50, %v4102_v47  ;;  %v4272_v59 = vld [vmem:[#allocation4 + $0x3a8] sm:$0xf0]  ;;  %1099 = vmatpush.bf16.msrb.mxu0 %v5028_v49  ;;  %v3814_v0 = vld [vmem:[#allocation4] sm:$0xf] }
  0x2f   :  { %7088 = vst [vmem:[#allocation37_spill] sm:$0xff] %v5033_v57  ;;  %v5039_v62 = vor.u32 %v4522_v58, %v4272_v59  ;;  %v4413_v1 = vld [vmem:[#allocation4 + $0x1c] sm:$0xf0]  ;;  %v4409_v8 = vld [vmem:[#allocation4 + $0x4] sm:$0xf] }
  0x30   :  { %7087 = vst [vmem:[#allocation36_spill] sm:$0xff] %v5031_v55  ;;  %v4070_v3 = vld [vmem:[#allocation4 + $0x200] sm:$0xf]  ;;  %1125 = vmatpush.bf16.msrb.mxu2 %v5033_v57  ;;  %v5043_v6 = vor.u32 %v4413_v1, %v3814_v0  ;;  %v3816_v10 = vld [vmem:[#allocation4 + $0x20] sm:$0xf0] }
  0x31   :  { %1139 = vmatpush.bf16.msrb.mxu3 %v5019_v38  ;;  %7089 = vst [vmem:[#allocation38_spill] sm:$0xff] %v5036_v61  ;;  %v4477_v7 = vld [vmem:[#allocation4 + $0x21c] sm:$0xf0]  ;;  %v5050_v17 = vor.u32 %v4409_v8, %v3816_v10  ;;  %v4470_v21 = vld [vmem:[#allocation4 + $0x1e4] sm:$0xf0] }
  0x32   :  { %3798 = vmatmul.msk.bf16.gmra.mxu1 %vm121_vm0, %v4402_v32  ;;  %v5009_v32 = vor.u32 %v4493_v26, %v4134_v24  ;;  %3795 = vmatmul.msk.bf16.gmra.mxu0 %vm121_vm0, %v4403_v20  ;;  %7090 = vst [vmem:[#allocation39_spill] sm:$0xff] %v5039_v62  ;;  %v5048_v15 = vor.u32 %v4477_v7, %v4070_v3  ;;  %v4302_v22 = vld [vmem:[#allocation4 + $0x3c8] sm:$0xf]  ;;  %v4466_v30 = vld [vmem:[#allocation4 + $0x1cc] sm:$0xf] }
  0x33   :  { %7091 = vst [vmem:[#allocation40_spill] sm:$0xff] %v5043_v6  ;;  %1100 = vmatpush.bf16.msrb.mxu0 %v5043_v6  ;;  %v4534_v29 = vld [vmem:[#allocation4 + $0x3e4] sm:$0xf0]  ;;  %v4048_v34 = vld [vmem:[#allocation4 + $0x1e8] sm:$0xf0] }
  0x34   :  { %3807 = vmatmul.msk.bf16.gmra.mxu3 %vm121_vm0, %v4403_v20  ;;  %7082 = vst [vmem:[#allocation31_spill] sm:$0xff] %v5009_v32  ;;  %1111 = vmatpush.bf16.msra.mxu1 %v5009_v32  ;;  %v5060_v39 = vor.u32 %v4534_v29, %v4302_v22  ;;  %v5062_v42 = vor.u32 %v4466_v30, %v4048_v34  ;;  %v4514_v45 = vld [vmem:[#allocation4 + $0x34c] sm:$0xf]  ;;  %v4014_v51 = vld [vmem:[#allocation4 + $0x188] sm:$0xf] }
  0x35   :  { %1184 = vmatpush.bf16.msra.mxu3 %v5023_v43  ;;  %7093 = vst [vmem:[#allocation42_spill] sm:$0xff] %v5048_v15  ;;  %v4240_v46 = vld [vmem:[#allocation4 + $0x368] sm:$0xf0]  ;;  %1126 = vmatpush.bf16.msrb.mxu2 %v5050_v17  ;;  %v4462_v54 = vld [vmem:[#allocation4 + $0x1a4] sm:$0xf0] }
  0x36   :  { %3803 = vmatmul.msk.bf16.gmra.mxu2 %vm121_vm0, %v4403_v20  ;;  %7094 = vst [vmem:[#allocation43_spill] sm:$0xff] %v5050_v17  ;;  %v5066_v50 = vor.u32 %v4514_v45, %v4240_v46  ;;  %v5070_v58 = vor.u32 %v4462_v54, %v4014_v51  ;;  %v4270_v59 = vld [vmem:[#allocation4 + $0x388] sm:$0xf]  ;;  %v4458_v1 = vld [vmem:[#allocation4 + $0x18c] sm:$0xf] }
  0x37   :  { %7096 = vst [vmem:[#allocation45_spill] sm:$0xff] %v5057_v35  ;;  %v4526_v0 = vld [vmem:[#allocation4 + $0x3a4] sm:$0xf0]  ;;  %v4016_v7 = vld [vmem:[#allocation4 + $0x1a8] sm:$0xf0] }
  0x38   :  { %1112 = vmatpush.bf16.msra.mxu1 %v5031_v55  ;;  %7097 = vst [vmem:[#allocation46_spill] sm:$0xff] %v5060_v39  ;;  %v5073_v3 = vor.u32 %v4526_v0, %v4270_v59  ;;  %v4506_v8 = vld [vmem:[#allocation4 + $0x30c] sm:$0xf]  ;;  %v3982_v22 = vld [vmem:[#allocation4 + $0x148] sm:$0xf] }
  0x39   :  { %1185 = vmatpush.bf16.msra.mxu3 %v5039_v62  ;;  %7098 = vst [vmem:[#allocation47_spill] sm:$0xff] %v5062_v42  ;;  %1171 = vmatpush.bf16.msra.mxu2 %v5062_v42  ;;  %v4208_v10 = vld [vmem:[#allocation4 + $0x328] sm:$0xf0]  ;;  %v4238_v29 = vld [vmem:[#allocation4 + $0x348] sm:$0xf] }
  0x3a   :  { %7099 = vst [vmem:[#allocation48_spill] sm:$0xff] %v5066_v50  ;;  %v4518_v46 = vld [vmem:[#allocation4 + $0x364] sm:$0xf0]  ;;  %v3984_v51 = vld [vmem:[#allocation4 + $0x168] sm:$0xf0] }
  0x3b   :  { %7100 = vst [vmem:[#allocation49_spill] sm:$0xff] %v5070_v58  ;;  %v5090_v54 = vor.u32 %v4518_v46, %v4238_v29  ;;  %v4498_v59 = vld [vmem:[#allocation4 + $0x2cc] sm:$0xf]  ;;  %v4312_v42 = vld [vmem:[#allocation4 + $0x3f0] sm:$0xf0] }
  0x3c   :  { %1113 = vmatpush.bf16.msra.mxu1 %v5048_v15  ;;  %7101 = vst [vmem:[#allocation50_spill] sm:$0xff] %v5073_v3  ;;  %v4176_v0 = vld [vmem:[#allocation4 + $0x2e8] sm:$0xf0]  ;;  %v3854_v6 = vld [vmem:[#allocation4 + $0x48] sm:$0xf] }
  0x3d   :  { %1186 = vmatpush.bf16.msra.mxu3 %v5066_v50  ;;  %7106 = vst [vmem:[#allocation55_spill] sm:$0xff] %v5090_v54  ;;  %v4410_v57 = vld [vmem:[#allocation4 + $0xc] sm:$0xf] }
  0x3e   :  { %v3824_v49 = vld [vmem:[#allocation4 + $0x28] sm:$0xf0] }
  0x40   :  { %1158 = vmatpush.bf16.msrb.mxu1 %v5060_v39 }
  0x42   :  { %3799 = vmatmul.msk.bf16.gmra.mxu1 %vm121_vm0, %v4403_v20  ;;  %v4046_v20 = vld [vmem:[#allocation4 + $0x1c8] sm:$0xf] }
  0x43   :  { %v5054_v26 = vor.u32 %v4470_v21, %v4046_v20  ;;  %v5077_v20 = vor.u32 %v4506_v8, %v4208_v10  ;;  %v5096_v8 = vor.u32 %v4498_v59, %v4176_v0  ;;  %v3952_v59 = vld [vmem:[#allocation4 + $0x128] sm:$0xf0] }
  0x44   :  { %1159 = vmatpush.bf16.msrb.mxu1 %v5073_v3  ;;  %3808 = vmatmul.msk.bf16.gmra.mxu3 %vm121_vm0, %v4918_v2  ;;  %v4490_v0 = vld [vmem:[#allocation4 + $0x28c] sm:$0xf] }
  0x45   :  { %7095 = vst [vmem:[#allocation44_spill] sm:$0xff] %v5054_v26  ;;  %1145 = vmatpush.bf16.msra.mxu0 %v5054_v26  ;;  %1187 = vmatpush.bf16.msra.mxu3 %v5077_v20 }
  0x46   :  { %7103 = vst [vmem:[#allocation52_spill] sm:$0xff] %v5077_v20  ;;  %3804 = vmatmul.msk.bf16.gmra.mxu2 %vm121_vm0, %v4918_v2 }
  0x47   :  { %7108 = vst [vmem:[#allocation57_spill] sm:$0xff] %v5096_v8 }
  0x48   :  { %1160 = vmatpush.bf16.msrb.mxu1 %v5090_v54 }
  0x49   :  { %1146 = vmatpush.bf16.msra.mxu0 %v5070_v58  ;;  %1188 = vmatpush.bf16.msra.mxu3 %v5096_v8  ;;  %v4531_v58 = vld [vmem:[#allocation4 + $0x3d4] sm:$0xf] }
  0x4a   :  { %v5148_v17 = vor.u32 %v4531_v58, %v4312_v42  ;;  %v3856_v42 = vld [vmem:[#allocation4 + $0x68] sm:$0xf0]  ;;  %v4523_v58 = vld [vmem:[#allocation4 + $0x394] sm:$0xf] }
  0x4c   :  { %7122 = vst [vmem:[#allocation71_spill] sm:$0xff] %v5148_v17 }
  0x52   :  { %3800 = vmatmul.msk.bf16.gmra.mxu1 %vm121_vm0, %v4918_v2 }
  0x8f   :  { %v5045_v11 = vpop.f32.mrf.mxu1  ;;  %v143_v12 = vpop.f32.mrf.mxu0 }
  0x90   :  { %7092 = vst [vmem:[#allocation41_spill] sm:$0xff] %v5045_v11  ;;  %v144_v24 = vadd.f32 %v143_v12, %v5036_v61  ;;  %v5075_v12 = vor.u32 %v4458_v1, %v4016_v7  ;;  %v4438_v61 = vld [vmem:[#allocation4 + $0xe4] sm:$0xf0] }
  0x92   :  { %v3809_v47 = vmul.f32 -1.442695, %v144_v24  ;;  %7102 = vst [vmem:[#allocation51_spill] sm:$0xff] %v5075_v12  ;;  %v4454_v24 = vld [vmem:[#allocation4 + $0x164] sm:$0xf0]  ;;  %1172 = vmatpush.bf16.msra.mxu2 %v5075_v12 }
  0x93   :  { %v5085_v45 = vor.u32 %v4454_v24, %v3982_v22  ;;  %v4446_v22 = vld [vmem:[#allocation4 + $0x124] sm:$0xf0] }
  0x94   :  { %4554 = vpow2.f32 %v3809_v47  ;;  %v4450_v47 = vld [vmem:[#allocation4 + $0x14c] sm:$0xf]  ;;  %v4206_v24 = vld [vmem:[#allocation4 + $0x308] sm:$0xf] }
  0x95   :  { %7105 = vst [vmem:[#allocation54_spill] sm:$0xff] %v5085_v45  ;;  %v5094_v7 = vor.u32 %v4450_v47, %v3984_v51  ;;  %1147 = vmatpush.bf16.msra.mxu0 %v5085_v45  ;;  %v4510_v47 = vld [vmem:[#allocation4 + $0x324] sm:$0xf0]  ;;  %v4442_v51 = vld [vmem:[#allocation4 + $0x10c] sm:$0xf] }
  0x96   :  { %v5111_v2 = vor.u32 %v4510_v47, %v4206_v24  ;;  %v4502_v47 = vld [vmem:[#allocation4 + $0x2e4] sm:$0xf0] }
  0x97   :  { %v230_v21 = vpop.f32.mrf.mxu3  ;;  %v5080_v30 = vpop.f32.mrf.mxu1  ;;  %7107 = vst [vmem:[#allocation56_spill] sm:$0xff] %v5094_v7  ;;  %1173 = vmatpush.bf16.msra.mxu2 %v5094_v7  ;;  %v4434_v7 = vld [vmem:[#allocation4 + $0xcc] sm:$0xf] }
  0x98   :  { %7104 = vst [vmem:[#allocation53_spill] sm:$0xff] %v5080_v30  ;;  %v231_v34 = vadd.f32 %v230_v21, %v5057_v35  ;;  %v3950_v21 = vld [vmem:[#allocation4 + $0x108] sm:$0xf]  ;;  %v4144_v30 = vld [vmem:[#allocation4 + $0x2a8] sm:$0xf0]  ;;  %1161 = vmatpush.bf16.msrb.mxu1 %v5111_v2 }
  0x99   :  { %v5108_v46 = vor.u32 %v4446_v22, %v3950_v21  ;;  %7111 = vst [vmem:[#allocation60_spill] sm:$0xff] %v5111_v2  ;;  %v5116_v11 = vor.u32 %v4490_v0, %v4144_v30  ;;  %v3918_v35 = vld [vmem:[#allocation4 + $0xc8] sm:$0xf]  ;;  %v4112_v0 = vld [vmem:[#allocation4 + $0x268] sm:$0xf0] }
  0x9a   :  { %v3811_v1 = vmul.f32 -1.442695, %v231_v34  ;;  %v4555_v10 = vpop.eup %4554  ;;  %v5104_v34 = vperm.slane %v5016_v37, 1  ;;  %v4174_v21 = vld [vmem:[#allocation4 + $0x2c8] sm:$0xf]  ;;  %v5120_v24 = vor.u32 %v4438_v61, %v3918_v35 }
  0x9b   :  { %v5101_v29 = vadd.f32 1.0, %v4555_v10  ;;  %7110 = vst [vmem:[#allocation59_spill] sm:$0xff] %v5108_v46  ;;  %1148 = vmatpush.bf16.msra.mxu0 %v5108_v46  ;;  %v5114_v10 = vor.u32 %v4442_v51, %v3952_v59  ;;  %1189 = vmatpush.bf16.msra.mxu3 %v5116_v11  ;;  %v5125_v30 = vor.u32 %v4502_v47, %v4174_v21  ;;  %v3920_v51 = vld [vmem:[#allocation4 + $0xe8] sm:$0xf0]  ;;  %v3886_v61 = vld [vmem:[#allocation4 + $0x88] sm:$0xf] }
  0x9c   :  { %7109 = vst [vmem:[#allocation58_spill] sm:$0xff] %v5104_v34  ;;  %4556 = vpow2.f32 %v3811_v1  ;;  %v4482_v59 = vld [vmem:[#allocation4 + $0x24c] sm:$0xf]  ;;  %v5127_v46 = vor.u32 %v4434_v7, %v3920_v51  ;;  %v4430_v35 = vld [vmem:[#allocation4 + $0xa4] sm:$0xf0] }
  0x9d   :  { %7112 = vst [vmem:[#allocation61_spill] sm:$0xff] %v5114_v10  ;;  %4558 = vrcp.f32 %v5101_v29  ;;  %1174 = vmatpush.bf16.msra.mxu2 %v5114_v10  ;;  %v5129_v45 = vor.u32 %v4482_v59, %v4112_v0  ;;  %1162 = vmatpush.bf16.msrb.mxu1 %v5125_v30  ;;  %v4426_v21 = vld [vmem:[#allocation4 + $0x8c] sm:$0xf]  ;;  %v5137_v51 = vor.u32 %v4430_v35, %v3886_v61  ;;  %v4110_v35 = vld [vmem:[#allocation4 + $0x248] sm:$0xf]  ;;  %vm397_vm1 = vweird.f32 %v5101_v29 }
  0x9e   :  { %7113 = vst [vmem:[#allocation62_spill] sm:$0xff] %v5116_v11  ;;  %v3888_v47 = vld [vmem:[#allocation4 + $0xa8] sm:$0xf0] }
  0x9f   :  { %v172_v22 = vpop.f32.mrf.mxu1  ;;  %7114 = vst [vmem:[#allocation63_spill] sm:$0xff] %v5120_v24  ;;  %1149 = vmatpush.bf16.msra.mxu0 %v5120_v24  ;;  %1190 = vmatpush.bf16.msra.mxu3 %v5129_v45  ;;  %v4080_v59 = vld [vmem:[#allocation4 + $0x228] sm:$0xf0]  ;;  %v5141_v24 = vor.u32 %v4426_v21, %v3888_v47  ;;  %v4280_v47 = vld [vmem:[#allocation4 + $0x3b0] sm:$0xf0] }
  0xa0   :  { %v173_v1 = vadd.f32 %v172_v22, %v5104_v34  ;;  %7115 = vst [vmem:[#allocation64_spill] sm:$0xff] %v5125_v30  ;;  %v4142_v22 = vld [vmem:[#allocation4 + $0x288] sm:$0xf] }
  0xa1   :  { %7116 = vst [vmem:[#allocation65_spill] sm:$0xff] %v5127_v46  ;;  %v4494_v34 = vld [vmem:[#allocation4 + $0x2a4] sm:$0xf0]  ;;  %1175 = vmatpush.bf16.msra.mxu2 %v5127_v46 }
  0xa2   :  { %7117 = vst [vmem:[#allocation66_spill] sm:$0xff] %v5129_v45  ;;  %v3810_v12 = vmul.f32 -1.442695, %v173_v1  ;;  %v4557_v10 = vpop.eup %4556  ;;  %v4474_v1 = vld [vmem:[#allocation4 + $0x20c] sm:$0xf]  ;;  %v5139_v0 = vor.u32 %v4494_v34, %v4142_v22 }
  0xa3   :  { %v5135_v7 = vpop.eup %4558  ;;  %7118 = vst [vmem:[#allocation67_spill] sm:$0xff] %v5137_v51  ;;  %v5143_v26 = vadd.f32 1.0, %v4557_v10  ;;  %1150 = vmatpush.bf16.msra.mxu0 %v5137_v51  ;;  %v5146_v46 = vor.u32 %v4474_v1, %v4080_v59  ;;  %v4486_v10 = vld [vmem:[#allocation4 + $0x264] sm:$0xf0]  ;;  %v4418_v22 = vld [vmem:[#allocation4 + $0x4c] sm:$0xf] }
  0xa4   :  { %4560 = vpow2.f32 %v3810_v12  ;;  %7119 = vst [vmem:[#allocation68_spill] sm:$0xff] %v5139_v0  ;;  %v4422_v12 = vld [vmem:[#allocation4 + $0x64] sm:$0xf0]  ;;  %v393_v61 = vmul.f32 %v5135_v7, %v5101_v29  ;;  %1163 = vmatpush.bf16.msrb.mxu1 %v5139_v0  ;;  %v5157_v21 = vor.u32 %v4486_v10, %v4110_v35  ;;  %v6851_v1 = vmov 0.0|0.0  }
  0xa5   :  { %7120 = vst [vmem:[#allocation69_spill] sm:$0xff] %v5141_v24  ;;  %1176 = vmatpush.bf16.msra.mxu2 %v5141_v24  ;;  %v5154_v34 = vor.u32 %v4422_v12, %v3854_v6  ;;  %1191 = vmatpush.bf16.msra.mxu3 %v5146_v46  ;;  %v5161_v59 = vor.u32 %v4418_v22, %v3856_v42  ;;  %v3822_v24 = vld [vmem:[#allocation4 + $0x8] sm:$0xf]  ;;  %4562 = vrcp.f32 %v5143_v26  ;;  %vm398_vm2 = vweird.f32 %v5135_v7 }
  0xa6   :  { %7121 = vst [vmem:[#allocation70_spill] sm:$0xff] %v5146_v46  ;;  %1114 = vmatmul.bf16.vlgmr.msra.gmra.mxu1 %v6851_v1  ;;  %1140 = vmatmul.bf16.vlgmr.msrb.gmra.mxu3 %v6851_v1  ;;  %v4414_v6 = vld [vmem:[#allocation4 + $0x24] sm:$0xf0]  ;;  %v5165_v35 = vor.u32 %v4523_v58, %v4280_v47  ;;  %v394_v46 = vsub.f32 1.0, %v393_v61  ;;  %v5175_v42 = vor.u32 %v4410_v57, %v3824_v49  ;;  %v4310_v58 = vld [vmem:[#allocation4 + $0x3d0] sm:$0xf]  ;;  %v201_v61 = vpop.f32.mrf.mxu2  ;;  %vm5208_vm3 = vmor %vm397_vm1, %vm398_vm2  ;;  %vm436_vm9 = vweird.f32 %v5143_v26 }
  0xa7   :  { %7123 = vst [vmem:[#allocation72_spill] sm:$0xff] %v5154_v34  ;;  %v4078_v12 = vld [vmem:[#allocation4 + $0x208] sm:$0xf]  ;;  %1151 = vmatpush.bf16.msra.mxu0 %v5154_v34  ;;  %v5167_v10 = vor.u32 %v4414_v6, %v3822_v24  ;;  %v4535_v47 = vld [vmem:[#allocation4 + $0x3ec] sm:$0xf0]  ;;  %v5180_v24 = vperm.slane %v5016_v37, 2 }
  0xa8   :  { %7124 = vst [vmem:[#allocation73_spill] sm:$0xff] %v5157_v21  ;;  %v4478_v0 = vld [vmem:[#allocation4 + $0x224] sm:$0xf0]  ;;  %1164 = vmatpush.bf16.msrb.mxu1 %v5157_v21  ;;  %v4248_v6 = vld [vmem:[#allocation4 + $0x370] sm:$0xf0]  ;;  %v395_v49 = vmul.f32 %v5135_v7, %v394_v46 }
  0xa9   :  { %7125 = vst [vmem:[#allocation74_spill] sm:$0xff] %v5161_v59  ;;  %1236 = vmatpush.bf16.msrb.mxu3 %v5148_v17  ;;  %1177 = vmatpush.bf16.msra.mxu2 %v5161_v59  ;;  %v5173_v22 = vor.u32 %v4478_v0, %v4078_v12  ;;  %v4515_v0 = vld [vmem:[#allocation4 + $0x354] sm:$0xf]  ;;  %v4278_v37 = vld [vmem:[#allocation4 + $0x390] sm:$0xf]  ;;  %v202_v1 = vadd.f32 %v201_v61, %v5180_v24  ;;  %v403_v61 = vand.u32 2147483648, %v5101_v29 }
  0xaa   :  { %v4561_v51 = vpop.eup %4560  ;;  %7126 = vst [vmem:[#allocation75_spill] sm:$0xff] %v5165_v35  ;;  %v5189_v57 = vor.u32 %v4515_v0, %v4248_v6  ;;  %v4527_v12 = vld [vmem:[#allocation4 + $0x3ac] sm:$0xf0]  ;;  %v4216_v46 = vld [vmem:[#allocation4 + $0x330] sm:$0xf0] }
  0xab   :  { %7127 = vst [vmem:[#allocation76_spill] sm:$0xff] %v5167_v10  ;;  %v5169_v30 = vadd.f32 1.0, %v4561_v51  ;;  %1152 = vmatpush.bf16.msra.mxu0 %v5167_v10  ;;  %v5184_v51 = vor.u32 %v4535_v47, %v4310_v58  ;;  %v5195_v58 = vor.u32 %v4527_v12, %v4278_v37  ;;  %v4507_v47 = vld [vmem:[#allocation4 + $0x314] sm:$0xf]  ;;  %v401_v17 = vand.u32 2147483647, %v5101_v29 }
  0xac   :  { %7128 = vst [vmem:[#allocation77_spill] sm:$0xff] %v5173_v22  ;;  %1165 = vmatpush.bf16.msrb.mxu1 %v5173_v22  ;;  %v5201_v0 = vor.u32 %v4507_v47, %v4216_v46  ;;  %v4499_v47 = vld [vmem:[#allocation4 + $0x2d4] sm:$0xf]  ;;  %v4511_v22 = vld [vmem:[#allocation4 + $0x32c] sm:$0xf0] }
  0xad   :  { %7129 = vst [vmem:[#allocation78_spill] sm:$0xff] %v5175_v42  ;;  %4564 = vrcp.f32 %v5169_v30  ;;  %1237 = vmatpush.bf16.msrb.mxu3 %v5165_v35  ;;  %1178 = vmatpush.bf16.msra.mxu2 %v5175_v42  ;;  %v5197_v35 = vpop.eup %4562  ;;  %v4519_v42 = vld [vmem:[#allocation4 + $0x36c] sm:$0xf0]  ;;  %v4184_v46 = vld [vmem:[#allocation4 + $0x2f0] sm:$0xf0]  ;;  %vm5217_vm4 = vcmp.eq.f32.partialorder %v401_v17, 8.507059e+37  ;;  %vm416_vm6 = vweird.f32 %v5169_v30 }
  0xae   :  { %7130 = vst [vmem:[#allocation79_spill] sm:$0xff] %v5180_v24  ;;  %v4246_v24 = vld [vmem:[#allocation4 + $0x350] sm:$0xf]  ;;  %4566 = vtanh.f32 %v202_v1  ;;  %v5222_v29 = vor.u32 %v4499_v47, %v4184_v46  ;;  %v422_v34 = vand.u32 2147483648, %v5169_v30  ;;  %v420_v17 = vand.u32 2147483647, %v5169_v30 }
  0xaf   :  { %7131 = vst [vmem:[#allocation80_spill] sm:$0xff] %v5184_v51  ;;  %v4152_v47 = vld [vmem:[#allocation4 + $0x2b0] sm:$0xf0]  ;;  %vm437_vm10 = vweird.f32 %v5197_v35 }
  0xb0   :  { %7132 = vst [vmem:[#allocation81_spill] sm:$0xff] %v5189_v57  ;;  %1210 = vmatpush.bf16.msra.mxu1 %v5184_v51  ;;  %v396_v51 = vadd.f32 %v5135_v7, %v395_v49  ;;  %v432_v49 = vmul.f32 %v5197_v35, %v5143_v26  ;;  %vm421_vm8 = vcmp.eq.f32.partialorder %v420_v17, 8.507059e+37  ;;  %vm5258_vm11 = vmor %vm436_vm9, %vm437_vm10 }
  0xb1   :  { %7133 = vst [vmem:[#allocation82_spill] sm:$0xff] %v5195_v58  ;;  %1238 = vmatpush.bf16.msrb.mxu3 %v5189_v57  ;;  %v5213_v57 = vor.u32 %v4519_v42, %v4246_v24  ;;  %v404_v24 = vor.u32 1.1754944e-38, %v403_v61  ;;  %v423_v61 = vor.u32 1.1754944e-38, %v422_v34 }
  0xb2   :  { %7134 = vst [vmem:[#allocation83_spill] sm:$0xff] %v5201_v0  ;;  %v400_v42 = vsel %vm5208_vm3, %v5135_v7, %v396_v51  ;;  %v433_v46 = vsub.f32 1.0, %v432_v49  ;;  %v4503_v49 = vld [vmem:[#allocation4 + $0x2ec] sm:$0xf0] }
  0xb3   :  { %v4565_v6 = vpop.eup %4564  ;;  %7137 = vst [vmem:[#allocation84_spill] sm:$0xff] %v5213_v57 }
  0xb4   :  { %v412_v37 = vmul.f32 %v4565_v6, %v5169_v30  ;;  %1211 = vmatpush.bf16.msra.mxu1 %v5195_v58  ;;  %7140 = vst [vmem:[#allocation85_spill] sm:$0xff] %v5222_v29  ;;  %v4214_v58 = vld [vmem:[#allocation4 + $0x310] sm:$0xf]  ;;  %vm417_vm5 = vweird.f32 %v4565_v6  ;;  %v4567_v51 = vpop.eup %4566  ;;  %v434_v30 = vmul.f32 %v5197_v35, %v433_v46 }
  0xb5   :  { %1239 = vmatpush.bf16.msrb.mxu3 %v5201_v0  ;;  %v5230_v1 = vor.u32 %v4511_v22, %v4214_v58  ;;  %v7142_v0 = vmov 0.0|0.0   ;;  %v405_v22 = vsel %vm5217_vm4, %v404_v24, %v400_v42  ;;  %vm418_vm7 = vmor %vm416_vm6, %vm417_vm5  ;;  %v4182_v58 = vld [vmem:[#allocation4 + $0x2d0] sm:$0xf]  ;;  %v442_v24 = vand.u32 2147483648, %v5143_v26 }
  0xb6   :  { %v413_v10 = vsub.f32 1.0, %v412_v37  ;;  %v4491_v37 = vld [vmem:[#allocation4 + $0x294] sm:$0xf]  ;;  %1166 = vmatmul.bf16.vlgmr.msrb.gmra.mxu1 %v7142_v0  ;;  %1192 = vmatmul.bf16.vlgmr.msra.gmra.mxu3 %v7142_v0  ;;  %v447_v34 = vmul.f32 %v4567_v51, %v405_v22  ;;  %v4495_v42 = vld [vmem:[#allocation4 + $0x2ac] sm:$0xf0] }
  0xb7   :  { %7141 = vst [vmem:[#allocation86_spill] sm:$0xff] %v5230_v1  ;;  %v4088_v51 = vld [vmem:[#allocation4 + $0x230] sm:$0xf0]  ;;  %v440_v22 = vand.u32 2147483647, %v5143_v26 }
  0xb8   :  { %v414_v21 = vmul.f32 %v4565_v6, %v413_v10  ;;  %1212 = vmatpush.bf16.msra.mxu1 %v5213_v57  ;;  %v5236_v10 = vor.u32 %v4491_v37, %v4152_v47  ;;  %v5243_v57 = vor.u32 %v4503_v49, %v4182_v58  ;;  %v4483_v37 = vld [vmem:[#allocation4 + $0x254] sm:$0xf]  ;;  %v4532_v58 = vld [vmem:[#allocation4 + $0x3dc] sm:$0xf] }
  0xb9   :  { %1240 = vmatpush.bf16.msrb.mxu3 %v5222_v29  ;;  %v4120_v47 = vld [vmem:[#allocation4 + $0x270] sm:$0xf0]  ;;  %vm441_vm12 = vcmp.eq.f32.partialorder %v440_v22, 8.507059e+37  ;;  %v4536_v22 = vld [vmem:[#allocation4 + $0x3f4] sm:$0xf0] }
  0xba   :  { %v415_v7 = vadd.f32 %v4565_v6, %v414_v21  ;;  %7143 = vst [vmem:[#allocation87_spill] sm:$0xff] %v5236_v10  ;;  %v5246_v59 = vor.u32 %v4483_v37, %v4120_v47  ;;  %v4118_v37 = vld [vmem:[#allocation4 + $0x250] sm:$0xf] }
  0xbb   :  { %7144 = vst [vmem:[#allocation88_spill] sm:$0xff] %v5243_v57  ;;  %v4487_v47 = vld [vmem:[#allocation4 + $0x26c] sm:$0xf0] }
  0xbc   :  { %v419_v12 = vsel %vm418_vm7, %v4565_v6, %v415_v7  ;;  %1213 = vmatpush.bf16.msra.mxu1 %v5230_v1  ;;  %7145 = vst [vmem:[#allocation89_spill] sm:$0xff] %v5246_v59  ;;  %v4150_v6 = vld [vmem:[#allocation4 + $0x290] sm:$0xf]  ;;  %v4475_v7 = vld [vmem:[#allocation4 + $0x214] sm:$0xf]  ;;  %v5269_v26 = vor.u32 %v4487_v47, %v4118_v37 }
  0xbd   :  { %v424_v21 = vsel %vm421_vm8, %v423_v61, %v419_v12  ;;  %1241 = vmatpush.bf16.msrb.mxu3 %v5236_v10  ;;  %v5254_v46 = vor.u32 %v4495_v42, %v4150_v6  ;;  %v435_v61 = vadd.f32 %v5197_v35, %v434_v30  ;;  %v4320_v12 = vld [vmem:[#allocation4 + $0x3f8] sm:$0xf0]  ;;  %v4054_v10 = vld [vmem:[#allocation4 + $0x1d0] sm:$0xf] }
  0xbe   :  { %v446_v29 = vmul.f32 0.0, %v424_v21  ;;  %v5266_v21 = vor.u32 %v4532_v58, %v4320_v12  ;;  %7151 = vst [vmem:[#allocation93_spill] sm:$0xff] %v5269_v26  ;;  %v4524_v30 = vld [vmem:[#allocation4 + $0x39c] sm:$0xf]  ;;  %v4086_v58 = vld [vmem:[#allocation4 + $0x210] sm:$0xf] }
  0xbf   :  { %7146 = vst [vmem:[#allocation90_spill] sm:$0xff] %v5254_v46  ;;  %v4288_v6 = vld [vmem:[#allocation4 + $0x3b8] sm:$0xf0]  ;;  %v439_v42 = vsel %vm5258_vm11, %v5197_v35, %v435_v61  ;;  %v4479_v12 = vld [vmem:[#allocation4 + $0x22c] sm:$0xf0] }
  0xc0   :  { %v5251_v17 = vadd.f32 %v447_v34, %v446_v29  ;;  %1214 = vmatpush.bf16.msra.mxu1 %v5243_v57  ;;  %v5264_v29 = vor.u32 %v4475_v7, %v4088_v51  ;;  %7150 = vst [vmem:[#allocation92_spill] sm:$0xff] %v5266_v21  ;;  %v443_v34 = vor.u32 1.1754944e-38, %v442_v24  ;;  %v4467_v7 = vld [vmem:[#allocation4 + $0x1d4] sm:$0xf]  ;;  %v5276_v24 = vor.u32 %v4524_v30, %v4288_v6  ;;  %v4318_v61 = vld [vmem:[#allocation4 + $0x3d8] sm:$0xf] }
  0xc1   :  { %1242 = vmatpush.bf16.msrb.mxu3 %v5246_v59  ;;  %v4471_v59 = vld [vmem:[#allocation4 + $0x1ec] sm:$0xf0]  ;;  %v4056_v51 = vld [vmem:[#allocation4 + $0x1f0] sm:$0xf0]  ;;  %v4516_v30 = vld [vmem:[#allocation4 + $0x35c] sm:$0xf] }
  0xc2   :  { %4568 = vtanh.f32 %v5251_v17  ;;  %7149 = vst [vmem:[#allocation91_spill] sm:$0xff] %v5264_v29  ;;  %v444_v47 = vsel %vm441_vm12, %v443_v34, %v439_v42  ;;  %v5282_v49 = vor.u32 %v4471_v59, %v4054_v10  ;;  %v4256_v6 = vld [vmem:[#allocation4 + $0x378] sm:$0xf0]  ;;  %v4463_v1 = vld [vmem:[#allocation4 + $0x1ac] sm:$0xf0] }
  0xc3   :  { %7152 = vst [vmem:[#allocation94_spill] sm:$0xff] %v5276_v24  ;;  %v4459_v34 = vld [vmem:[#allocation4 + $0x194] sm:$0xf]  ;;  %v4286_v10 = vld [vmem:[#allocation4 + $0x398] sm:$0xf] }
  0xc4   :  { %1215 = vmatpush.bf16.msra.mxu1 %v5254_v46  ;;  %v5279_v46 = vor.u32 %v4479_v12, %v4086_v58  ;;  %7154 = vst [vmem:[#allocation96_spill] sm:$0xff] %v5282_v49  ;;  %v4024_v42 = vld [vmem:[#allocation4 + $0x1b0] sm:$0xf0]  ;;  %v5289_v58 = vor.u32 %v4536_v22, %v4318_v61  ;;  %v5291_v12 = vor.u32 %v4516_v30, %v4256_v6  ;;  %v4528_v59 = vld [vmem:[#allocation4 + $0x3b4] sm:$0xf0] }
  0xc5   :  { %1243 = vmatpush.bf16.msrb.mxu3 %v5264_v29  ;;  %v5284_v29 = vor.u32 %v4467_v7, %v4056_v51  ;;  %v5300_v51 = vor.u32 %v4459_v34, %v4024_v42  ;;  %v4455_v61 = vld [vmem:[#allocation4 + $0x16c] sm:$0xf0]  ;;  %v4451_v22 = vld [vmem:[#allocation4 + $0x154] sm:$0xf]  ;;  %v5304_v6 = vor.u32 %v4528_v59, %v4286_v10  ;;  %v4500_v34 = vld [vmem:[#allocation4 + $0x2dc] sm:$0xf] }
  0xc6   :  { %7153 = vst [vmem:[#allocation95_spill] sm:$0xff] %v5279_v46  ;;  %v3992_v30 = vld [vmem:[#allocation4 + $0x170] sm:$0xf0]  ;;  %v4192_v42 = vld [vmem:[#allocation4 + $0x2f8] sm:$0xf0] }
  0xc7   :  { %7155 = vst [vmem:[#allocation97_spill] sm:$0xff] %v5284_v29  ;;  %v4443_v10 = vld [vmem:[#allocation4 + $0x114] sm:$0xf] }
  0xc8   :  { %v4569_v37 = vpop.eup %4568  ;;  %1216 = vmatpush.bf16.msra.mxu1 %v5269_v26  ;;  %1244 = vmatmul.bf16.vlgmr.msrb.gmra.mxu3 %v7142_v0  ;;  %7156 = vst [vmem:[#allocation98_spill] sm:$0xff] %v5289_v58  ;;  %v5313_v26 = vor.u32 %v4451_v22, %v3992_v30  ;;  %v3960_v59 = vld [vmem:[#allocation4 + $0x130] sm:$0xf0]  ;;  %v3926_v22 = vld [vmem:[#allocation4 + $0xd0] sm:$0xf] }
  0xc9   :  { %1288 = vmatpush.bf16.msra.mxu3 %v5266_v21  ;;  %v450_v35 = vmul.f32 %v4569_v37, %v444_v47  ;;  %v4022_v21 = vld [vmem:[#allocation4 + $0x190] sm:$0xf]  ;;  %7157 = vst [vmem:[#allocation99_spill] sm:$0xff] %v5291_v12  ;;  %v4508_v47 = vld [vmem:[#allocation4 + $0x31c] sm:$0xf] }
  0xca   :  { %v5298_v7 = vor.u32 %v4463_v1, %v4022_v21  ;;  %7159 = vst [vmem:[#allocation101_spill] sm:$0xff] %v5300_v51  ;;  %v3990_v37 = vld [vmem:[#allocation4 + $0x150] sm:$0xf]  ;;  %v4254_v1 = vld [vmem:[#allocation4 + $0x358] sm:$0xf] }
  0xcb   :  { %v5286_v57 = vpack.c.bf16 %v450_v35, %v450_v35  ;;  %v4224_v35 = vld [vmem:[#allocation4 + $0x338] sm:$0xf0]  ;;  %7160 = vst [vmem:[#allocation102_spill] sm:$0xff] %v5304_v6  ;;  %v4520_v21 = vld [vmem:[#allocation4 + $0x374] sm:$0xf0] }
  0xcc   :  { %1217 = vmatpush.bf16.msra.mxu1 %v5279_v46  ;;  %7158 = vst [vmem:[#allocation100_spill] sm:$0xff] %v5298_v7  ;;  %v5311_v46 = vor.u32 %v4455_v61, %v3990_v37  ;;  %v5325_v61 = vor.u32 %v4443_v10, %v3960_v59  ;;  %v4439_v30 = vld [vmem:[#allocation4 + $0xec] sm:$0xf0] }
  0xcd   :  { %1289 = vmatpush.bf16.msra.mxu3 %v5276_v24  ;;  %1101 = vmatmul.bf16.vlgmr.msrb.gmra.mxu0 %v5286_v57  ;;  %v5306_v24 = vor.u32 %v4508_v47, %v4224_v35  ;;  %7163 = vst [vmem:[#allocation105_spill] sm:$0xff] %v5313_v26  ;;  %v5317_v47 = vor.u32 %v4520_v21, %v4254_v1  ;;  %v3894_v10 = vld [vmem:[#allocation4 + $0x90] sm:$0xf] }
  0xce   :  { %1127 = vmatmul.bf16.vlgmr.msrb.gmra.mxu2 %v5286_v57  ;;  %1197 = vmatpush.bf16.msrb.mxu0 %v5282_v49  ;;  %7162 = vst [vmem:[#allocation104_spill] sm:$0xff] %v5311_v46  ;;  %v5319_v35 = vor.u32 %v4500_v34, %v4192_v42  ;;  %v4492_v49 = vld [vmem:[#allocation4 + $0x29c] sm:$0xf]  ;;  %v4190_v34 = vld [vmem:[#allocation4 + $0x2d8] sm:$0xf] }
  0xcf   :  { %1223 = vmatpush.bf16.msrb.mxu2 %v5284_v29  ;;  %7161 = vst [vmem:[#allocation103_spill] sm:$0xff] %v5306_v24  ;;  %1218 = vmatmul.bf16.vlgmr.msra.gmra.mxu1 %v7142_v0  ;;  %v4222_v29 = vld [vmem:[#allocation4 + $0x318] sm:$0xf]  ;;  %v4431_v59 = vld [vmem:[#allocation4 + $0xac] sm:$0xf0] }
  0xd0   :  { %1262 = vmatpush.bf16.msrb.mxu1 %v5289_v58  ;;  %v3958_v58 = vld [vmem:[#allocation4 + $0x110] sm:$0xf]  ;;  %7164 = vst [vmem:[#allocation106_spill] sm:$0xff] %v5317_v47  ;;  %v4504_v42 = vld [vmem:[#allocation4 + $0x2f4] sm:$0xf0] }
  0xd1   :  { %1290 = vmatpush.bf16.msra.mxu3 %v5291_v12  ;;  %v4447_v12 = vld [vmem:[#allocation4 + $0x12c] sm:$0xf0]  ;;  %7165 = vst [vmem:[#allocation107_spill] sm:$0xff] %v5319_v35 }
  0xd2   :  { %1198 = vmatpush.bf16.msrb.mxu0 %v5298_v7  ;;  %v4512_v7 = vld [vmem:[#allocation4 + $0x334] sm:$0xf0]  ;;  %v5323_v37 = vor.u32 %v4447_v12, %v3958_v58  ;;  %7167 = vst [vmem:[#allocation109_spill] sm:$0xff] %v5325_v61  ;;  %v5335_v58 = vor.u32 %v4439_v30, %v3926_v22  ;;  %v5349_v22 = vor.u32 %v4431_v59, %v3894_v10  ;;  %v3830_v10 = vld [vmem:[#allocation4 + $0x10] sm:$0xf] }
  0xd3   :  { %1224 = vmatpush.bf16.msrb.mxu2 %v5300_v51  ;;  %v4160_v51 = vld [vmem:[#allocation4 + $0x2b8] sm:$0xf0]  ;;  %v5329_v1 = vor.u32 %v4512_v7, %v4222_v29  ;;  %v5341_v29 = vor.u32 %v4504_v42, %v4190_v34  ;;  %v4158_v7 = vld [vmem:[#allocation4 + $0x298] sm:$0xf]  ;;  %v3862_v34 = vld [vmem:[#allocation4 + $0x50] sm:$0xf] }
  0xd4   :  { %1263 = vmatpush.bf16.msrb.mxu1 %v5304_v6  ;;  %7166 = vst [vmem:[#allocation108_spill] sm:$0xff] %v5323_v37  ;;  %v4435_v6 = vld [vmem:[#allocation4 + $0xd4] sm:$0xf]  ;;  %v5331_v21 = vor.u32 %v4492_v49, %v4160_v51  ;;  %v4496_v51 = vld [vmem:[#allocation4 + $0x2b4] sm:$0xf0] }
  0xd5   :  { %1291 = vmatpush.bf16.msra.mxu3 %v5306_v24  ;;  %v3928_v24 = vld [vmem:[#allocation4 + $0xf0] sm:$0xf0]  ;;  %7168 = vst [vmem:[#allocation110_spill] sm:$0xff] %v5329_v1  ;;  %v4423_v42 = vld [vmem:[#allocation4 + $0x6c] sm:$0xf0] }
  0xd6   :  { %1199 = vmatpush.bf16.msrb.mxu0 %v5311_v46  ;;  %7169 = vst [vmem:[#allocation111_spill] sm:$0xff] %v5331_v21  ;;  %v4484_v46 = vld [vmem:[#allocation4 + $0x25c] sm:$0xf]  ;;  %v5337_v12 = vor.u32 %v4435_v6, %v3928_v24  ;;  %v4415_v59 = vld [vmem:[#allocation4 + $0x2c] sm:$0xf0] }
  0xd7   :  { %1225 = vmatpush.bf16.msrb.mxu2 %v5313_v26  ;;  %v4128_v26 = vld [vmem:[#allocation4 + $0x278] sm:$0xf0]  ;;  %7170 = vst [vmem:[#allocation112_spill] sm:$0xff] %v5335_v58 }
  0xd8   :  { %1264 = vmatpush.bf16.msrb.mxu1 %v5317_v47  ;;  %7171 = vst [vmem:[#allocation113_spill] sm:$0xff] %v5337_v12  ;;  %v4427_v47 = vld [vmem:[#allocation4 + $0x94] sm:$0xf]  ;;  %v5343_v49 = vor.u32 %v4484_v46, %v4128_v26  ;;  %v4476_v24 = vld [vmem:[#allocation4 + $0x21c] sm:$0xf] }
  0xd9   :  { %1292 = vmatpush.bf16.msra.mxu3 %v5319_v35  ;;  %v3896_v35 = vld [vmem:[#allocation4 + $0xb0] sm:$0xf0]  ;;  %7172 = vst [vmem:[#allocation114_spill] sm:$0xff] %v5341_v29  ;;  %v4096_v6 = vld [vmem:[#allocation4 + $0x238] sm:$0xf0] }
  0xda   :  { %1200 = vmatpush.bf16.msrb.mxu0 %v5323_v37  ;;  %7173 = vst [vmem:[#allocation115_spill] sm:$0xff] %v5343_v49  ;;  %v5351_v30 = vor.u32 %v4427_v47, %v3896_v35  ;;  %v4419_v46 = vld [vmem:[#allocation4 + $0x54] sm:$0xf]  ;;  %v5361_v47 = vor.u32 %v4423_v42, %v3862_v34  ;;  %v4062_v37 = vld [vmem:[#allocation4 + $0x1d8] sm:$0xf] }
  0xdb   :  { %1226 = vmatpush.bf16.msrb.mxu2 %v5325_v61  ;;  %v3864_v26 = vld [vmem:[#allocation4 + $0x70] sm:$0xf0]  ;;  %v4126_v61 = vld [vmem:[#allocation4 + $0x258] sm:$0xf] }
  0xdc   :  { %1265 = vmatpush.bf16.msrb.mxu1 %v5329_v1  ;;  %7174 = vst [vmem:[#allocation116_spill] sm:$0xff] %v5351_v30  ;;  %v5357_v1 = vor.u32 %v4476_v24, %v4096_v6  ;;  %v5363_v35 = vor.u32 %v4419_v46, %v3864_v26  ;;  %v4468_v24 = vld [vmem:[#allocation4 + $0x1dc] sm:$0xf]  ;;  %v4094_v34 = vld [vmem:[#allocation4 + $0x218] sm:$0xf]  ;;  %v5372_v46 = vor.u32 %v4415_v59, %v3830_v10  ;;  %v5385_v10 = vpop.f32.mrf.mxu1 }
  0xdd   :  { %1293 = vmatpush.bf16.msra.mxu3 %v5331_v21  ;;  %1153 = vmatmul.bf16.vlgmr.msra.gmra.mxu0 %v5286_v57  ;;  %v5355_v21 = vor.u32 %v4496_v51, %v4158_v7  ;;  %v4472_v51 = vld [vmem:[#allocation4 + $0x1f4] sm:$0xf0]  ;;  %v4064_v6 = vld [vmem:[#allocation4 + $0x1f8] sm:$0xf0] }
  0xde   :  { %1179 = vmatmul.bf16.vlgmr.msra.gmra.mxu2 %v5286_v57  ;;  %1201 = vmatpush.bf16.msrb.mxu0 %v5335_v58  ;;  %7176 = vst [vmem:[#allocation118_spill] sm:$0xff] %v5357_v1  ;;  %v4488_v58 = vld [vmem:[#allocation4 + $0x274] sm:$0xf0] }
  0xdf   :  { %1227 = vmatpush.bf16.msrb.mxu2 %v5337_v12  ;;  %7175 = vst [vmem:[#allocation117_spill] sm:$0xff] %v5355_v21  ;;  %v4411_v12 = vld [vmem:[#allocation4 + $0x14] sm:$0xf]  ;;  %v5367_v7 = vor.u32 %v4488_v58, %v4126_v61  ;;  %v4480_v42 = vld [vmem:[#allocation4 + $0x234] sm:$0xf0] }
  0xe0   :  { %1266 = vmatpush.bf16.msrb.mxu1 %v5341_v29  ;;  %v3832_v29 = vld [vmem:[#allocation4 + $0x30] sm:$0xf0]  ;;  %v4030_v61 = vld [vmem:[#allocation4 + $0x198] sm:$0xf] }
  0xe1   :  { %1294 = vmatpush.bf16.msra.mxu3 %v5343_v49  ;;  %7177 = vst [vmem:[#allocation119_spill] sm:$0xff] %v5367_v7  ;;  %v5374_v26 = vor.u32 %v4411_v12, %v3832_v29  ;;  %v5376_v49 = vor.u32 %v4472_v51, %v4062_v37  ;;  %v4464_v58 = vld [vmem:[#allocation4 + $0x1b4] sm:$0xf0]  ;;  %v4452_v51 = vld [vmem:[#allocation4 + $0x15c] sm:$0xf] }
  0xe2   :  { %1202 = vmatpush.bf16.msrb.mxu0 %v5349_v22  ;;  %v5391_v37 = vor.u32 %v4464_v58, %v4030_v61  ;;  %v3998_v29 = vld [vmem:[#allocation4 + $0x158] sm:$0xf]  ;;  %v4444_v61 = vld [vmem:[#allocation4 + $0x11c] sm:$0xf] }
  0xe3   :  { %1228 = vmatpush.bf16.msrb.mxu2 %v5351_v30  ;;  %v5382_v30 = vor.u32 %v4480_v42, %v4094_v34  ;;  %v4456_v59 = vld [vmem:[#allocation4 + $0x174] sm:$0xf0]  ;;  %v5406_v34 = vpop.f32.mrf.mxu3  ;;  %v3968_v58 = vld [vmem:[#allocation4 + $0x138] sm:$0xf0] }
  0xe4   :  { %1267 = vmatpush.bf16.msrb.mxu1 %v5355_v21  ;;  %v4032_v21 = vld [vmem:[#allocation4 + $0x1b8] sm:$0xf0]  ;;  %v4448_v42 = vld [vmem:[#allocation4 + $0x134] sm:$0xf0] }
  0xe5   :  { %1295 = vmatpush.bf16.msra.mxu3 %v5357_v1  ;;  %v5378_v1 = vor.u32 %v4468_v24, %v4064_v6  ;;  %7178 = vst [vmem:[#allocation120_spill] sm:$0xff] %v5382_v30  ;;  %v4000_v24 = vld [vmem:[#allocation4 + $0x178] sm:$0xf0]  ;;  %v3966_v6 = vld [vmem:[#allocation4 + $0x118] sm:$0xf] }
  0xe6   :  { %1203 = vmatpush.bf16.msrb.mxu0 %v5361_v47 }
  0xe7   :  { %1229 = vmatpush.bf16.msrb.mxu2 %v5363_v35 }
  0xe8   :  { %1296 = vmatmul.bf16.vlgmr.msra.gmra.mxu3 %v7142_v0  ;;  %1268 = vmatpush.bf16.msrb.mxu1 %v5367_v7 }
  0xe9   :  { %1476 = vmatpush.bf16.msrb.mxu3 %v4923_v16  ;;  %v4460_v16 = vld [vmem:[#allocation4 + $0x19c] sm:$0xf] }
  0xea   :  { %1204 = vmatpush.bf16.msrb.mxu0 %v5372_v46  ;;  %v5393_v12 = vor.u32 %v4460_v16, %v4032_v21  ;;  %v5402_v16 = vor.u32 %v4456_v59, %v3998_v29  ;;  %v5404_v21 = vor.u32 %v4452_v51, %v4000_v24  ;;  %v5415_v29 = vor.u32 %v4448_v42, %v3966_v6  ;;  %v3934_v51 = vld [vmem:[#allocation4 + $0xd8] sm:$0xf] }
  0xeb   :  { %1230 = vmatpush.bf16.msrb.mxu2 %v5374_v26  ;;  %v5417_v59 = vor.u32 %v4444_v61, %v3968_v58  ;;  %v4440_v24 = vld [vmem:[#allocation4 + $0xf4] sm:$0xf0]  ;;  %v4428_v61 = vld [vmem:[#allocation4 + $0x9c] sm:$0xf] }
  0xec   :  { %1269 = vmatpush.bf16.msrb.mxu1 %v5382_v30  ;;  %v3902_v6 = vld [vmem:[#allocation4 + $0x98] sm:$0xf]  ;;  %v3904_v58 = vld [vmem:[#allocation4 + $0xb8] sm:$0xf0]  ;;  %v7226_v30 = vld [vmem:[#allocation74_spill] sm:$0xff] }
  0xed   :  { %1477 = vmatpush.bf16.msrb.mxu3 %v4932_v19  ;;  %1205 = vmatmul.bf16.vlgmr.msrb.gmra.mxu0 %v5286_v57  ;;  %v4436_v19 = vld [vmem:[#allocation4 + $0xdc] sm:$0xf]  ;;  %v4432_v42 = vld [vmem:[#allocation4 + $0xb4] sm:$0xf0] }
  0xee   :  { %1249 = vmatpush.bf16.msra.mxu0 %v5376_v49  ;;  %1231 = vmatmul.bf16.vlgmr.msrb.gmra.mxu2 %v5286_v57 }
  0xef   :  { %1275 = vmatpush.bf16.msra.mxu2 %v5378_v1  ;;  %1270 = vmatmul.bf16.vlgmr.msrb.gmra.mxu1 %v7142_v0  ;;  %v5423_v0 = vor.u32 %v4440_v24, %v3934_v51  ;;  %v5435_v51 = vor.u32 %v4432_v42, %v3902_v6  ;;  %v4424_v24 = vld [vmem:[#allocation4 + $0x74] sm:$0xf0] }
  0xf0   :  { %1450 = vmatpush.bf16.msra.mxu1 %v4937_v27  ;;  %v3936_v27 = vld [vmem:[#allocation4 + $0xf8] sm:$0xf0]  ;;  %v3838_v6 = vld [vmem:[#allocation4 + $0x18] sm:$0xf] }
  0xf1   :  { %1478 = vmatpush.bf16.msrb.mxu3 %v4942_v31  ;;  %v5410_v31 = vpop.f32.mrf.mxu1  ;;  %7182 = vst [vmem:[#allocation124_spill] sm:$0xff] %v5435_v51  ;;  %v4416_v42 = vld [vmem:[#allocation4 + $0x34] sm:$0xf0] }
  0xf2   :  { %1250 = vmatpush.bf16.msra.mxu0 %v5391_v37  ;;  %7179 = vst [vmem:[#allocation121_spill] sm:$0xff] %v5410_v31  ;;  %v5425_v31 = vor.u32 %v4436_v19, %v3936_v27  ;;  %v5437_v19 = vor.u32 %v4428_v61, %v3904_v58  ;;  %v3870_v27 = vld [vmem:[#allocation4 + $0x58] sm:$0xf]  ;;  %v4412_v61 = vld [vmem:[#allocation4 + $0x1c] sm:$0xf] }
  0xf3   :  { %1276 = vmatpush.bf16.msra.mxu2 %v5393_v12  ;;  %v3840_v58 = vld [vmem:[#allocation4 + $0x38] sm:$0xf0] }
  0xf4   :  { %1451 = vmatpush.bf16.msra.mxu1 %v4954_v40  ;;  %7183 = vst [vmem:[#allocation125_spill] sm:$0xff] %v5437_v19 }
  0xf5   :  { %1479 = vmatpush.bf16.msrb.mxu3 %v4960_v44  ;;  %v5427_v44 = vpop.f32.mrf.mxu3 }
  0xf6   :  { %1251 = vmatpush.bf16.msra.mxu0 %v5402_v16  ;;  %7180 = vst [vmem:[#allocation122_spill] sm:$0xff] %v5427_v44 }
  0xf7   :  { %1277 = vmatpush.bf16.msra.mxu2 %v5404_v21 }
  0xf8   :  { %1452 = vmatpush.bf16.msra.mxu1 %v4968_v52  ;;  %v3872_v52 = vld [vmem:[#allocation4 + $0x78] sm:$0xf0] }
  0xf9   :  { %1480 = vmatpush.bf16.msrb.mxu3 %v4973_v56  ;;  %v5430_v40 = vpop.f32.mrf.mxu1  ;;  %v4420_v56 = vld [vmem:[#allocation4 + $0x5c] sm:$0xf] }
  0xfa   :  { %1252 = vmatpush.bf16.msra.mxu0 %v5415_v29  ;;  %7181 = vst [vmem:[#allocation123_spill] sm:$0xff] %v5430_v40  ;;  %v5443_v40 = vor.u32 %v4424_v24, %v3870_v27  ;;  %v5445_v44 = vor.u32 %v4420_v56, %v3872_v52  ;;  %v5454_v27 = vor.u32 %v4416_v42, %v3838_v6  ;;  %v5478_v42 = vpop.f32.mrf.mxu2 }
  0xfb   :  { %1278 = vmatpush.bf16.msra.mxu2 %v5417_v59  ;;  %v5456_v52 = vor.u32 %v4412_v61, %v3840_v58 }
  0xfc   :  { %1453 = vmatpush.bf16.msra.mxu1 %v4980_v63  ;;  %7184 = vst [vmem:[#allocation126_spill] sm:$0xff] %v5443_v40  ;;  %v7225_v63 = vld [vmem:[#allocation72_spill] sm:$0xff] }
  0xfd   :  { %1481 = vmatpush.bf16.msrb.mxu3 %v4985_v5  ;;  %7185 = vst [vmem:[#allocation127_spill] sm:$0xff] %v5445_v44  ;;  %v5447_v5 = vpop.f32.mrf.mxu3 }
  0xfe   :  { %1253 = vmatpush.bf16.msra.mxu0 %v5423_v0  ;;  %7186 = vst [vmem:[#allocation128_spill] sm:$0xff] %v5447_v5 }
  0xff   :  { %1279 = vmatpush.bf16.msra.mxu2 %v5425_v31  ;;  %7187 = vst [vmem:[#allocation129_spill] sm:$0xff] %v5454_v27 }
 0x100   :  { %1454 = vmatpush.bf16.msra.mxu1 %v4992_v13  ;;  %7188 = vst [vmem:[#allocation130_spill] sm:$0xff] %v5456_v52 }
 0x101   :  { %1482 = vmatpush.bf16.msrb.mxu3 %v4997_v18  ;;  %v5458_v56 = vpop.f32.mrf.mxu1 }
 0x102   :  { %1254 = vmatpush.bf16.msra.mxu0 %v5435_v51  ;;  %7189 = vst [vmem:[#allocation131_spill] sm:$0xff] %v5458_v56  ;;  %v7197_v56 = vld [vmem:[#allocation70_spill] sm:$0xff] }
 0x103   :  { %1280 = vmatpush.bf16.msra.mxu2 %v5437_v19 }
 0x104   :  { %1455 = vmatpush.bf16.msra.mxu1 %v5009_v32  ;;  %v7224_v32 = vld [vmem:[#allocation69_spill] sm:$0xff] }
 0x105   :  { %1483 = vmatpush.bf16.msrb.mxu3 %v5019_v38  ;;  %v5466_v24 = vpop.f32.mrf.mxu3  ;;  %v7218_v38 = vld [vmem:[#allocation61_spill] sm:$0xff] }
 0x106   :  { %1255 = vmatpush.bf16.msra.mxu0 %v5443_v40  ;;  %7190 = vst [vmem:[#allocation132_spill] sm:$0xff] %v5466_v24  ;;  %v7196_v24 = vld [vmem:[#allocation64_spill] sm:$0xff] }
 0x107   :  { %1281 = vmatpush.bf16.msra.mxu2 %v5445_v44 }
 0x108   :  { %1456 = vmatpush.bf16.msra.mxu1 %v5031_v55  ;;  %v7220_v55 = vld [vmem:[#allocation63_spill] sm:$0xff] }
 0x109   :  { %1528 = vmatpush.bf16.msra.mxu3 %v5023_v43  ;;  %v5472_v6 = vpop.f32.mrf.mxu1  ;;  %v7216_v43 = vld [vmem:[#allocation56_spill] sm:$0xff] }
 0x10a   :  { %1256 = vmatpush.bf16.msra.mxu0 %v5454_v27  ;;  %7191 = vst [vmem:[#allocation133_spill] sm:$0xff] %v5472_v6 }
 0x10b   :  { %1282 = vmatpush.bf16.msra.mxu2 %v5456_v52 }
 0x10c   :  { %1457 = vmatpush.bf16.msra.mxu1 %v5048_v15 }
 0x10d   :  { %1529 = vmatpush.bf16.msra.mxu3 %v5039_v62  ;;  %1257 = vmatmul.bf16.vlgmr.msra.gmra.mxu0 %v5286_v57  ;;  %v5482_v61 = vpop.f32.mrf.mxu3 }
 0x10e   :  { %1437 = vmatpush.bf16.msrb.mxu0 %v4935_v23  ;;  %1283 = vmatmul.bf16.vlgmr.msra.gmra.mxu2 %v5286_v57  ;;  %7192 = vst [vmem:[#allocation134_spill] sm:$0xff] %v5482_v61  ;;  %v5490_v57 = vpop.f32.mrf.mxu2  ;;  %v145_v61 = vpop.f32.mrf.mxu0 }
 0x10f   :  { %1463 = vmatpush.bf16.msrb.mxu2 %v4939_v28  ;;  %7193 = vst [vmem:[#allocation135_spill] sm:$0xff] %v5490_v57  ;;  %v7200_v57 = vld [vmem:[#allocation35_spill] sm:$0xff] }
 0x110   :  { %1502 = vmatpush.bf16.msrb.mxu1 %v5060_v39  ;;  %v7217_v39 = vld [vmem:[#allocation59_spill] sm:$0xff] }
 0x111   :  { %1530 = vmatpush.bf16.msra.mxu3 %v5066_v50  ;;  %v5492_v58 = vpop.f32.mrf.mxu1  ;;  %v7211_v50 = vld [vmem:[#allocation51_spill] sm:$0xff] }
 0x112   :  { %1438 = vmatpush.bf16.msrb.mxu0 %v4951_v36  ;;  %7194 = vst [vmem:[#allocation136_spill] sm:$0xff] %v5492_v58 }
 0x113   :  { %1464 = vmatpush.bf16.msrb.mxu2 %v4956_v41 }
 0x114   :  { %1503 = vmatpush.bf16.msrb.mxu1 %v5073_v3  ;;  %v7215_v3 = vld [vmem:[#allocation54_spill] sm:$0xff] }
 0x115   :  { %1531 = vmatpush.bf16.msra.mxu3 %v5077_v20  ;;  %v5498_v6 = vpop.f32.mrf.mxu3  ;;  %v7205_v20 = vld [vmem:[#allocation40_spill] sm:$0xff] }
 0x116   :  { %1439 = vmatpush.bf16.msrb.mxu0 %v4965_v48  ;;  %7195 = vst [vmem:[#allocation137_spill] sm:$0xff] %v5498_v6  ;;  %v5504_v58 = vpop.f32.mrf.mxu2 }
 0x117   :  { %1465 = vmatpush.bf16.msrb.mxu2 %v4970_v53  ;;  %7198 = vst [vmem:[#allocation138_spill] sm:$0xff] %v5504_v58  ;;  %v7209_v58 = vld [vmem:[#allocation73_spill] sm:$0xff] }
 0x118   :  { %1504 = vmatpush.bf16.msrb.mxu1 %v5090_v54 }
 0x119   :  { %1532 = vmatpush.bf16.msra.mxu3 %v5096_v8  ;;  %v5506_v5 = vpop.f32.mrf.mxu1  ;;  %v5511_v8 = vpop.f32.mrf.mxu0 }
 0x11a   :  { %1440 = vmatpush.bf16.msrb.mxu0 %v4978_v60  ;;  %7199 = vst [vmem:[#allocation139_spill] sm:$0xff] %v5506_v5  ;;  %v7210_v5 = vld [vmem:[#allocation49_spill] sm:$0xff] }
 0x11b   :  { %1466 = vmatpush.bf16.msrb.mxu2 %v4983_v4  ;;  %7203 = vst [vmem:[#allocation140_spill] sm:$0xff] %v5511_v8  ;;  %v7213_v8 = vld [vmem:[#allocation77_spill] sm:$0xff] }
 0x11c   :  { %1505 = vmatpush.bf16.msrb.mxu1 %v5111_v2  ;;  %v7206_v2 = vld [vmem:[#allocation43_spill] sm:$0xff] }
 0x11d   :  { %1533 = vmatpush.bf16.msra.mxu3 %v5116_v11  ;;  %v7201_v11 = vld [vmem:[#allocation37_spill] sm:$0xff]  ;;  %v5513_v6 = vpop.f32.mrf.mxu3 }
 0x11e   :  { %1441 = vmatpush.bf16.msrb.mxu0 %v4990_v9  ;;  %7204 = vst [vmem:[#allocation141_spill] sm:$0xff] %v5513_v6  ;;  %v5522_v54 = vpop.f32.mrf.mxu2 }
 0x11f   :  { %1467 = vmatpush.bf16.msrb.mxu2 %v4994_v14  ;;  %7212 = vst [vmem:[#allocation142_spill] sm:$0xff] %v5522_v54  ;;  %v7221_v54 = vld [vmem:[#allocation65_spill] sm:$0xff] }
 0x120   :  { %1506 = vmatpush.bf16.msrb.mxu1 %v7196_v24  ;;  %v7207_v24 = vld [vmem:[#allocation44_spill] sm:$0xff] }
 0x121   :  { %1534 = vmatpush.bf16.msra.mxu3 %v5129_v45  ;;  %v7202_v45 = vld [vmem:[#allocation68_spill] sm:$0xff]  ;;  %v5525_v6 = vpop.f32.mrf.mxu0 }
 0x122   :  { %1442 = vmatpush.bf16.msrb.mxu0 %v5005_v25  ;;  %7214 = vst [vmem:[#allocation143_spill] sm:$0xff] %v5525_v6  ;;  %v7223_v6 = vld [vmem:[#allocation67_spill] sm:$0xff] }
 0x123   :  { %1468 = vmatpush.bf16.msrb.mxu2 %v5011_v33 }
 0x124   :  { %1507 = vmatpush.bf16.msrb.mxu1 %v7202_v45  ;;  %v1115_v45 = vpop.f32.mrf.mxu1 }
 0x125   :  { %1535 = vmatpush.bf16.msra.mxu3 %v7197_v56  ;;  %v7208_v56 = vld [vmem:[#allocation47_spill] sm:$0xff] }
 0x126   :  { %1443 = vmatpush.bf16.msrb.mxu0 %v7200_v57  ;;  %v5531_v15 = vpop.f32.mrf.mxu2 }
 0x127   :  { %1469 = vmatpush.bf16.msrb.mxu2 %v7201_v11  ;;  %7219 = vst [vmem:[#allocation144_spill] sm:$0xff] %v5531_v15  ;;  %v7229_v15 = vld [vmem:[#allocation76_spill] sm:$0xff] }
 0x128   :  { %1508 = vmatpush.bf16.msrb.mxu1 %v7209_v58 }
 0x129   :  { %v1141_v62 = vpop.f32.mrf.mxu3 }
 0x12a   :  { %1444 = vmatpush.bf16.msrb.mxu0 %v7205_v20 }
 0x12b   :  { %1470 = vmatpush.bf16.msrb.mxu2 %v7206_v2 }
 0x12c   :  { %1509 = vmatpush.bf16.msrb.mxu1 %v7213_v8  ;;  %v1117_v58 = vpop.f32.mrf.mxu1  ;;  %v5535_v8 = vpop.f32.mrf.mxu0 }
 0x12d   :  { %7222 = vst [vmem:[#allocation145_spill] sm:$0xff] %v5535_v8 }
 0x12e   :  { %1489 = vmatpush.bf16.msra.mxu0 %v7207_v24 }
 0x12f   :  { %1515 = vmatpush.bf16.msra.mxu2 %v7208_v56 }
 0x131   :  { %v1143_v18 = vpop.f32.mrf.mxu3 }
 0x132   :  { %1490 = vmatpush.bf16.msra.mxu0 %v7210_v5 }
 0x133   :  { %1516 = vmatpush.bf16.msra.mxu2 %v7211_v50 }
 0x134   :  { %v1167_v13 = vpop.f32.mrf.mxu1  ;;  %v5543_v58 = vpop.f32.mrf.mxu0 }
 0x135   :  { %7228 = vst [vmem:[#allocation147_spill] sm:$0xff] %v5543_v58 }
 0x136   :  { %1491 = vmatpush.bf16.msra.mxu0 %v7215_v3 }
 0x137   :  { %1517 = vmatpush.bf16.msra.mxu2 %v7216_v43 }
 0x139   :  { %v1193_v18 = vpop.f32.mrf.mxu3 }
 0x13a   :  { %1492 = vmatpush.bf16.msra.mxu0 %v7217_v39 }
 0x13b   :  { %1518 = vmatpush.bf16.msra.mxu2 %v7218_v38  ;;  %v5541_v38 = vpop.f32.mrf.mxu2 }
 0x13c   :  { %7227 = vst [vmem:[#allocation146_spill] sm:$0xff] %v5541_v38  ;;  %v7233_v38 = vld [vmem:[#allocation58_spill] sm:$0xff] }
 0x13d   :  { %v175_v58 = vadd.f32 %v5385_v10, %v7233_v38 }
 0x13e   :  { %1493 = vmatpush.bf16.msra.mxu0 %v7220_v55  ;;  %v7230_v55 = vld [vmem:[#allocation78_spill] sm:$0xff] }
 0x13f   :  { %1519 = vmatpush.bf16.msra.mxu2 %v7221_v54  ;;  %v1169_v54 = vpop.f32.mrf.mxu1 }
 0x142   :  { %1494 = vmatpush.bf16.msra.mxu0 %v7223_v6  ;;  %v1195_v6 = vpop.f32.mrf.mxu3 }
 0x143   :  { %1520 = vmatpush.bf16.msra.mxu2 %v7224_v32  ;;  %v5547_v8 = vpop.f32.mrf.mxu2  ;;  %v7232_v32 = vld [vmem:[#allocation38_spill] sm:$0xff] }
 0x144   :  { %7231 = vst [vmem:[#allocation148_spill] sm:$0xff] %v5547_v8  ;;  %v146_v7 = vadd.f32 %v145_v61, %v7232_v32 }
 0x146   :  { %1495 = vmatpush.bf16.msra.mxu0 %v7225_v63 }
 0x147   :  { %1521 = vmatpush.bf16.msra.mxu2 %v7226_v30 }
 0x14a   :  { %1496 = vmatpush.bf16.msra.mxu0 %v7229_v15  ;;  %v1102_v39 = vpop.f32.mrf.mxu0 }
 0x14b   :  { %1522 = vmatpush.bf16.msra.mxu2 %v7230_v55  ;;  %v1116_v43 = vadd.f32 %v1115_v45, %v1102_v39  ;;  %v5552_v15 = vpop.f32.mrf.mxu3 }
 0x14c   :  { %v1219_v3 = vpop.f32.mrf.mxu1 }
 0x14d   :  { %v1368_v63 = vadd.f32 %v1116_v43, %v146_v7 }
 0x14f   :  { %v4327_v30 = vmul.f32 -1.442695, %v1368_v63 }
 0x151   :  { %v1128_v50 = vpop.f32.mrf.mxu2  ;;  %4570 = vpow2.f32 %v4327_v30  ;;  %v7234_v30 = vld [vmem:[#allocation45_spill] sm:$0xff] }
 0x152   :  { %v1142_v5 = vadd.f32 %v1141_v62, %v1128_v50  ;;  %v1104_v55 = vpop.f32.mrf.mxu0  ;;  %v233_v62 = vadd.f32 %v5406_v34, %v7234_v30 }
 0x153   :  { %v1247_v39 = vpop.f32.mrf.mxu3 }
 0x154   :  { %v1369_v54 = vadd.f32 %v1142_v5, %v175_v58  ;;  %v1221_v8 = vpop.f32.mrf.mxu1  ;;  %v5559_v39 = vld [vmem:[%s6803_s4] sm:$0xf] }
 0x156   :  { %v4328_v56 = vmul.f32 -1.442695, %v1369_v54 }
 0x157   :  { %v4571_v6 = vpop.eup %4570 }
 0x158   :  { %4572 = vpow2.f32 %v4328_v56  ;;  %v1375_v24 = vadd.f32 1.0, %v4571_v6 }
 0x159   :  { %v1130_v61 = vpop.f32.mrf.mxu2 }
 0x15a   :  { %4574 = vrcp.f32 %v1375_v24  ;;  %v1154_v43 = vpop.f32.mrf.mxu0  ;;  %vm1381_vm15 = vweird.f32 %v1375_v24 }
 0x15b   :  { %v1168_v54 = vadd.f32 %v1167_v13, %v1154_v43 }
 0x15e   :  { %v4573_v63 = vpop.eup %4572 }
 0x15f   :  { %v1394_v45 = vadd.f32 1.0, %v4573_v63  ;;  %v7235_v63 = vld [vmem:[#allocation79_spill] sm:$0xff] }
 0x160   :  { %v4575_v7 = vpop.eup %4574  ;;  %v204_v38 = vadd.f32 %v5478_v42, %v7235_v63  ;;  %v1385_v42 = vand.u32 2147483647, %v1375_v24 }
 0x161   :  { %4576 = vrcp.f32 %v1394_v45  ;;  %v1180_v10 = vpop.f32.mrf.mxu2  ;;  %v1377_v50 = vmul.f32 %v4575_v7, %v1375_v24  ;;  %v1406_v13 = vand.u32 2147483648, %v1394_v45  ;;  %vm1382_vm13 = vweird.f32 %v4575_v7 }
 0x162   :  { %v1194_v55 = vadd.f32 %v1193_v18, %v1180_v10  ;;  %v1156_v5 = vpop.f32.mrf.mxu0  ;;  %v1370_v18 = vadd.f32 %v1168_v54, %v204_v38  ;;  %v5564_v10 = vperm.slane %v5559_v39, 0  ;;  %vm1400_vm0 = vweird.f32 %v1394_v45  ;;  %vm5568_vm1 = vmor %vm1381_vm15, %vm1382_vm13 }
 0x163   :  { %v1378_v58 = vsub.f32 1.0, %v1377_v50  ;;  %vm1386_vm4 = vcmp.eq.f32.partialorder %v1385_v42, 8.507059e+37 }
 0x164   :  { %v1371_v8 = vadd.f32 %v1194_v55, %v233_v62  ;;  %7236 = vst [vmem:[#allocation149_spill] sm:$0xff] %v5564_v10  ;;  %v1387_v62 = vand.u32 2147483648, %v1375_v24 }
 0x165   :  { %v1379_v61 = vmul.f32 %v4575_v7, %v1378_v58  ;;  %v1404_v58 = vand.u32 2147483647, %v1394_v45 }
 0x166   :  { %v4329_v56 = vmul.f32 -1.442695, %v1371_v8 }
 0x167   :  { %v4577_v6 = vpop.eup %4576  ;;  %v1380_v43 = vadd.f32 %v4575_v7, %v1379_v61  ;;  %vm1405_vm3 = vcmp.eq.f32.partialorder %v1404_v58, 8.507059e+37 }
 0x168   :  { %v1396_v32 = vmul.f32 %v4577_v6, %v1394_v45  ;;  %4578 = vpow2.f32 %v4329_v56  ;;  %vm1401_vm14 = vweird.f32 %v4577_v6  ;;  %v5578_v45 = vperm.slane %v5559_v39, 1 }
 0x169   :  { %v1182_v34 = vpop.f32.mrf.mxu2  ;;  %4580 = vtanh.f32 %v1370_v18  ;;  %vm1402_vm2 = vmor %vm1400_vm0, %vm1401_vm14 }
 0x16a   :  { %v1397_v30 = vsub.f32 1.0, %v1396_v32  ;;  %v1206_v50 = vpop.f32.mrf.mxu0  ;;  %v1407_v34 = vor.u32 1.1754944e-38, %v1406_v13 }
 0x16b   :  { %v5566_v55 = vpop.f32.mrf.mxu3  ;;  %v1220_v8 = vadd.f32 %v1219_v3, %v1206_v50  ;;  %v1388_v50 = vor.u32 1.1754944e-38, %v1387_v62 }
 0x16c   :  { %v1398_v5 = vmul.f32 %v4577_v6, %v1397_v30  ;;  %v5573_v61 = vpop.f32.mrf.mxu1  ;;  %v1384_v30 = vsel %vm5568_vm1, %v4575_v7, %v1380_v43 }
 0x16d   :  { %v1301_v54 = vadd.f32 %v1220_v8, %v5564_v10 }
 0x16e   :  { %v4579_v56 = vpop.eup %4578  ;;  %v1399_v38 = vadd.f32 %v4577_v6, %v1398_v5  ;;  %v1389_v5 = vsel %vm1386_vm4, %v1388_v50, %v1384_v30 }
 0x16f   :  { %v1414_v3 = vadd.f32 1.0, %v4579_v56  ;;  %v4324_v8 = vmul.f32 -1.442695, %v1301_v54  ;;  %v4581_v7 = vpop.eup %4580 }
 0x170   :  { %v1403_v24 = vsel %vm1402_vm2, %v4577_v6, %v1399_v38  ;;  %v1431_v6 = vmul.f32 %v4581_v7, %v1389_v5 }
 0x171   :  { %v1408_v63 = vsel %vm1405_vm3, %v1407_v34, %v1403_v24  ;;  %4582 = vrcp.f32 %v1414_v3  ;;  %v1232_v18 = vpop.f32.mrf.mxu2  ;;  %vm1420_vm6 = vweird.f32 %v1414_v3 }
 0x172   :  { %v1246_v10 = vadd.f32 %v5552_v15, %v1232_v18  ;;  %v1430_v13 = vmul.f32 %v1408_v63, %v5251_v17  ;;  %v1208_v2 = vpop.f32.mrf.mxu0  ;;  %4584 = vpow2.f32 %v4324_v8  ;;  %v1426_v15 = vand.u32 2147483648, %v1414_v3 }
 0x173   :  { %v1299_v32 = vpop.f32.mrf.mxu3  ;;  %v1424_v63 = vand.u32 2147483647, %v1414_v3 }
 0x174   :  { %v1302_v43 = vadd.f32 %v1246_v10, %v5578_v45  ;;  %v1273_v58 = vpop.f32.mrf.mxu1  ;;  %v5583_v42 = vadd.f32 %v1431_v6, %v1430_v13  ;;  %v1427_v50 = vor.u32 1.1754944e-38, %v1426_v15  ;;  %v7240_v6 = vld [vmem:[#allocation97_spill] sm:$0xff]  ;;  %v5603_v15 = vperm.slane %v5559_v39, 3 }
 0x175   :  { %vm1425_vm8 = vcmp.eq.f32.partialorder %v1424_v63, 8.507059e+37  ;;  %v5606_v63 = vperm.slane %v5559_v39, 2  ;;  %v7246_v39 = vld [vmem:[#allocation109_spill] sm:$0xff] }
 0x176   :  { %v4325_v62 = vmul.f32 -1.442695, %v1302_v43  ;;  %v7239_v43 = vld [vmem:[#allocation96_spill] sm:$0xff] }
 0x177   :  { %v4583_v56 = vpop.eup %4582 }
 0x178   :  { %v1416_v38 = vmul.f32 %v4583_v56, %v1414_v3  ;;  %4586 = vpow2.f32 %v4325_v62  ;;  %v4585_v17 = vpop.eup %4584  ;;  %vm1421_vm5 = vweird.f32 %v4583_v56 }
 0x179   :  { %v1234_v34 = vpop.f32.mrf.mxu2  ;;  %4588 = vtanh.f32 %v5583_v42  ;;  %vm1422_vm7 = vmor %vm1420_vm6, %vm1421_vm5  ;;  %v5586_v24 = vadd.f32 1.0, %v4585_v17 }
 0x17a   :  { %v1417_v54 = vsub.f32 1.0, %v1416_v38  ;;  %v7241_v38 = vld [vmem:[#allocation100_spill] sm:$0xff]  ;;  %v7242_v34 = vld [vmem:[#allocation101_spill] sm:$0xff] }
 0x17b   :  { %vm1314_vm13 = vweird.f32 %v5586_v24 }
 0x17c   :  { %v1418_v2 = vmul.f32 %v4583_v56, %v1417_v54 }
 0x17e   :  { %v4587_v30 = vpop.eup %4586  ;;  %v1419_v10 = vadd.f32 %v4583_v56, %v1418_v2 }
 0x17f   :  { %v5588_v18 = vadd.f32 1.0, %v4587_v30  ;;  %v4589_v8 = vpop.eup %4588 }
 0x180   :  { %v1423_v5 = vsel %vm1422_vm7, %v4583_v56, %v1419_v10 }
 0x181   :  { %v1428_v13 = vsel %vm1425_vm8, %v1427_v50, %v1423_v5  ;;  %4590 = vrcp.f32 %v5588_v18  ;;  %v7243_v50 = vld [vmem:[#allocation104_spill] sm:$0xff]  ;;  %v7244_v5 = vld [vmem:[#allocation105_spill] sm:$0xff]  ;;  %vm1333_vm10 = vweird.f32 %v5588_v18 }
 0x182   :  { %v1434_v32 = vmul.f32 %v4589_v8, %v1428_v13  ;;  %4592 = vrcp.f32 %v5586_v24 }
 0x184   :  { %v5592_v7 = vpack.c.bf16 %v1434_v32, %v1434_v32 }
 0x186   :  { %1445 = vmatmul.bf16.vlgmr.msrb.gmra.mxu0 %v5592_v7  ;;  %1471 = vmatmul.bf16.vlgmr.msrb.gmra.mxu2 %v5592_v7 }
 0x187   :  { %v4591_v3 = vpop.eup %4590  ;;  %1541 = vmatpush.bf16.msrb.mxu0 %v7239_v43  ;;  %1567 = vmatpush.bf16.msrb.mxu2 %v7240_v6  ;;  %v7245_v6 = vld [vmem:[#allocation108_spill] sm:$0xff] }
 0x188   :  { %v4593_v58 = vpop.eup %4592  ;;  %v1329_v56 = vmul.f32 %v4591_v3, %v5588_v18  ;;  %vm1334_vm9 = vweird.f32 %v4591_v3 }
 0x189   :  { %v1310_v54 = vmul.f32 %v4593_v58, %v5586_v24  ;;  %vm1315_vm11 = vweird.f32 %v4593_v58  ;;  %vm1335_vm12 = vmor %vm1333_vm10, %vm1334_vm9 }
 0x18a   :  { %v1258_v62 = vpop.f32.mrf.mxu0  ;;  %v1330_v17 = vsub.f32 1.0, %v1329_v56  ;;  %vm1316_vm14 = vmor %vm1314_vm13, %vm1315_vm11 }
 0x18b   :  { %1542 = vmatpush.bf16.msrb.mxu0 %v7241_v38  ;;  %1568 = vmatpush.bf16.msrb.mxu2 %v7242_v34  ;;  %v1272_v30 = vadd.f32 %v5573_v61, %v1258_v62  ;;  %v1311_v8 = vsub.f32 1.0, %v1310_v54  ;;  %v1339_v62 = vand.u32 2147483648, %v5588_v18  ;;  %v7247_v54 = vld [vmem:[#allocation112_spill] sm:$0xff] }
 0x18c   :  { %v1331_v34 = vmul.f32 %v4591_v3, %v1330_v17  ;;  %v7248_v17 = vld [vmem:[#allocation113_spill] sm:$0xff] }
 0x18d   :  { %v1303_v38 = vadd.f32 %v1272_v30, %v5606_v63  ;;  %v1312_v43 = vmul.f32 %v4593_v58, %v1311_v8  ;;  %v1337_v30 = vand.u32 2147483647, %v5588_v18 }
 0x18e   :  { %v1332_v61 = vadd.f32 %v4591_v3, %v1331_v34  ;;  %v1320_v34 = vand.u32 2147483648, %v5586_v24 }
 0x18f   :  { %1543 = vmatpush.bf16.msrb.mxu0 %v7243_v50  ;;  %1569 = vmatpush.bf16.msrb.mxu2 %v7244_v5  ;;  %vm1338_vm15 = vcmp.eq.f32.partialorder %v1337_v30, 8.507059e+37 }
 0x190   :  { %v1336_v8 = vsel %vm1335_vm12, %v4591_v3, %v1332_v61  ;;  %v1321_v18 = vor.u32 1.1754944e-38, %v1320_v34 }
 0x191   :  { %v1284_v2 = vpop.f32.mrf.mxu2 }
 0x192   :  { %v1298_v10 = vadd.f32 %v5566_v55, %v1284_v2  ;;  %v1260_v13 = vpop.f32.mrf.mxu0  ;;  %v1313_v2 = vadd.f32 %v4593_v58, %v1312_v43 }
 0x193   :  { %1544 = vmatpush.bf16.msrb.mxu0 %v7245_v6  ;;  %1570 = vmatpush.bf16.msrb.mxu2 %v7246_v39 }
 0x194   :  { %v1304_v32 = vadd.f32 %v1298_v10, %v5603_v15  ;;  %v1318_v10 = vand.u32 2147483647, %v5586_v24 }
 0x196   :  { %v4326_v56 = vmul.f32 -1.442695, %v1304_v32  ;;  %1497 = vmatmul.bf16.vlgmr.msra.gmra.mxu0 %v5592_v7  ;;  %1523 = vmatmul.bf16.vlgmr.msra.gmra.mxu2 %v5592_v7  ;;  %v7249_v32 = vld [vmem:[#allocation116_spill] sm:$0xff]  ;;  %vm1319_vm0 = vcmp.eq.f32.partialorder %v1318_v10, 8.507059e+37 }
 0x197   :  { %1545 = vmatpush.bf16.msrb.mxu0 %v7247_v54  ;;  %1571 = vmatpush.bf16.msrb.mxu2 %v7248_v17 }
 0x198   :  { %4594 = vpow2.f32 %v4326_v56  ;;  %v1317_v56 = vsel %vm1316_vm14, %v4593_v58, %v1313_v2 }
 0x199   :  { %v1286_v55 = vpop.f32.mrf.mxu2  ;;  %4596 = vtanh.f32 %v1303_v38  ;;  %v1340_v38 = vor.u32 1.1754944e-38, %v1339_v62  ;;  %v1322_v54 = vsel %vm1319_vm0, %v1321_v18, %v1317_v56  ;;  %v7251_v18 = vld [vmem:[#allocation71_spill] sm:$0xff] }
 0x19b   :  { %1546 = vmatpush.bf16.msrb.mxu0 %v5349_v22  ;;  %1572 = vmatpush.bf16.msrb.mxu2 %v7249_v32  ;;  %v1341_v17 = vsel %vm1338_vm15, %v1340_v38, %v1336_v8 }
 0x19c   :  { %v1363_v24 = vmul.f32 0.0, %v1341_v17 }
 0x19e   :  { %v4595_v13 = vpop.eup %4594 }
 0x19f   :  { %v1347_v43 = vadd.f32 1.0, %v4595_v13  ;;  %v4597_v55 = vpop.eup %4596  ;;  %1547 = vmatpush.bf16.msrb.mxu0 %v5361_v47  ;;  %1573 = vmatpush.bf16.msrb.mxu2 %v5363_v35 }
 0x1a0   :  { %v1364_v3 = vmul.f32 %v4597_v55, %v1322_v54 }
 0x1a1   :  { %4598 = vrcp.f32 %v1347_v43  ;;  %v1359_v54 = vand.u32 2147483648, %v1347_v43  ;;  %v1357_v30 = vand.u32 2147483647, %v1347_v43  ;;  %vm1353_vm2 = vweird.f32 %v1347_v43 }
 0x1a2   :  { %v5632_v58 = vadd.f32 %v1364_v3, %v1363_v24  ;;  %v7252_v24 = vld [vmem:[#allocation82_spill] sm:$0xff]  ;;  %v7253_v3 = vld [vmem:[#allocation75_spill] sm:$0xff] }
 0x1a3   :  { %1548 = vmatpush.bf16.msrb.mxu0 %v5372_v46  ;;  %1574 = vmatpush.bf16.msrb.mxu2 %v5374_v26  ;;  %v1360_v10 = vor.u32 1.1754944e-38, %v1359_v54  ;;  %vm1358_vm4 = vcmp.eq.f32.partialorder %v1357_v30, 8.507059e+37  ;;  %v7257_v54 = vld [vmem:[#allocation83_spill] sm:$0xff]  ;;  %v7259_v30 = vld [vmem:[#allocation85_spill] sm:$0xff] }
 0x1a4   :  { %4600 = vtanh.f32 %v5632_v58 }
 0x1a6   :  { %1549 = vmatmul.bf16.vlgmr.msrb.gmra.mxu0 %v5592_v7  ;;  %1575 = vmatmul.bf16.vlgmr.msrb.gmra.mxu2 %v5592_v7 }
 0x1a7   :  { %v4599_v61 = vpop.eup %4598  ;;  %1593 = vmatpush.bf16.msra.mxu0 %v5376_v49  ;;  %1619 = vmatpush.bf16.msra.mxu2 %v5378_v1 }
 0x1a8   :  { %v1349_v62 = vmul.f32 %v4599_v61, %v1347_v43  ;;  %vm1354_vm1 = vweird.f32 %v4599_v61  ;;  %v7250_v43 = vld [vmem:[#allocation80_spill] sm:$0xff] }
 0x1a9   :  { %vm1355_vm3 = vmor %vm1353_vm2, %vm1354_vm1 }
 0x1aa   :  { %v1350_v2 = vsub.f32 1.0, %v1349_v62  ;;  %v4601_v13 = vpop.eup %4600  ;;  %v7255_v62 = vld [vmem:[#allocation81_spill] sm:$0xff] }
 0x1ab   :  { %1594 = vmatpush.bf16.msra.mxu0 %v5391_v37  ;;  %1620 = vmatpush.bf16.msra.mxu2 %v5393_v12 }
 0x1ac   :  { %v1351_v17 = vmul.f32 %v4599_v61, %v1350_v2  ;;  %v7256_v2 = vld [vmem:[#allocation86_spill] sm:$0xff] }
 0x1ae   :  { %v1352_v34 = vadd.f32 %v4599_v61, %v1351_v17  ;;  %v7258_v17 = vld [vmem:[#allocation88_spill] sm:$0xff] }
 0x1af   :  { %1595 = vmatpush.bf16.msra.mxu0 %v5402_v16  ;;  %1621 = vmatpush.bf16.msra.mxu2 %v5404_v21 }
 0x1b0   :  { %v1356_v8 = vsel %vm1355_vm3, %v4599_v61, %v1352_v34  ;;  %v7254_v61 = vld [vmem:[#allocation84_spill] sm:$0xff]  ;;  %v7260_v34 = vld [vmem:[#allocation90_spill] sm:$0xff] }
 0x1b1   :  { %v1361_v38 = vsel %vm1358_vm4, %v1360_v10, %v1356_v8  ;;  %v7261_v10 = vld [vmem:[#allocation87_spill] sm:$0xff]  ;;  %v7262_v8 = vld [vmem:[#allocation93_spill] sm:$0xff] }
 0x1b2   :  { %v1367_v56 = vmul.f32 %v4601_v13, %v1361_v38  ;;  %v7263_v13 = vld [vmem:[#allocation89_spill] sm:$0xff]  ;;  %v7265_v38 = vld [vmem:[#allocation91_spill] sm:$0xff] }
 0x1b3   :  { %1596 = vmatpush.bf16.msra.mxu0 %v5415_v29  ;;  %1622 = vmatpush.bf16.msra.mxu2 %v5417_v59 }
 0x1b4   :  { %v5645_v55 = vpack.c.bf16 %v1367_v56, %v1367_v56  ;;  %v7266_v56 = vld [vmem:[#allocation98_spill] sm:$0xff] }
 0x1b6   :  { %1458 = vmatmul.bf16.vlgmr.msra.gmra.mxu1 %v5645_v55  ;;  %1484 = vmatmul.bf16.vlgmr.msrb.gmra.mxu3 %v5645_v55 }
 0x1b7   :  { %1554 = vmatpush.bf16.msra.mxu1 %v7250_v43  ;;  %1580 = vmatpush.bf16.msrb.mxu3 %v7251_v18 }
 0x1b8   :  { %1597 = vmatpush.bf16.msra.mxu0 %v5423_v0  ;;  %1623 = vmatpush.bf16.msra.mxu2 %v5425_v31 }
 0x1bb   :  { %1555 = vmatpush.bf16.msra.mxu1 %v7252_v24  ;;  %1581 = vmatpush.bf16.msrb.mxu3 %v7253_v3 }
 0x1bc   :  { %1598 = vmatpush.bf16.msra.mxu0 %v5435_v51  ;;  %1624 = vmatpush.bf16.msra.mxu2 %v5437_v19 }
 0x1bf   :  { %1556 = vmatpush.bf16.msra.mxu1 %v7254_v61  ;;  %1582 = vmatpush.bf16.msrb.mxu3 %v7255_v62 }
 0x1c0   :  { %1599 = vmatpush.bf16.msra.mxu0 %v5443_v40  ;;  %1625 = vmatpush.bf16.msra.mxu2 %v5445_v44 }
 0x1c3   :  { %1557 = vmatpush.bf16.msra.mxu1 %v7256_v2  ;;  %1583 = vmatpush.bf16.msrb.mxu3 %v7257_v54 }
 0x1c4   :  { %1600 = vmatpush.bf16.msra.mxu0 %v5454_v27  ;;  %1626 = vmatpush.bf16.msra.mxu2 %v5456_v52 }
 0x1c6   :  { %1510 = vmatmul.bf16.vlgmr.msrb.gmra.mxu1 %v5645_v55  ;;  %1536 = vmatmul.bf16.vlgmr.msra.gmra.mxu3 %v5645_v55 }
 0x1c7   :  { %1558 = vmatpush.bf16.msra.mxu1 %v7258_v17  ;;  %1584 = vmatpush.bf16.msrb.mxu3 %v7259_v30 }
 0x1c8   :  { %1781 = vmatpush.bf16.msrb.mxu0 %v4935_v23  ;;  %1807 = vmatpush.bf16.msrb.mxu2 %v4939_v28 }
 0x1c9   :  { %1601 = vmatmul.bf16.vlgmr.msra.gmra.mxu0 %v5592_v7  ;;  %1627 = vmatmul.bf16.vlgmr.msra.gmra.mxu2 %v5592_v7  ;;  %v7264_v7 = vld [vmem:[#allocation95_spill] sm:$0xff] }
 0x1cb   :  { %1559 = vmatpush.bf16.msra.mxu1 %v7260_v34  ;;  %1585 = vmatpush.bf16.msrb.mxu3 %v7261_v10  ;;  %v7267_v34 = vld [vmem:[#allocation92_spill] sm:$0xff] }
 0x1cc   :  { %1782 = vmatpush.bf16.msrb.mxu0 %v4951_v36  ;;  %1808 = vmatpush.bf16.msrb.mxu2 %v4956_v41  ;;  %v7333_v36 = vld [vmem:[#allocation58_spill] sm:$0xff] }
 0x1cf   :  { %1560 = vmatpush.bf16.msra.mxu1 %v7262_v8  ;;  %1586 = vmatpush.bf16.msrb.mxu3 %v7263_v13  ;;  %v7268_v13 = vld [vmem:[#allocation102_spill] sm:$0xff] }
 0x1d0   :  { %1783 = vmatpush.bf16.msrb.mxu0 %v4965_v48  ;;  %1809 = vmatpush.bf16.msrb.mxu2 %v4970_v53  ;;  %v7332_v53 = vld [vmem:[#allocation140_spill] sm:$0xff] }
 0x1d3   :  { %1561 = vmatpush.bf16.msra.mxu1 %v7264_v7  ;;  %1587 = vmatpush.bf16.msrb.mxu3 %v7265_v38  ;;  %v7270_v38 = vld [vmem:[#allocation106_spill] sm:$0xff]  ;;  %v7319_v7 = vld [vmem:[#allocation55_spill] sm:$0xff] }
 0x1d4   :  { %1784 = vmatpush.bf16.msrb.mxu0 %v4978_v60  ;;  %1810 = vmatpush.bf16.msrb.mxu2 %v4983_v4  ;;  %v7269_v60 = vld [vmem:[#allocation94_spill] sm:$0xff]  ;;  %v7323_v4 = vld [vmem:[#allocation64_spill] sm:$0xff] }
 0x1d6   :  { %1562 = vmatmul.bf16.vlgmr.msra.gmra.mxu1 %v5645_v55  ;;  %1588 = vmatmul.bf16.vlgmr.msrb.gmra.mxu3 %v5645_v55 }
 0x1d7   :  { %1606 = vmatpush.bf16.msrb.mxu1 %v7266_v56  ;;  %1632 = vmatpush.bf16.msra.mxu3 %v7267_v34  ;;  %v7271_v56 = vld [vmem:[#allocation99_spill] sm:$0xff] }
 0x1d8   :  { %1785 = vmatpush.bf16.msrb.mxu0 %v4990_v9  ;;  %1811 = vmatpush.bf16.msrb.mxu2 %v4994_v14  ;;  %v7272_v14 = vld [vmem:[#allocation110_spill] sm:$0xff]  ;;  %v7273_v9 = vld [vmem:[#allocation103_spill] sm:$0xff] }
 0x1db   :  { %1607 = vmatpush.bf16.msrb.mxu1 %v7268_v13  ;;  %1633 = vmatpush.bf16.msra.mxu3 %v7269_v60  ;;  %v7274_v13 = vld [vmem:[#allocation43_spill] sm:$0xff]  ;;  %v7275_v60 = vld [vmem:[#allocation44_spill] sm:$0xff] }
 0x1dc   :  { %1786 = vmatpush.bf16.msrb.mxu0 %v5005_v25  ;;  %1812 = vmatpush.bf16.msrb.mxu2 %v5011_v33  ;;  %v7276_v25 = vld [vmem:[#allocation47_spill] sm:$0xff]  ;;  %v7277_v33 = vld [vmem:[#allocation114_spill] sm:$0xff] }
 0x1df   :  { %1608 = vmatpush.bf16.msrb.mxu1 %v7270_v38  ;;  %1634 = vmatpush.bf16.msra.mxu3 %v7271_v56  ;;  %v7278_v38 = vld [vmem:[#allocation107_spill] sm:$0xff]  ;;  %v7279_v56 = vld [vmem:[#allocation49_spill] sm:$0xff] }
 0x1e0   :  { %1787 = vmatpush.bf16.msrb.mxu0 %v7200_v57  ;;  %1813 = vmatpush.bf16.msrb.mxu2 %v7201_v11  ;;  %v7280_v57 = vld [vmem:[#allocation51_spill] sm:$0xff]  ;;  %v7281_v11 = vld [vmem:[#allocation117_spill] sm:$0xff] }
 0x1e3   :  { %1609 = vmatpush.bf16.msrb.mxu1 %v7272_v14  ;;  %1635 = vmatpush.bf16.msra.mxu3 %v7273_v9  ;;  %v7282_v14 = vld [vmem:[#allocation111_spill] sm:$0xff]  ;;  %v7283_v9 = vld [vmem:[#allocation54_spill] sm:$0xff] }
 0x1e4   :  { %1788 = vmatpush.bf16.msrb.mxu0 %v7205_v20  ;;  %1814 = vmatpush.bf16.msrb.mxu2 %v7274_v13  ;;  %v7284_v20 = vld [vmem:[#allocation56_spill] sm:$0xff]  ;;  %v7285_v13 = vld [vmem:[#allocation119_spill] sm:$0xff] }
 0x1e7   :  { %1610 = vmatpush.bf16.msrb.mxu1 %v7277_v33  ;;  %1636 = vmatpush.bf16.msra.mxu3 %v7278_v38  ;;  %v7288_v33 = vld [vmem:[#allocation61_spill] sm:$0xff]  ;;  %v7289_v38 = vld [vmem:[#allocation120_spill] sm:$0xff] }
 0x1e8   :  { %1833 = vmatpush.bf16.msra.mxu0 %v7275_v60  ;;  %1859 = vmatpush.bf16.msra.mxu2 %v7276_v25  ;;  %v7286_v60 = vld [vmem:[#allocation115_spill] sm:$0xff] }
 0x1e9   :  { %v7287_v25 = vld [vmem:[#allocation59_spill] sm:$0xff] }
 0x1eb   :  { %1611 = vmatpush.bf16.msrb.mxu1 %v7281_v11  ;;  %1637 = vmatpush.bf16.msra.mxu3 %v7282_v14  ;;  %v7292_v11 = vld [vmem:[#allocation8_spill] sm:$0xff]  ;;  %v7293_v14 = vld [vmem:[#allocation63_spill] sm:$0xff] }
 0x1ec   :  { %1834 = vmatpush.bf16.msra.mxu0 %v7279_v56  ;;  %1860 = vmatpush.bf16.msra.mxu2 %v7280_v57  ;;  %v7290_v56 = vld [vmem:[#allocation118_spill] sm:$0xff]  ;;  %v7291_v57 = vld [vmem:[#allocation11_spill] sm:$0xff] }
 0x1ef   :  { %1612 = vmatpush.bf16.msrb.mxu1 %v7285_v13  ;;  %1638 = vmatpush.bf16.msra.mxu3 %v7286_v60  ;;  %v7295_v60 = vld [vmem:[#allocation15_spill] sm:$0xff]  ;;  %v7304_v13 = vld [vmem:[#allocation17_spill] sm:$0xff] }
 0x1f0   :  { %1835 = vmatpush.bf16.msra.mxu0 %v7283_v9  ;;  %1861 = vmatpush.bf16.msra.mxu2 %v7284_v20  ;;  %v7294_v9 = vld [vmem:[#allocation65_spill] sm:$0xff]  ;;  %v7313_v20 = vld [vmem:[#allocation42_spill] sm:$0xff] }
 0x1f3   :  { %1613 = vmatpush.bf16.msrb.mxu1 %v7289_v38  ;;  %1639 = vmatpush.bf16.msra.mxu3 %v7290_v56  ;;  %v7298_v38 = vld [vmem:[#allocation69_spill] sm:$0xff]  ;;  %v7299_v56 = vld [vmem:[#allocation19_spill] sm:$0xff] }
 0x1f4   :  { %1836 = vmatpush.bf16.msra.mxu0 %v7287_v25  ;;  %1862 = vmatpush.bf16.msra.mxu2 %v7288_v33  ;;  %v7296_v25 = vld [vmem:[#allocation9_spill] sm:$0xff]  ;;  %v7297_v33 = vld [vmem:[#allocation67_spill] sm:$0xff] }
 0x1f6   :  { %1614 = vmatmul.bf16.vlgmr.msrb.gmra.mxu1 %v5645_v55  ;;  %1640 = vmatmul.bf16.vlgmr.msra.gmra.mxu3 %v5645_v55  ;;  %v7305_v55 = vld [vmem:[#allocation76_spill] sm:$0xff] }
 0x1f7   :  { %1794 = vmatpush.bf16.msra.mxu1 %v7291_v57  ;;  %1820 = vmatpush.bf16.msrb.mxu3 %v7292_v11  ;;  %v7300_v57 = vld [vmem:[#allocation13_spill] sm:$0xff]  ;;  %v7301_v11 = vld [vmem:[#allocation72_spill] sm:$0xff] }
 0x1f8   :  { %1837 = vmatpush.bf16.msra.mxu0 %v7293_v14  ;;  %1863 = vmatpush.bf16.msra.mxu2 %v7294_v9  ;;  %v7302_v14 = vld [vmem:[#allocation74_spill] sm:$0xff]  ;;  %v7303_v9 = vld [vmem:[#allocation23_spill] sm:$0xff] }
 0x1fb   :  { %1795 = vmatpush.bf16.msra.mxu1 %v7295_v60  ;;  %1821 = vmatpush.bf16.msrb.mxu3 %v7296_v25  ;;  %v7306_v60 = vld [vmem:[#allocation78_spill] sm:$0xff]  ;;  %v7307_v25 = vld [vmem:[#allocation27_spill] sm:$0xff] }
 0x1fc   :  { %1838 = vmatpush.bf16.msra.mxu0 %v7297_v33  ;;  %1864 = vmatpush.bf16.msra.mxu2 %v7298_v38  ;;  %v7308_v33 = vld [vmem:[#allocation21_spill] sm:$0xff]  ;;  %v7309_v38 = vld [vmem:[#allocation31_spill] sm:$0xff] }
 0x1ff   :  { %1796 = vmatpush.bf16.msra.mxu1 %v7299_v56  ;;  %1822 = vmatpush.bf16.msrb.mxu3 %v7300_v57  ;;  %v7310_v56 = vld [vmem:[#allocation25_spill] sm:$0xff] }
 0x200   :  { %1839 = vmatpush.bf16.msra.mxu0 %v7301_v11  ;;  %1865 = vmatpush.bf16.msra.mxu2 %v7302_v14  ;;  %v7311_v11 = vld [vmem:[#allocation36_spill] sm:$0xff]  ;;  %v7312_v14 = vld [vmem:[#allocation29_spill] sm:$0xff] }
 0x203   :  { %1797 = vmatpush.bf16.msra.mxu1 %v7303_v9  ;;  %1823 = vmatpush.bf16.msrb.mxu3 %v7304_v13  ;;  %v1446_v57 = vpop.f32.mrf.mxu0  ;;  %v7314_v13 = vld [vmem:[#allocation33_spill] sm:$0xff] }
 0x204   :  { %1840 = vmatpush.bf16.msra.mxu0 %v7305_v55  ;;  %1866 = vmatpush.bf16.msra.mxu2 %v7306_v60  ;;  %v7315_v60 = vld [vmem:[#allocation46_spill] sm:$0xff] }
 0x207   :  { %1798 = vmatpush.bf16.msra.mxu1 %v7307_v25  ;;  %1824 = vmatpush.bf16.msrb.mxu3 %v7308_v33  ;;  %v7316_v25 = vld [vmem:[#allocation34_spill] sm:$0xff] }
 0x208   :  { %v7317_v33 = vld [vmem:[#allocation50_spill] sm:$0xff] }
 0x209   :  { %v1472_v9 = vpop.f32.mrf.mxu2 }
 0x20b   :  { %1799 = vmatpush.bf16.msra.mxu1 %v7309_v38  ;;  %1825 = vmatpush.bf16.msrb.mxu3 %v7310_v56  ;;  %v1448_v55 = vpop.f32.mrf.mxu0  ;;  %v7318_v38 = vld [vmem:[#allocation39_spill] sm:$0xff] }
 0x20f   :  { %1800 = vmatpush.bf16.msra.mxu1 %v7311_v11  ;;  %1826 = vmatpush.bf16.msrb.mxu3 %v7312_v14  ;;  %v7320_v11 = vld [vmem:[#allocation48_spill] sm:$0xff] }
 0x210   :  { %v7321_v14 = vld [vmem:[#allocation60_spill] sm:$0xff] }
 0x211   :  { %v1474_v56 = vpop.f32.mrf.mxu2 }
 0x213   :  { %1801 = vmatpush.bf16.msra.mxu1 %v7313_v20  ;;  %1827 = vmatpush.bf16.msrb.mxu3 %v7314_v13  ;;  %v1498_v34 = vpop.f32.mrf.mxu0  ;;  %v7322_v20 = vld [vmem:[#allocation52_spill] sm:$0xff] }
 0x217   :  { %1846 = vmatpush.bf16.msrb.mxu1 %v7315_v60  ;;  %1872 = vmatpush.bf16.msra.mxu3 %v7316_v25  ;;  %v7324_v60 = vld [vmem:[#allocation57_spill] sm:$0xff]  ;;  %v7325_v25 = vld [vmem:[#allocation68_spill] sm:$0xff] }
 0x219   :  { %v1524_v13 = vpop.f32.mrf.mxu2 }
 0x21b   :  { %1847 = vmatpush.bf16.msrb.mxu1 %v7317_v33  ;;  %1873 = vmatpush.bf16.msra.mxu3 %v7318_v38  ;;  %v1500_v55 = vpop.f32.mrf.mxu0  ;;  %v7326_v33 = vld [vmem:[#allocation62_spill] sm:$0xff] }
 0x21f   :  { %1848 = vmatpush.bf16.msrb.mxu1 %v7319_v7  ;;  %1874 = vmatpush.bf16.msra.mxu3 %v7320_v11  ;;  %v7327_v7 = vld [vmem:[#allocation73_spill] sm:$0xff]  ;;  %v7328_v11 = vld [vmem:[#allocation66_spill] sm:$0xff] }
 0x221   :  { %v1526_v56 = vpop.f32.mrf.mxu2 }
 0x223   :  { %1849 = vmatpush.bf16.msrb.mxu1 %v7321_v14  ;;  %1875 = vmatpush.bf16.msra.mxu3 %v7322_v20  ;;  %v5757_v38 = vpop.f32.mrf.mxu0  ;;  %v7329_v14 = vld [vmem:[#allocation77_spill] sm:$0xff]  ;;  %v7330_v20 = vld [vmem:[#allocation70_spill] sm:$0xff] }
 0x227   :  { %1850 = vmatpush.bf16.msrb.mxu1 %v7323_v4  ;;  %1876 = vmatpush.bf16.msra.mxu3 %v7324_v60  ;;  %v7331_v60 = vld [vmem:[#allocation38_spill] sm:$0xff] }
 0x229   :  { %v5763_v55 = vpop.f32.mrf.mxu2 }
 0x22b   :  { %1851 = vmatpush.bf16.msrb.mxu1 %v7325_v25  ;;  %1877 = vmatpush.bf16.msra.mxu3 %v7326_v33  ;;  %v1552_v4 = vpop.f32.mrf.mxu0  ;;  %v149_v25 = vadd.f32 %v7332_v53, %v7331_v60 }
 0x22f   :  { %1852 = vmatpush.bf16.msrb.mxu1 %v7327_v7  ;;  %1878 = vmatpush.bf16.msra.mxu3 %v7328_v11  ;;  %v7334_v7 = vld [vmem:[#allocation121_spill] sm:$0xff] }
 0x230   :  { %v178_v30 = vadd.f32 %v7334_v7, %v7333_v36 }
 0x231   :  { %v1578_v33 = vpop.f32.mrf.mxu2 }
 0x232   :  { %v7336_v33 = vld [vmem:[#allocation135_spill] sm:$0xff] }
 0x233   :  { %1853 = vmatpush.bf16.msrb.mxu1 %v7329_v14  ;;  %1879 = vmatpush.bf16.msra.mxu3 %v7330_v20  ;;  %v1459_v8 = vpop.f32.mrf.mxu1 }
 0x234   :  { %v1460_v48 = vadd.f32 %v1459_v8, %v1446_v57 }
 0x236   :  { %v1712_v56 = vadd.f32 %v1460_v48, %v149_v25  ;;  %v7335_v25 = vld [vmem:[#allocation79_spill] sm:$0xff] }
 0x237   :  { %v207_v8 = vadd.f32 %v7336_v33, %v7335_v25 }
 0x238   :  { %v4333_v10 = vmul.f32 -1.442695, %v1712_v56 }
 0x239   :  { %v1485_v41 = vpop.f32.mrf.mxu3 }
 0x23a   :  { %4602 = vpow2.f32 %v4333_v10  ;;  %v1486_v11 = vadd.f32 %v1485_v41, %v1472_v9 }
 0x23b   :  { %v1461_v14 = vpop.f32.mrf.mxu1 }
 0x23c   :  { %v1713_v17 = vadd.f32 %v1486_v11, %v178_v30  ;;  %v7337_v14 = vld [vmem:[#allocation45_spill] sm:$0xff]  ;;  %v7338_v11 = vld [vmem:[#allocation122_spill] sm:$0xff] }
 0x23e   :  { %v4334_v20 = vmul.f32 -1.442695, %v1713_v17  ;;  %v236_v17 = vadd.f32 %v7338_v11, %v7337_v14 }
 0x240   :  { %v4603_v28 = vpop.eup %4602  ;;  %4604 = vpow2.f32 %v4334_v20 }
 0x241   :  { %v1719_v4 = vadd.f32 1.0, %v4603_v28  ;;  %v1487_v23 = vpop.f32.mrf.mxu3 }
 0x243   :  { %4606 = vrcp.f32 %v1719_v4  ;;  %v1511_v52 = vpop.f32.mrf.mxu1  ;;  %v1731_v10 = vand.u32 2147483648, %v1719_v4  ;;  %vm1725_vm6 = vweird.f32 %v1719_v4 }
 0x244   :  { %v1512_v53 = vadd.f32 %v1511_v52, %v1498_v34 }
 0x245   :  { %v1732_v11 = vor.u32 1.1754944e-38, %v1731_v10 }
 0x246   :  { %v5769_v57 = vpop.f32.mrf.mxu0  ;;  %v4605_v48 = vpop.eup %4604  ;;  %v1714_v41 = vadd.f32 %v1512_v53, %v207_v8 }
 0x247   :  { %v1738_v56 = vadd.f32 1.0, %v4605_v48  ;;  %v1729_v48 = vand.u32 2147483647, %v1719_v4 }
 0x249   :  { %v4607_v7 = vpop.eup %4606  ;;  %4608 = vrcp.f32 %v1738_v56  ;;  %v1537_v9 = vpop.f32.mrf.mxu3  ;;  %vm1730_vm8 = vcmp.eq.f32.partialorder %v1729_v48, 8.507059e+37  ;;  %vm1744_vm10 = vweird.f32 %v1738_v56 }
 0x24a   :  { %v1721_v20 = vmul.f32 %v4607_v7, %v1719_v4  ;;  %v1538_v28 = vadd.f32 %v1537_v9, %v1524_v13  ;;  %4610 = vtanh.f32 %v1714_v41  ;;  %vm1726_vm5 = vweird.f32 %v4607_v7 }
 0x24b   :  { %v1513_v30 = vpop.f32.mrf.mxu1  ;;  %vm1727_vm7 = vmor %vm1725_vm6, %vm1726_vm5  ;;  %v1748_v41 = vand.u32 2147483647, %v1738_v56 }
 0x24c   :  { %v5775_v23 = vpop.f32.mrf.mxu2  ;;  %v1722_v52 = vsub.f32 1.0, %v1721_v20  ;;  %v1715_v34 = vadd.f32 %v1538_v28, %v236_v17  ;;  %v1750_v17 = vand.u32 2147483648, %v1738_v56 }
 0x24d   :  { %vm1749_vm12 = vcmp.eq.f32.partialorder %v1748_v41, 8.507059e+37 }
 0x24e   :  { %v1604_v36 = vpop.f32.mrf.mxu0  ;;  %v1723_v60 = vmul.f32 %v4607_v7, %v1722_v52  ;;  %v4335_v33 = vmul.f32 -1.442695, %v1715_v34 }
 0x24f   :  { %v4609_v25 = vpop.eup %4608 }
 0x250   :  { %v1740_v53 = vmul.f32 %v4609_v25, %v1738_v56  ;;  %v1724_v8 = vadd.f32 %v4607_v7, %v1723_v60  ;;  %4612 = vpow2.f32 %v4335_v33  ;;  %v4611_v20 = vpop.eup %4610  ;;  %vm1745_vm9 = vweird.f32 %v4609_v25  ;;  %v7339_v33 = vld [vmem:[#allocation149_spill] sm:$0xff] }
 0x251   :  { %v1539_v13 = vpop.f32.mrf.mxu3  ;;  %vm1746_vm11 = vmor %vm1744_vm10, %vm1745_vm9 }
 0x252   :  { %v1741_v9 = vsub.f32 1.0, %v1740_v53  ;;  %v1728_v14 = vsel %vm1727_vm7, %v4607_v7, %v1724_v8  ;;  %v1751_v53 = vor.u32 1.1754944e-38, %v1750_v17 }
 0x253   :  { %v1733_v28 = vsel %vm1730_vm8, %v1732_v11, %v1728_v14  ;;  %v1563_v30 = vpop.f32.mrf.mxu1 }
 0x254   :  { %v1630_v36 = vpop.f32.mrf.mxu2  ;;  %v1742_v52 = vmul.f32 %v4609_v25, %v1741_v9  ;;  %v1775_v34 = vmul.f32 %v4611_v20, %v1733_v28  ;;  %v1564_v27 = vadd.f32 %v1563_v30, %v5757_v38 }
 0x256   :  { %v4613_v60 = vpop.eup %4612  ;;  %v1743_v4 = vadd.f32 %v4609_v25, %v1742_v52  ;;  %v1645_v10 = vadd.f32 %v1564_v27, %v7339_v33 }
 0x257   :  { %v1758_v7 = vadd.f32 1.0, %v4613_v60 }
 0x258   :  { %v1747_v48 = vsel %vm1746_vm11, %v4609_v25, %v1743_v4  ;;  %v4330_v13 = vmul.f32 -1.442695, %v1645_v10 }
 0x259   :  { %v1752_v8 = vsel %vm1749_vm12, %v1751_v53, %v1747_v48  ;;  %4614 = vrcp.f32 %v1758_v7  ;;  %v1589_v14 = vpop.f32.mrf.mxu3  ;;  %v1770_v36 = vand.u32 2147483648, %v1758_v7  ;;  %v1768_v52 = vand.u32 2147483647, %v1758_v7 }
 0x25a   :  { %v1774_v11 = vmul.f32 %v1752_v8, %v5583_v42  ;;  %v1590_v9 = vadd.f32 %v1589_v14, %v5763_v55  ;;  %4616 = vpow2.f32 %v4330_v13  ;;  %vm1764_vm14 = vweird.f32 %v1758_v7  ;;  %v7340_v13 = vld [vmem:[#allocation96_spill] sm:$0xff] }
 0x25b   :  { %v1565_v20 = vpop.f32.mrf.mxu1  ;;  %vm1769_vm0 = vcmp.eq.f32.partialorder %v1768_v52, 8.507059e+37 }
 0x25c   :  { %v5781_v38 = vadd.f32 %v1775_v34, %v1774_v11  ;;  %v1646_v56 = vadd.f32 %v1590_v9, %v5578_v45  ;;  %v1771_v34 = vor.u32 1.1754944e-38, %v1770_v36  ;;  %v7341_v9 = vld [vmem:[#allocation97_spill] sm:$0xff] }
 0x25e   :  { %v4331_v27 = vmul.f32 -1.442695, %v1646_v56 }
 0x25f   :  { %v4615_v28 = vpop.eup %4614 }
 0x260   :  { %v1760_v17 = vmul.f32 %v4615_v28, %v1758_v7  ;;  %4618 = vpow2.f32 %v4331_v27  ;;  %v4617_v30 = vpop.eup %4616  ;;  %vm1765_vm13 = vweird.f32 %v4615_v28 }
 0x261   :  { %v1591_v25 = vpop.f32.mrf.mxu3  ;;  %4620 = vtanh.f32 %v5781_v38  ;;  %vm1766_vm15 = vmor %vm1764_vm14, %vm1765_vm13  ;;  %v5785_v4 = vadd.f32 1.0, %v4617_v30 }
 0x262   :  { %v1761_v41 = vsub.f32 1.0, %v1760_v17  ;;  %v7343_v17 = vld [vmem:[#allocation101_spill] sm:$0xff] }
 0x263   :  { %vm1658_vm5 = vweird.f32 %v5785_v4 }
 0x264   :  { %v1762_v42 = vmul.f32 %v4615_v28, %v1761_v41 }
 0x266   :  { %v4619_v55 = vpop.eup %4618  ;;  %v1763_v60 = vadd.f32 %v4615_v28, %v1762_v42 }
 0x267   :  { %v1671_v10 = vadd.f32 1.0, %v4619_v55  ;;  %v4621_v48 = vpop.eup %4620 }
 0x268   :  { %v1767_v53 = vsel %vm1766_vm15, %v4615_v28, %v1763_v60  ;;  %v7342_v28 = vld [vmem:[#allocation100_spill] sm:$0xff] }
 0x269   :  { %v1772_v8 = vsel %vm1769_vm0, %v1771_v34, %v1767_v53  ;;  %4622 = vrcp.f32 %v1671_v10  ;;  %vm1677_vm2 = vweird.f32 %v1671_v10 }
 0x26a   :  { %v1778_v14 = vmul.f32 %v4621_v48, %v1772_v8  ;;  %4624 = vrcp.f32 %v5785_v4 }
 0x26c   :  { %v5788_v11 = vpack.c.bf16 %v1778_v14, %v1778_v14  ;;  %v1683_v14 = vand.u32 2147483648, %v1671_v10 }
 0x26e   :  { %1789 = vmatmul.bf16.vlgmr.msrb.gmra.mxu0 %v5788_v11  ;;  %1815 = vmatmul.bf16.vlgmr.msrb.gmra.mxu2 %v5788_v11 }
 0x26f   :  { %v4623_v7 = vpop.eup %4622  ;;  %1885 = vmatpush.bf16.msrb.mxu0 %v7340_v13  ;;  %1911 = vmatpush.bf16.msrb.mxu2 %v7341_v9 }
 0x270   :  { %v4625_v56 = vpop.eup %4624  ;;  %v1673_v27 = vmul.f32 %v4623_v7, %v1671_v10  ;;  %vm1678_vm1 = vweird.f32 %v4623_v7 }
 0x271   :  { %v1654_v25 = vmul.f32 %v4625_v56, %v5785_v4  ;;  %vm1659_vm3 = vweird.f32 %v4625_v56  ;;  %vm5809_vm4 = vmor %vm1677_vm2, %vm1678_vm1 }
 0x272   :  { %v1674_v41 = vsub.f32 1.0, %v1673_v27  ;;  %v7345_v27 = vld [vmem:[#allocation113_spill] sm:$0xff]  ;;  %vm1660_vm6 = vmor %vm1658_vm5, %vm1659_vm3 }
 0x273   :  { %v1615_v20 = vpop.f32.mrf.mxu1  ;;  %1886 = vmatpush.bf16.msrb.mxu0 %v7342_v28  ;;  %1912 = vmatpush.bf16.msrb.mxu2 %v7343_v17  ;;  %v1655_v52 = vsub.f32 1.0, %v1654_v25 }
 0x274   :  { %v1616_v30 = vadd.f32 %v1615_v20, %v5769_v57  ;;  %v1675_v34 = vmul.f32 %v4623_v7, %v1674_v41  ;;  %v7344_v20 = vld [vmem:[#allocation112_spill] sm:$0xff]  ;;  %v1681_v41 = vand.u32 2147483647, %v1671_v10 }
 0x275   :  { %v1656_v8 = vmul.f32 %v4625_v56, %v1655_v52 }
 0x276   :  { %v1647_v53 = vadd.f32 %v1616_v30, %v5606_v63  ;;  %v1676_v57 = vadd.f32 %v4623_v7, %v1675_v34  ;;  %v1664_v30 = vand.u32 2147483648, %v5785_v4  ;;  %vm1682_vm7 = vcmp.eq.f32.partialorder %v1681_v41, 8.507059e+37 }
 0x277   :  { %1887 = vmatpush.bf16.msrb.mxu0 %v7243_v50  ;;  %1913 = vmatpush.bf16.msrb.mxu2 %v7244_v5  ;;  %v1657_v25 = vadd.f32 %v4625_v56, %v1656_v8 }
 0x278   :  { %v1680_v52 = vsel %vm5809_vm4, %v4623_v7, %v1676_v57 }
 0x279   :  { %v1641_v36 = vpop.f32.mrf.mxu3  ;;  %v1661_v10 = vsel %vm1660_vm6, %v4625_v56, %v1657_v25 }
 0x27a   :  { %v1642_v42 = vadd.f32 %v1641_v36, %v5775_v23 }
 0x27b   :  { %v1617_v55 = vpop.f32.mrf.mxu1  ;;  %1888 = vmatpush.bf16.msrb.mxu0 %v7245_v6  ;;  %1914 = vmatpush.bf16.msrb.mxu2 %v7246_v39 }
 0x27c   :  { %v1648_v60 = vadd.f32 %v1642_v42, %v5603_v15  ;;  %v1662_v42 = vand.u32 2147483647, %v5785_v4 }
 0x27e   :  { %v4332_v48 = vmul.f32 -1.442695, %v1648_v60  ;;  %1841 = vmatmul.bf16.vlgmr.msra.gmra.mxu0 %v5788_v11  ;;  %1867 = vmatmul.bf16.vlgmr.msra.gmra.mxu2 %v5788_v11  ;;  %v1684_v60 = vor.u32 1.1754944e-38, %v1683_v14  ;;  %vm1663_vm8 = vcmp.eq.f32.partialorder %v1662_v42, 8.507059e+37 }
 0x27f   :  { %1889 = vmatpush.bf16.msrb.mxu0 %v7344_v20  ;;  %1915 = vmatpush.bf16.msrb.mxu2 %v7345_v27 }
 0x280   :  { %4626 = vpow2.f32 %v4332_v48  ;;  %v1665_v48 = vor.u32 1.1754944e-38, %v1664_v30  ;;  %v1685_v8 = vsel %vm1682_vm7, %v1684_v60, %v1680_v52 }
 0x281   :  { %v1643_v23 = vpop.f32.mrf.mxu3  ;;  %4628 = vtanh.f32 %v1647_v53  ;;  %v1707_v4 = vmul.f32 %v1685_v8, %v5632_v58  ;;  %v7350_v8 = vld [vmem:[#allocation10_spill] sm:$0xff] }
 0x282   :  { %v1666_v23 = vsel %vm1663_vm8, %v1665_v48, %v1661_v10  ;;  %v7349_v48 = vld [vmem:[#allocation130_spill] sm:$0xff] }
 0x283   :  { %1890 = vmatpush.bf16.msrb.mxu0 %v5349_v22  ;;  %1916 = vmatpush.bf16.msrb.mxu2 %v7249_v32 }
 0x286   :  { %v4627_v55 = vpop.eup %4626 }
 0x287   :  { %v1691_v34 = vadd.f32 1.0, %v4627_v55  ;;  %v4629_v53 = vpop.eup %4628  ;;  %1891 = vmatpush.bf16.msrb.mxu0 %v5361_v47  ;;  %1917 = vmatpush.bf16.msrb.mxu2 %v5363_v35 }
 0x288   :  { %v1708_v7 = vmul.f32 %v4629_v53, %v1666_v23  ;;  %v7351_v23 = vld [vmem:[#allocation12_spill] sm:$0xff] }
 0x289   :  { %4630 = vrcp.f32 %v1691_v34  ;;  %v1703_v58 = vand.u32 2147483648, %v1691_v34  ;;  %v1701_v36 = vand.u32 2147483647, %v1691_v34  ;;  %vm1697_vm10 = vweird.f32 %v1691_v34 }
 0x28a   :  { %v5825_v57 = vadd.f32 %v1708_v7, %v1707_v4  ;;  %v7352_v4 = vld [vmem:[#allocation88_spill] sm:$0xff]  ;;  %v7353_v7 = vld [vmem:[#allocation85_spill] sm:$0xff] }
 0x28b   :  { %1892 = vmatpush.bf16.msrb.mxu0 %v5372_v46  ;;  %1918 = vmatpush.bf16.msrb.mxu2 %v5374_v26  ;;  %v1704_v42 = vor.u32 1.1754944e-38, %v1703_v58  ;;  %vm1702_vm12 = vcmp.eq.f32.partialorder %v1701_v36, 8.507059e+37  ;;  %v7357_v58 = vld [vmem:[#allocation87_spill] sm:$0xff]  ;;  %v7359_v36 = vld [vmem:[#allocation20_spill] sm:$0xff] }
 0x28c   :  { %4632 = vtanh.f32 %v5825_v57 }
 0x28e   :  { %1893 = vmatmul.bf16.vlgmr.msrb.gmra.mxu0 %v5788_v11  ;;  %1919 = vmatmul.bf16.vlgmr.msrb.gmra.mxu2 %v5788_v11 }
 0x28f   :  { %v4631_v56 = vpop.eup %4630  ;;  %1937 = vmatpush.bf16.msra.mxu0 %v5376_v49  ;;  %1963 = vmatpush.bf16.msra.mxu2 %v5378_v1 }
 0x290   :  { %v1693_v14 = vmul.f32 %v4631_v56, %v1691_v34  ;;  %vm1698_vm9 = vweird.f32 %v4631_v56  ;;  %v7348_v34 = vld [vmem:[#allocation129_spill] sm:$0xff] }
 0x291   :  { %vm1699_vm11 = vmor %vm1697_vm10, %vm1698_vm9 }
 0x292   :  { %v1694_v25 = vsub.f32 1.0, %v1693_v14  ;;  %v4633_v55 = vpop.eup %4632  ;;  %v7355_v14 = vld [vmem:[#allocation16_spill] sm:$0xff] }
 0x293   :  { %1938 = vmatpush.bf16.msra.mxu0 %v5391_v37  ;;  %1964 = vmatpush.bf16.msra.mxu2 %v5393_v12 }
 0x294   :  { %v1695_v41 = vmul.f32 %v4631_v56, %v1694_v25  ;;  %v7356_v25 = vld [vmem:[#allocation90_spill] sm:$0xff] }
 0x296   :  { %v1696_v30 = vadd.f32 %v4631_v56, %v1695_v41  ;;  %v7358_v41 = vld [vmem:[#allocation18_spill] sm:$0xff] }
 0x297   :  { %1939 = vmatpush.bf16.msra.mxu0 %v5402_v16  ;;  %1965 = vmatpush.bf16.msra.mxu2 %v5404_v21 }
 0x298   :  { %v1700_v52 = vsel %vm1699_vm11, %v4631_v56, %v1696_v30  ;;  %v7354_v56 = vld [vmem:[#allocation14_spill] sm:$0xff]  ;;  %v7360_v30 = vld [vmem:[#allocation93_spill] sm:$0xff] }
 0x299   :  { %v1705_v60 = vsel %vm1702_vm12, %v1704_v42, %v1700_v52  ;;  %v7361_v42 = vld [vmem:[#allocation89_spill] sm:$0xff]  ;;  %v7362_v52 = vld [vmem:[#allocation22_spill] sm:$0xff] }
 0x29a   :  { %v1711_v10 = vmul.f32 %v4633_v55, %v1705_v60  ;;  %v7363_v55 = vld [vmem:[#allocation24_spill] sm:$0xff]  ;;  %v7365_v60 = vld [vmem:[#allocation91_spill] sm:$0xff] }
 0x29b   :  { %1940 = vmatpush.bf16.msra.mxu0 %v5415_v29  ;;  %1966 = vmatpush.bf16.msra.mxu2 %v5417_v59 }
 0x29c   :  { %v5838_v53 = vpack.c.bf16 %v1711_v10, %v1711_v10  ;;  %v7366_v10 = vld [vmem:[#allocation98_spill] sm:$0xff] }
 0x29e   :  { %1802 = vmatmul.bf16.vlgmr.msra.gmra.mxu1 %v5838_v53  ;;  %1828 = vmatmul.bf16.vlgmr.msrb.gmra.mxu3 %v5838_v53 }
 0x29f   :  { %1898 = vmatpush.bf16.msra.mxu1 %v7250_v43  ;;  %1924 = vmatpush.bf16.msrb.mxu3 %v7251_v18 }
 0x2a0   :  { %1941 = vmatpush.bf16.msra.mxu0 %v5423_v0  ;;  %1967 = vmatpush.bf16.msra.mxu2 %v5425_v31 }
 0x2a3   :  { %1899 = vmatpush.bf16.msra.mxu1 %v7252_v24  ;;  %1925 = vmatpush.bf16.msrb.mxu3 %v7253_v3 }
 0x2a4   :  { %1942 = vmatpush.bf16.msra.mxu0 %v5435_v51  ;;  %1968 = vmatpush.bf16.msra.mxu2 %v5437_v19 }
 0x2a7   :  { %1900 = vmatpush.bf16.msra.mxu1 %v7254_v61  ;;  %1926 = vmatpush.bf16.msrb.mxu3 %v7255_v62 }
 0x2a8   :  { %1943 = vmatpush.bf16.msra.mxu0 %v5443_v40  ;;  %1969 = vmatpush.bf16.msra.mxu2 %v5445_v44 }
 0x2ab   :  { %1901 = vmatpush.bf16.msra.mxu1 %v7256_v2  ;;  %1927 = vmatpush.bf16.msrb.mxu3 %v7257_v54  ;;  %v7440_v54 = vld [vmem:[#allocation58_spill] sm:$0xff] }
 0x2ac   :  { %1944 = vmatpush.bf16.msra.mxu0 %v7348_v34  ;;  %1970 = vmatpush.bf16.msra.mxu2 %v7349_v48 }
 0x2ae   :  { %1854 = vmatmul.bf16.vlgmr.msrb.gmra.mxu1 %v5838_v53  ;;  %1880 = vmatmul.bf16.vlgmr.msra.gmra.mxu3 %v5838_v53 }
 0x2af   :  { %1902 = vmatpush.bf16.msra.mxu1 %v7352_v4  ;;  %1928 = vmatpush.bf16.msrb.mxu3 %v7353_v7  ;;  %v7430_v7 = vld [vmem:[#allocation64_spill] sm:$0xff]  ;;  %v7434_v4 = vld [vmem:[#allocation73_spill] sm:$0xff] }
 0x2b0   :  { %2125 = vmatpush.bf16.msrb.mxu0 %v7350_v8  ;;  %2151 = vmatpush.bf16.msrb.mxu2 %v7351_v23  ;;  %v7438_v23 = vld [vmem:[#allocation38_spill] sm:$0xff] }
 0x2b1   :  { %1945 = vmatmul.bf16.vlgmr.msra.gmra.mxu0 %v5788_v11  ;;  %1971 = vmatmul.bf16.vlgmr.msra.gmra.mxu2 %v5788_v11  ;;  %v7364_v11 = vld [vmem:[#allocation95_spill] sm:$0xff] }
 0x2b3   :  { %1903 = vmatpush.bf16.msra.mxu1 %v7356_v25  ;;  %1929 = vmatpush.bf16.msrb.mxu3 %v7357_v58  ;;  %v7367_v25 = vld [vmem:[#allocation92_spill] sm:$0xff]  ;;  %v7368_v58 = vld [vmem:[#allocation26_spill] sm:$0xff] }
 0x2b4   :  { %2126 = vmatpush.bf16.msrb.mxu0 %v7354_v56  ;;  %2152 = vmatpush.bf16.msrb.mxu2 %v7355_v14  ;;  %v7426_v56 = vld [vmem:[#allocation55_spill] sm:$0xff] }
 0x2b7   :  { %1904 = vmatpush.bf16.msra.mxu1 %v7360_v30  ;;  %1930 = vmatpush.bf16.msrb.mxu3 %v7361_v42  ;;  %v7370_v42 = vld [vmem:[#allocation102_spill] sm:$0xff]  ;;  %v7379_v30 = vld [vmem:[#allocation103_spill] sm:$0xff] }
 0x2b8   :  { %2127 = vmatpush.bf16.msrb.mxu0 %v7358_v41  ;;  %2153 = vmatpush.bf16.msrb.mxu2 %v7359_v36  ;;  %v7369_v41 = vld [vmem:[#allocation28_spill] sm:$0xff] }
 0x2b9   :  { %v7380_v36 = vld [vmem:[#allocation40_spill] sm:$0xff] }
 0x2bb   :  { %1905 = vmatpush.bf16.msra.mxu1 %v7364_v11  ;;  %1931 = vmatpush.bf16.msrb.mxu3 %v7365_v60  ;;  %v7373_v11 = vld [vmem:[#allocation32_spill] sm:$0xff]  ;;  %v7374_v60 = vld [vmem:[#allocation106_spill] sm:$0xff] }
 0x2bc   :  { %2128 = vmatpush.bf16.msrb.mxu0 %v7362_v52  ;;  %2154 = vmatpush.bf16.msrb.mxu2 %v7363_v55  ;;  %v7371_v52 = vld [vmem:[#allocation94_spill] sm:$0xff] }
 0x2bd   :  { %v7372_v55 = vld [vmem:[#allocation30_spill] sm:$0xff] }
 0x2be   :  { %1906 = vmatmul.bf16.vlgmr.msra.gmra.mxu1 %v5838_v53  ;;  %1932 = vmatmul.bf16.vlgmr.msrb.gmra.mxu3 %v5838_v53 }
 0x2bf   :  { %1950 = vmatpush.bf16.msrb.mxu1 %v7366_v10  ;;  %1976 = vmatpush.bf16.msra.mxu3 %v7367_v25  ;;  %v7375_v10 = vld [vmem:[#allocation99_spill] sm:$0xff] }
 0x2c0   :  { %2129 = vmatpush.bf16.msrb.mxu0 %v7368_v58  ;;  %2155 = vmatpush.bf16.msrb.mxu2 %v7369_v41  ;;  %v7376_v25 = vld [vmem:[#allocation35_spill] sm:$0xff]  ;;  %v7377_v58 = vld [vmem:[#allocation37_spill] sm:$0xff]  ;;  %v7378_v41 = vld [vmem:[#allocation110_spill] sm:$0xff] }
 0x2c3   :  { %1951 = vmatpush.bf16.msrb.mxu1 %v7370_v42  ;;  %1977 = vmatpush.bf16.msra.mxu3 %v7371_v52  ;;  %v7381_v42 = vld [vmem:[#allocation43_spill] sm:$0xff]  ;;  %v7382_v52 = vld [vmem:[#allocation44_spill] sm:$0xff] }
 0x2c4   :  { %2130 = vmatpush.bf16.msrb.mxu0 %v7372_v55  ;;  %2156 = vmatpush.bf16.msrb.mxu2 %v7373_v11  ;;  %v7383_v55 = vld [vmem:[#allocation47_spill] sm:$0xff]  ;;  %v7384_v11 = vld [vmem:[#allocation114_spill] sm:$0xff] }
 0x2c7   :  { %1952 = vmatpush.bf16.msrb.mxu1 %v7374_v60  ;;  %1978 = vmatpush.bf16.msra.mxu3 %v7375_v10  ;;  %v7385_v60 = vld [vmem:[#allocation107_spill] sm:$0xff]  ;;  %v7386_v10 = vld [vmem:[#allocation49_spill] sm:$0xff] }
 0x2c8   :  { %2131 = vmatpush.bf16.msrb.mxu0 %v7376_v25  ;;  %2157 = vmatpush.bf16.msrb.mxu2 %v7377_v58  ;;  %v7387_v25 = vld [vmem:[#allocation51_spill] sm:$0xff]  ;;  %v7388_v58 = vld [vmem:[#allocation117_spill] sm:$0xff] }
 0x2cb   :  { %1953 = vmatpush.bf16.msrb.mxu1 %v7378_v41  ;;  %1979 = vmatpush.bf16.msra.mxu3 %v7379_v30  ;;  %v7389_v41 = vld [vmem:[#allocation111_spill] sm:$0xff]  ;;  %v7390_v30 = vld [vmem:[#allocation54_spill] sm:$0xff] }
 0x2cc   :  { %2132 = vmatpush.bf16.msrb.mxu0 %v7380_v36  ;;  %2158 = vmatpush.bf16.msrb.mxu2 %v7381_v42  ;;  %v7391_v36 = vld [vmem:[#allocation56_spill] sm:$0xff]  ;;  %v7392_v42 = vld [vmem:[#allocation119_spill] sm:$0xff] }
 0x2cf   :  { %1954 = vmatpush.bf16.msrb.mxu1 %v7384_v11  ;;  %1980 = vmatpush.bf16.msra.mxu3 %v7385_v60  ;;  %v7395_v11 = vld [vmem:[#allocation61_spill] sm:$0xff]  ;;  %v7396_v60 = vld [vmem:[#allocation120_spill] sm:$0xff] }
 0x2d0   :  { %2177 = vmatpush.bf16.msra.mxu0 %v7382_v52  ;;  %2203 = vmatpush.bf16.msra.mxu2 %v7383_v55  ;;  %v7393_v52 = vld [vmem:[#allocation115_spill] sm:$0xff] }
 0x2d1   :  { %v7394_v55 = vld [vmem:[#allocation59_spill] sm:$0xff] }
 0x2d3   :  { %1955 = vmatpush.bf16.msrb.mxu1 %v7388_v58  ;;  %1981 = vmatpush.bf16.msra.mxu3 %v7389_v41  ;;  %v7399_v58 = vld [vmem:[#allocation8_spill] sm:$0xff]  ;;  %v7400_v41 = vld [vmem:[#allocation63_spill] sm:$0xff] }
 0x2d4   :  { %2178 = vmatpush.bf16.msra.mxu0 %v7386_v10  ;;  %2204 = vmatpush.bf16.msra.mxu2 %v7387_v25  ;;  %v7397_v10 = vld [vmem:[#allocation118_spill] sm:$0xff]  ;;  %v7398_v25 = vld [vmem:[#allocation11_spill] sm:$0xff] }
 0x2d7   :  { %1956 = vmatpush.bf16.msrb.mxu1 %v7392_v42  ;;  %1982 = vmatpush.bf16.msra.mxu3 %v7393_v52  ;;  %v7402_v52 = vld [vmem:[#allocation15_spill] sm:$0xff]  ;;  %v7411_v42 = vld [vmem:[#allocation17_spill] sm:$0xff] }
 0x2d8   :  { %2179 = vmatpush.bf16.msra.mxu0 %v7390_v30  ;;  %2205 = vmatpush.bf16.msra.mxu2 %v7391_v36  ;;  %v7401_v30 = vld [vmem:[#allocation65_spill] sm:$0xff]  ;;  %v7420_v36 = vld [vmem:[#allocation42_spill] sm:$0xff] }
 0x2db   :  { %1957 = vmatpush.bf16.msrb.mxu1 %v7396_v60  ;;  %1983 = vmatpush.bf16.msra.mxu3 %v7397_v10  ;;  %v7405_v60 = vld [vmem:[#allocation69_spill] sm:$0xff]  ;;  %v7406_v10 = vld [vmem:[#allocation19_spill] sm:$0xff] }
 0x2dc   :  { %2180 = vmatpush.bf16.msra.mxu0 %v7394_v55  ;;  %2206 = vmatpush.bf16.msra.mxu2 %v7395_v11  ;;  %v7403_v55 = vld [vmem:[#allocation9_spill] sm:$0xff]  ;;  %v7404_v11 = vld [vmem:[#allocation67_spill] sm:$0xff] }
 0x2de   :  { %1958 = vmatmul.bf16.vlgmr.msrb.gmra.mxu1 %v5838_v53  ;;  %1984 = vmatmul.bf16.vlgmr.msra.gmra.mxu3 %v5838_v53  ;;  %v7412_v53 = vld [vmem:[#allocation76_spill] sm:$0xff] }
 0x2df   :  { %2138 = vmatpush.bf16.msra.mxu1 %v7398_v25  ;;  %2164 = vmatpush.bf16.msrb.mxu3 %v7399_v58  ;;  %v7407_v25 = vld [vmem:[#allocation13_spill] sm:$0xff]  ;;  %v7408_v58 = vld [vmem:[#allocation72_spill] sm:$0xff] }
 0x2e0   :  { %2181 = vmatpush.bf16.msra.mxu0 %v7400_v41  ;;  %2207 = vmatpush.bf16.msra.mxu2 %v7401_v30  ;;  %v7409_v41 = vld [vmem:[#allocation74_spill] sm:$0xff]  ;;  %v7410_v30 = vld [vmem:[#allocation23_spill] sm:$0xff] }
 0x2e3   :  { %2139 = vmatpush.bf16.msra.mxu1 %v7402_v52  ;;  %2165 = vmatpush.bf16.msrb.mxu3 %v7403_v55  ;;  %v7413_v52 = vld [vmem:[#allocation78_spill] sm:$0xff]  ;;  %v7414_v55 = vld [vmem:[#allocation27_spill] sm:$0xff] }
 0x2e4   :  { %2182 = vmatpush.bf16.msra.mxu0 %v7404_v11  ;;  %2208 = vmatpush.bf16.msra.mxu2 %v7405_v60  ;;  %v7415_v11 = vld [vmem:[#allocation21_spill] sm:$0xff]  ;;  %v7416_v60 = vld [vmem:[#allocation31_spill] sm:$0xff] }
 0x2e7   :  { %2140 = vmatpush.bf16.msra.mxu1 %v7406_v10  ;;  %2166 = vmatpush.bf16.msrb.mxu3 %v7407_v25  ;;  %v7417_v10 = vld [vmem:[#allocation25_spill] sm:$0xff] }
 0x2e8   :  { %2183 = vmatpush.bf16.msra.mxu0 %v7408_v58  ;;  %2209 = vmatpush.bf16.msra.mxu2 %v7409_v41  ;;  %v7418_v58 = vld [vmem:[#allocation36_spill] sm:$0xff]  ;;  %v7419_v41 = vld [vmem:[#allocation29_spill] sm:$0xff] }
 0x2eb   :  { %2141 = vmatpush.bf16.msra.mxu1 %v7410_v30  ;;  %2167 = vmatpush.bf16.msrb.mxu3 %v7411_v42  ;;  %v1790_v25 = vpop.f32.mrf.mxu0  ;;  %v7421_v42 = vld [vmem:[#allocation33_spill] sm:$0xff] }
 0x2ec   :  { %2184 = vmatpush.bf16.msra.mxu0 %v7412_v53  ;;  %2210 = vmatpush.bf16.msra.mxu2 %v7413_v52  ;;  %v7422_v52 = vld [vmem:[#allocation46_spill] sm:$0xff] }
 0x2ef   :  { %2142 = vmatpush.bf16.msra.mxu1 %v7414_v55  ;;  %2168 = vmatpush.bf16.msrb.mxu3 %v7415_v11  ;;  %v7423_v55 = vld [vmem:[#allocation34_spill] sm:$0xff] }
 0x2f0   :  { %v7424_v11 = vld [vmem:[#allocation50_spill] sm:$0xff] }
 0x2f1   :  { %v1816_v30 = vpop.f32.mrf.mxu2 }
 0x2f3   :  { %2143 = vmatpush.bf16.msra.mxu1 %v7416_v60  ;;  %2169 = vmatpush.bf16.msrb.mxu3 %v7417_v10  ;;  %v1792_v53 = vpop.f32.mrf.mxu0  ;;  %v7425_v60 = vld [vmem:[#allocation39_spill] sm:$0xff] }
 0x2f7   :  { %2144 = vmatpush.bf16.msra.mxu1 %v7418_v58  ;;  %2170 = vmatpush.bf16.msrb.mxu3 %v7419_v41  ;;  %v7427_v58 = vld [vmem:[#allocation48_spill] sm:$0xff] }
 0x2f8   :  { %v7428_v41 = vld [vmem:[#allocation60_spill] sm:$0xff] }
 0x2f9   :  { %v1818_v10 = vpop.f32.mrf.mxu2 }
 0x2fb   :  { %2145 = vmatpush.bf16.msra.mxu1 %v7420_v36  ;;  %2171 = vmatpush.bf16.msrb.mxu3 %v7421_v42  ;;  %v1842_v14 = vpop.f32.mrf.mxu0  ;;  %v7429_v36 = vld [vmem:[#allocation52_spill] sm:$0xff] }
 0x2ff   :  { %2190 = vmatpush.bf16.msrb.mxu1 %v7422_v52  ;;  %2216 = vmatpush.bf16.msra.mxu3 %v7423_v55  ;;  %v7431_v52 = vld [vmem:[#allocation57_spill] sm:$0xff]  ;;  %v7432_v55 = vld [vmem:[#allocation68_spill] sm:$0xff] }
 0x301   :  { %v1868_v42 = vpop.f32.mrf.mxu2 }
 0x303   :  { %2191 = vmatpush.bf16.msrb.mxu1 %v7424_v11  ;;  %2217 = vmatpush.bf16.msra.mxu3 %v7425_v60  ;;  %v1844_v53 = vpop.f32.mrf.mxu0  ;;  %v7433_v11 = vld [vmem:[#allocation62_spill] sm:$0xff] }
 0x307   :  { %2192 = vmatpush.bf16.msrb.mxu1 %v7426_v56  ;;  %2218 = vmatpush.bf16.msra.mxu3 %v7427_v58  ;;  %v7435_v56 = vld [vmem:[#allocation66_spill] sm:$0xff]  ;;  %v7436_v58 = vld [vmem:[#allocation77_spill] sm:$0xff] }
 0x309   :  { %v1870_v10 = vpop.f32.mrf.mxu2 }
 0x30b   :  { %2193 = vmatpush.bf16.msrb.mxu1 %v7428_v41  ;;  %2219 = vmatpush.bf16.msra.mxu3 %v7429_v36  ;;  %v1894_v60 = vpop.f32.mrf.mxu0  ;;  %v7437_v41 = vld [vmem:[#allocation70_spill] sm:$0xff] }
 0x30f   :  { %2194 = vmatpush.bf16.msrb.mxu1 %v7430_v7  ;;  %2220 = vmatpush.bf16.msra.mxu3 %v7431_v52  ;;  %v7439_v52 = vld [vmem:[#allocation143_spill] sm:$0xff] }
 0x310   :  { %v151_v8 = vadd.f32 %v7439_v52, %v7438_v23  ;;  %v7444_v23 = vld [vmem:[#allocation79_spill] sm:$0xff] }
 0x311   :  { %v5954_v36 = vpop.f32.mrf.mxu2 }
 0x313   :  { %2195 = vmatpush.bf16.msrb.mxu1 %v7432_v55  ;;  %2221 = vmatpush.bf16.msra.mxu3 %v7433_v11  ;;  %v1896_v53 = vpop.f32.mrf.mxu0 }
 0x317   :  { %2196 = vmatpush.bf16.msrb.mxu1 %v7434_v4  ;;  %2222 = vmatpush.bf16.msra.mxu3 %v7435_v56  ;;  %v7441_v4 = vld [vmem:[#allocation123_spill] sm:$0xff] }
 0x318   :  { %v180_v2 = vadd.f32 %v7441_v4, %v7440_v54  ;;  %v7443_v4 = vld [vmem:[#allocation128_spill] sm:$0xff] }
 0x319   :  { %v1922_v48 = vpop.f32.mrf.mxu2 }
 0x31b   :  { %2197 = vmatpush.bf16.msrb.mxu1 %v7436_v58  ;;  %2223 = vmatpush.bf16.msra.mxu3 %v7437_v41  ;;  %v1803_v7 = vpop.f32.mrf.mxu1 }
 0x31c   :  { %v1804_v55 = vadd.f32 %v1803_v7, %v1790_v25 }
 0x31e   :  { %v2056_v11 = vadd.f32 %v1804_v55, %v151_v8  ;;  %v7442_v55 = vld [vmem:[#allocation45_spill] sm:$0xff] }
 0x320   :  { %v4339_v10 = vmul.f32 -1.442695, %v2056_v11  ;;  %v238_v11 = vadd.f32 %v7443_v4, %v7442_v55 }
 0x321   :  { %v1829_v34 = vpop.f32.mrf.mxu3 }
 0x322   :  { %4634 = vpow2.f32 %v4339_v10  ;;  %v1830_v56 = vadd.f32 %v1829_v34, %v1816_v30 }
 0x323   :  { %v1805_v58 = vpop.f32.mrf.mxu1 }
 0x324   :  { %v2057_v44 = vadd.f32 %v1830_v56, %v180_v2 }
 0x326   :  { %v4340_v41 = vmul.f32 -1.442695, %v2057_v44 }
 0x328   :  { %v4635_v40 = vpop.eup %4634  ;;  %4636 = vpow2.f32 %v4340_v41 }
 0x329   :  { %v2063_v53 = vadd.f32 1.0, %v4635_v40  ;;  %v1831_v62 = vpop.f32.mrf.mxu3 }
 0x32b   :  { %4638 = vrcp.f32 %v2063_v53  ;;  %v1855_v61 = vpop.f32.mrf.mxu1  ;;  %vm2069_vm15 = vweird.f32 %v2063_v53 }
 0x32c   :  { %v1856_v41 = vadd.f32 %v1855_v61, %v1842_v14 }
 0x32e   :  { %v5960_v52 = vpop.f32.mrf.mxu0  ;;  %v4637_v48 = vpop.eup %4636 }
 0x32f   :  { %v2082_v8 = vadd.f32 1.0, %v4637_v48  ;;  %v7445_v48 = vld [vmem:[#allocation138_spill] sm:$0xff] }
 0x330   :  { %v209_v19 = vadd.f32 %v7445_v48, %v7444_v23 }
 0x331   :  { %v4639_v7 = vpop.eup %4638  ;;  %4640 = vrcp.f32 %v2082_v8  ;;  %v1881_v25 = vpop.f32.mrf.mxu3  ;;  %v2094_v55 = vand.u32 2147483648, %v2082_v8  ;;  %v2092_v61 = vand.u32 2147483647, %v2082_v8  ;;  %vm2088_vm0 = vweird.f32 %v2082_v8 }
 0x332   :  { %v2065_v34 = vmul.f32 %v4639_v7, %v2063_v53  ;;  %v1882_v58 = vadd.f32 %v1881_v25, %v1868_v42  ;;  %v2058_v4 = vadd.f32 %v1856_v41, %v209_v19  ;;  %vm2070_vm13 = vweird.f32 %v4639_v7 }
 0x333   :  { %v1857_v44 = vpop.f32.mrf.mxu1  ;;  %v2075_v25 = vand.u32 2147483648, %v2063_v53  ;;  %vm5968_vm1 = vmor %vm2069_vm15, %vm2070_vm13  ;;  %vm2093_vm3 = vcmp.eq.f32.partialorder %v2092_v61, 8.507059e+37 }
 0x334   :  { %v5964_v2 = vpop.f32.mrf.mxu2  ;;  %v2066_v56 = vsub.f32 1.0, %v2065_v34  ;;  %v2059_v40 = vadd.f32 %v1882_v58, %v238_v11  ;;  %v2073_v58 = vand.u32 2147483647, %v2063_v53 }
 0x336   :  { %v1948_v62 = vpop.f32.mrf.mxu0  ;;  %v4341_v30 = vmul.f32 -1.442695, %v2059_v40  ;;  %v2067_v54 = vmul.f32 %v4639_v7, %v2066_v56  ;;  %vm2074_vm4 = vcmp.eq.f32.partialorder %v2073_v58, 8.507059e+37 }
 0x337   :  { %v4641_v10 = vpop.eup %4640  ;;  %v2076_v62 = vor.u32 1.1754944e-38, %v2075_v25 }
 0x338   :  { %v2084_v51 = vmul.f32 %v4641_v10, %v2082_v8  ;;  %4642 = vpow2.f32 %v4341_v30  ;;  %v2068_v42 = vadd.f32 %v4639_v7, %v2067_v54  ;;  %vm2089_vm14 = vweird.f32 %v4641_v10 }
 0x339   :  { %v1883_v3 = vpop.f32.mrf.mxu3  ;;  %4644 = vtanh.f32 %v2058_v4  ;;  %vm2090_vm2 = vmor %vm2088_vm0, %vm2089_vm14 }
 0x33a   :  { %v2085_v24 = vsub.f32 1.0, %v2084_v51  ;;  %v2095_v3 = vor.u32 1.1754944e-38, %v2094_v55 }
 0x33b   :  { %v1907_v34 = vpop.f32.mrf.mxu1 }
 0x33c   :  { %v1974_v44 = vpop.f32.mrf.mxu2  ;;  %v2086_v11 = vmul.f32 %v4641_v10, %v2085_v24  ;;  %v1908_v14 = vadd.f32 %v1907_v34, %v1894_v60  ;;  %v2072_v24 = vsel %vm5968_vm1, %v4639_v7, %v2068_v42 }
 0x33d   :  { %v2077_v41 = vsel %vm2074_vm4, %v2076_v62, %v2072_v24 }
 0x33e   :  { %v4643_v56 = vpop.eup %4642  ;;  %v2087_v51 = vadd.f32 %v4641_v10, %v2086_v11  ;;  %v1989_v19 = vadd.f32 %v1908_v14, %v7339_v33 }
 0x33f   :  { %v2102_v54 = vadd.f32 1.0, %v4643_v56  ;;  %v4645_v34 = vpop.eup %4644 }
 0x340   :  { %v2091_v60 = vsel %vm2090_vm2, %v4641_v10, %v2087_v51  ;;  %v4336_v30 = vmul.f32 -1.442695, %v1989_v19  ;;  %v2119_v11 = vmul.f32 %v4645_v34, %v2077_v41 }
 0x341   :  { %v2096_v53 = vsel %vm2093_vm3, %v2095_v3, %v2091_v60  ;;  %4646 = vrcp.f32 %v2102_v54  ;;  %v1933_v8 = vpop.f32.mrf.mxu3  ;;  %v2114_v58 = vand.u32 2147483648, %v2102_v54  ;;  %vm2108_vm6 = vweird.f32 %v2102_v54 }
 0x342   :  { %v1934_v48 = vadd.f32 %v1933_v8, %v5954_v36  ;;  %v2118_v4 = vmul.f32 %v2096_v53, %v5781_v38  ;;  %4648 = vpow2.f32 %v4336_v30  ;;  %v2112_v38 = vand.u32 2147483647, %v2102_v54 }
 0x343   :  { %v1909_v44 = vpop.f32.mrf.mxu1  ;;  %v2115_v19 = vor.u32 1.1754944e-38, %v2114_v58 }
 0x344   :  { %v1990_v55 = vadd.f32 %v1934_v48, %v5578_v45  ;;  %v5978_v10 = vadd.f32 %v2119_v11, %v2118_v4  ;;  %vm2113_vm8 = vcmp.eq.f32.partialorder %v2112_v38, 8.507059e+37 }
 0x346   :  { %v4337_v7 = vmul.f32 -1.442695, %v1990_v55 }
 0x347   :  { %v4647_v42 = vpop.eup %4646 }
 0x348   :  { %v2104_v25 = vmul.f32 %v4647_v42, %v2102_v54  ;;  %4650 = vpow2.f32 %v4337_v7  ;;  %v4649_v36 = vpop.eup %4648  ;;  %vm2109_vm5 = vweird.f32 %v4647_v42 }
 0x349   :  { %v1935_v61 = vpop.f32.mrf.mxu3  ;;  %4652 = vtanh.f32 %v5978_v10  ;;  %vm2110_vm7 = vmor %vm2108_vm6, %vm2109_vm5  ;;  %v5981_v3 = vadd.f32 1.0, %v4649_v36 }
 0x34a   :  { %v2105_v14 = vsub.f32 1.0, %v2104_v25 }
 0x34b   :  { %vm2002_vm13 = vweird.f32 %v5981_v3 }
 0x34c   :  { %v2106_v56 = vmul.f32 %v4647_v42, %v2105_v14 }
 0x34e   :  { %v4651_v40 = vpop.eup %4650  ;;  %v2107_v51 = vadd.f32 %v4647_v42, %v2106_v56 }
 0x34f   :  { %v2015_v24 = vadd.f32 1.0, %v4651_v40  ;;  %v4653_v60 = vpop.eup %4652 }
 0x350   :  { %v2111_v62 = vsel %vm2110_vm7, %v4647_v42, %v2107_v51 }
 0x351   :  { %v2116_v53 = vsel %vm2113_vm8, %v2115_v19, %v2111_v62  ;;  %4654 = vrcp.f32 %v2015_v24  ;;  %v2027_v38 = vand.u32 2147483648, %v2015_v24  ;;  %vm2021_vm10 = vweird.f32 %v2015_v24  ;;  %v7451_v19 = vld [vmem:[#allocation75_spill] sm:$0xff] }
 0x352   :  { %v2122_v8 = vmul.f32 %v4653_v60, %v2116_v53  ;;  %4656 = vrcp.f32 %v5981_v3  ;;  %v2025_v51 = vand.u32 2147483647, %v2015_v24  ;;  %v2008_v62 = vand.u32 2147483648, %v5981_v3 }
 0x353   :  { %v2006_v60 = vand.u32 2147483647, %v5981_v3 }
 0x354   :  { %v5984_v41 = vpack.c.bf16 %v2122_v8, %v2122_v8  ;;  %vm2026_vm15 = vcmp.eq.f32.partialorder %v2025_v51, 8.507059e+37  ;;  %v7450_v51 = vld [vmem:[#allocation82_spill] sm:$0xff] }
 0x355   :  { %vm2007_vm0 = vcmp.eq.f32.partialorder %v2006_v60, 8.507059e+37  ;;  %v7453_v60 = vld [vmem:[#allocation125_spill] sm:$0xff] }
 0x356   :  { %2133 = vmatmul.bf16.vlgmr.msrb.gmra.mxu0 %v5984_v41  ;;  %2159 = vmatmul.bf16.vlgmr.msrb.gmra.mxu2 %v5984_v41 }
 0x357   :  { %v4655_v54 = vpop.eup %4654  ;;  %2229 = vmatpush.bf16.msrb.mxu0 %v7340_v13  ;;  %2255 = vmatpush.bf16.msrb.mxu2 %v7341_v9 }
 0x358   :  { %v4657_v48 = vpop.eup %4656  ;;  %v2017_v4 = vmul.f32 %v4655_v54, %v2015_v24  ;;  %vm2022_vm9 = vweird.f32 %v4655_v54 }
 0x359   :  { %v1998_v44 = vmul.f32 %v4657_v48, %v5981_v3  ;;  %vm2003_vm11 = vweird.f32 %v4657_v48  ;;  %vm6005_vm12 = vmor %vm2021_vm10, %vm2022_vm9 }
 0x35a   :  { %v2018_v34 = vsub.f32 1.0, %v2017_v4  ;;  %vm2004_vm14 = vmor %vm2002_vm13, %vm2003_vm11 }
 0x35b   :  { %v1959_v30 = vpop.f32.mrf.mxu1  ;;  %2230 = vmatpush.bf16.msrb.mxu0 %v7342_v28  ;;  %2256 = vmatpush.bf16.msrb.mxu2 %v7343_v17  ;;  %v1999_v42 = vsub.f32 1.0, %v1998_v44 }
 0x35c   :  { %v1960_v11 = vadd.f32 %v1959_v30, %v5960_v52  ;;  %v2019_v14 = vmul.f32 %v4655_v54, %v2018_v34  ;;  %v2028_v30 = vor.u32 1.1754944e-38, %v2027_v38  ;;  %v2009_v34 = vor.u32 1.1754944e-38, %v2008_v62  ;;  %v7452_v62 = vld [vmem:[#allocation124_spill] sm:$0xff] }
 0x35d   :  { %v2000_v56 = vmul.f32 %v4657_v48, %v1999_v42 }
 0x35e   :  { %v1991_v58 = vadd.f32 %v1960_v11, %v5606_v63  ;;  %v2020_v52 = vadd.f32 %v4655_v54, %v2019_v14 }
 0x35f   :  { %2231 = vmatpush.bf16.msrb.mxu0 %v7243_v50  ;;  %2257 = vmatpush.bf16.msrb.mxu2 %v7244_v5  ;;  %v2001_v40 = vadd.f32 %v4657_v48, %v2000_v56 }
 0x360   :  { %v2024_v53 = vsel %vm6005_vm12, %v4655_v54, %v2020_v52 }
 0x361   :  { %v1985_v55 = vpop.f32.mrf.mxu3  ;;  %v2005_v24 = vsel %vm2004_vm14, %v4657_v48, %v2001_v40 }
 0x362   :  { %v1986_v7 = vadd.f32 %v1985_v55, %v5964_v2  ;;  %v2029_v55 = vsel %vm2026_vm15, %v2028_v30, %v2024_v53  ;;  %v2010_v11 = vsel %vm2007_vm0, %v2009_v34, %v2005_v24  ;;  %v7454_v53 = vld [vmem:[#allocation84_spill] sm:$0xff]  ;;  %v7456_v30 = vld [vmem:[#allocation126_spill] sm:$0xff]  ;;  %v7457_v24 = vld [vmem:[#allocation127_spill] sm:$0xff] }
 0x363   :  { %v1961_v25 = vpop.f32.mrf.mxu1  ;;  %2232 = vmatpush.bf16.msrb.mxu0 %v7245_v6  ;;  %2258 = vmatpush.bf16.msrb.mxu2 %v7246_v39  ;;  %v2051_v3 = vmul.f32 %v2029_v55, %v5825_v57  ;;  %v7460_v34 = vld [vmem:[#allocation129_spill] sm:$0xff]  ;;  %v7461_v55 = vld [vmem:[#allocation130_spill] sm:$0xff] }
 0x364   :  { %v1992_v61 = vadd.f32 %v1986_v7, %v5603_v15 }
 0x366   :  { %v4338_v36 = vmul.f32 -1.442695, %v1992_v61  ;;  %2185 = vmatmul.bf16.vlgmr.msra.gmra.mxu0 %v5984_v41  ;;  %2211 = vmatmul.bf16.vlgmr.msra.gmra.mxu2 %v5984_v41 }
 0x367   :  { %2233 = vmatpush.bf16.msrb.mxu0 %v7344_v20  ;;  %2259 = vmatpush.bf16.msrb.mxu2 %v7345_v27 }
 0x368   :  { %4658 = vpow2.f32 %v4338_v36 }
 0x369   :  { %v1987_v2 = vpop.f32.mrf.mxu3  ;;  %4660 = vtanh.f32 %v1991_v58 }
 0x36b   :  { %2234 = vmatpush.bf16.msrb.mxu0 %v5349_v22  ;;  %2260 = vmatpush.bf16.msrb.mxu2 %v7249_v32 }
 0x36e   :  { %v4659_v8 = vpop.eup %4658 }
 0x36f   :  { %v2035_v4 = vadd.f32 1.0, %v4659_v8  ;;  %v4661_v44 = vpop.eup %4660  ;;  %2235 = vmatpush.bf16.msrb.mxu0 %v5361_v47  ;;  %2261 = vmatpush.bf16.msrb.mxu2 %v5363_v35  ;;  %v7455_v8 = vld [vmem:[#allocation81_spill] sm:$0xff] }
 0x370   :  { %v2052_v54 = vmul.f32 %v4661_v44, %v2010_v11  ;;  %v7459_v44 = vld [vmem:[#allocation83_spill] sm:$0xff]  ;;  %v7462_v11 = vld [vmem:[#allocation10_spill] sm:$0xff] }
 0x371   :  { %4662 = vrcp.f32 %v2035_v4  ;;  %v2047_v57 = vand.u32 2147483648, %v2035_v4  ;;  %v2045_v14 = vand.u32 2147483647, %v2035_v4  ;;  %vm2041_vm2 = vweird.f32 %v2035_v4 }
 0x372   :  { %v6021_v7 = vadd.f32 %v2052_v54, %v2051_v3  ;;  %v7463_v3 = vld [vmem:[#allocation12_spill] sm:$0xff] }
 0x373   :  { %2236 = vmatpush.bf16.msrb.mxu0 %v5372_v46  ;;  %2262 = vmatpush.bf16.msrb.mxu2 %v5374_v26  ;;  %v2048_v36 = vor.u32 1.1754944e-38, %v2047_v57  ;;  %vm2046_vm4 = vcmp.eq.f32.partialorder %v2045_v14, 8.507059e+37  ;;  %v7464_v54 = vld [vmem:[#allocation88_spill] sm:$0xff]  ;;  %v7468_v57 = vld [vmem:[#allocation90_spill] sm:$0xff] }
 0x374   :  { %4664 = vtanh.f32 %v6021_v7  ;;  %v7470_v14 = vld [vmem:[#allocation18_spill] sm:$0xff] }
 0x376   :  { %2237 = vmatmul.bf16.vlgmr.msrb.gmra.mxu0 %v5984_v41  ;;  %2263 = vmatmul.bf16.vlgmr.msrb.gmra.mxu2 %v5984_v41 }
 0x377   :  { %v4663_v48 = vpop.eup %4662  ;;  %2281 = vmatpush.bf16.msra.mxu0 %v5376_v49  ;;  %2307 = vmatpush.bf16.msra.mxu2 %v5378_v1 }
 0x378   :  { %v2037_v42 = vmul.f32 %v4663_v48, %v2035_v4  ;;  %vm2042_vm1 = vweird.f32 %v4663_v48  ;;  %v7458_v4 = vld [vmem:[#allocation86_spill] sm:$0xff] }
 0x379   :  { %vm2043_vm3 = vmor %vm2041_vm2, %vm2042_vm1 }
 0x37a   :  { %v2038_v25 = vsub.f32 1.0, %v2037_v42  ;;  %v4665_v52 = vpop.eup %4664  ;;  %v7466_v42 = vld [vmem:[#allocation14_spill] sm:$0xff] }
 0x37b   :  { %2282 = vmatpush.bf16.msra.mxu0 %v5391_v37  ;;  %2308 = vmatpush.bf16.msra.mxu2 %v5393_v12 }
 0x37c   :  { %v2039_v61 = vmul.f32 %v4663_v48, %v2038_v25  ;;  %v7467_v25 = vld [vmem:[#allocation16_spill] sm:$0xff] }
 0x37e   :  { %v2040_v58 = vadd.f32 %v4663_v48, %v2039_v61  ;;  %v7469_v61 = vld [vmem:[#allocation87_spill] sm:$0xff] }
 0x37f   :  { %2283 = vmatpush.bf16.msra.mxu0 %v5402_v16  ;;  %2309 = vmatpush.bf16.msra.mxu2 %v5404_v21 }
 0x380   :  { %v2044_v56 = vsel %vm2043_vm3, %v4663_v48, %v2040_v58  ;;  %v7465_v48 = vld [vmem:[#allocation85_spill] sm:$0xff]  ;;  %v7471_v58 = vld [vmem:[#allocation20_spill] sm:$0xff] }
 0x381   :  { %v2049_v2 = vsel %vm2046_vm4, %v2048_v36, %v2044_v56  ;;  %v7472_v36 = vld [vmem:[#allocation93_spill] sm:$0xff] }
 0x382   :  { %v2055_v38 = vmul.f32 %v4665_v52, %v2049_v2  ;;  %v7473_v56 = vld [vmem:[#allocation89_spill] sm:$0xff]  ;;  %v7474_v52 = vld [vmem:[#allocation22_spill] sm:$0xff]  ;;  %v7475_v2 = vld [vmem:[#allocation24_spill] sm:$0xff] }
 0x383   :  { %2284 = vmatpush.bf16.msra.mxu0 %v5415_v29  ;;  %2310 = vmatpush.bf16.msra.mxu2 %v5417_v59 }
 0x384   :  { %v6034_v40 = vpack.c.bf16 %v2055_v38, %v2055_v38  ;;  %v7477_v38 = vld [vmem:[#allocation91_spill] sm:$0xff] }
 0x386   :  { %2146 = vmatmul.bf16.vlgmr.msra.gmra.mxu1 %v6034_v40  ;;  %2172 = vmatmul.bf16.vlgmr.msrb.gmra.mxu3 %v6034_v40 }
 0x387   :  { %2242 = vmatpush.bf16.msra.mxu1 %v7250_v43  ;;  %2268 = vmatpush.bf16.msrb.mxu3 %v7251_v18 }
 0x388   :  { %2285 = vmatpush.bf16.msra.mxu0 %v5423_v0  ;;  %2311 = vmatpush.bf16.msra.mxu2 %v5425_v31 }
 0x38b   :  { %2243 = vmatpush.bf16.msra.mxu1 %v7450_v51  ;;  %2269 = vmatpush.bf16.msrb.mxu3 %v7451_v19 }
 0x38c   :  { %2286 = vmatpush.bf16.msra.mxu0 %v7452_v62  ;;  %2312 = vmatpush.bf16.msra.mxu2 %v7453_v60 }
 0x38f   :  { %2244 = vmatpush.bf16.msra.mxu1 %v7454_v53  ;;  %2270 = vmatpush.bf16.msrb.mxu3 %v7455_v8 }
 0x390   :  { %2287 = vmatpush.bf16.msra.mxu0 %v7456_v30  ;;  %2313 = vmatpush.bf16.msra.mxu2 %v7457_v24 }
 0x393   :  { %2245 = vmatpush.bf16.msra.mxu1 %v7458_v4  ;;  %2271 = vmatpush.bf16.msrb.mxu3 %v7459_v44  ;;  %v7552_v4 = vld [vmem:[#allocation58_spill] sm:$0xff] }
 0x394   :  { %2288 = vmatpush.bf16.msra.mxu0 %v7460_v34  ;;  %2314 = vmatpush.bf16.msra.mxu2 %v7461_v55 }
 0x396   :  { %2198 = vmatmul.bf16.vlgmr.msrb.gmra.mxu1 %v6034_v40  ;;  %2224 = vmatmul.bf16.vlgmr.msra.gmra.mxu3 %v6034_v40 }
 0x397   :  { %2246 = vmatpush.bf16.msra.mxu1 %v7464_v54  ;;  %2272 = vmatpush.bf16.msrb.mxu3 %v7465_v48  ;;  %v7538_v48 = vld [vmem:[#allocation55_spill] sm:$0xff]  ;;  %v7542_v54 = vld [vmem:[#allocation64_spill] sm:$0xff] }
 0x398   :  { %2469 = vmatpush.bf16.msrb.mxu0 %v7462_v11  ;;  %2495 = vmatpush.bf16.msrb.mxu2 %v7463_v3  ;;  %v7551_v11 = vld [vmem:[#allocation145_spill] sm:$0xff] }
 0x399   :  { %2289 = vmatmul.bf16.vlgmr.msra.gmra.mxu0 %v5984_v41  ;;  %2315 = vmatmul.bf16.vlgmr.msra.gmra.mxu2 %v5984_v41  ;;  %v7476_v41 = vld [vmem:[#allocation95_spill] sm:$0xff] }
 0x39b   :  { %2247 = vmatpush.bf16.msra.mxu1 %v7468_v57  ;;  %2273 = vmatpush.bf16.msrb.mxu3 %v7469_v61  ;;  %v7479_v57 = vld [vmem:[#allocation92_spill] sm:$0xff]  ;;  %v7480_v61 = vld [vmem:[#allocation26_spill] sm:$0xff] }
 0x39c   :  { %2470 = vmatpush.bf16.msrb.mxu0 %v7466_v42  ;;  %2496 = vmatpush.bf16.msrb.mxu2 %v7467_v25  ;;  %v7478_v25 = vld [vmem:[#allocation98_spill] sm:$0xff] }
 0x39f   :  { %2248 = vmatpush.bf16.msra.mxu1 %v7472_v36  ;;  %2274 = vmatpush.bf16.msrb.mxu3 %v7473_v56  ;;  %v7482_v56 = vld [vmem:[#allocation102_spill] sm:$0xff]  ;;  %v7491_v36 = vld [vmem:[#allocation103_spill] sm:$0xff] }
 0x3a0   :  { %2471 = vmatpush.bf16.msrb.mxu0 %v7470_v14  ;;  %2497 = vmatpush.bf16.msrb.mxu2 %v7471_v58  ;;  %v7481_v14 = vld [vmem:[#allocation28_spill] sm:$0xff] }
 0x3a1   :  { %v7492_v58 = vld [vmem:[#allocation40_spill] sm:$0xff] }
 0x3a3   :  { %2249 = vmatpush.bf16.msra.mxu1 %v7476_v41  ;;  %2275 = vmatpush.bf16.msrb.mxu3 %v7477_v38  ;;  %v7485_v41 = vld [vmem:[#allocation32_spill] sm:$0xff]  ;;  %v7486_v38 = vld [vmem:[#allocation106_spill] sm:$0xff] }
 0x3a4   :  { %2472 = vmatpush.bf16.msrb.mxu0 %v7474_v52  ;;  %2498 = vmatpush.bf16.msrb.mxu2 %v7475_v2  ;;  %v7483_v52 = vld [vmem:[#allocation94_spill] sm:$0xff] }
 0x3a5   :  { %v7484_v2 = vld [vmem:[#allocation30_spill] sm:$0xff] }
 0x3a6   :  { %2250 = vmatmul.bf16.vlgmr.msra.gmra.mxu1 %v6034_v40  ;;  %2276 = vmatmul.bf16.vlgmr.msrb.gmra.mxu3 %v6034_v40 }
 0x3a7   :  { %2294 = vmatpush.bf16.msrb.mxu1 %v7478_v25  ;;  %2320 = vmatpush.bf16.msra.mxu3 %v7479_v57  ;;  %v7487_v25 = vld [vmem:[#allocation99_spill] sm:$0xff] }
 0x3a8   :  { %2473 = vmatpush.bf16.msrb.mxu0 %v7480_v61  ;;  %2499 = vmatpush.bf16.msrb.mxu2 %v7481_v14  ;;  %v7488_v57 = vld [vmem:[#allocation35_spill] sm:$0xff]  ;;  %v7489_v61 = vld [vmem:[#allocation37_spill] sm:$0xff]  ;;  %v7490_v14 = vld [vmem:[#allocation110_spill] sm:$0xff] }
 0x3ab   :  { %2295 = vmatpush.bf16.msrb.mxu1 %v7482_v56  ;;  %2321 = vmatpush.bf16.msra.mxu3 %v7483_v52  ;;  %v7493_v56 = vld [vmem:[#allocation43_spill] sm:$0xff]  ;;  %v7494_v52 = vld [vmem:[#allocation44_spill] sm:$0xff] }
 0x3ac   :  { %2474 = vmatpush.bf16.msrb.mxu0 %v7484_v2  ;;  %2500 = vmatpush.bf16.msrb.mxu2 %v7485_v41  ;;  %v7495_v2 = vld [vmem:[#allocation47_spill] sm:$0xff]  ;;  %v7496_v41 = vld [vmem:[#allocation114_spill] sm:$0xff] }
 0x3af   :  { %2296 = vmatpush.bf16.msrb.mxu1 %v7486_v38  ;;  %2322 = vmatpush.bf16.msra.mxu3 %v7487_v25  ;;  %v7497_v38 = vld [vmem:[#allocation107_spill] sm:$0xff]  ;;  %v7498_v25 = vld [vmem:[#allocation49_spill] sm:$0xff] }
 0x3b0   :  { %2475 = vmatpush.bf16.msrb.mxu0 %v7488_v57  ;;  %2501 = vmatpush.bf16.msrb.mxu2 %v7489_v61  ;;  %v7499_v57 = vld [vmem:[#allocation51_spill] sm:$0xff]  ;;  %v7500_v61 = vld [vmem:[#allocation117_spill] sm:$0xff] }
 0x3b3   :  { %2297 = vmatpush.bf16.msrb.mxu1 %v7490_v14  ;;  %2323 = vmatpush.bf16.msra.mxu3 %v7491_v36  ;;  %v7501_v14 = vld [vmem:[#allocation111_spill] sm:$0xff]  ;;  %v7502_v36 = vld [vmem:[#allocation54_spill] sm:$0xff] }
 0x3b4   :  { %2476 = vmatpush.bf16.msrb.mxu0 %v7492_v58  ;;  %2502 = vmatpush.bf16.msrb.mxu2 %v7493_v56  ;;  %v7503_v58 = vld [vmem:[#allocation56_spill] sm:$0xff]  ;;  %v7504_v56 = vld [vmem:[#allocation119_spill] sm:$0xff] }
 0x3b7   :  { %2298 = vmatpush.bf16.msrb.mxu1 %v7496_v41  ;;  %2324 = vmatpush.bf16.msra.mxu3 %v7497_v38  ;;  %v7507_v41 = vld [vmem:[#allocation61_spill] sm:$0xff]  ;;  %v7508_v38 = vld [vmem:[#allocation120_spill] sm:$0xff] }
 0x3b8   :  { %2521 = vmatpush.bf16.msra.mxu0 %v7494_v52  ;;  %2547 = vmatpush.bf16.msra.mxu2 %v7495_v2  ;;  %v7505_v52 = vld [vmem:[#allocation115_spill] sm:$0xff] }
 0x3b9   :  { %v7506_v2 = vld [vmem:[#allocation59_spill] sm:$0xff] }
 0x3bb   :  { %2299 = vmatpush.bf16.msrb.mxu1 %v7500_v61  ;;  %2325 = vmatpush.bf16.msra.mxu3 %v7501_v14  ;;  %v7511_v61 = vld [vmem:[#allocation8_spill] sm:$0xff]  ;;  %v7512_v14 = vld [vmem:[#allocation63_spill] sm:$0xff] }
 0x3bc   :  { %2522 = vmatpush.bf16.msra.mxu0 %v7498_v25  ;;  %2548 = vmatpush.bf16.msra.mxu2 %v7499_v57  ;;  %v7509_v25 = vld [vmem:[#allocation118_spill] sm:$0xff]  ;;  %v7510_v57 = vld [vmem:[#allocation11_spill] sm:$0xff] }
 0x3bf   :  { %2300 = vmatpush.bf16.msrb.mxu1 %v7504_v56  ;;  %2326 = vmatpush.bf16.msra.mxu3 %v7505_v52  ;;  %v7514_v52 = vld [vmem:[#allocation15_spill] sm:$0xff]  ;;  %v7523_v56 = vld [vmem:[#allocation17_spill] sm:$0xff] }
 0x3c0   :  { %2523 = vmatpush.bf16.msra.mxu0 %v7502_v36  ;;  %2549 = vmatpush.bf16.msra.mxu2 %v7503_v58  ;;  %v7513_v36 = vld [vmem:[#allocation65_spill] sm:$0xff]  ;;  %v7532_v58 = vld [vmem:[#allocation42_spill] sm:$0xff] }
 0x3c3   :  { %2301 = vmatpush.bf16.msrb.mxu1 %v7508_v38  ;;  %2327 = vmatpush.bf16.msra.mxu3 %v7509_v25  ;;  %v7517_v38 = vld [vmem:[#allocation69_spill] sm:$0xff]  ;;  %v7518_v25 = vld [vmem:[#allocation19_spill] sm:$0xff] }
 0x3c4   :  { %2524 = vmatpush.bf16.msra.mxu0 %v7506_v2  ;;  %2550 = vmatpush.bf16.msra.mxu2 %v7507_v41  ;;  %v7515_v2 = vld [vmem:[#allocation9_spill] sm:$0xff]  ;;  %v7516_v41 = vld [vmem:[#allocation67_spill] sm:$0xff] }
 0x3c6   :  { %2302 = vmatmul.bf16.vlgmr.msrb.gmra.mxu1 %v6034_v40  ;;  %2328 = vmatmul.bf16.vlgmr.msra.gmra.mxu3 %v6034_v40  ;;  %v7524_v40 = vld [vmem:[#allocation76_spill] sm:$0xff] }
 0x3c7   :  { %2482 = vmatpush.bf16.msra.mxu1 %v7510_v57  ;;  %2508 = vmatpush.bf16.msrb.mxu3 %v7511_v61  ;;  %v7519_v57 = vld [vmem:[#allocation13_spill] sm:$0xff]  ;;  %v7520_v61 = vld [vmem:[#allocation72_spill] sm:$0xff] }
 0x3c8   :  { %2525 = vmatpush.bf16.msra.mxu0 %v7512_v14  ;;  %2551 = vmatpush.bf16.msra.mxu2 %v7513_v36  ;;  %v7521_v14 = vld [vmem:[#allocation74_spill] sm:$0xff]  ;;  %v7522_v36 = vld [vmem:[#allocation23_spill] sm:$0xff] }
 0x3cb   :  { %2483 = vmatpush.bf16.msra.mxu1 %v7514_v52  ;;  %2509 = vmatpush.bf16.msrb.mxu3 %v7515_v2  ;;  %v7525_v52 = vld [vmem:[#allocation78_spill] sm:$0xff]  ;;  %v7526_v2 = vld [vmem:[#allocation27_spill] sm:$0xff] }
 0x3cc   :  { %2526 = vmatpush.bf16.msra.mxu0 %v7516_v41  ;;  %2552 = vmatpush.bf16.msra.mxu2 %v7517_v38  ;;  %v7527_v41 = vld [vmem:[#allocation21_spill] sm:$0xff]  ;;  %v7528_v38 = vld [vmem:[#allocation31_spill] sm:$0xff] }
 0x3cf   :  { %2484 = vmatpush.bf16.msra.mxu1 %v7518_v25  ;;  %2510 = vmatpush.bf16.msrb.mxu3 %v7519_v57  ;;  %v7529_v25 = vld [vmem:[#allocation25_spill] sm:$0xff] }
 0x3d0   :  { %2527 = vmatpush.bf16.msra.mxu0 %v7520_v61  ;;  %2553 = vmatpush.bf16.msra.mxu2 %v7521_v14  ;;  %v7530_v61 = vld [vmem:[#allocation36_spill] sm:$0xff]  ;;  %v7531_v14 = vld [vmem:[#allocation29_spill] sm:$0xff] }
 0x3d3   :  { %2485 = vmatpush.bf16.msra.mxu1 %v7522_v36  ;;  %2511 = vmatpush.bf16.msrb.mxu3 %v7523_v56  ;;  %v2134_v57 = vpop.f32.mrf.mxu0  ;;  %v7533_v56 = vld [vmem:[#allocation33_spill] sm:$0xff] }
 0x3d4   :  { %2528 = vmatpush.bf16.msra.mxu0 %v7524_v40  ;;  %2554 = vmatpush.bf16.msra.mxu2 %v7525_v52  ;;  %v7534_v52 = vld [vmem:[#allocation46_spill] sm:$0xff] }
 0x3d7   :  { %2486 = vmatpush.bf16.msra.mxu1 %v7526_v2  ;;  %2512 = vmatpush.bf16.msrb.mxu3 %v7527_v41  ;;  %v7535_v2 = vld [vmem:[#allocation34_spill] sm:$0xff] }
 0x3d8   :  { %v7536_v41 = vld [vmem:[#allocation50_spill] sm:$0xff] }
 0x3d9   :  { %v2160_v36 = vpop.f32.mrf.mxu2 }
 0x3db   :  { %2487 = vmatpush.bf16.msra.mxu1 %v7528_v38  ;;  %2513 = vmatpush.bf16.msrb.mxu3 %v7529_v25  ;;  %v2136_v40 = vpop.f32.mrf.mxu0  ;;  %v7537_v38 = vld [vmem:[#allocation39_spill] sm:$0xff] }
 0x3df   :  { %2488 = vmatpush.bf16.msra.mxu1 %v7530_v61  ;;  %2514 = vmatpush.bf16.msrb.mxu3 %v7531_v14  ;;  %v7539_v61 = vld [vmem:[#allocation48_spill] sm:$0xff] }
 0x3e0   :  { %v7540_v14 = vld [vmem:[#allocation60_spill] sm:$0xff] }
 0x3e1   :  { %v2162_v25 = vpop.f32.mrf.mxu2 }
 0x3e3   :  { %2489 = vmatpush.bf16.msra.mxu1 %v7532_v58  ;;  %2515 = vmatpush.bf16.msrb.mxu3 %v7533_v56  ;;  %v2186_v42 = vpop.f32.mrf.mxu0  ;;  %v7541_v58 = vld [vmem:[#allocation52_spill] sm:$0xff] }
 0x3e7   :  { %2534 = vmatpush.bf16.msrb.mxu1 %v7534_v52  ;;  %2560 = vmatpush.bf16.msra.mxu3 %v7535_v2  ;;  %v7543_v52 = vld [vmem:[#allocation57_spill] sm:$0xff]  ;;  %v7544_v2 = vld [vmem:[#allocation68_spill] sm:$0xff] }
 0x3e9   :  { %v2212_v56 = vpop.f32.mrf.mxu2 }
 0x3eb   :  { %2535 = vmatpush.bf16.msrb.mxu1 %v7536_v41  ;;  %2561 = vmatpush.bf16.msra.mxu3 %v7537_v38  ;;  %v2188_v40 = vpop.f32.mrf.mxu0  ;;  %v7545_v41 = vld [vmem:[#allocation62_spill] sm:$0xff] }
 0x3ef   :  { %2536 = vmatpush.bf16.msrb.mxu1 %v7538_v48  ;;  %2562 = vmatpush.bf16.msra.mxu3 %v7539_v61  ;;  %v7546_v48 = vld [vmem:[#allocation73_spill] sm:$0xff]  ;;  %v7547_v61 = vld [vmem:[#allocation66_spill] sm:$0xff] }
 0x3f1   :  { %v2214_v25 = vpop.f32.mrf.mxu2 }
 0x3f3   :  { %2537 = vmatpush.bf16.msrb.mxu1 %v7540_v14  ;;  %2563 = vmatpush.bf16.msra.mxu3 %v7541_v58  ;;  %v6146_v38 = vpop.f32.mrf.mxu0  ;;  %v7548_v14 = vld [vmem:[#allocation77_spill] sm:$0xff]  ;;  %v7549_v58 = vld [vmem:[#allocation70_spill] sm:$0xff] }
 0x3f7   :  { %2538 = vmatpush.bf16.msrb.mxu1 %v7542_v54  ;;  %2564 = vmatpush.bf16.msra.mxu3 %v7543_v52  ;;  %v7550_v52 = vld [vmem:[#allocation38_spill] sm:$0xff] }
 0x3f9   :  { %v6152_v40 = vpop.f32.mrf.mxu2 }
 0x3fb   :  { %2539 = vmatpush.bf16.msrb.mxu1 %v7544_v2  ;;  %2565 = vmatpush.bf16.msra.mxu3 %v7545_v41  ;;  %v2240_v54 = vpop.f32.mrf.mxu0  ;;  %v154_v2 = vadd.f32 %v7551_v11, %v7550_v52 }
 0x3ff   :  { %2540 = vmatpush.bf16.msrb.mxu1 %v7546_v48  ;;  %2566 = vmatpush.bf16.msra.mxu3 %v7547_v61  ;;  %v7553_v48 = vld [vmem:[#allocation131_spill] sm:$0xff] }
 0x400   :  { %v183_v24 = vadd.f32 %v7553_v48, %v7552_v4 }
 0x401   :  { %v2266_v41 = vpop.f32.mrf.mxu2 }
 0x403   :  { %2541 = vmatpush.bf16.msrb.mxu1 %v7548_v14  ;;  %2567 = vmatpush.bf16.msra.mxu3 %v7549_v58  ;;  %v2147_v3 = vpop.f32.mrf.mxu1 }
 0x404   :  { %v2148_v55 = vadd.f32 %v2147_v3, %v2134_v57  ;;  %v7554_v57 = vld [vmem:[#allocation142_spill] sm:$0xff] }
 0x406   :  { %v2400_v25 = vadd.f32 %v2148_v55, %v154_v2  ;;  %v212_v2 = vadd.f32 %v7554_v57, %v7444_v23 }
 0x408   :  { %v4345_v34 = vmul.f32 -1.442695, %v2400_v25 }
 0x409   :  { %v2173_v44 = vpop.f32.mrf.mxu3 }
 0x40a   :  { %4666 = vpow2.f32 %v4345_v34  ;;  %v2174_v61 = vadd.f32 %v2173_v44, %v2160_v36 }
 0x40b   :  { %v2149_v14 = vpop.f32.mrf.mxu1 }
 0x40c   :  { %v2401_v30 = vadd.f32 %v2174_v61, %v183_v24  ;;  %v7555_v24 = vld [vmem:[#allocation45_spill] sm:$0xff] }
 0x40e   :  { %v4346_v58 = vmul.f32 -1.442695, %v2401_v30  ;;  %v7556_v30 = vld [vmem:[#allocation132_spill] sm:$0xff] }
 0x40f   :  { %v241_v61 = vadd.f32 %v7556_v30, %v7555_v24 }
 0x410   :  { %v4667_v8 = vpop.eup %4666  ;;  %4668 = vpow2.f32 %v4346_v58 }
 0x411   :  { %v2407_v54 = vadd.f32 1.0, %v4667_v8  ;;  %v2175_v53 = vpop.f32.mrf.mxu3 }
 0x413   :  { %4670 = vrcp.f32 %v2407_v54  ;;  %v2199_v60 = vpop.f32.mrf.mxu1  ;;  %v2419_v36 = vand.u32 2147483648, %v2407_v54  ;;  %vm2413_vm6 = vweird.f32 %v2407_v54 }
 0x414   :  { %v2200_v11 = vadd.f32 %v2199_v60, %v2186_v42 }
 0x415   :  { %v2420_v30 = vor.u32 1.1754944e-38, %v2419_v36 }
 0x416   :  { %v6158_v3 = vpop.f32.mrf.mxu0  ;;  %v4669_v55 = vpop.eup %4668  ;;  %v2402_v44 = vadd.f32 %v2200_v11, %v212_v2 }
 0x417   :  { %v2426_v41 = vadd.f32 1.0, %v4669_v55  ;;  %v2417_v55 = vand.u32 2147483647, %v2407_v54 }
 0x419   :  { %v4671_v48 = vpop.eup %4670  ;;  %4672 = vrcp.f32 %v2426_v41  ;;  %v2225_v34 = vpop.f32.mrf.mxu3  ;;  %vm2418_vm8 = vcmp.eq.f32.partialorder %v2417_v55, 8.507059e+37  ;;  %vm2432_vm10 = vweird.f32 %v2426_v41 }
 0x41a   :  { %v2409_v14 = vmul.f32 %v4671_v48, %v2407_v54  ;;  %v2226_v8 = vadd.f32 %v2225_v34, %v2212_v56  ;;  %4674 = vtanh.f32 %v2402_v44  ;;  %vm2414_vm5 = vweird.f32 %v4671_v48 }
 0x41b   :  { %v2201_v58 = vpop.f32.mrf.mxu1  ;;  %vm2415_vm7 = vmor %vm2413_vm6, %vm2414_vm5  ;;  %v2436_v44 = vand.u32 2147483647, %v2426_v41 }
 0x41c   :  { %v6164_v53 = vpop.f32.mrf.mxu2  ;;  %v2410_v60 = vsub.f32 1.0, %v2409_v14  ;;  %v2403_v42 = vadd.f32 %v2226_v8, %v241_v61  ;;  %v2438_v61 = vand.u32 2147483648, %v2426_v41 }
 0x41d   :  { %vm2437_vm12 = vcmp.eq.f32.partialorder %v2436_v44, 8.507059e+37 }
 0x41e   :  { %v2292_v25 = vpop.f32.mrf.mxu0  ;;  %v2411_v4 = vmul.f32 %v4671_v48, %v2410_v60  ;;  %v4347_v57 = vmul.f32 -1.442695, %v2403_v42 }
 0x41f   :  { %v4673_v23 = vpop.eup %4672 }
 0x420   :  { %v2428_v11 = vmul.f32 %v4673_v23, %v2426_v41  ;;  %v2412_v2 = vadd.f32 %v4671_v48, %v2411_v4  ;;  %4676 = vpow2.f32 %v4347_v57  ;;  %v4675_v14 = vpop.eup %4674  ;;  %vm2433_vm9 = vweird.f32 %v4673_v23 }
 0x421   :  { %v2227_v56 = vpop.f32.mrf.mxu3  ;;  %vm2434_vm11 = vmor %vm2432_vm10, %vm2433_vm9  ;;  %v2439_v57 = vor.u32 1.1754944e-38, %v2438_v61 }
 0x422   :  { %v2429_v34 = vsub.f32 1.0, %v2428_v11  ;;  %v2416_v24 = vsel %vm2415_vm7, %v4671_v48, %v2412_v2 }
 0x423   :  { %v2421_v8 = vsel %vm2418_vm8, %v2420_v30, %v2416_v24  ;;  %v2251_v60 = vpop.f32.mrf.mxu1 }
 0x424   :  { %v2318_v58 = vpop.f32.mrf.mxu2  ;;  %v2430_v25 = vmul.f32 %v4673_v23, %v2429_v34  ;;  %v2463_v42 = vmul.f32 %v4675_v14, %v2421_v8  ;;  %v2252_v52 = vadd.f32 %v2251_v60, %v6146_v38 }
 0x426   :  { %v4677_v4 = vpop.eup %4676  ;;  %v2431_v54 = vadd.f32 %v4673_v23, %v2430_v25  ;;  %v2333_v36 = vadd.f32 %v2252_v52, %v7339_v33 }
 0x427   :  { %v2446_v48 = vadd.f32 1.0, %v4677_v4 }
 0x428   :  { %v2435_v55 = vsel %vm2434_vm11, %v4673_v23, %v2431_v54  ;;  %v4342_v30 = vmul.f32 -1.442695, %v2333_v36 }
 0x429   :  { %v2440_v11 = vsel %vm2437_vm12, %v2439_v57, %v2435_v55  ;;  %4678 = vrcp.f32 %v2446_v48  ;;  %v2277_v24 = vpop.f32.mrf.mxu3  ;;  %v2458_v44 = vand.u32 2147483648, %v2446_v48  ;;  %v2456_v60 = vand.u32 2147483647, %v2446_v48 }
 0x42a   :  { %v2462_v2 = vmul.f32 %v2440_v11, %v5978_v10  ;;  %v2278_v56 = vadd.f32 %v2277_v24, %v6152_v40  ;;  %4680 = vpow2.f32 %v4342_v30  ;;  %vm2452_vm14 = vweird.f32 %v2446_v48 }
 0x42b   :  { %v2253_v34 = vpop.f32.mrf.mxu1  ;;  %vm2457_vm0 = vcmp.eq.f32.partialorder %v2456_v60, 8.507059e+37 }
 0x42c   :  { %v6170_v38 = vadd.f32 %v2463_v42, %v2462_v2  ;;  %v2334_v41 = vadd.f32 %v2278_v56, %v5578_v45  ;;  %v2459_v42 = vor.u32 1.1754944e-38, %v2458_v44 }
 0x42e   :  { %v4343_v52 = vmul.f32 -1.442695, %v2334_v41 }
 0x42f   :  { %v4679_v14 = vpop.eup %4678 }
 0x430   :  { %v2448_v61 = vmul.f32 %v4679_v14, %v2446_v48  ;;  %4682 = vpow2.f32 %v4343_v52  ;;  %v4681_v58 = vpop.eup %4680  ;;  %vm2453_vm13 = vweird.f32 %v4679_v14 }
 0x431   :  { %v2279_v23 = vpop.f32.mrf.mxu3  ;;  %4684 = vtanh.f32 %v6170_v38  ;;  %vm2454_vm15 = vmor %vm2452_vm14, %vm2453_vm13  ;;  %v6174_v4 = vadd.f32 1.0, %v4681_v58 }
 0x432   :  { %v2449_v8 = vsub.f32 1.0, %v2448_v61 }
 0x433   :  { %vm2346_vm5 = vweird.f32 %v6174_v4 }
 0x434   :  { %v2450_v10 = vmul.f32 %v4679_v14, %v2449_v8 }
 0x436   :  { %v4683_v40 = vpop.eup %4682  ;;  %v2451_v25 = vadd.f32 %v4679_v14, %v2450_v10 }
 0x437   :  { %v2359_v54 = vadd.f32 1.0, %v4683_v40  ;;  %v4685_v57 = vpop.eup %4684 }
 0x438   :  { %v2455_v36 = vsel %vm2454_vm15, %v4679_v14, %v2451_v25 }
 0x439   :  { %v2460_v55 = vsel %vm2457_vm0, %v2459_v42, %v2455_v36  ;;  %4686 = vrcp.f32 %v2359_v54  ;;  %v2371_v25 = vand.u32 2147483648, %v2359_v54  ;;  %vm2365_vm2 = vweird.f32 %v2359_v54 }
 0x43a   :  { %v2466_v11 = vmul.f32 %v4685_v57, %v2460_v55  ;;  %4688 = vrcp.f32 %v6174_v4  ;;  %v2369_v36 = vand.u32 2147483647, %v2359_v54  ;;  %v2352_v55 = vand.u32 2147483648, %v6174_v4 }
 0x43c   :  { %v6177_v24 = vpack.c.bf16 %v2466_v11, %v2466_v11  ;;  %v2350_v11 = vand.u32 2147483647, %v6174_v4  ;;  %vm2370_vm7 = vcmp.eq.f32.partialorder %v2369_v36, 8.507059e+37 }
 0x43e   :  { %2477 = vmatmul.bf16.vlgmr.msrb.gmra.mxu0 %v6177_v24  ;;  %2503 = vmatmul.bf16.vlgmr.msrb.gmra.mxu2 %v6177_v24  ;;  %vm2351_vm8 = vcmp.eq.f32.partialorder %v2350_v11, 8.507059e+37  ;;  %v7560_v11 = vld [vmem:[#allocation84_spill] sm:$0xff] }
 0x43f   :  { %v4687_v48 = vpop.eup %4686  ;;  %2573 = vmatpush.bf16.msrb.mxu0 %v7340_v13  ;;  %2599 = vmatpush.bf16.msrb.mxu2 %v7341_v9 }
 0x440   :  { %v4689_v30 = vpop.eup %4688  ;;  %v2361_v56 = vmul.f32 %v4687_v48, %v2359_v54  ;;  %vm2366_vm1 = vweird.f32 %v4687_v48 }
 0x441   :  { %v2342_v34 = vmul.f32 %v4689_v30, %v6174_v4  ;;  %vm2347_vm3 = vweird.f32 %v4689_v30  ;;  %vm6198_vm4 = vmor %vm2365_vm2, %vm2366_vm1 }
 0x442   :  { %v2362_v41 = vsub.f32 1.0, %v2361_v56  ;;  %vm2348_vm6 = vmor %vm2346_vm5, %vm2347_vm3 }
 0x443   :  { %v2303_v2 = vpop.f32.mrf.mxu1  ;;  %2574 = vmatpush.bf16.msrb.mxu0 %v7342_v28  ;;  %2600 = vmatpush.bf16.msrb.mxu2 %v7343_v17  ;;  %v2343_v23 = vsub.f32 1.0, %v2342_v34  ;;  %v2372_v34 = vor.u32 1.1754944e-38, %v2371_v25 }
 0x444   :  { %v2304_v14 = vadd.f32 %v2303_v2, %v6158_v3  ;;  %v2363_v58 = vmul.f32 %v4687_v48, %v2362_v41 }
 0x445   :  { %v2344_v40 = vmul.f32 %v4689_v30, %v2343_v23 }
 0x446   :  { %v2335_v10 = vadd.f32 %v2304_v14, %v5606_v63  ;;  %v2364_v3 = vadd.f32 %v4687_v48, %v2363_v58  ;;  %v2353_v14 = vor.u32 1.1754944e-38, %v2352_v55  ;;  %v7559_v55 = vld [vmem:[#allocation125_spill] sm:$0xff] }
 0x447   :  { %2575 = vmatpush.bf16.msrb.mxu0 %v7243_v50  ;;  %2601 = vmatpush.bf16.msrb.mxu2 %v7244_v5  ;;  %v2345_v42 = vadd.f32 %v4689_v30, %v2344_v40 }
 0x448   :  { %v2368_v2 = vsel %vm6198_vm4, %v4687_v48, %v2364_v3 }
 0x449   :  { %v2329_v52 = vpop.f32.mrf.mxu3  ;;  %v2349_v54 = vsel %vm2348_vm6, %v4689_v30, %v2345_v42 }
 0x44a   :  { %v2330_v61 = vadd.f32 %v2329_v52, %v6164_v53  ;;  %v2354_v23 = vsel %vm2351_vm8, %v2353_v14, %v2349_v54  ;;  %v7564_v54 = vld [vmem:[#allocation86_spill] sm:$0xff] }
 0x44b   :  { %v2305_v8 = vpop.f32.mrf.mxu1  ;;  %2576 = vmatpush.bf16.msrb.mxu0 %v7245_v6  ;;  %2602 = vmatpush.bf16.msrb.mxu2 %v7246_v39  ;;  %v7567_v14 = vld [vmem:[#allocation130_spill] sm:$0xff] }
 0x44c   :  { %v2336_v44 = vadd.f32 %v2330_v61, %v5603_v15  ;;  %v2373_v61 = vsel %vm2370_vm7, %v2372_v34, %v2368_v2  ;;  %v7561_v2 = vld [vmem:[#allocation81_spill] sm:$0xff]  ;;  %v7563_v34 = vld [vmem:[#allocation127_spill] sm:$0xff] }
 0x44d   :  { %v2395_v4 = vmul.f32 %v2373_v61, %v6021_v7  ;;  %v7568_v61 = vld [vmem:[#allocation10_spill] sm:$0xff] }
 0x44e   :  { %v4344_v60 = vmul.f32 -1.442695, %v2336_v44  ;;  %2529 = vmatmul.bf16.vlgmr.msra.gmra.mxu0 %v6177_v24  ;;  %2555 = vmatmul.bf16.vlgmr.msra.gmra.mxu2 %v6177_v24 }
 0x44f   :  { %2577 = vmatpush.bf16.msrb.mxu0 %v7344_v20  ;;  %2603 = vmatpush.bf16.msrb.mxu2 %v7345_v27 }
 0x450   :  { %4690 = vpow2.f32 %v4344_v60 }
 0x451   :  { %v2331_v53 = vpop.f32.mrf.mxu3  ;;  %4692 = vtanh.f32 %v2335_v10 }
 0x453   :  { %2578 = vmatpush.bf16.msrb.mxu0 %v5349_v22  ;;  %2604 = vmatpush.bf16.msrb.mxu2 %v7249_v32 }
 0x456   :  { %v4691_v56 = vpop.eup %4690 }
 0x457   :  { %v2379_v41 = vadd.f32 1.0, %v4691_v56  ;;  %v4693_v52 = vpop.eup %4692  ;;  %2579 = vmatpush.bf16.msrb.mxu0 %v5361_v47  ;;  %2605 = vmatpush.bf16.msrb.mxu2 %v5363_v35  ;;  %v7562_v56 = vld [vmem:[#allocation126_spill] sm:$0xff] }
 0x458   :  { %v2396_v48 = vmul.f32 %v4693_v52, %v2354_v23  ;;  %v7566_v52 = vld [vmem:[#allocation129_spill] sm:$0xff]  ;;  %v7569_v23 = vld [vmem:[#allocation12_spill] sm:$0xff] }
 0x459   :  { %4694 = vrcp.f32 %v2379_v41  ;;  %v2391_v7 = vand.u32 2147483648, %v2379_v41  ;;  %v2389_v60 = vand.u32 2147483647, %v2379_v41  ;;  %vm2385_vm10 = vweird.f32 %v2379_v41 }
 0x45a   :  { %v6214_v8 = vadd.f32 %v2396_v48, %v2395_v4  ;;  %v7570_v4 = vld [vmem:[#allocation88_spill] sm:$0xff]  ;;  %v7571_v48 = vld [vmem:[#allocation85_spill] sm:$0xff] }
 0x45b   :  { %2580 = vmatpush.bf16.msrb.mxu0 %v5372_v46  ;;  %2606 = vmatpush.bf16.msrb.mxu2 %v5374_v26  ;;  %v2392_v3 = vor.u32 1.1754944e-38, %v2391_v7  ;;  %vm2390_vm12 = vcmp.eq.f32.partialorder %v2389_v60, 8.507059e+37  ;;  %v7575_v7 = vld [vmem:[#allocation87_spill] sm:$0xff]  ;;  %v7577_v60 = vld [vmem:[#allocation20_spill] sm:$0xff] }
 0x45c   :  { %4696 = vtanh.f32 %v6214_v8 }
 0x45e   :  { %2581 = vmatmul.bf16.vlgmr.msrb.gmra.mxu0 %v6177_v24  ;;  %2607 = vmatmul.bf16.vlgmr.msrb.gmra.mxu2 %v6177_v24 }
 0x45f   :  { %v4695_v30 = vpop.eup %4694  ;;  %2625 = vmatpush.bf16.msra.mxu0 %v5376_v49  ;;  %2651 = vmatpush.bf16.msra.mxu2 %v5378_v1 }
 0x460   :  { %v2381_v44 = vmul.f32 %v4695_v30, %v2379_v41  ;;  %vm2386_vm9 = vweird.f32 %v4695_v30  ;;  %v7565_v41 = vld [vmem:[#allocation83_spill] sm:$0xff] }
 0x461   :  { %vm2387_vm11 = vmor %vm2385_vm10, %vm2386_vm9 }
 0x462   :  { %v2382_v58 = vsub.f32 1.0, %v2381_v44  ;;  %v4697_v25 = vpop.eup %4696  ;;  %v7573_v44 = vld [vmem:[#allocation16_spill] sm:$0xff] }
 0x463   :  { %2626 = vmatpush.bf16.msra.mxu0 %v5391_v37  ;;  %2652 = vmatpush.bf16.msra.mxu2 %v5393_v12 }
 0x464   :  { %v2383_v10 = vmul.f32 %v4695_v30, %v2382_v58  ;;  %v7574_v58 = vld [vmem:[#allocation90_spill] sm:$0xff] }
 0x466   :  { %v2384_v40 = vadd.f32 %v4695_v30, %v2383_v10  ;;  %v7576_v10 = vld [vmem:[#allocation18_spill] sm:$0xff] }
 0x467   :  { %2627 = vmatpush.bf16.msra.mxu0 %v5402_v16  ;;  %2653 = vmatpush.bf16.msra.mxu2 %v5404_v21 }
 0x468   :  { %v2388_v53 = vsel %vm2387_vm11, %v4695_v30, %v2384_v40  ;;  %v7572_v30 = vld [vmem:[#allocation14_spill] sm:$0xff]  ;;  %v7578_v40 = vld [vmem:[#allocation93_spill] sm:$0xff] }
 0x469   :  { %v2393_v42 = vsel %vm2390_vm12, %v2392_v3, %v2388_v53  ;;  %v7579_v3 = vld [vmem:[#allocation89_spill] sm:$0xff]  ;;  %v7580_v53 = vld [vmem:[#allocation22_spill] sm:$0xff] }
 0x46a   :  { %v2399_v36 = vmul.f32 %v4697_v25, %v2393_v42  ;;  %v7581_v25 = vld [vmem:[#allocation24_spill] sm:$0xff]  ;;  %v7583_v42 = vld [vmem:[#allocation91_spill] sm:$0xff] }
 0x46b   :  { %2628 = vmatpush.bf16.msra.mxu0 %v5415_v29  ;;  %2654 = vmatpush.bf16.msra.mxu2 %v5417_v59 }
 0x46c   :  { %v6227_v57 = vpack.c.bf16 %v2399_v36, %v2399_v36  ;;  %v7584_v36 = vld [vmem:[#allocation98_spill] sm:$0xff] }
 0x46e   :  { %2490 = vmatmul.bf16.vlgmr.msra.gmra.mxu1 %v6227_v57  ;;  %2516 = vmatmul.bf16.vlgmr.msrb.gmra.mxu3 %v6227_v57 }
 0x46f   :  { %2586 = vmatpush.bf16.msra.mxu1 %v7250_v43  ;;  %2612 = vmatpush.bf16.msrb.mxu3 %v7251_v18 }
 0x470   :  { %2629 = vmatpush.bf16.msra.mxu0 %v5423_v0  ;;  %2655 = vmatpush.bf16.msra.mxu2 %v5425_v31 }
 0x473   :  { %2587 = vmatpush.bf16.msra.mxu1 %v7450_v51  ;;  %2613 = vmatpush.bf16.msrb.mxu3 %v7451_v19 }
 0x474   :  { %2630 = vmatpush.bf16.msra.mxu0 %v7452_v62  ;;  %2656 = vmatpush.bf16.msra.mxu2 %v7559_v55 }
 0x477   :  { %2588 = vmatpush.bf16.msra.mxu1 %v7560_v11  ;;  %2614 = vmatpush.bf16.msrb.mxu3 %v7561_v2 }
 0x478   :  { %2631 = vmatpush.bf16.msra.mxu0 %v7562_v56  ;;  %2657 = vmatpush.bf16.msra.mxu2 %v7563_v34 }
 0x47b   :  { %2589 = vmatpush.bf16.msra.mxu1 %v7564_v54  ;;  %2615 = vmatpush.bf16.msrb.mxu3 %v7565_v41  ;;  %v7658_v41 = vld [vmem:[#allocation58_spill] sm:$0xff] }
 0x47c   :  { %2632 = vmatpush.bf16.msra.mxu0 %v7566_v52  ;;  %2658 = vmatpush.bf16.msra.mxu2 %v7567_v14 }
 0x47e   :  { %2542 = vmatmul.bf16.vlgmr.msrb.gmra.mxu1 %v6227_v57  ;;  %2568 = vmatmul.bf16.vlgmr.msra.gmra.mxu3 %v6227_v57 }
 0x47f   :  { %2590 = vmatpush.bf16.msra.mxu1 %v7570_v4  ;;  %2616 = vmatpush.bf16.msrb.mxu3 %v7571_v48  ;;  %v7648_v48 = vld [vmem:[#allocation64_spill] sm:$0xff]  ;;  %v7652_v4 = vld [vmem:[#allocation73_spill] sm:$0xff] }
 0x480   :  { %2813 = vmatpush.bf16.msrb.mxu0 %v7568_v61  ;;  %2839 = vmatpush.bf16.msrb.mxu2 %v7569_v23  ;;  %v7656_v23 = vld [vmem:[#allocation38_spill] sm:$0xff] }
 0x481   :  { %2633 = vmatmul.bf16.vlgmr.msra.gmra.mxu0 %v6177_v24  ;;  %2659 = vmatmul.bf16.vlgmr.msra.gmra.mxu2 %v6177_v24  ;;  %v7582_v24 = vld [vmem:[#allocation95_spill] sm:$0xff] }
 0x483   :  { %2591 = vmatpush.bf16.msra.mxu1 %v7574_v58  ;;  %2617 = vmatpush.bf16.msrb.mxu3 %v7575_v7  ;;  %v7585_v58 = vld [vmem:[#allocation92_spill] sm:$0xff]  ;;  %v7586_v7 = vld [vmem:[#allocation26_spill] sm:$0xff] }
 0x484   :  { %2814 = vmatpush.bf16.msrb.mxu0 %v7572_v30  ;;  %2840 = vmatpush.bf16.msrb.mxu2 %v7573_v44  ;;  %v7644_v30 = vld [vmem:[#allocation55_spill] sm:$0xff] }
 0x487   :  { %2592 = vmatpush.bf16.msra.mxu1 %v7578_v40  ;;  %2618 = vmatpush.bf16.msrb.mxu3 %v7579_v3  ;;  %v7588_v3 = vld [vmem:[#allocation102_spill] sm:$0xff]  ;;  %v7597_v40 = vld [vmem:[#allocation103_spill] sm:$0xff] }
 0x488   :  { %2815 = vmatpush.bf16.msrb.mxu0 %v7576_v10  ;;  %2841 = vmatpush.bf16.msrb.mxu2 %v7577_v60  ;;  %v7587_v10 = vld [vmem:[#allocation28_spill] sm:$0xff] }
 0x489   :  { %v7598_v60 = vld [vmem:[#allocation40_spill] sm:$0xff] }
 0x48b   :  { %2593 = vmatpush.bf16.msra.mxu1 %v7582_v24  ;;  %2619 = vmatpush.bf16.msrb.mxu3 %v7583_v42  ;;  %v7591_v24 = vld [vmem:[#allocation32_spill] sm:$0xff]  ;;  %v7592_v42 = vld [vmem:[#allocation106_spill] sm:$0xff] }
 0x48c   :  { %2816 = vmatpush.bf16.msrb.mxu0 %v7580_v53  ;;  %2842 = vmatpush.bf16.msrb.mxu2 %v7581_v25  ;;  %v7589_v53 = vld [vmem:[#allocation94_spill] sm:$0xff] }
 0x48d   :  { %v7590_v25 = vld [vmem:[#allocation30_spill] sm:$0xff] }
 0x48e   :  { %2594 = vmatmul.bf16.vlgmr.msra.gmra.mxu1 %v6227_v57  ;;  %2620 = vmatmul.bf16.vlgmr.msrb.gmra.mxu3 %v6227_v57 }
 0x48f   :  { %2638 = vmatpush.bf16.msrb.mxu1 %v7584_v36  ;;  %2664 = vmatpush.bf16.msra.mxu3 %v7585_v58  ;;  %v7593_v36 = vld [vmem:[#allocation99_spill] sm:$0xff] }
 0x490   :  { %2817 = vmatpush.bf16.msrb.mxu0 %v7586_v7  ;;  %2843 = vmatpush.bf16.msrb.mxu2 %v7587_v10  ;;  %v7594_v58 = vld [vmem:[#allocation35_spill] sm:$0xff]  ;;  %v7595_v7 = vld [vmem:[#allocation37_spill] sm:$0xff]  ;;  %v7596_v10 = vld [vmem:[#allocation110_spill] sm:$0xff] }
 0x493   :  { %2639 = vmatpush.bf16.msrb.mxu1 %v7588_v3  ;;  %2665 = vmatpush.bf16.msra.mxu3 %v7589_v53  ;;  %v7599_v3 = vld [vmem:[#allocation43_spill] sm:$0xff]  ;;  %v7600_v53 = vld [vmem:[#allocation44_spill] sm:$0xff] }
 0x494   :  { %2818 = vmatpush.bf16.msrb.mxu0 %v7590_v25  ;;  %2844 = vmatpush.bf16.msrb.mxu2 %v7591_v24  ;;  %v7601_v25 = vld [vmem:[#allocation47_spill] sm:$0xff]  ;;  %v7602_v24 = vld [vmem:[#allocation114_spill] sm:$0xff] }
 0x497   :  { %2640 = vmatpush.bf16.msrb.mxu1 %v7592_v42  ;;  %2666 = vmatpush.bf16.msra.mxu3 %v7593_v36  ;;  %v7603_v42 = vld [vmem:[#allocation107_spill] sm:$0xff]  ;;  %v7604_v36 = vld [vmem:[#allocation49_spill] sm:$0xff] }
 0x498   :  { %2819 = vmatpush.bf16.msrb.mxu0 %v7594_v58  ;;  %2845 = vmatpush.bf16.msrb.mxu2 %v7595_v7  ;;  %v7605_v58 = vld [vmem:[#allocation51_spill] sm:$0xff]  ;;  %v7606_v7 = vld [vmem:[#allocation117_spill] sm:$0xff] }
 0x49b   :  { %2641 = vmatpush.bf16.msrb.mxu1 %v7596_v10  ;;  %2667 = vmatpush.bf16.msra.mxu3 %v7597_v40  ;;  %v7607_v10 = vld [vmem:[#allocation111_spill] sm:$0xff]  ;;  %v7608_v40 = vld [vmem:[#allocation54_spill] sm:$0xff] }
 0x49c   :  { %2820 = vmatpush.bf16.msrb.mxu0 %v7598_v60  ;;  %2846 = vmatpush.bf16.msrb.mxu2 %v7599_v3  ;;  %v7609_v60 = vld [vmem:[#allocation56_spill] sm:$0xff]  ;;  %v7610_v3 = vld [vmem:[#allocation119_spill] sm:$0xff] }
 0x49f   :  { %2642 = vmatpush.bf16.msrb.mxu1 %v7602_v24  ;;  %2668 = vmatpush.bf16.msra.mxu3 %v7603_v42  ;;  %v7613_v24 = vld [vmem:[#allocation61_spill] sm:$0xff]  ;;  %v7614_v42 = vld [vmem:[#allocation120_spill] sm:$0xff] }
 0x4a0   :  { %2865 = vmatpush.bf16.msra.mxu0 %v7600_v53  ;;  %2891 = vmatpush.bf16.msra.mxu2 %v7601_v25  ;;  %v7611_v53 = vld [vmem:[#allocation115_spill] sm:$0xff] }
 0x4a1   :  { %v7612_v25 = vld [vmem:[#allocation59_spill] sm:$0xff] }
 0x4a3   :  { %2643 = vmatpush.bf16.msrb.mxu1 %v7606_v7  ;;  %2669 = vmatpush.bf16.msra.mxu3 %v7607_v10  ;;  %v7617_v7 = vld [vmem:[#allocation8_spill] sm:$0xff]  ;;  %v7618_v10 = vld [vmem:[#allocation63_spill] sm:$0xff] }
 0x4a4   :  { %2866 = vmatpush.bf16.msra.mxu0 %v7604_v36  ;;  %2892 = vmatpush.bf16.msra.mxu2 %v7605_v58  ;;  %v7615_v36 = vld [vmem:[#allocation118_spill] sm:$0xff]  ;;  %v7616_v58 = vld [vmem:[#allocation11_spill] sm:$0xff] }
 0x4a7   :  { %2644 = vmatpush.bf16.msrb.mxu1 %v7610_v3  ;;  %2670 = vmatpush.bf16.msra.mxu3 %v7611_v53  ;;  %v7620_v53 = vld [vmem:[#allocation15_spill] sm:$0xff]  ;;  %v7629_v3 = vld [vmem:[#allocation17_spill] sm:$0xff] }
 0x4a8   :  { %2867 = vmatpush.bf16.msra.mxu0 %v7608_v40  ;;  %2893 = vmatpush.bf16.msra.mxu2 %v7609_v60  ;;  %v7619_v40 = vld [vmem:[#allocation65_spill] sm:$0xff]  ;;  %v7638_v60 = vld [vmem:[#allocation42_spill] sm:$0xff] }
 0x4ab   :  { %2645 = vmatpush.bf16.msrb.mxu1 %v7614_v42  ;;  %2671 = vmatpush.bf16.msra.mxu3 %v7615_v36  ;;  %v7623_v42 = vld [vmem:[#allocation69_spill] sm:$0xff]  ;;  %v7624_v36 = vld [vmem:[#allocation19_spill] sm:$0xff] }
 0x4ac   :  { %2868 = vmatpush.bf16.msra.mxu0 %v7612_v25  ;;  %2894 = vmatpush.bf16.msra.mxu2 %v7613_v24  ;;  %v7621_v25 = vld [vmem:[#allocation9_spill] sm:$0xff]  ;;  %v7622_v24 = vld [vmem:[#allocation67_spill] sm:$0xff] }
 0x4ae   :  { %2646 = vmatmul.bf16.vlgmr.msrb.gmra.mxu1 %v6227_v57  ;;  %2672 = vmatmul.bf16.vlgmr.msra.gmra.mxu3 %v6227_v57  ;;  %v7630_v57 = vld [vmem:[#allocation76_spill] sm:$0xff] }
 0x4af   :  { %2826 = vmatpush.bf16.msra.mxu1 %v7616_v58  ;;  %2852 = vmatpush.bf16.msrb.mxu3 %v7617_v7  ;;  %v7625_v58 = vld [vmem:[#allocation13_spill] sm:$0xff]  ;;  %v7626_v7 = vld [vmem:[#allocation72_spill] sm:$0xff] }
 0x4b0   :  { %2869 = vmatpush.bf16.msra.mxu0 %v7618_v10  ;;  %2895 = vmatpush.bf16.msra.mxu2 %v7619_v40  ;;  %v7627_v10 = vld [vmem:[#allocation74_spill] sm:$0xff]  ;;  %v7628_v40 = vld [vmem:[#allocation23_spill] sm:$0xff] }
 0x4b3   :  { %2827 = vmatpush.bf16.msra.mxu1 %v7620_v53  ;;  %2853 = vmatpush.bf16.msrb.mxu3 %v7621_v25  ;;  %v7631_v53 = vld [vmem:[#allocation78_spill] sm:$0xff]  ;;  %v7632_v25 = vld [vmem:[#allocation27_spill] sm:$0xff] }
 0x4b4   :  { %2870 = vmatpush.bf16.msra.mxu0 %v7622_v24  ;;  %2896 = vmatpush.bf16.msra.mxu2 %v7623_v42  ;;  %v7633_v24 = vld [vmem:[#allocation21_spill] sm:$0xff]  ;;  %v7634_v42 = vld [vmem:[#allocation31_spill] sm:$0xff] }
 0x4b7   :  { %2828 = vmatpush.bf16.msra.mxu1 %v7624_v36  ;;  %2854 = vmatpush.bf16.msrb.mxu3 %v7625_v58  ;;  %v7635_v36 = vld [vmem:[#allocation25_spill] sm:$0xff] }
 0x4b8   :  { %2871 = vmatpush.bf16.msra.mxu0 %v7626_v7  ;;  %2897 = vmatpush.bf16.msra.mxu2 %v7627_v10  ;;  %v7636_v7 = vld [vmem:[#allocation36_spill] sm:$0xff]  ;;  %v7637_v10 = vld [vmem:[#allocation29_spill] sm:$0xff] }
 0x4bb   :  { %2829 = vmatpush.bf16.msra.mxu1 %v7628_v40  ;;  %2855 = vmatpush.bf16.msrb.mxu3 %v7629_v3  ;;  %v2478_v58 = vpop.f32.mrf.mxu0  ;;  %v7639_v3 = vld [vmem:[#allocation33_spill] sm:$0xff] }
 0x4bc   :  { %2872 = vmatpush.bf16.msra.mxu0 %v7630_v57  ;;  %2898 = vmatpush.bf16.msra.mxu2 %v7631_v53  ;;  %v7640_v53 = vld [vmem:[#allocation46_spill] sm:$0xff] }
 0x4bf   :  { %2830 = vmatpush.bf16.msra.mxu1 %v7632_v25  ;;  %2856 = vmatpush.bf16.msrb.mxu3 %v7633_v24  ;;  %v7641_v25 = vld [vmem:[#allocation34_spill] sm:$0xff] }
 0x4c0   :  { %v7642_v24 = vld [vmem:[#allocation50_spill] sm:$0xff] }
 0x4c1   :  { %v2504_v40 = vpop.f32.mrf.mxu2 }
 0x4c3   :  { %2831 = vmatpush.bf16.msra.mxu1 %v7634_v42  ;;  %2857 = vmatpush.bf16.msrb.mxu3 %v7635_v36  ;;  %v2480_v57 = vpop.f32.mrf.mxu0  ;;  %v7643_v42 = vld [vmem:[#allocation39_spill] sm:$0xff] }
 0x4c7   :  { %2832 = vmatpush.bf16.msra.mxu1 %v7636_v7  ;;  %2858 = vmatpush.bf16.msrb.mxu3 %v7637_v10  ;;  %v7645_v7 = vld [vmem:[#allocation48_spill] sm:$0xff] }
 0x4c8   :  { %v7646_v10 = vld [vmem:[#allocation60_spill] sm:$0xff] }
 0x4c9   :  { %v2506_v36 = vpop.f32.mrf.mxu2 }
 0x4cb   :  { %2833 = vmatpush.bf16.msra.mxu1 %v7638_v60  ;;  %2859 = vmatpush.bf16.msrb.mxu3 %v7639_v3  ;;  %v2530_v44 = vpop.f32.mrf.mxu0  ;;  %v7647_v60 = vld [vmem:[#allocation52_spill] sm:$0xff] }
 0x4cf   :  { %2878 = vmatpush.bf16.msrb.mxu1 %v7640_v53  ;;  %2904 = vmatpush.bf16.msra.mxu3 %v7641_v25  ;;  %v7649_v53 = vld [vmem:[#allocation57_spill] sm:$0xff]  ;;  %v7650_v25 = vld [vmem:[#allocation68_spill] sm:$0xff] }
 0x4d1   :  { %v2556_v3 = vpop.f32.mrf.mxu2 }
 0x4d3   :  { %2879 = vmatpush.bf16.msrb.mxu1 %v7642_v24  ;;  %2905 = vmatpush.bf16.msra.mxu3 %v7643_v42  ;;  %v2532_v57 = vpop.f32.mrf.mxu0  ;;  %v7651_v24 = vld [vmem:[#allocation62_spill] sm:$0xff] }
 0x4d7   :  { %2880 = vmatpush.bf16.msrb.mxu1 %v7644_v30  ;;  %2906 = vmatpush.bf16.msra.mxu3 %v7645_v7  ;;  %v7653_v30 = vld [vmem:[#allocation66_spill] sm:$0xff]  ;;  %v7654_v7 = vld [vmem:[#allocation77_spill] sm:$0xff] }
 0x4d9   :  { %v2558_v36 = vpop.f32.mrf.mxu2 }
 0x4db   :  { %2881 = vmatpush.bf16.msrb.mxu1 %v7646_v10  ;;  %2907 = vmatpush.bf16.msra.mxu3 %v7647_v60  ;;  %v2582_v42 = vpop.f32.mrf.mxu0  ;;  %v7655_v10 = vld [vmem:[#allocation70_spill] sm:$0xff] }
 0x4df   :  { %2882 = vmatpush.bf16.msrb.mxu1 %v7648_v48  ;;  %2908 = vmatpush.bf16.msra.mxu3 %v7649_v53  ;;  %v7657_v53 = vld [vmem:[#allocation147_spill] sm:$0xff] }
 0x4e0   :  { %v156_v61 = vadd.f32 %v7657_v53, %v7656_v23  ;;  %v7662_v23 = vld [vmem:[#allocation79_spill] sm:$0xff] }
 0x4e1   :  { %v6343_v60 = vpop.f32.mrf.mxu2 }
 0x4e3   :  { %2883 = vmatpush.bf16.msrb.mxu1 %v7650_v25  ;;  %2909 = vmatpush.bf16.msra.mxu3 %v7651_v24  ;;  %v2584_v57 = vpop.f32.mrf.mxu0 }
 0x4e7   :  { %2884 = vmatpush.bf16.msrb.mxu1 %v7652_v4  ;;  %2910 = vmatpush.bf16.msra.mxu3 %v7653_v30  ;;  %v7659_v4 = vld [vmem:[#allocation133_spill] sm:$0xff] }
 0x4e8   :  { %v185_v54 = vadd.f32 %v7659_v4, %v7658_v41  ;;  %v7661_v4 = vld [vmem:[#allocation134_spill] sm:$0xff] }
 0x4e9   :  { %v2610_v14 = vpop.f32.mrf.mxu2 }
 0x4eb   :  { %2885 = vmatpush.bf16.msrb.mxu1 %v7654_v7  ;;  %2911 = vmatpush.bf16.msra.mxu3 %v7655_v10  ;;  %v2491_v48 = vpop.f32.mrf.mxu1 }
 0x4ec   :  { %v2492_v25 = vadd.f32 %v2491_v48, %v2478_v58 }
 0x4ee   :  { %v2744_v24 = vadd.f32 %v2492_v25, %v156_v61  ;;  %v7660_v25 = vld [vmem:[#allocation45_spill] sm:$0xff] }
 0x4f0   :  { %v4351_v36 = vmul.f32 -1.442695, %v2744_v24  ;;  %v243_v24 = vadd.f32 %v7661_v4, %v7660_v25 }
 0x4f1   :  { %v2517_v52 = vpop.f32.mrf.mxu3 }
 0x4f2   :  { %4698 = vpow2.f32 %v4351_v36  ;;  %v2518_v30 = vadd.f32 %v2517_v52, %v2504_v40 }
 0x4f3   :  { %v2493_v7 = vpop.f32.mrf.mxu1 }
 0x4f4   :  { %v2745_v34 = vadd.f32 %v2518_v30, %v185_v54 }
 0x4f6   :  { %v4352_v10 = vmul.f32 -1.442695, %v2745_v34 }
 0x4f8   :  { %v4699_v56 = vpop.eup %4698  ;;  %4700 = vpow2.f32 %v4352_v10 }
 0x4f9   :  { %v2751_v57 = vadd.f32 1.0, %v4699_v56  ;;  %v2519_v2 = vpop.f32.mrf.mxu3 }
 0x4fb   :  { %4702 = vrcp.f32 %v2751_v57  ;;  %v2543_v11 = vpop.f32.mrf.mxu1  ;;  %vm2757_vm15 = vweird.f32 %v2751_v57 }
 0x4fc   :  { %v2544_v10 = vadd.f32 %v2543_v11, %v2530_v44 }
 0x4fe   :  { %v6349_v53 = vpop.f32.mrf.mxu0  ;;  %v4701_v14 = vpop.eup %4700 }
 0x4ff   :  { %v2770_v61 = vadd.f32 1.0, %v4701_v14  ;;  %v7663_v14 = vld [vmem:[#allocation144_spill] sm:$0xff] }
 0x500   :  { %v214_v55 = vadd.f32 %v7663_v14, %v7662_v23 }
 0x501   :  { %v4703_v48 = vpop.eup %4702  ;;  %4704 = vrcp.f32 %v2770_v61  ;;  %v2569_v58 = vpop.f32.mrf.mxu3  ;;  %v2782_v25 = vand.u32 2147483648, %v2770_v61  ;;  %v2780_v11 = vand.u32 2147483647, %v2770_v61  ;;  %vm2776_vm0 = vweird.f32 %v2770_v61 }
 0x502   :  { %v2753_v52 = vmul.f32 %v4703_v48, %v2751_v57  ;;  %v2570_v7 = vadd.f32 %v2569_v58, %v2556_v3  ;;  %v2746_v4 = vadd.f32 %v2544_v10, %v214_v55  ;;  %vm2758_vm13 = vweird.f32 %v4703_v48 }
 0x503   :  { %v2545_v34 = vpop.f32.mrf.mxu1  ;;  %v2763_v58 = vand.u32 2147483648, %v2751_v57  ;;  %vm6357_vm1 = vmor %vm2757_vm15, %vm2758_vm13  ;;  %v2783_v55 = vor.u32 1.1754944e-38, %v2782_v25  ;;  %vm2781_vm3 = vcmp.eq.f32.partialorder %v2780_v11, 8.507059e+37 }
 0x504   :  { %v6353_v54 = vpop.f32.mrf.mxu2  ;;  %v2754_v30 = vsub.f32 1.0, %v2753_v52  ;;  %v2747_v56 = vadd.f32 %v2570_v7, %v243_v24  ;;  %v2761_v7 = vand.u32 2147483647, %v2751_v57 }
 0x506   :  { %v2636_v2 = vpop.f32.mrf.mxu0  ;;  %v4353_v40 = vmul.f32 -1.442695, %v2747_v56  ;;  %v2755_v41 = vmul.f32 %v4703_v48, %v2754_v30  ;;  %vm2762_vm4 = vcmp.eq.f32.partialorder %v2761_v7, 8.507059e+37 }
 0x507   :  { %v4705_v36 = vpop.eup %4704  ;;  %v2764_v2 = vor.u32 1.1754944e-38, %v2763_v58 }
 0x508   :  { %v2772_v62 = vmul.f32 %v4705_v36, %v2770_v61  ;;  %4706 = vpow2.f32 %v4353_v40  ;;  %v2756_v3 = vadd.f32 %v4703_v48, %v2755_v41  ;;  %vm2777_vm14 = vweird.f32 %v4705_v36 }
 0x509   :  { %v2571_v19 = vpop.f32.mrf.mxu3  ;;  %4708 = vtanh.f32 %v2746_v4  ;;  %vm2778_vm2 = vmor %vm2776_vm0, %vm2777_vm14 }
 0x50a   :  { %v2773_v51 = vsub.f32 1.0, %v2772_v62 }
 0x50b   :  { %v2595_v52 = vpop.f32.mrf.mxu1 }
 0x50c   :  { %v2662_v34 = vpop.f32.mrf.mxu2  ;;  %v2774_v24 = vmul.f32 %v4705_v36, %v2773_v51  ;;  %v2596_v44 = vadd.f32 %v2595_v52, %v2582_v42  ;;  %v2760_v51 = vsel %vm6357_vm1, %v4703_v48, %v2756_v3 }
 0x50d   :  { %v2765_v10 = vsel %vm2762_vm4, %v2764_v2, %v2760_v51 }
 0x50e   :  { %v4707_v30 = vpop.eup %4706  ;;  %v2775_v19 = vadd.f32 %v4705_v36, %v2774_v24  ;;  %v2677_v62 = vadd.f32 %v2596_v44, %v7339_v33 }
 0x50f   :  { %v2790_v41 = vadd.f32 1.0, %v4707_v30  ;;  %v4709_v52 = vpop.eup %4708 }
 0x510   :  { %v2779_v42 = vsel %vm2778_vm2, %v4705_v36, %v2775_v19  ;;  %v4348_v40 = vmul.f32 -1.442695, %v2677_v62  ;;  %v2807_v24 = vmul.f32 %v4709_v52, %v2765_v10 }
 0x511   :  { %v2784_v57 = vsel %vm2781_vm3, %v2783_v55, %v2779_v42  ;;  %4710 = vrcp.f32 %v2790_v41  ;;  %v2621_v61 = vpop.f32.mrf.mxu3  ;;  %v2802_v7 = vand.u32 2147483648, %v2790_v41  ;;  %vm2796_vm6 = vweird.f32 %v2790_v41 }
 0x512   :  { %v2622_v14 = vadd.f32 %v2621_v61, %v6343_v60  ;;  %v2806_v4 = vmul.f32 %v2784_v57, %v6170_v38  ;;  %4712 = vpow2.f32 %v4348_v40  ;;  %v2800_v38 = vand.u32 2147483647, %v2790_v41 }
 0x513   :  { %v2597_v34 = vpop.f32.mrf.mxu1  ;;  %v2803_v62 = vor.u32 1.1754944e-38, %v2802_v7 }
 0x514   :  { %v2678_v25 = vadd.f32 %v2622_v14, %v5578_v45  ;;  %v6367_v36 = vadd.f32 %v2807_v24, %v2806_v4  ;;  %vm2801_vm8 = vcmp.eq.f32.partialorder %v2800_v38, 8.507059e+37 }
 0x516   :  { %v4349_v48 = vmul.f32 -1.442695, %v2678_v25 }
 0x517   :  { %v4711_v3 = vpop.eup %4710 }
 0x518   :  { %v2792_v58 = vmul.f32 %v4711_v3, %v2790_v41  ;;  %4714 = vpow2.f32 %v4349_v48  ;;  %v4713_v60 = vpop.eup %4712  ;;  %vm2797_vm5 = vweird.f32 %v4711_v3 }
 0x519   :  { %v2623_v11 = vpop.f32.mrf.mxu3  ;;  %4716 = vtanh.f32 %v6367_v36  ;;  %vm2798_vm7 = vmor %vm2796_vm6, %vm2797_vm5  ;;  %v6370_v55 = vadd.f32 1.0, %v4713_v60 }
 0x51a   :  { %v2793_v44 = vsub.f32 1.0, %v2792_v58 }
 0x51b   :  { %vm2690_vm13 = vweird.f32 %v6370_v55 }
 0x51c   :  { %v2794_v30 = vmul.f32 %v4711_v3, %v2793_v44 }
 0x51e   :  { %v4715_v56 = vpop.eup %4714  ;;  %v2795_v19 = vadd.f32 %v4711_v3, %v2794_v30 }
 0x51f   :  { %v2703_v51 = vadd.f32 1.0, %v4715_v56  ;;  %v4717_v42 = vpop.eup %4716 }
 0x520   :  { %v2799_v2 = vsel %vm2798_vm7, %v4711_v3, %v2795_v19 }
 0x521   :  { %v2804_v57 = vsel %vm2801_vm8, %v2803_v62, %v2799_v2  ;;  %4718 = vrcp.f32 %v2703_v51  ;;  %v2715_v38 = vand.u32 2147483648, %v2703_v51  ;;  %vm2709_vm10 = vweird.f32 %v2703_v51  ;;  %v7669_v62 = vld [vmem:[#allocation75_spill] sm:$0xff] }
 0x522   :  { %v2810_v61 = vmul.f32 %v4717_v42, %v2804_v57  ;;  %4720 = vrcp.f32 %v6370_v55  ;;  %v2713_v19 = vand.u32 2147483647, %v2703_v51  ;;  %v2696_v2 = vand.u32 2147483648, %v6370_v55 }
 0x523   :  { %v2694_v42 = vand.u32 2147483647, %v6370_v55 }
 0x524   :  { %v6373_v10 = vpack.c.bf16 %v2810_v61, %v2810_v61  ;;  %vm2714_vm15 = vcmp.eq.f32.partialorder %v2713_v19, 8.507059e+37  ;;  %v7668_v19 = vld [vmem:[#allocation82_spill] sm:$0xff] }
 0x525   :  { %vm2695_vm0 = vcmp.eq.f32.partialorder %v2694_v42, 8.507059e+37  ;;  %v7671_v42 = vld [vmem:[#allocation125_spill] sm:$0xff] }
 0x526   :  { %2821 = vmatmul.bf16.vlgmr.msrb.gmra.mxu0 %v6373_v10  ;;  %2847 = vmatmul.bf16.vlgmr.msrb.gmra.mxu2 %v6373_v10 }
 0x527   :  { %v4719_v41 = vpop.eup %4718  ;;  %2917 = vmatpush.bf16.msrb.mxu0 %v7340_v13  ;;  %2943 = vmatpush.bf16.msrb.mxu2 %v7341_v9 }
 0x528   :  { %v4721_v14 = vpop.eup %4720  ;;  %v2705_v4 = vmul.f32 %v4719_v41, %v2703_v51  ;;  %vm2710_vm9 = vweird.f32 %v4719_v41 }
 0x529   :  { %v2686_v34 = vmul.f32 %v4721_v14, %v6370_v55  ;;  %vm2691_vm11 = vweird.f32 %v4721_v14  ;;  %vm6394_vm12 = vmor %vm2709_vm10, %vm2710_vm9 }
 0x52a   :  { %v2706_v52 = vsub.f32 1.0, %v2705_v4  ;;  %vm2692_vm14 = vmor %vm2690_vm13, %vm2691_vm11 }
 0x52b   :  { %v2647_v40 = vpop.f32.mrf.mxu1  ;;  %2918 = vmatpush.bf16.msrb.mxu0 %v7342_v28  ;;  %2944 = vmatpush.bf16.msrb.mxu2 %v7343_v17  ;;  %v2687_v3 = vsub.f32 1.0, %v2686_v34 }
 0x52c   :  { %v2648_v24 = vadd.f32 %v2647_v40, %v6349_v53  ;;  %v2707_v44 = vmul.f32 %v4719_v41, %v2706_v52  ;;  %v2716_v40 = vor.u32 1.1754944e-38, %v2715_v38  ;;  %v2697_v52 = vor.u32 1.1754944e-38, %v2696_v2  ;;  %v7670_v2 = vld [vmem:[#allocation124_spill] sm:$0xff] }
 0x52d   :  { %v2688_v30 = vmul.f32 %v4721_v14, %v2687_v3 }
 0x52e   :  { %v2679_v7 = vadd.f32 %v2648_v24, %v5606_v63  ;;  %v2708_v53 = vadd.f32 %v4719_v41, %v2707_v44 }
 0x52f   :  { %2919 = vmatpush.bf16.msrb.mxu0 %v7243_v50  ;;  %2945 = vmatpush.bf16.msrb.mxu2 %v7244_v5  ;;  %v2689_v56 = vadd.f32 %v4721_v14, %v2688_v30 }
 0x530   :  { %v2712_v57 = vsel %vm6394_vm12, %v4719_v41, %v2708_v53 }
 0x531   :  { %v2673_v25 = vpop.f32.mrf.mxu3  ;;  %v2693_v51 = vsel %vm2692_vm14, %v4721_v14, %v2689_v56 }
 0x532   :  { %v2674_v48 = vadd.f32 %v2673_v25, %v6353_v54  ;;  %v2717_v25 = vsel %vm2714_vm15, %v2716_v40, %v2712_v57  ;;  %v2698_v24 = vsel %vm2695_vm0, %v2697_v52, %v2693_v51  ;;  %v7672_v57 = vld [vmem:[#allocation84_spill] sm:$0xff]  ;;  %v7674_v40 = vld [vmem:[#allocation126_spill] sm:$0xff]  ;;  %v7675_v51 = vld [vmem:[#allocation127_spill] sm:$0xff] }
 0x533   :  { %v2649_v58 = vpop.f32.mrf.mxu1  ;;  %2920 = vmatpush.bf16.msrb.mxu0 %v7245_v6  ;;  %2946 = vmatpush.bf16.msrb.mxu2 %v7246_v39  ;;  %v2739_v55 = vmul.f32 %v2717_v25, %v6214_v8  ;;  %v7678_v52 = vld [vmem:[#allocation129_spill] sm:$0xff]  ;;  %v7679_v25 = vld [vmem:[#allocation130_spill] sm:$0xff] }
 0x534   :  { %v2680_v11 = vadd.f32 %v2674_v48, %v5603_v15 }
 0x536   :  { %v4350_v60 = vmul.f32 -1.442695, %v2680_v11  ;;  %2873 = vmatmul.bf16.vlgmr.msra.gmra.mxu0 %v6373_v10  ;;  %2899 = vmatmul.bf16.vlgmr.msra.gmra.mxu2 %v6373_v10 }
 0x537   :  { %2921 = vmatpush.bf16.msrb.mxu0 %v7344_v20  ;;  %2947 = vmatpush.bf16.msrb.mxu2 %v7345_v27 }
 0x538   :  { %4722 = vpow2.f32 %v4350_v60 }
 0x539   :  { %v2675_v54 = vpop.f32.mrf.mxu3  ;;  %4724 = vtanh.f32 %v2679_v7 }
 0x53b   :  { %2922 = vmatpush.bf16.msrb.mxu0 %v5349_v22  ;;  %2948 = vmatpush.bf16.msrb.mxu2 %v7249_v32 }
 0x53e   :  { %v4723_v61 = vpop.eup %4722 }
 0x53f   :  { %v2723_v4 = vadd.f32 1.0, %v4723_v61  ;;  %v4725_v34 = vpop.eup %4724  ;;  %2923 = vmatpush.bf16.msrb.mxu0 %v5361_v47  ;;  %2949 = vmatpush.bf16.msrb.mxu2 %v5363_v35  ;;  %v7673_v61 = vld [vmem:[#allocation81_spill] sm:$0xff] }
 0x540   :  { %v2740_v41 = vmul.f32 %v4725_v34, %v2698_v24  ;;  %v7677_v34 = vld [vmem:[#allocation83_spill] sm:$0xff]  ;;  %v7680_v24 = vld [vmem:[#allocation10_spill] sm:$0xff] }
 0x541   :  { %4726 = vrcp.f32 %v2723_v4  ;;  %v2735_v8 = vand.u32 2147483648, %v2723_v4  ;;  %v2733_v44 = vand.u32 2147483647, %v2723_v4  ;;  %vm2729_vm2 = vweird.f32 %v2723_v4 }
 0x542   :  { %v6410_v48 = vadd.f32 %v2740_v41, %v2739_v55  ;;  %v7681_v55 = vld [vmem:[#allocation12_spill] sm:$0xff] }
 0x543   :  { %2924 = vmatpush.bf16.msrb.mxu0 %v5372_v46  ;;  %2950 = vmatpush.bf16.msrb.mxu2 %v5374_v26  ;;  %v2736_v60 = vor.u32 1.1754944e-38, %v2735_v8  ;;  %vm2734_vm4 = vcmp.eq.f32.partialorder %v2733_v44, 8.507059e+37  ;;  %v7682_v41 = vld [vmem:[#allocation88_spill] sm:$0xff]  ;;  %v7686_v8 = vld [vmem:[#allocation90_spill] sm:$0xff] }
 0x544   :  { %4728 = vtanh.f32 %v6410_v48  ;;  %v7688_v44 = vld [vmem:[#allocation18_spill] sm:$0xff] }
 0x546   :  { %2925 = vmatmul.bf16.vlgmr.msrb.gmra.mxu0 %v6373_v10  ;;  %2951 = vmatmul.bf16.vlgmr.msrb.gmra.mxu2 %v6373_v10 }
 0x547   :  { %v4727_v14 = vpop.eup %4726  ;;  %2969 = vmatpush.bf16.msra.mxu0 %v5376_v49  ;;  %2995 = vmatpush.bf16.msra.mxu2 %v5378_v1 }
 0x548   :  { %v2725_v3 = vmul.f32 %v4727_v14, %v2723_v4  ;;  %vm2730_vm1 = vweird.f32 %v4727_v14  ;;  %v7676_v4 = vld [vmem:[#allocation86_spill] sm:$0xff] }
 0x549   :  { %vm2731_vm3 = vmor %vm2729_vm2, %vm2730_vm1 }
 0x54a   :  { %v2726_v58 = vsub.f32 1.0, %v2725_v3  ;;  %v4729_v53 = vpop.eup %4728  ;;  %v7684_v3 = vld [vmem:[#allocation14_spill] sm:$0xff] }
 0x54b   :  { %2970 = vmatpush.bf16.msra.mxu0 %v5391_v37  ;;  %2996 = vmatpush.bf16.msra.mxu2 %v5393_v12 }
 0x54c   :  { %v2727_v11 = vmul.f32 %v4727_v14, %v2726_v58  ;;  %v7685_v58 = vld [vmem:[#allocation16_spill] sm:$0xff] }
 0x54e   :  { %v2728_v7 = vadd.f32 %v4727_v14, %v2727_v11  ;;  %v7687_v11 = vld [vmem:[#allocation87_spill] sm:$0xff] }
 0x54f   :  { %2971 = vmatpush.bf16.msra.mxu0 %v5402_v16  ;;  %2997 = vmatpush.bf16.msra.mxu2 %v5404_v21 }
 0x550   :  { %v2732_v30 = vsel %vm2731_vm3, %v4727_v14, %v2728_v7  ;;  %v7683_v14 = vld [vmem:[#allocation85_spill] sm:$0xff]  ;;  %v7689_v7 = vld [vmem:[#allocation20_spill] sm:$0xff] }
 0x551   :  { %v2737_v54 = vsel %vm2734_vm4, %v2736_v60, %v2732_v30  ;;  %v7690_v60 = vld [vmem:[#allocation93_spill] sm:$0xff] }
 0x552   :  { %v2743_v38 = vmul.f32 %v4729_v53, %v2737_v54  ;;  %v7691_v30 = vld [vmem:[#allocation89_spill] sm:$0xff]  ;;  %v7692_v53 = vld [vmem:[#allocation22_spill] sm:$0xff]  ;;  %v7693_v54 = vld [vmem:[#allocation24_spill] sm:$0xff] }
 0x553   :  { %2972 = vmatpush.bf16.msra.mxu0 %v5415_v29  ;;  %2998 = vmatpush.bf16.msra.mxu2 %v5417_v59 }
 0x554   :  { %v6423_v56 = vpack.c.bf16 %v2743_v38, %v2743_v38  ;;  %v7695_v38 = vld [vmem:[#allocation91_spill] sm:$0xff] }
 0x556   :  { %2834 = vmatmul.bf16.vlgmr.msra.gmra.mxu1 %v6423_v56  ;;  %2860 = vmatmul.bf16.vlgmr.msrb.gmra.mxu3 %v6423_v56 }
 0x557   :  { %2930 = vmatpush.bf16.msra.mxu1 %v7250_v43  ;;  %2956 = vmatpush.bf16.msrb.mxu3 %v7251_v18 }
 0x558   :  { %2973 = vmatpush.bf16.msra.mxu0 %v5423_v0  ;;  %2999 = vmatpush.bf16.msra.mxu2 %v5425_v31 }
 0x55b   :  { %2931 = vmatpush.bf16.msra.mxu1 %v7668_v19  ;;  %2957 = vmatpush.bf16.msrb.mxu3 %v7669_v62 }
 0x55c   :  { %2974 = vmatpush.bf16.msra.mxu0 %v7670_v2  ;;  %3000 = vmatpush.bf16.msra.mxu2 %v7671_v42 }
 0x55f   :  { %2932 = vmatpush.bf16.msra.mxu1 %v7672_v57  ;;  %2958 = vmatpush.bf16.msrb.mxu3 %v7673_v61 }
 0x560   :  { %2975 = vmatpush.bf16.msra.mxu0 %v7674_v40  ;;  %3001 = vmatpush.bf16.msra.mxu2 %v7675_v51 }
 0x563   :  { %2933 = vmatpush.bf16.msra.mxu1 %v7676_v4  ;;  %2959 = vmatpush.bf16.msrb.mxu3 %v7677_v34  ;;  %v7770_v4 = vld [vmem:[#allocation58_spill] sm:$0xff] }
 0x564   :  { %2976 = vmatpush.bf16.msra.mxu0 %v7678_v52  ;;  %3002 = vmatpush.bf16.msra.mxu2 %v7679_v25 }
 0x566   :  { %2886 = vmatmul.bf16.vlgmr.msrb.gmra.mxu1 %v6423_v56  ;;  %2912 = vmatmul.bf16.vlgmr.msra.gmra.mxu3 %v6423_v56 }
 0x567   :  { %2934 = vmatpush.bf16.msra.mxu1 %v7682_v41  ;;  %2960 = vmatpush.bf16.msrb.mxu3 %v7683_v14  ;;  %v7769_v41 = vld [vmem:[#allocation41_spill] sm:$0xff] }
 0x568   :  { %3157 = vmatpush.bf16.msrb.mxu0 %v7680_v24  ;;  %3183 = vmatpush.bf16.msrb.mxu2 %v7681_v55  ;;  %v7696_v24 = vld [vmem:[#allocation98_spill] sm:$0xff]  ;;  %v7697_v55 = vld [vmem:[#allocation92_spill] sm:$0xff] }
 0x569   :  { %2977 = vmatmul.bf16.vlgmr.msra.gmra.mxu0 %v6373_v10  ;;  %3003 = vmatmul.bf16.vlgmr.msra.gmra.mxu2 %v6373_v10  ;;  %v7694_v10 = vld [vmem:[#allocation95_spill] sm:$0xff] }
 0x56b   :  { %2935 = vmatpush.bf16.msra.mxu1 %v7686_v8  ;;  %2961 = vmatpush.bf16.msrb.mxu3 %v7687_v11  ;;  %v7756_v11 = vld [vmem:[#allocation55_spill] sm:$0xff]  ;;  %v7760_v8 = vld [vmem:[#allocation64_spill] sm:$0xff] }
 0x56c   :  { %3158 = vmatpush.bf16.msrb.mxu0 %v7684_v3  ;;  %3184 = vmatpush.bf16.msrb.mxu2 %v7685_v58  ;;  %v7698_v3 = vld [vmem:[#allocation26_spill] sm:$0xff]  ;;  %v7699_v58 = vld [vmem:[#allocation28_spill] sm:$0xff] }
 0x56f   :  { %2936 = vmatpush.bf16.msra.mxu1 %v7690_v60  ;;  %2962 = vmatpush.bf16.msrb.mxu3 %v7691_v30  ;;  %v7710_v30 = vld [vmem:[#allocation40_spill] sm:$0xff] }
 0x570   :  { %3159 = vmatpush.bf16.msrb.mxu0 %v7688_v44  ;;  %3185 = vmatpush.bf16.msrb.mxu2 %v7689_v7  ;;  %v7700_v44 = vld [vmem:[#allocation102_spill] sm:$0xff] }
 0x571   :  { %v7701_v7 = vld [vmem:[#allocation94_spill] sm:$0xff] }
 0x573   :  { %2937 = vmatpush.bf16.msra.mxu1 %v7694_v10  ;;  %2963 = vmatpush.bf16.msrb.mxu3 %v7695_v38  ;;  %v7704_v38 = vld [vmem:[#allocation106_spill] sm:$0xff]  ;;  %v7709_v10 = vld [vmem:[#allocation103_spill] sm:$0xff] }
 0x574   :  { %3160 = vmatpush.bf16.msrb.mxu0 %v7692_v53  ;;  %3186 = vmatpush.bf16.msrb.mxu2 %v7693_v54  ;;  %v7702_v53 = vld [vmem:[#allocation30_spill] sm:$0xff]  ;;  %v7703_v54 = vld [vmem:[#allocation32_spill] sm:$0xff] }
 0x576   :  { %2938 = vmatmul.bf16.vlgmr.msra.gmra.mxu1 %v6423_v56  ;;  %2964 = vmatmul.bf16.vlgmr.msrb.gmra.mxu3 %v6423_v56 }
 0x577   :  { %2982 = vmatpush.bf16.msrb.mxu1 %v7696_v24  ;;  %3008 = vmatpush.bf16.msra.mxu3 %v7697_v55  ;;  %v7705_v24 = vld [vmem:[#allocation99_spill] sm:$0xff] }
 0x578   :  { %3161 = vmatpush.bf16.msrb.mxu0 %v7698_v3  ;;  %3187 = vmatpush.bf16.msrb.mxu2 %v7699_v58  ;;  %v7706_v55 = vld [vmem:[#allocation35_spill] sm:$0xff]  ;;  %v7707_v3 = vld [vmem:[#allocation37_spill] sm:$0xff]  ;;  %v7708_v58 = vld [vmem:[#allocation110_spill] sm:$0xff] }
 0x57b   :  { %2983 = vmatpush.bf16.msrb.mxu1 %v7700_v44  ;;  %3009 = vmatpush.bf16.msra.mxu3 %v7701_v7  ;;  %v7711_v44 = vld [vmem:[#allocation43_spill] sm:$0xff]  ;;  %v7712_v7 = vld [vmem:[#allocation44_spill] sm:$0xff] }
 0x57c   :  { %3162 = vmatpush.bf16.msrb.mxu0 %v7702_v53  ;;  %3188 = vmatpush.bf16.msrb.mxu2 %v7703_v54  ;;  %v7713_v53 = vld [vmem:[#allocation47_spill] sm:$0xff]  ;;  %v7714_v54 = vld [vmem:[#allocation114_spill] sm:$0xff] }
 0x57f   :  { %2984 = vmatpush.bf16.msrb.mxu1 %v7704_v38  ;;  %3010 = vmatpush.bf16.msra.mxu3 %v7705_v24  ;;  %v7715_v38 = vld [vmem:[#allocation107_spill] sm:$0xff]  ;;  %v7716_v24 = vld [vmem:[#allocation49_spill] sm:$0xff] }
 0x580   :  { %3163 = vmatpush.bf16.msrb.mxu0 %v7706_v55  ;;  %3189 = vmatpush.bf16.msrb.mxu2 %v7707_v3  ;;  %v7717_v55 = vld [vmem:[#allocation51_spill] sm:$0xff]  ;;  %v7718_v3 = vld [vmem:[#allocation117_spill] sm:$0xff] }
 0x583   :  { %2985 = vmatpush.bf16.msrb.mxu1 %v7708_v58  ;;  %3011 = vmatpush.bf16.msra.mxu3 %v7709_v10  ;;  %v7719_v58 = vld [vmem:[#allocation111_spill] sm:$0xff]  ;;  %v7720_v10 = vld [vmem:[#allocation54_spill] sm:$0xff] }
 0x584   :  { %3164 = vmatpush.bf16.msrb.mxu0 %v7710_v30  ;;  %3190 = vmatpush.bf16.msrb.mxu2 %v7711_v44  ;;  %v7721_v30 = vld [vmem:[#allocation56_spill] sm:$0xff]  ;;  %v7722_v44 = vld [vmem:[#allocation119_spill] sm:$0xff] }
 0x587   :  { %2986 = vmatpush.bf16.msrb.mxu1 %v7714_v54  ;;  %3012 = vmatpush.bf16.msra.mxu3 %v7715_v38  ;;  %v7725_v54 = vld [vmem:[#allocation61_spill] sm:$0xff]  ;;  %v7726_v38 = vld [vmem:[#allocation120_spill] sm:$0xff] }
 0x588   :  { %3209 = vmatpush.bf16.msra.mxu0 %v7712_v7  ;;  %3235 = vmatpush.bf16.msra.mxu2 %v7713_v53  ;;  %v7723_v7 = vld [vmem:[#allocation115_spill] sm:$0xff] }
 0x589   :  { %v7724_v53 = vld [vmem:[#allocation59_spill] sm:$0xff] }
 0x58b   :  { %2987 = vmatpush.bf16.msrb.mxu1 %v7718_v3  ;;  %3013 = vmatpush.bf16.msra.mxu3 %v7719_v58  ;;  %v7729_v3 = vld [vmem:[#allocation8_spill] sm:$0xff]  ;;  %v7730_v58 = vld [vmem:[#allocation63_spill] sm:$0xff] }
 0x58c   :  { %3210 = vmatpush.bf16.msra.mxu0 %v7716_v24  ;;  %3236 = vmatpush.bf16.msra.mxu2 %v7717_v55  ;;  %v7727_v24 = vld [vmem:[#allocation118_spill] sm:$0xff]  ;;  %v7728_v55 = vld [vmem:[#allocation11_spill] sm:$0xff] }
 0x58f   :  { %2988 = vmatpush.bf16.msrb.mxu1 %v7722_v44  ;;  %3014 = vmatpush.bf16.msra.mxu3 %v7723_v7  ;;  %v7741_v7 = vld [vmem:[#allocation17_spill] sm:$0xff]  ;;  %v7750_v44 = vld [vmem:[#allocation42_spill] sm:$0xff] }
 0x590   :  { %3211 = vmatpush.bf16.msra.mxu0 %v7720_v10  ;;  %3237 = vmatpush.bf16.msra.mxu2 %v7721_v30  ;;  %v7731_v10 = vld [vmem:[#allocation65_spill] sm:$0xff]  ;;  %v7732_v30 = vld [vmem:[#allocation15_spill] sm:$0xff] }
 0x593   :  { %2989 = vmatpush.bf16.msrb.mxu1 %v7726_v38  ;;  %3015 = vmatpush.bf16.msra.mxu3 %v7727_v24  ;;  %v7735_v38 = vld [vmem:[#allocation69_spill] sm:$0xff]  ;;  %v7736_v24 = vld [vmem:[#allocation19_spill] sm:$0xff] }
 0x594   :  { %3212 = vmatpush.bf16.msra.mxu0 %v7724_v53  ;;  %3238 = vmatpush.bf16.msra.mxu2 %v7725_v54  ;;  %v7733_v53 = vld [vmem:[#allocation9_spill] sm:$0xff]  ;;  %v7734_v54 = vld [vmem:[#allocation67_spill] sm:$0xff] }
 0x596   :  { %2990 = vmatmul.bf16.vlgmr.msrb.gmra.mxu1 %v6423_v56  ;;  %3016 = vmatmul.bf16.vlgmr.msra.gmra.mxu3 %v6423_v56  ;;  %v7742_v56 = vld [vmem:[#allocation76_spill] sm:$0xff] }
 0x597   :  { %3170 = vmatpush.bf16.msra.mxu1 %v7728_v55  ;;  %3196 = vmatpush.bf16.msrb.mxu3 %v7729_v3  ;;  %v7737_v55 = vld [vmem:[#allocation13_spill] sm:$0xff]  ;;  %v7738_v3 = vld [vmem:[#allocation72_spill] sm:$0xff] }
 0x598   :  { %3213 = vmatpush.bf16.msra.mxu0 %v7730_v58  ;;  %3239 = vmatpush.bf16.msra.mxu2 %v7731_v10  ;;  %v7739_v58 = vld [vmem:[#allocation74_spill] sm:$0xff]  ;;  %v7740_v10 = vld [vmem:[#allocation23_spill] sm:$0xff] }
 0x59b   :  { %3171 = vmatpush.bf16.msra.mxu1 %v7732_v30  ;;  %3197 = vmatpush.bf16.msrb.mxu3 %v7733_v53  ;;  %v7743_v30 = vld [vmem:[#allocation78_spill] sm:$0xff]  ;;  %v7744_v53 = vld [vmem:[#allocation27_spill] sm:$0xff] }
 0x59c   :  { %3214 = vmatpush.bf16.msra.mxu0 %v7734_v54  ;;  %3240 = vmatpush.bf16.msra.mxu2 %v7735_v38  ;;  %v7745_v54 = vld [vmem:[#allocation21_spill] sm:$0xff]  ;;  %v7746_v38 = vld [vmem:[#allocation31_spill] sm:$0xff] }
 0x59f   :  { %3172 = vmatpush.bf16.msra.mxu1 %v7736_v24  ;;  %3198 = vmatpush.bf16.msrb.mxu3 %v7737_v55  ;;  %v7747_v24 = vld [vmem:[#allocation25_spill] sm:$0xff] }
 0x5a0   :  { %3215 = vmatpush.bf16.msra.mxu0 %v7738_v3  ;;  %3241 = vmatpush.bf16.msra.mxu2 %v7739_v58  ;;  %v7748_v3 = vld [vmem:[#allocation36_spill] sm:$0xff]  ;;  %v7749_v58 = vld [vmem:[#allocation29_spill] sm:$0xff] }
 0x5a3   :  { %3173 = vmatpush.bf16.msra.mxu1 %v7740_v10  ;;  %3199 = vmatpush.bf16.msrb.mxu3 %v7741_v7  ;;  %v2822_v55 = vpop.f32.mrf.mxu0  ;;  %v7751_v7 = vld [vmem:[#allocation33_spill] sm:$0xff] }
 0x5a4   :  { %3216 = vmatpush.bf16.msra.mxu0 %v7742_v56  ;;  %3242 = vmatpush.bf16.msra.mxu2 %v7743_v30  ;;  %v7752_v30 = vld [vmem:[#allocation46_spill] sm:$0xff] }
 0x5a7   :  { %3174 = vmatpush.bf16.msra.mxu1 %v7744_v53  ;;  %3200 = vmatpush.bf16.msrb.mxu3 %v7745_v54  ;;  %v7753_v53 = vld [vmem:[#allocation34_spill] sm:$0xff] }
 0x5a8   :  { %v7754_v54 = vld [vmem:[#allocation50_spill] sm:$0xff] }
 0x5a9   :  { %v2848_v10 = vpop.f32.mrf.mxu2 }
 0x5ab   :  { %3175 = vmatpush.bf16.msra.mxu1 %v7746_v38  ;;  %3201 = vmatpush.bf16.msrb.mxu3 %v7747_v24  ;;  %v2824_v56 = vpop.f32.mrf.mxu0  ;;  %v7755_v38 = vld [vmem:[#allocation39_spill] sm:$0xff] }
 0x5af   :  { %3176 = vmatpush.bf16.msra.mxu1 %v7748_v3  ;;  %3202 = vmatpush.bf16.msrb.mxu3 %v7749_v58  ;;  %v7757_v3 = vld [vmem:[#allocation48_spill] sm:$0xff] }
 0x5b0   :  { %v7758_v58 = vld [vmem:[#allocation60_spill] sm:$0xff] }
 0x5b1   :  { %v2850_v24 = vpop.f32.mrf.mxu2 }
 0x5b3   :  { %3177 = vmatpush.bf16.msra.mxu1 %v7750_v44  ;;  %3203 = vmatpush.bf16.msrb.mxu3 %v7751_v7  ;;  %v2874_v60 = vpop.f32.mrf.mxu0  ;;  %v7759_v44 = vld [vmem:[#allocation52_spill] sm:$0xff] }
 0x5b7   :  { %3222 = vmatpush.bf16.msrb.mxu1 %v7752_v30  ;;  %3248 = vmatpush.bf16.msra.mxu3 %v7753_v53  ;;  %v7761_v30 = vld [vmem:[#allocation57_spill] sm:$0xff]  ;;  %v7762_v53 = vld [vmem:[#allocation68_spill] sm:$0xff] }
 0x5b9   :  { %v2900_v7 = vpop.f32.mrf.mxu2 }
 0x5bb   :  { %3223 = vmatpush.bf16.msrb.mxu1 %v7754_v54  ;;  %3249 = vmatpush.bf16.msra.mxu3 %v7755_v38  ;;  %v2876_v56 = vpop.f32.mrf.mxu0  ;;  %v7763_v54 = vld [vmem:[#allocation62_spill] sm:$0xff] }
 0x5bf   :  { %3224 = vmatpush.bf16.msrb.mxu1 %v7756_v11  ;;  %3250 = vmatpush.bf16.msra.mxu3 %v7757_v3  ;;  %v7764_v11 = vld [vmem:[#allocation73_spill] sm:$0xff]  ;;  %v7765_v3 = vld [vmem:[#allocation66_spill] sm:$0xff] }
 0x5c1   :  { %v2902_v38 = vpop.f32.mrf.mxu2 }
 0x5c3   :  { %3225 = vmatpush.bf16.msrb.mxu1 %v7758_v58  ;;  %3251 = vmatpush.bf16.msra.mxu3 %v7759_v44  ;;  %v6535_v24 = vpop.f32.mrf.mxu0  ;;  %v7766_v58 = vld [vmem:[#allocation77_spill] sm:$0xff]  ;;  %v7767_v44 = vld [vmem:[#allocation70_spill] sm:$0xff] }
 0x5c7   :  { %3226 = vmatpush.bf16.msrb.mxu1 %v7760_v8  ;;  %3252 = vmatpush.bf16.msra.mxu3 %v7761_v30  ;;  %v7768_v30 = vld [vmem:[#allocation38_spill] sm:$0xff] }
 0x5c9   :  { %v6541_v56 = vpop.f32.mrf.mxu2 }
 0x5cb   :  { %3227 = vmatpush.bf16.msrb.mxu1 %v7762_v53  ;;  %3253 = vmatpush.bf16.msra.mxu3 %v7763_v54  ;;  %v2928_v8 = vpop.f32.mrf.mxu0  ;;  %v159_v53 = vadd.f32 %v7769_v41, %v7768_v30 }
 0x5cf   :  { %3228 = vmatpush.bf16.msrb.mxu1 %v7764_v11  ;;  %3254 = vmatpush.bf16.msra.mxu3 %v7765_v3  ;;  %v7771_v11 = vld [vmem:[#allocation136_spill] sm:$0xff] }
 0x5d0   :  { %v188_v51 = vadd.f32 %v7771_v11, %v7770_v4 }
 0x5d1   :  { %v2954_v54 = vpop.f32.mrf.mxu2 }
 0x5d3   :  { %3229 = vmatpush.bf16.msrb.mxu1 %v7766_v58  ;;  %3255 = vmatpush.bf16.msra.mxu3 %v7767_v44  ;;  %v2835_v14 = vpop.f32.mrf.mxu1 }
 0x5d4   :  { %v2836_v25 = vadd.f32 %v2835_v14, %v2822_v55  ;;  %v7772_v55 = vld [vmem:[#allocation146_spill] sm:$0xff] }
 0x5d6   :  { %v3088_v38 = vadd.f32 %v2836_v25, %v159_v53  ;;  %v217_v53 = vadd.f32 %v7772_v55, %v7662_v23 }
 0x5d8   :  { %v4357_v52 = vmul.f32 -1.442695, %v3088_v38 }
 0x5d9   :  { %v2861_v34 = vpop.f32.mrf.mxu3 }
 0x5da   :  { %4730 = vpow2.f32 %v4357_v52  ;;  %v2862_v3 = vadd.f32 %v2861_v34, %v2848_v10 }
 0x5db   :  { %v2837_v58 = vpop.f32.mrf.mxu1 }
 0x5dc   :  { %v3089_v40 = vadd.f32 %v2862_v3, %v188_v51  ;;  %v7773_v51 = vld [vmem:[#allocation45_spill] sm:$0xff] }
 0x5de   :  { %v4358_v44 = vmul.f32 -1.442695, %v3089_v40  ;;  %v7774_v40 = vld [vmem:[#allocation137_spill] sm:$0xff] }
 0x5df   :  { %v246_v10 = vadd.f32 %v7774_v40, %v7773_v51 }
 0x5e0   :  { %v4731_v61 = vpop.eup %4730  ;;  %4732 = vpow2.f32 %v4358_v44 }
 0x5e1   :  { %v3095_v8 = vadd.f32 1.0, %v4731_v61  ;;  %v2863_v57 = vpop.f32.mrf.mxu3 }
 0x5e3   :  { %4734 = vrcp.f32 %v3095_v8  ;;  %v2887_v42 = vpop.f32.mrf.mxu1  ;;  %v3107_v58 = vand.u32 2147483648, %v3095_v8  ;;  %vm3101_vm6 = vweird.f32 %v3095_v8 }
 0x5e4   :  { %v2888_v41 = vadd.f32 %v2887_v42, %v2874_v60 }
 0x5e5   :  { %v3108_v40 = vor.u32 1.1754944e-38, %v3107_v58 }
 0x5e6   :  { %v6547_v14 = vpop.f32.mrf.mxu0  ;;  %v4733_v25 = vpop.eup %4732  ;;  %v3090_v34 = vadd.f32 %v2888_v41, %v217_v53 }
 0x5e7   :  { %v3114_v54 = vadd.f32 1.0, %v4733_v25  ;;  %v3105_v25 = vand.u32 2147483647, %v3095_v8 }
 0x5e9   :  { %v4735_v38 = vpop.eup %4734  ;;  %4736 = vrcp.f32 %v3114_v54  ;;  %v2913_v52 = vpop.f32.mrf.mxu3  ;;  %vm3106_vm8 = vcmp.eq.f32.partialorder %v3105_v25, 8.507059e+37  ;;  %vm3120_vm10 = vweird.f32 %v3114_v54 }
 0x5ea   :  { %v3097_v11 = vmul.f32 %v4735_v38, %v3095_v8  ;;  %v2914_v61 = vadd.f32 %v2913_v52, %v2900_v7  ;;  %4738 = vtanh.f32 %v3090_v34  ;;  %vm3102_vm5 = vweird.f32 %v4735_v38 }
 0x5eb   :  { %v2889_v3 = vpop.f32.mrf.mxu1  ;;  %vm3103_vm7 = vmor %vm3101_vm6, %vm3102_vm5  ;;  %v3124_v34 = vand.u32 2147483647, %v3114_v54 }
 0x5ec   :  { %v6553_v57 = vpop.f32.mrf.mxu2  ;;  %v3098_v42 = vsub.f32 1.0, %v3097_v11  ;;  %v3091_v60 = vadd.f32 %v2914_v61, %v246_v10  ;;  %v3126_v10 = vand.u32 2147483648, %v3114_v54 }
 0x5ed   :  { %vm3125_vm12 = vcmp.eq.f32.partialorder %v3124_v34, 8.507059e+37 }
 0x5ee   :  { %v2980_v44 = vpop.f32.mrf.mxu0  ;;  %v3099_v4 = vmul.f32 %v4735_v38, %v3098_v42  ;;  %v4359_v55 = vmul.f32 -1.442695, %v3091_v60 }
 0x5ef   :  { %v4737_v23 = vpop.eup %4736 }
 0x5f0   :  { %v3116_v41 = vmul.f32 %v4737_v23, %v3114_v54  ;;  %v3100_v53 = vadd.f32 %v4735_v38, %v3099_v4  ;;  %4740 = vpow2.f32 %v4359_v55  ;;  %v4739_v11 = vpop.eup %4738  ;;  %vm3121_vm9 = vweird.f32 %v4737_v23 }
 0x5f1   :  { %v2915_v7 = vpop.f32.mrf.mxu3  ;;  %vm3122_vm11 = vmor %vm3120_vm10, %vm3121_vm9  ;;  %v3127_v55 = vor.u32 1.1754944e-38, %v3126_v10 }
 0x5f2   :  { %v3117_v52 = vsub.f32 1.0, %v3116_v41  ;;  %v3104_v51 = vsel %vm3103_vm7, %v4735_v38, %v3100_v53 }
 0x5f3   :  { %v3109_v61 = vsel %vm3106_vm8, %v3108_v40, %v3104_v51  ;;  %v2939_v42 = vpop.f32.mrf.mxu1 }
 0x5f4   :  { %v3006_v3 = vpop.f32.mrf.mxu2  ;;  %v3118_v44 = vmul.f32 %v4737_v23, %v3117_v52  ;;  %v3151_v60 = vmul.f32 %v4739_v11, %v3109_v61  ;;  %v2940_v30 = vadd.f32 %v2939_v42, %v6535_v24 }
 0x5f6   :  { %v4741_v4 = vpop.eup %4740  ;;  %v3119_v8 = vadd.f32 %v4737_v23, %v3118_v44  ;;  %v3021_v58 = vadd.f32 %v2940_v30, %v7339_v33 }
 0x5f7   :  { %v3134_v38 = vadd.f32 1.0, %v4741_v4 }
 0x5f8   :  { %v3123_v25 = vsel %vm3122_vm11, %v4737_v23, %v3119_v8  ;;  %v4354_v40 = vmul.f32 -1.442695, %v3021_v58 }
 0x5f9   :  { %v3128_v41 = vsel %vm3125_vm12, %v3127_v55, %v3123_v25  ;;  %4742 = vrcp.f32 %v3134_v38  ;;  %v2965_v51 = vpop.f32.mrf.mxu3  ;;  %v3146_v34 = vand.u32 2147483648, %v3134_v38  ;;  %v3144_v42 = vand.u32 2147483647, %v3134_v38 }
 0x5fa   :  { %v3150_v53 = vmul.f32 %v3128_v41, %v6367_v36  ;;  %v2966_v7 = vadd.f32 %v2965_v51, %v6541_v56  ;;  %4744 = vpow2.f32 %v4354_v40  ;;  %vm3140_vm14 = vweird.f32 %v3134_v38 }
 0x5fb   :  { %v2941_v52 = vpop.f32.mrf.mxu1  ;;  %vm3145_vm0 = vcmp.eq.f32.partialorder %v3144_v42, 8.507059e+37 }
 0x5fc   :  { %v6559_v24 = vadd.f32 %v3151_v60, %v3150_v53  ;;  %v3022_v54 = vadd.f32 %v2966_v7, %v5578_v45  ;;  %v3147_v60 = vor.u32 1.1754944e-38, %v3146_v34 }
 0x5fe   :  { %v4355_v30 = vmul.f32 -1.442695, %v3022_v54 }
 0x5ff   :  { %v4743_v11 = vpop.eup %4742 }
 0x600   :  { %v3136_v10 = vmul.f32 %v4743_v11, %v3134_v38  ;;  %4746 = vpow2.f32 %v4355_v30  ;;  %v4745_v3 = vpop.eup %4744  ;;  %vm3141_vm13 = vweird.f32 %v4743_v11 }
 0x601   :  { %v2967_v23 = vpop.f32.mrf.mxu3  ;;  %4748 = vtanh.f32 %v6559_v24  ;;  %vm3142_vm15 = vmor %vm3140_vm14, %vm3141_vm13  ;;  %v6563_v4 = vadd.f32 1.0, %v4745_v3 }
 0x602   :  { %v3137_v61 = vsub.f32 1.0, %v3136_v10 }
 0x603   :  { %vm3034_vm5 = vweird.f32 %v6563_v4 }
 0x604   :  { %v3138_v36 = vmul.f32 %v4743_v11, %v3137_v61 }
 0x606   :  { %v4747_v56 = vpop.eup %4746  ;;  %v3139_v44 = vadd.f32 %v4743_v11, %v3138_v36 }
 0x607   :  { %v3047_v8 = vadd.f32 1.0, %v4747_v56  ;;  %v4749_v55 = vpop.eup %4748 }
 0x608   :  { %v3143_v58 = vsel %vm3142_vm15, %v4743_v11, %v3139_v44 }
 0x609   :  { %v3148_v25 = vsel %vm3145_vm0, %v3147_v60, %v3143_v58  ;;  %4750 = vrcp.f32 %v3047_v8  ;;  %v3059_v44 = vand.u32 2147483648, %v3047_v8  ;;  %vm3053_vm2 = vweird.f32 %v3047_v8 }
 0x60a   :  { %v3154_v41 = vmul.f32 %v4749_v55, %v3148_v25  ;;  %4752 = vrcp.f32 %v6563_v4  ;;  %v3057_v58 = vand.u32 2147483647, %v3047_v8  ;;  %v3040_v25 = vand.u32 2147483648, %v6563_v4 }
 0x60c   :  { %v6566_v51 = vpack.c.bf16 %v3154_v41, %v3154_v41  ;;  %v3038_v41 = vand.u32 2147483647, %v6563_v4  ;;  %vm3058_vm7 = vcmp.eq.f32.partialorder %v3057_v58, 8.507059e+37 }
 0x60e   :  { %3165 = vmatmul.bf16.vlgmr.msrb.gmra.mxu0 %v6566_v51  ;;  %3191 = vmatmul.bf16.vlgmr.msrb.gmra.mxu2 %v6566_v51  ;;  %vm3039_vm8 = vcmp.eq.f32.partialorder %v3038_v41, 8.507059e+37  ;;  %v7778_v41 = vld [vmem:[#allocation84_spill] sm:$0xff] }
 0x60f   :  { %v4751_v38 = vpop.eup %4750  ;;  %3261 = vmatpush.bf16.msrb.mxu0 %v7340_v13  ;;  %3287 = vmatpush.bf16.msrb.mxu2 %v7341_v9 }
 0x610   :  { %v4753_v40 = vpop.eup %4752  ;;  %v3049_v7 = vmul.f32 %v4751_v38, %v3047_v8  ;;  %vm3054_vm1 = vweird.f32 %v4751_v38 }
 0x611   :  { %v3030_v52 = vmul.f32 %v4753_v40, %v6563_v4  ;;  %vm3035_vm3 = vweird.f32 %v4753_v40  ;;  %vm6587_vm4 = vmor %vm3053_vm2, %vm3054_vm1 }
 0x612   :  { %v3050_v54 = vsub.f32 1.0, %v3049_v7  ;;  %vm3036_vm6 = vmor %vm3034_vm5, %vm3035_vm3 }
 0x613   :  { %v2991_v53 = vpop.f32.mrf.mxu1  ;;  %3262 = vmatpush.bf16.msrb.mxu0 %v7342_v28  ;;  %3288 = vmatpush.bf16.msrb.mxu2 %v7343_v17  ;;  %v3031_v23 = vsub.f32 1.0, %v3030_v52  ;;  %v3060_v52 = vor.u32 1.1754944e-38, %v3059_v44 }
 0x614   :  { %v2992_v11 = vadd.f32 %v2991_v53, %v6547_v14  ;;  %v3051_v3 = vmul.f32 %v4751_v38, %v3050_v54 }
 0x615   :  { %v3032_v56 = vmul.f32 %v4753_v40, %v3031_v23 }
 0x616   :  { %v3023_v36 = vadd.f32 %v2992_v11, %v5606_v63  ;;  %v3052_v14 = vadd.f32 %v4751_v38, %v3051_v3  ;;  %v3041_v11 = vor.u32 1.1754944e-38, %v3040_v25  ;;  %v7777_v25 = vld [vmem:[#allocation125_spill] sm:$0xff] }
 0x617   :  { %3263 = vmatpush.bf16.msrb.mxu0 %v7243_v50  ;;  %3289 = vmatpush.bf16.msrb.mxu2 %v7244_v5  ;;  %v3033_v60 = vadd.f32 %v4753_v40, %v3032_v56 }
 0x618   :  { %v3056_v53 = vsel %vm6587_vm4, %v4751_v38, %v3052_v14 }
 0x619   :  { %v3017_v30 = vpop.f32.mrf.mxu3  ;;  %v3037_v8 = vsel %vm3036_vm6, %v4753_v40, %v3033_v60 }
 0x61a   :  { %v3018_v10 = vadd.f32 %v3017_v30, %v6553_v57  ;;  %v3042_v23 = vsel %vm3039_vm8, %v3041_v11, %v3037_v8  ;;  %v7782_v8 = vld [vmem:[#allocation86_spill] sm:$0xff] }
 0x61b   :  { %v2993_v61 = vpop.f32.mrf.mxu1  ;;  %3264 = vmatpush.bf16.msrb.mxu0 %v7245_v6  ;;  %3290 = vmatpush.bf16.msrb.mxu2 %v7246_v39  ;;  %v7785_v11 = vld [vmem:[#allocation130_spill] sm:$0xff] }
 0x61c   :  { %v3024_v34 = vadd.f32 %v3018_v10, %v5603_v15  ;;  %v3061_v10 = vsel %vm3058_vm7, %v3060_v52, %v3056_v53  ;;  %v7779_v53 = vld [vmem:[#allocation81_spill] sm:$0xff]  ;;  %v7781_v52 = vld [vmem:[#allocation127_spill] sm:$0xff] }
 0x61d   :  { %v3083_v4 = vmul.f32 %v3061_v10, %v6410_v48  ;;  %v7786_v10 = vld [vmem:[#allocation88_spill] sm:$0xff] }
 0x61e   :  { %v4356_v42 = vmul.f32 -1.442695, %v3024_v34  ;;  %3217 = vmatmul.bf16.vlgmr.msra.gmra.mxu0 %v6566_v51  ;;  %3243 = vmatmul.bf16.vlgmr.msra.gmra.mxu2 %v6566_v51 }
 0x61f   :  { %3265 = vmatpush.bf16.msrb.mxu0 %v7344_v20  ;;  %3291 = vmatpush.bf16.msrb.mxu2 %v7345_v27 }
 0x620   :  { %4754 = vpow2.f32 %v4356_v42 }
 0x621   :  { %v3019_v57 = vpop.f32.mrf.mxu3  ;;  %4756 = vtanh.f32 %v3023_v36 }
 0x623   :  { %3266 = vmatpush.bf16.msrb.mxu0 %v5349_v22  ;;  %3292 = vmatpush.bf16.msrb.mxu2 %v7249_v32 }
 0x626   :  { %v4755_v7 = vpop.eup %4754 }
 0x627   :  { %v3067_v54 = vadd.f32 1.0, %v4755_v7  ;;  %v4757_v30 = vpop.eup %4756  ;;  %3267 = vmatpush.bf16.msrb.mxu0 %v5361_v47  ;;  %3293 = vmatpush.bf16.msrb.mxu2 %v5363_v35  ;;  %v7780_v7 = vld [vmem:[#allocation126_spill] sm:$0xff] }
 0x628   :  { %v3084_v38 = vmul.f32 %v4757_v30, %v3042_v23  ;;  %v7784_v30 = vld [vmem:[#allocation129_spill] sm:$0xff] }
 0x629   :  { %4758 = vrcp.f32 %v3067_v54  ;;  %v3079_v48 = vand.u32 2147483648, %v3067_v54  ;;  %v3077_v42 = vand.u32 2147483647, %v3067_v54  ;;  %vm3073_vm10 = vweird.f32 %v3067_v54  ;;  %v7787_v23 = vld [vmem:[#allocation85_spill] sm:$0xff] }
 0x62a   :  { %v6603_v61 = vadd.f32 %v3084_v38, %v3083_v4  ;;  %v7788_v4 = vld [vmem:[#allocation90_spill] sm:$0xff]  ;;  %v7791_v38 = vld [vmem:[#allocation89_spill] sm:$0xff] }
 0x62b   :  { %3268 = vmatpush.bf16.msrb.mxu0 %v5372_v46  ;;  %3294 = vmatpush.bf16.msrb.mxu2 %v5374_v26  ;;  %v3080_v14 = vor.u32 1.1754944e-38, %v3079_v48  ;;  %vm3078_vm12 = vcmp.eq.f32.partialorder %v3077_v42, 8.507059e+37 }
 0x62c   :  { %4760 = vtanh.f32 %v6603_v61 }
 0x62e   :  { %3269 = vmatmul.bf16.vlgmr.msrb.gmra.mxu0 %v6566_v51  ;;  %3295 = vmatmul.bf16.vlgmr.msrb.gmra.mxu2 %v6566_v51 }
 0x62f   :  { %v4759_v40 = vpop.eup %4758  ;;  %3313 = vmatpush.bf16.msra.mxu0 %v5376_v49  ;;  %3339 = vmatpush.bf16.msra.mxu2 %v5378_v1 }
 0x630   :  { %v3069_v34 = vmul.f32 %v4759_v40, %v3067_v54  ;;  %vm3074_vm9 = vweird.f32 %v4759_v40  ;;  %v7783_v54 = vld [vmem:[#allocation83_spill] sm:$0xff] }
 0x631   :  { %vm3075_vm11 = vmor %vm3073_vm10, %vm3074_vm9 }
 0x632   :  { %v3070_v3 = vsub.f32 1.0, %v3069_v34  ;;  %v4761_v44 = vpop.eup %4760  ;;  %v7811_v34 = vld [vmem:[#allocation53_spill] sm:$0xff] }
 0x633   :  { %3314 = vmatpush.bf16.msra.mxu0 %v5391_v37  ;;  %3340 = vmatpush.bf16.msra.mxu2 %v5393_v12 }
 0x634   :  { %v3071_v36 = vmul.f32 %v4759_v40, %v3070_v3 }
 0x636   :  { %v3072_v56 = vadd.f32 %v4759_v40, %v3071_v36 }
 0x637   :  { %3315 = vmatpush.bf16.msra.mxu0 %v5402_v16  ;;  %3341 = vmatpush.bf16.msra.mxu2 %v5404_v21 }
 0x638   :  { %v3076_v57 = vsel %vm3075_vm11, %v4759_v40, %v3072_v56  ;;  %v7795_v40 = vld [vmem:[#allocation92_spill] sm:$0xff] }
 0x639   :  { %v3081_v60 = vsel %vm3078_vm12, %v3080_v14, %v3076_v57  ;;  %v7812_v57 = vld [vmem:[#allocation58_spill] sm:$0xff] }
 0x63a   :  { %v3087_v58 = vmul.f32 %v4761_v44, %v3081_v60  ;;  %v7813_v44 = vld [vmem:[#allocation139_spill] sm:$0xff] }
 0x63b   :  { %3316 = vmatpush.bf16.msra.mxu0 %v5415_v29  ;;  %3342 = vmatpush.bf16.msra.mxu2 %v5417_v59  ;;  %v190_v60 = vadd.f32 %v7813_v44, %v7812_v57 }
 0x63c   :  { %v6616_v55 = vpack.c.bf16 %v3087_v58, %v3087_v58 }
 0x63e   :  { %3178 = vmatmul.bf16.vlgmr.msra.gmra.mxu1 %v6616_v55  ;;  %3204 = vmatmul.bf16.vlgmr.msrb.gmra.mxu3 %v6616_v55 }
 0x63f   :  { %3274 = vmatpush.bf16.msra.mxu1 %v7250_v43  ;;  %3300 = vmatpush.bf16.msrb.mxu3 %v7251_v18 }
 0x640   :  { %3317 = vmatpush.bf16.msra.mxu0 %v5423_v0  ;;  %3343 = vmatpush.bf16.msra.mxu2 %v5425_v31 }
 0x643   :  { %3275 = vmatpush.bf16.msra.mxu1 %v7668_v19  ;;  %3301 = vmatpush.bf16.msrb.mxu3 %v7669_v62 }
 0x644   :  { %3318 = vmatpush.bf16.msra.mxu0 %v7670_v2  ;;  %3344 = vmatpush.bf16.msra.mxu2 %v7777_v25 }
 0x647   :  { %3276 = vmatpush.bf16.msra.mxu1 %v7778_v41  ;;  %3302 = vmatpush.bf16.msrb.mxu3 %v7779_v53 }
 0x648   :  { %3319 = vmatpush.bf16.msra.mxu0 %v7780_v7  ;;  %3345 = vmatpush.bf16.msra.mxu2 %v7781_v52 }
 0x64b   :  { %3277 = vmatpush.bf16.msra.mxu1 %v7782_v8  ;;  %3303 = vmatpush.bf16.msrb.mxu3 %v7783_v54 }
 0x64c   :  { %3320 = vmatpush.bf16.msra.mxu0 %v7784_v30  ;;  %3346 = vmatpush.bf16.msra.mxu2 %v7785_v11 }
 0x64e   :  { %3230 = vmatmul.bf16.vlgmr.msrb.gmra.mxu1 %v6616_v55  ;;  %3256 = vmatmul.bf16.vlgmr.msra.gmra.mxu3 %v6616_v55 }
 0x64f   :  { %3278 = vmatpush.bf16.msra.mxu1 %v7786_v10  ;;  %3304 = vmatpush.bf16.msrb.mxu3 %v7787_v23 }
 0x650   :  { %3501 = vmatpush.bf16.msrb.mxu0 %v7340_v13  ;;  %3527 = vmatpush.bf16.msrb.mxu2 %v7341_v9  ;;  %v7789_v13 = vld [vmem:[#allocation87_spill] sm:$0xff]  ;;  %v7790_v9 = vld [vmem:[#allocation93_spill] sm:$0xff] }
 0x651   :  { %3321 = vmatmul.bf16.vlgmr.msra.gmra.mxu0 %v6566_v51  ;;  %3347 = vmatmul.bf16.vlgmr.msra.gmra.mxu2 %v6566_v51  ;;  %v7792_v51 = vld [vmem:[#allocation95_spill] sm:$0xff] }
 0x653   :  { %3279 = vmatpush.bf16.msra.mxu1 %v7788_v4  ;;  %3305 = vmatpush.bf16.msrb.mxu3 %v7789_v13 }
 0x654   :  { %3502 = vmatpush.bf16.msrb.mxu0 %v7342_v28  ;;  %3528 = vmatpush.bf16.msrb.mxu2 %v7343_v17  ;;  %v7793_v28 = vld [vmem:[#allocation91_spill] sm:$0xff]  ;;  %v7794_v17 = vld [vmem:[#allocation98_spill] sm:$0xff] }
 0x657   :  { %3280 = vmatpush.bf16.msra.mxu1 %v7790_v9  ;;  %3306 = vmatpush.bf16.msrb.mxu3 %v7791_v38 }
 0x658   :  { %3503 = vmatpush.bf16.msrb.mxu0 %v7243_v50  ;;  %3529 = vmatpush.bf16.msrb.mxu2 %v7244_v5  ;;  %v7796_v50 = vld [vmem:[#allocation102_spill] sm:$0xff] }
 0x659   :  { %v7798_v5 = vld [vmem:[#allocation106_spill] sm:$0xff] }
 0x65b   :  { %3281 = vmatpush.bf16.msra.mxu1 %v7792_v51  ;;  %3307 = vmatpush.bf16.msrb.mxu3 %v7793_v28 }
 0x65c   :  { %3504 = vmatpush.bf16.msrb.mxu0 %v7245_v6  ;;  %3530 = vmatpush.bf16.msrb.mxu2 %v7246_v39  ;;  %v7797_v6 = vld [vmem:[#allocation94_spill] sm:$0xff]  ;;  %v7799_v39 = vld [vmem:[#allocation99_spill] sm:$0xff] }
 0x65e   :  { %3282 = vmatmul.bf16.vlgmr.msra.gmra.mxu1 %v6616_v55  ;;  %3308 = vmatmul.bf16.vlgmr.msrb.gmra.mxu3 %v6616_v55 }
 0x65f   :  { %3326 = vmatpush.bf16.msrb.mxu1 %v7794_v17  ;;  %3352 = vmatpush.bf16.msra.mxu3 %v7795_v40 }
 0x660   :  { %3505 = vmatpush.bf16.msrb.mxu0 %v7344_v20  ;;  %3531 = vmatpush.bf16.msrb.mxu2 %v7345_v27  ;;  %v7800_v20 = vld [vmem:[#allocation110_spill] sm:$0xff]  ;;  %v7801_v27 = vld [vmem:[#allocation103_spill] sm:$0xff] }
 0x663   :  { %3327 = vmatpush.bf16.msrb.mxu1 %v7796_v50  ;;  %3353 = vmatpush.bf16.msra.mxu3 %v7797_v6 }
 0x664   :  { %3506 = vmatpush.bf16.msrb.mxu0 %v5349_v22  ;;  %3532 = vmatpush.bf16.msrb.mxu2 %v7249_v32  ;;  %v7802_v22 = vld [vmem:[#allocation114_spill] sm:$0xff]  ;;  %v7803_v32 = vld [vmem:[#allocation107_spill] sm:$0xff] }
 0x667   :  { %3328 = vmatpush.bf16.msrb.mxu1 %v7798_v5  ;;  %3354 = vmatpush.bf16.msra.mxu3 %v7799_v39 }
 0x668   :  { %3507 = vmatpush.bf16.msrb.mxu0 %v5361_v47  ;;  %3533 = vmatpush.bf16.msrb.mxu2 %v5363_v35  ;;  %v7804_v47 = vld [vmem:[#allocation117_spill] sm:$0xff]  ;;  %v7805_v35 = vld [vmem:[#allocation111_spill] sm:$0xff] }
 0x66b   :  { %3329 = vmatpush.bf16.msrb.mxu1 %v7800_v20  ;;  %3355 = vmatpush.bf16.msra.mxu3 %v7801_v27 }
 0x66c   :  { %3508 = vmatpush.bf16.msrb.mxu0 %v5372_v46  ;;  %3534 = vmatpush.bf16.msrb.mxu2 %v5374_v26  ;;  %v7806_v46 = vld [vmem:[#allocation119_spill] sm:$0xff]  ;;  %v7809_v26 = vld [vmem:[#allocation118_spill] sm:$0xff] }
 0x66f   :  { %3330 = vmatpush.bf16.msrb.mxu1 %v7802_v22  ;;  %3356 = vmatpush.bf16.msra.mxu3 %v7803_v32 }
 0x670   :  { %3553 = vmatpush.bf16.msra.mxu0 %v5376_v49  ;;  %3579 = vmatpush.bf16.msra.mxu2 %v5378_v1  ;;  %v7807_v49 = vld [vmem:[#allocation115_spill] sm:$0xff]  ;;  %v7808_v1 = vld [vmem:[#allocation120_spill] sm:$0xff] }
 0x673   :  { %3331 = vmatpush.bf16.msrb.mxu1 %v7804_v47  ;;  %3357 = vmatpush.bf16.msra.mxu3 %v7805_v35 }
 0x674   :  { %3554 = vmatpush.bf16.msra.mxu0 %v5391_v37  ;;  %3580 = vmatpush.bf16.msra.mxu2 %v5393_v12 }
 0x677   :  { %3332 = vmatpush.bf16.msrb.mxu1 %v7806_v46  ;;  %3358 = vmatpush.bf16.msra.mxu3 %v7807_v49 }
 0x678   :  { %3555 = vmatpush.bf16.msra.mxu0 %v5402_v16  ;;  %3581 = vmatpush.bf16.msra.mxu2 %v5404_v21 }
 0x67b   :  { %3333 = vmatpush.bf16.msrb.mxu1 %v7808_v1  ;;  %3359 = vmatpush.bf16.msra.mxu3 %v7809_v26 }
 0x67c   :  { %3556 = vmatpush.bf16.msra.mxu0 %v5415_v29  ;;  %3582 = vmatpush.bf16.msra.mxu2 %v5417_v59 }
 0x67e   :  { %3334 = vmatmul.bf16.vlgmr.msrb.gmra.mxu1 %v6616_v55  ;;  %3360 = vmatmul.bf16.vlgmr.msra.gmra.mxu3 %v6616_v55 }
 0x67f   :  { %3514 = vmatpush.bf16.msra.mxu1 %v7250_v43  ;;  %3540 = vmatpush.bf16.msrb.mxu3 %v7251_v18 }
 0x680   :  { %3557 = vmatpush.bf16.msra.mxu0 %v5423_v0  ;;  %3583 = vmatpush.bf16.msra.mxu2 %v5425_v31 }
 0x683   :  { %3515 = vmatpush.bf16.msra.mxu1 %v7668_v19  ;;  %3541 = vmatpush.bf16.msrb.mxu3 %v7669_v62 }
 0x684   :  { %3558 = vmatpush.bf16.msra.mxu0 %v7670_v2  ;;  %3584 = vmatpush.bf16.msra.mxu2 %v7777_v25  ;;  %v7810_v2 = vld [vmem:[#allocation38_spill] sm:$0xff] }
 0x685   :  { %v161_v3 = vadd.f32 %v7811_v34, %v7810_v2 }
 0x687   :  { %3516 = vmatpush.bf16.msra.mxu1 %v7778_v41  ;;  %3542 = vmatpush.bf16.msrb.mxu3 %v7779_v53 }
 0x688   :  { %3559 = vmatpush.bf16.msra.mxu0 %v7780_v7  ;;  %3585 = vmatpush.bf16.msra.mxu2 %v7781_v52 }
 0x68b   :  { %3517 = vmatpush.bf16.msra.mxu1 %v7782_v8  ;;  %3543 = vmatpush.bf16.msrb.mxu3 %v7783_v54  ;;  %v3166_v31 = vpop.f32.mrf.mxu0 }
 0x68c   :  { %3560 = vmatpush.bf16.msra.mxu0 %v7784_v30  ;;  %3586 = vmatpush.bf16.msra.mxu2 %v7785_v11 }
 0x68f   :  { %3518 = vmatpush.bf16.msra.mxu1 %v7786_v10  ;;  %3544 = vmatpush.bf16.msrb.mxu3 %v7787_v23 }
 0x691   :  { %v3192_v37 = vpop.f32.mrf.mxu2 }
 0x693   :  { %3519 = vmatpush.bf16.msra.mxu1 %v7788_v4  ;;  %3545 = vmatpush.bf16.msrb.mxu3 %v7789_v13  ;;  %v3168_v12 = vpop.f32.mrf.mxu0  ;;  %v7814_v4 = vld [vmem:[#allocation45_spill] sm:$0xff] }
 0x694   :  { %v7815_v13 = vld [vmem:[#allocation141_spill] sm:$0xff] }
 0x697   :  { %3520 = vmatpush.bf16.msra.mxu1 %v7790_v9  ;;  %3546 = vmatpush.bf16.msrb.mxu3 %v7791_v38  ;;  %v248_v9 = vadd.f32 %v7815_v13, %v7814_v4 }
 0x699   :  { %v3194_v16 = vpop.f32.mrf.mxu2 }
 0x69b   :  { %3521 = vmatpush.bf16.msra.mxu1 %v7792_v51  ;;  %3547 = vmatpush.bf16.msrb.mxu3 %v7793_v28  ;;  %v3218_v21 = vpop.f32.mrf.mxu0 }
 0x69f   :  { %3566 = vmatpush.bf16.msrb.mxu1 %v7794_v17  ;;  %3592 = vmatpush.bf16.msra.mxu3 %v7795_v40 }
 0x6a1   :  { %v3244_v29 = vpop.f32.mrf.mxu2 }
 0x6a3   :  { %3567 = vmatpush.bf16.msrb.mxu1 %v7796_v50  ;;  %3593 = vmatpush.bf16.msra.mxu3 %v7797_v6  ;;  %v3220_v59 = vpop.f32.mrf.mxu0 }
 0x6a7   :  { %3568 = vmatpush.bf16.msrb.mxu1 %v7798_v5  ;;  %3594 = vmatpush.bf16.msra.mxu3 %v7799_v39 }
 0x6a9   :  { %v3246_v0 = vpop.f32.mrf.mxu2 }
 0x6ab   :  { %3569 = vmatpush.bf16.msrb.mxu1 %v7800_v20  ;;  %3595 = vmatpush.bf16.msra.mxu3 %v7801_v27  ;;  %v3270_v43 = vpop.f32.mrf.mxu0 }
 0x6af   :  { %3570 = vmatpush.bf16.msrb.mxu1 %v7802_v22  ;;  %3596 = vmatpush.bf16.msra.mxu3 %v7803_v32  ;;  %v7816_v22 = vld [vmem:[#allocation79_spill] sm:$0xff]  ;;  %v7817_v32 = vld [vmem:[#allocation148_spill] sm:$0xff] }
 0x6b1   :  { %v6732_v18 = vpop.f32.mrf.mxu2 }
 0x6b3   :  { %3571 = vmatpush.bf16.msrb.mxu1 %v7804_v47  ;;  %3597 = vmatpush.bf16.msra.mxu3 %v7805_v35  ;;  %v3272_v19 = vpop.f32.mrf.mxu0  ;;  %v219_v47 = vadd.f32 %v7817_v32, %v7816_v22 }
 0x6b7   :  { %3572 = vmatpush.bf16.msrb.mxu1 %v7806_v46  ;;  %3598 = vmatpush.bf16.msra.mxu3 %v7807_v49 }
 0x6b9   :  { %v3298_v36 = vpop.f32.mrf.mxu2 }
 0x6bb   :  { %3573 = vmatpush.bf16.msrb.mxu1 %v7808_v1  ;;  %3599 = vmatpush.bf16.msra.mxu3 %v7809_v26  ;;  %v3179_v62 = vpop.f32.mrf.mxu1 }
 0x6bc   :  { %v3180_v48 = vadd.f32 %v3179_v62, %v3166_v31 }
 0x6be   :  { %v3432_v42 = vadd.f32 %v3180_v48, %v161_v3 }
 0x6c0   :  { %v4363_v56 = vmul.f32 -1.442695, %v3432_v42 }
 0x6c1   :  { %v3205_v14 = vpop.f32.mrf.mxu3 }
 0x6c2   :  { %4762 = vpow2.f32 %v4363_v56  ;;  %v3206_v58 = vadd.f32 %v3205_v14, %v3192_v37 }
 0x6c3   :  { %v3181_v55 = vpop.f32.mrf.mxu1 }
 0x6c4   :  { %v3433_v25 = vadd.f32 %v3206_v58, %v190_v60 }
 0x6c6   :  { %v4364_v41 = vmul.f32 -1.442695, %v3433_v25 }
 0x6c8   :  { %v4763_v53 = vpop.eup %4762  ;;  %4764 = vpow2.f32 %v4364_v41 }
 0x6c9   :  { %v3439_v7 = vadd.f32 1.0, %v4763_v53  ;;  %v3207_v52 = vpop.f32.mrf.mxu3 }
 0x6cb   :  { %4766 = vrcp.f32 %v3439_v7  ;;  %v3231_v8 = vpop.f32.mrf.mxu1  ;;  %v3451_v37 = vand.u32 2147483648, %v3439_v7  ;;  %vm3445_vm15 = vweird.f32 %v3439_v7  ;;  %v3449_v0 = vand.u32 2147483647, %v3439_v7 }
 0x6cc   :  { %v3232_v5 = vadd.f32 %v3231_v8, %v3218_v21 }
 0x6cd   :  { %v3452_v42 = vor.u32 1.1754944e-38, %v3451_v37  ;;  %vm3450_vm4 = vcmp.eq.f32.partialorder %v3449_v0, 8.507059e+37 }
 0x6ce   :  { %v6738_v54 = vpop.f32.mrf.mxu0  ;;  %v4765_v30 = vpop.eup %4764  ;;  %v3434_v1 = vadd.f32 %v3232_v5, %v219_v47 }
 0x6cf   :  { %v3458_v11 = vadd.f32 1.0, %v4765_v30 }
 0x6d1   :  { %v4767_v10 = vpop.eup %4766  ;;  %4768 = vrcp.f32 %v3458_v11  ;;  %v3257_v23 = vpop.f32.mrf.mxu3  ;;  %v3470_v26 = vand.u32 2147483648, %v3458_v11  ;;  %v3468_v21 = vand.u32 2147483647, %v3458_v11  ;;  %vm3464_vm0 = vweird.f32 %v3458_v11 }
 0x6d2   :  { %v3441_v38 = vmul.f32 %v4767_v10, %v3439_v7  ;;  %v3258_v51 = vadd.f32 %v3257_v23, %v3244_v29  ;;  %vm3446_vm13 = vweird.f32 %v4767_v10 }
 0x6d3   :  { %v3233_v17 = vpop.f32.mrf.mxu1  ;;  %vm6746_vm1 = vmor %vm3445_vm15, %vm3446_vm13  ;;  %v3471_v3 = vor.u32 1.1754944e-38, %v3470_v26  ;;  %vm3469_vm3 = vcmp.eq.f32.partialorder %v3468_v21, 8.507059e+37 }
 0x6d4   :  { %v6742_v28 = vpop.f32.mrf.mxu2  ;;  %v3442_v40 = vsub.f32 1.0, %v3441_v38  ;;  %v3435_v50 = vadd.f32 %v3258_v51, %v248_v9 }
 0x6d6   :  { %v3324_v6 = vpop.f32.mrf.mxu0  ;;  %v4365_v39 = vmul.f32 -1.442695, %v3435_v50  ;;  %v3443_v27 = vmul.f32 %v4767_v10, %v3442_v40 }
 0x6d7   :  { %v4769_v20 = vpop.eup %4768 }
 0x6d8   :  { %v3460_v35 = vmul.f32 %v4769_v20, %v3458_v11  ;;  %4770 = vpow2.f32 %v4365_v39  ;;  %v3444_v31 = vadd.f32 %v4767_v10, %v3443_v27  ;;  %vm3465_vm14 = vweird.f32 %v4769_v20 }
 0x6d9   :  { %v3259_v46 = vpop.f32.mrf.mxu3  ;;  %4772 = vtanh.f32 %v3434_v1  ;;  %vm3466_vm2 = vmor %vm3464_vm0, %vm3465_vm14 }
 0x6da   :  { %v3461_v49 = vsub.f32 1.0, %v3460_v35  ;;  %v3448_v48 = vsel %vm6746_vm1, %v4767_v10, %v3444_v31 }
 0x6db   :  { %v3283_v16 = vpop.f32.mrf.mxu1  ;;  %v3453_v57 = vsel %vm3450_vm4, %v3452_v42, %v3448_v48 }
 0x6dc   :  { %v3350_v12 = vpop.f32.mrf.mxu2  ;;  %v3462_v29 = vmul.f32 %v4769_v20, %v3461_v49  ;;  %v3284_v59 = vadd.f32 %v3283_v16, %v3270_v43 }
 0x6de   :  { %v4771_v19 = vpop.eup %4770  ;;  %v3463_v2 = vadd.f32 %v4769_v20, %v3462_v29  ;;  %v3365_v34 = vadd.f32 %v3284_v59, %v7339_v33 }
 0x6df   :  { %v3478_v36 = vadd.f32 1.0, %v4771_v19  ;;  %v4773_v25 = vpop.eup %4772 }
 0x6e0   :  { %v3467_v43 = vsel %vm3466_vm2, %v4769_v20, %v3463_v2  ;;  %v4360_v44 = vmul.f32 -1.442695, %v3365_v34  ;;  %v3495_v53 = vmul.f32 %v4773_v25, %v3453_v57 }
 0x6e1   :  { %v3472_v56 = vsel %vm3469_vm3, %v3471_v3, %v3467_v43  ;;  %4774 = vrcp.f32 %v3478_v36  ;;  %v3309_v14 = vpop.f32.mrf.mxu3  ;;  %v3490_v23 = vand.u32 2147483648, %v3478_v36  ;;  %vm3484_vm6 = vweird.f32 %v3478_v36 }
 0x6e2   :  { %v3310_v60 = vadd.f32 %v3309_v14, %v6732_v18  ;;  %v3494_v58 = vmul.f32 %v3472_v56, %v6559_v24  ;;  %4776 = vpow2.f32 %v4360_v44  ;;  %v3488_v18 = vand.u32 2147483647, %v3478_v36 }
 0x6e3   :  { %v3285_v55 = vpop.f32.mrf.mxu1  ;;  %v3491_v17 = vor.u32 1.1754944e-38, %v3490_v23 }
 0x6e4   :  { %v3366_v41 = vadd.f32 %v3310_v60, %v5578_v45  ;;  %v3496_v8 = vadd.f32 %v3495_v53, %v3494_v58  ;;  %vm3489_vm8 = vcmp.eq.f32.partialorder %v3488_v18, 8.507059e+37 }
 0x6e6   :  { %v4361_v7 = vmul.f32 -1.442695, %v3366_v41 }
 0x6e7   :  { %v4775_v52 = vpop.eup %4774 }
 0x6e8   :  { %v3480_v30 = vmul.f32 %v4775_v52, %v3478_v36  ;;  %4778 = vpow2.f32 %v4361_v7  ;;  %v4777_v4 = vpop.eup %4776  ;;  %vm3485_vm5 = vweird.f32 %v4775_v52 }
 0x6e9   :  { %v3311_v11 = vpop.f32.mrf.mxu3  ;;  %4780 = vtanh.f32 %v3496_v8  ;;  %v3372_v38 = vadd.f32 1.0, %v4777_v4  ;;  %vm3486_vm7 = vmor %vm3484_vm6, %vm3485_vm5 }
 0x6ea   :  { %v3481_v10 = vsub.f32 1.0, %v3480_v30 }
 0x6eb   :  { %v3384_v62 = vand.u32 2147483648, %v3372_v38  ;;  %vm3378_vm13 = vweird.f32 %v3372_v38  ;;  %v3382_v2 = vand.u32 2147483647, %v3372_v38 }
 0x6ec   :  { %v3482_v13 = vmul.f32 %v4775_v52, %v3481_v10 }
 0x6ed   :  { %v3385_v56 = vor.u32 1.1754944e-38, %v3384_v62  ;;  %vm3383_vm0 = vcmp.eq.f32.partialorder %v3382_v2, 8.507059e+37 }
 0x6ee   :  { %v4779_v24 = vpop.eup %4778  ;;  %v3483_v9 = vadd.f32 %v4775_v52, %v3482_v13 }
 0x6ef   :  { %v3391_v51 = vadd.f32 1.0, %v4779_v24  ;;  %v4781_v50 = vpop.eup %4780 }
 0x6f0   :  { %v3487_v40 = vsel %vm3486_vm7, %v4775_v52, %v3483_v9 }
 0x6f1   :  { %4782 = vrcp.f32 %v3391_v51  ;;  %v3492_v6 = vsel %vm3489_vm8, %v3491_v17, %v3487_v40  ;;  %v3403_v19 = vand.u32 2147483648, %v3391_v51  ;;  %vm3397_vm10 = vweird.f32 %v3391_v51 }
 0x6f2   :  { %v3498_v5 = vmul.f32 %v4781_v50, %v3492_v6  ;;  %4784 = vrcp.f32 %v3372_v38  ;;  %v4544_v50 = vld [vmem:[%s6804_s5 + $0x38] sm:$0xff]  ;;  %v4543_v6 = vld [vmem:[%s6804_s5 + $0x30] sm:$0xff] }
 0x6f3   :  { %v3404_v48 = vor.u32 1.1754944e-38, %v3403_v19 }
 0x6f4   :  { %v3499_v39 = vpack.c.bf16 %v3498_v5, %v3498_v5 }
 0x6f6   :  { %3509 = vmatmul.bf16.vlgmr.msrb.gmra.mxu0 %v3499_v39  ;;  %3535 = vmatmul.bf16.vlgmr.msrb.gmra.mxu2 %v3499_v39 }
 0x6f7   :  { %v4783_v20 = vpop.eup %4782  ;;  %3741 = vmatpush.bf16.msrb.mxu0 %v4544_v50 }
 0x6f8   :  { %v4785_v22 = vpop.eup %4784  ;;  %v3393_v32 = vmul.f32 %v4783_v20, %v3391_v51  ;;  %vm3398_vm9 = vweird.f32 %v4783_v20 }
 0x6f9   :  { %v3374_v47 = vmul.f32 %v4785_v22, %v3372_v38  ;;  %vm3379_vm11 = vweird.f32 %v4785_v22  ;;  %vm3399_vm12 = vmor %vm3397_vm10, %vm3398_vm9 }
 0x6fa   :  { %v3394_v35 = vsub.f32 1.0, %v3393_v32  ;;  %vm3380_vm14 = vmor %vm3378_vm13, %vm3379_vm11 }
 0x6fb   :  { %v3335_v27 = vpop.f32.mrf.mxu1  ;;  %v3375_v26 = vsub.f32 1.0, %v3374_v47  ;;  %3742 = vmatpush.bf16.msrb.mxu0 %v4543_v6 }
 0x6fc   :  { %v3336_v49 = vadd.f32 %v3335_v27, %v6738_v54  ;;  %v3395_v12 = vmul.f32 %v4783_v20, %v3394_v35  ;;  %v4542_v27 = vld [vmem:[%s6804_s5 + $0x28] sm:$0xff]  ;;  %v4541_v35 = vld [vmem:[%s6804_s5 + $0x20] sm:$0xff] }
 0x6fd   :  { %v3376_v21 = vmul.f32 %v4785_v22, %v3375_v26 }
 0x6fe   :  { %v3367_v16 = vadd.f32 %v3336_v49, %v5606_v63  ;;  %v3396_v59 = vadd.f32 %v4783_v20, %v3395_v12  ;;  %v4539_v12 = vld [vmem:[%s6804_s5 + $0x10] sm:$0xff] }
 0x6ff   :  { %v3377_v54 = vadd.f32 %v4785_v22, %v3376_v21  ;;  %3743 = vmatpush.bf16.msrb.mxu0 %v4542_v27 }
 0x700   :  { %v3400_v34 = vsel %vm3399_vm12, %v4783_v20, %v3396_v59  ;;  %v4537_v59 = vld [vmem:[%s6804_s5] sm:$0xff] }
 0x701   :  { %v3361_v46 = vpop.f32.mrf.mxu3  ;;  %v3381_v36 = vsel %vm3380_vm14, %v4785_v22, %v3377_v54 }
 0x702   :  { %v3362_v1 = vadd.f32 %v3361_v46, %v6742_v28  ;;  %v3401_v28 = vand.u32 2147483647, %v3391_v51  ;;  %v3386_v57 = vsel %vm3383_vm0, %v3385_v56, %v3381_v36 }
 0x703   :  { %v3337_v31 = vpop.f32.mrf.mxu1  ;;  %3744 = vmatpush.bf16.msrb.mxu0 %v4541_v35 }
 0x704   :  { %v3368_v37 = vadd.f32 %v3362_v1, %v5603_v15  ;;  %vm3402_vm15 = vcmp.eq.f32.partialorder %v3401_v28, 8.507059e+37 }
 0x705   :  { %v3405_v14 = vsel %vm3402_vm15, %v3404_v48, %v3400_v34 }
 0x706   :  { %v4362_v29 = vmul.f32 -1.442695, %v3368_v37  ;;  %3561 = vmatmul.bf16.vlgmr.msra.gmra.mxu0 %v3499_v39  ;;  %3587 = vmatmul.bf16.vlgmr.msra.gmra.mxu2 %v3499_v39  ;;  %v3427_v44 = vmul.f32 %v3405_v14, %v6603_v61 }
 0x708   :  { %4786 = vpow2.f32 %v4362_v29 }
 0x709   :  { %v3363_v0 = vpop.f32.mrf.mxu3  ;;  %4788 = vtanh.f32 %v3367_v16 }
 0x70e   :  { %v4787_v3 = vpop.eup %4786 }
 0x70f   :  { %v3411_v42 = vadd.f32 1.0, %v4787_v3  ;;  %v4789_v43 = vpop.eup %4788 }
 0x710   :  { %v3428_v60 = vmul.f32 %v4789_v43, %v3386_v57 }
 0x711   :  { %4790 = vrcp.f32 %v3411_v42  ;;  %v3423_v53 = vand.u32 2147483648, %v3411_v42  ;;  %v3421_v52 = vand.u32 2147483647, %v3411_v42  ;;  %vm3417_vm2 = vweird.f32 %v3411_v42 }
 0x712   :  { %v6761_v55 = vadd.f32 %v3428_v60, %v3427_v44 }
 0x713   :  { %v3424_v30 = vor.u32 1.1754944e-38, %v3423_v53  ;;  %vm3422_vm4 = vcmp.eq.f32.partialorder %v3421_v52, 8.507059e+37 }
 0x714   :  { %4792 = vtanh.f32 %v6761_v55 }
 0x717   :  { %v4791_v58 = vpop.eup %4790 }
 0x718   :  { %v3413_v25 = vmul.f32 %v4791_v58, %v3411_v42  ;;  %vm3418_vm1 = vweird.f32 %v4791_v58 }
 0x719   :  { %vm3419_vm3 = vmor %vm3417_vm2, %vm3418_vm1 }
 0x71a   :  { %v3414_v41 = vsub.f32 1.0, %v3413_v25  ;;  %v4793_v10 = vpop.eup %4792 }
 0x71c   :  { %v3415_v7 = vmul.f32 %v4791_v58, %v3414_v41 }
 0x71e   :  { %v3416_v8 = vadd.f32 %v4791_v58, %v3415_v7 }
 0x720   :  { %v3420_v11 = vsel %vm3419_vm3, %v4791_v58, %v3416_v8 }
 0x721   :  { %v3425_v61 = vsel %vm3422_vm4, %v3424_v30, %v3420_v11 }
 0x722   :  { %v3431_v23 = vmul.f32 %v4793_v10, %v3425_v61 }
 0x724   :  { %v3500_v4 = vpack.c.bf16 %v3431_v23, %v3431_v23 }
 0x726   :  { %3522 = vmatmul.bf16.vlgmr.msra.gmra.mxu1 %v3500_v4  ;;  %3548 = vmatmul.bf16.vlgmr.msrb.gmra.mxu3 %v3500_v4 }
 0x736   :  { %3574 = vmatmul.bf16.vlgmr.msrb.gmra.mxu1 %v3500_v4  ;;  %3600 = vmatmul.bf16.vlgmr.msra.gmra.mxu3 %v3500_v4 }
 0x773   :  { %v3510_v13 = vpop.f32.mrf.mxu0 }
 0x779   :  { %v3536_v18 = vpop.f32.mrf.mxu2 }
 0x77b   :  { %v3512_v24 = vpop.f32.mrf.mxu0 }
 0x781   :  { %v3538_v9 = vpop.f32.mrf.mxu2 }
 0x783   :  { %v3562_v38 = vpop.f32.mrf.mxu0 }
 0x789   :  { %v3588_v51 = vpop.f32.mrf.mxu2 }
 0x78b   :  { %v3564_v17 = vpop.f32.mrf.mxu0 }
 0x791   :  { %v3590_v40 = vpop.f32.mrf.mxu2 }
 0x7a3   :  { %v3523_v5 = vpop.f32.mrf.mxu1 }
 0x7a4   :  { %v3524_v39 = vadd.f32 %v3523_v5, %v3510_v13 }
 0x7a6   :  { %v3605_v20 = vadd.f32 %v3524_v39, %v7339_v33  ;;  %v4540_v33 = vld [vmem:[%s6804_s5 + $0x18] sm:$0xff] }
 0x7a7   :  { %3745 = vmatpush.bf16.msrb.mxu0 %v4540_v33 }
 0x7a8   :  { %v4366_v22 = vmul.f32 -1.442695, %v3605_v20 }
 0x7a9   :  { %v3549_v32 = vpop.f32.mrf.mxu3 }
 0x7aa   :  { %4794 = vpow2.f32 %v4366_v22  ;;  %v3550_v47 = vadd.f32 %v3549_v32, %v3536_v18  ;;  %v4553_v22 = vld [vmem:[%s6805_s6] ss:$0 sm:$0xff] }
 0x7ab   :  { %v3525_v46 = vpop.f32.mrf.mxu1  ;;  %3746 = vmatpush.bf16.msrb.mxu0 %v4539_v12 }
 0x7ac   :  { %v3606_v49 = vadd.f32 %v3550_v47, %v5578_v45  ;;  %v4538_v45 = vld [vmem:[%s6804_s5 + $0x8] sm:$0xff] }
 0x7ae   :  { %v4367_v1 = vmul.f32 -1.442695, %v3606_v49 }
 0x7af   :  { %3747 = vmatpush.bf16.msrb.mxu0 %v4538_v45 }
 0x7b0   :  { %v4795_v26 = vpop.eup %4794  ;;  %4796 = vpow2.f32 %v4367_v1 }
 0x7b1   :  { %v3612_v31 = vadd.f32 1.0, %v4795_v26  ;;  %v3551_v37 = vpop.f32.mrf.mxu3 }
 0x7b3   :  { %4798 = vrcp.f32 %v3612_v31  ;;  %v3575_v16 = vpop.f32.mrf.mxu1  ;;  %3748 = vmatpush.bf16.msrb.mxu0 %v4537_v59  ;;  %v3624_v25 = vand.u32 2147483648, %v3612_v31  ;;  %vm3618_vm7 = vweird.f32 %v3612_v31 }
 0x7b4   :  { %v3576_v3 = vadd.f32 %v3575_v16, %v3562_v38 }
 0x7b5   :  { %v3625_v11 = vor.u32 1.1754944e-38, %v3624_v25 }
 0x7b6   :  { %v4797_v29 = vpop.eup %4796  ;;  %v3607_v57 = vadd.f32 %v3576_v3, %v5606_v63 }
 0x7b7   :  { %v3631_v21 = vadd.f32 1.0, %v4797_v29 }
 0x7b9   :  { %v4799_v0 = vpop.eup %4798  ;;  %4800 = vrcp.f32 %v3631_v21  ;;  %v3601_v19 = vpop.f32.mrf.mxu3  ;;  %v3643_v44 = vand.u32 2147483648, %v3631_v21  ;;  %v3641_v41 = vand.u32 2147483647, %v3631_v21  ;;  %vm3637_vm8 = vweird.f32 %v3631_v21 }
 0x7ba   :  { %v3614_v54 = vmul.f32 %v4799_v0, %v3612_v31  ;;  %v3602_v28 = vadd.f32 %v3601_v19, %v3588_v51  ;;  %vm3619_vm5 = vweird.f32 %v4799_v0 }
 0x7bb   :  { %v3577_v62 = vpop.f32.mrf.mxu1  ;;  %vm3620_vm9 = vmor %vm3618_vm7, %vm3619_vm5  ;;  %v3644_v52 = vor.u32 1.1754944e-38, %v3643_v44  ;;  %vm3642_vm11 = vcmp.eq.f32.partialorder %v3641_v41, 8.507059e+37 }
 0x7bc   :  { %v3615_v2 = vsub.f32 1.0, %v3614_v54  ;;  %v3608_v34 = vadd.f32 %v3602_v28, %v5603_v15  ;;  %v3622_v15 = vand.u32 2147483647, %v3612_v31 }
 0x7be   :  { %v4368_v48 = vmul.f32 -1.442695, %v3608_v34  ;;  %v3616_v42 = vmul.f32 %v4799_v0, %v3615_v2  ;;  %vm3623_vm12 = vcmp.eq.f32.partialorder %v3622_v15, 8.507059e+37 }
 0x7bf   :  { %v4801_v36 = vpop.eup %4800 }
 0x7c0   :  { %v3633_v43 = vmul.f32 %v4801_v36, %v3631_v21  ;;  %4802 = vpow2.f32 %v4368_v48  ;;  %v3617_v60 = vadd.f32 %v4799_v0, %v3616_v42  ;;  %vm3638_vm6 = vweird.f32 %v4801_v36 }
 0x7c1   :  { %v3603_v56 = vpop.f32.mrf.mxu3  ;;  %4804 = vtanh.f32 %v3607_v57  ;;  %vm3639_vm10 = vmor %vm3637_vm8, %vm3638_vm6 }
 0x7c2   :  { %v3634_v14 = vsub.f32 1.0, %v3633_v43  ;;  %v3621_v8 = vsel %vm3620_vm9, %v4799_v0, %v3617_v60 }
 0x7c3   :  { %v3626_v61 = vsel %vm3623_vm12, %v3625_v11, %v3621_v8 }
 0x7c4   :  { %v3635_v58 = vmul.f32 %v4801_v36, %v3634_v14 }
 0x7c6   :  { %v4803_v53 = vpop.eup %4802  ;;  %v3636_v7 = vadd.f32 %v4801_v36, %v3635_v58 }
 0x7c7   :  { %v3651_v30 = vadd.f32 1.0, %v4803_v53  ;;  %v4805_v4 = vpop.eup %4804 }
 0x7c8   :  { %v3640_v63 = vsel %vm3639_vm10, %v4801_v36, %v3636_v7  ;;  %v3668_v13 = vmul.f32 %v4805_v4, %v3626_v61 }
 0x7c9   :  { %v3645_v10 = vsel %vm3642_vm11, %v3644_v52, %v3640_v63  ;;  %4806 = vrcp.f32 %v3651_v30  ;;  %v3663_v51 = vand.u32 2147483648, %v3651_v30  ;;  %v3661_v40 = vand.u32 2147483647, %v3651_v30 }
 0x7ca   :  { %v3667_v23 = vmul.f32 %v3645_v10, %v6761_v55  ;;  %vm3657_vm14 = vweird.f32 %v3651_v30 }
 0x7cb   :  { %v3664_v6 = vor.u32 1.1754944e-38, %v3663_v51  ;;  %vm3662_vm0 = vcmp.eq.f32.partialorder %v3661_v40, 8.507059e+37 }
 0x7cc   :  { %v3669_v24 = vadd.f32 %v3668_v13, %v3667_v23 }
 0x7ce   :  { %4808 = vtanh.f32 %v3669_v24 }
 0x7cf   :  { %v4807_v18 = vpop.eup %4806 }
 0x7d0   :  { %v3653_v9 = vmul.f32 %v4807_v18, %v3651_v30  ;;  %vm3658_vm13 = vweird.f32 %v4807_v18 }
 0x7d1   :  { %vm3659_vm15 = vmor %vm3657_vm14, %vm3658_vm13 }
 0x7d2   :  { %v3654_v38 = vsub.f32 1.0, %v3653_v9 }
 0x7d4   :  { %v3655_v17 = vmul.f32 %v4807_v18, %v3654_v38  ;;  %v4809_v39 = vpop.eup %4808 }
 0x7d6   :  { %v3656_v50 = vadd.f32 %v4807_v18, %v3655_v17 }
 0x7d8   :  { %v3660_v5 = vsel %vm3659_vm15, %v4807_v18, %v3656_v50 }
 0x7d9   :  { %v3665_v20 = vsel %vm3662_vm0, %v3664_v6, %v3660_v5 }
 0x7da   :  { %v3671_v55 = vmul.f32 %v4809_v39, %v3665_v20 }
 0x7dc   :  { %v3672_v27 = vpack.c.bf16 %v3671_v55, %v3671_v55 }
 0x7de   :  { %3749 = vmatmul.bf16.vlgmr.msrb.gmra.mxu0 %v3672_v27 }
 0x85b   :  { %v3750_v32 = vpop.f32.mrf.mxu0 }
 0x85c   :  { %v3751_v47 = vadd.f32 %v4553_v22, %v3750_v32 }
 0x85e   :  { %3754 = vst [vmem:[%s6806_s7] sm:$0xff] %v3751_v47 }
 0x863   :  { %v3752_v35 = vpop.f32.mrf.mxu0 }
 0x864   :  { %3759 = vsyncpa [#allocation3], 1 }
 0x865   :  { %3760 = vsyncpa [#allocation5], 1 }

</bundles_post_ra>
